<compile_context>
chip_gen: v7x
topology: tpu7x:2x2x1
jax: 0.10.0
libtpu: 0.0.40
codegen_flags: <defaults>
</compile_context>

<pallas_src>
import functools

import jax
import jax.numpy as jnp
from jax.experimental import pallas as pl
from jax.experimental.pallas import tpu as pltpu

KS = 3  # 3x3 convs


def _dilate_res_kernel(w1_ref, b1_ref, w2_ref, b2_ref, x_ref, out_ref, xbuf, ybuf,
                       *, C, H, W, d1, d2):
    # x_ref:  (nb, C, H, W)                unpadded input block
    # xbuf:   (nb, C, H + 2*d1, W + 2*d1)  padded input   (VMEM scratch)
    # ybuf:   (nb, C, H + 2*d2, W + 2*d2)  padded conv1 activation (VMEM scratch)
    # out_ref:(nb, C, H, W)
    nb = x_ref.shape[0]

    # Zero both padded scratches.  Only the borders actually need zeros (the
    # interiors are fully overwritten below), but this is cheap (vst slot has
    # slack) and is correct regardless of how the parallel batch axis is
    # sharded across TensorCores.
    xbuf[...] = jnp.zeros_like(xbuf)
    ybuf[...] = jnp.zeros_like(ybuf)

    # Fused "same" padding: stage the input into the center of the d1-padded scratch.
    xbuf[:, :, pl.ds(d1, H), pl.ds(d1, W)] = x_ref[...].astype(jnp.float32)

    # ---- conv1 (dilation d1) + bias + LeakyReLU(0.2) -> interior of ybuf ----
    acc1 = [jnp.zeros((nb, H, W), jnp.float32) for _ in range(C)]
    for i in range(C):
        for kh in range(KS):
            for kw in range(KS):
                # Hoisted tap: loaded once, reused for all C output channels.
                tap = xbuf[:, i, pl.ds(kh * d1, H), pl.ds(kw * d1, W)]
                for o in range(C):
                    wv = w1_ref[((o * C + i) * KS + kh) * KS + kw]
                    acc1[o] = acc1[o] + wv * tap
    for o in range(C):
        a = acc1[o] + b1_ref[o]
        a = jnp.where(a >= 0.0, a, 0.2 * a)  # LeakyReLU(0.2)
        ybuf[:, o, pl.ds(d2, H), pl.ds(d2, W)] = a

    # ---- conv2 (dilation d2) + bias + residual add ----
    acc2 = [jnp.zeros((nb, H, W), jnp.float32) for _ in range(C)]
    for i in range(C):
        for kh in range(KS):
            for kw in range(KS):
                tap = ybuf[:, i, pl.ds(kh * d2, H), pl.ds(kw * d2, W)]
                for o in range(C):
                    wv = w2_ref[((o * C + i) * KS + kh) * KS + kw]
                    acc2[o] = acc2[o] + wv * tap
    for o in range(C):
        res = acc2[o] + b2_ref[o] + x_ref[:, o, :, :].astype(jnp.float32)
        out_ref[:, o, :, :] = res.astype(out_ref.dtype)


def dilate_res_block(x, w1, b1, w2, b2, *, d1=5, d2=3, batch_block=None):
    """x: (N, C, H, W) float32.  w*: (C, C, 3, 3) already spectrally normalized."""
    N, C, H, W = x.shape

    # Default batch folding: keep 2 grid steps when possible so both v7x
    # TensorCores get work; on single-TC chips (v5e/v6e) the single extra
    # serial step costs ~0.35us while still amortizing overhead for larger N.
    if batch_block is None:
        batch_block = N // 2 if (N >= 2 and N % 2 == 0) else 1
    nb = batch_block
    assert N % nb == 0, "batch_block must divide N"
    grid = (N // nb,)

    w1_flat = w1.reshape(-1).astype(jnp.float32)
    w2_flat = w2.reshape(-1).astype(jnp.float32)
    b1 = b1.astype(jnp.float32)
    b2 = b2.astype(jnp.float32)

    # 2 convs * (mul + add) per MAC, N*C*C*KS*KS*H*W MACs per conv.
    flops = 2 * 2 * N * C * C * KS * KS * H * W
    bytes_accessed = (2 * N * C * H * W + w1_flat.size + w2_flat.size
                      + b1.size + b2.size) * 4
    cost = pl.CostEstimate(flops=flops, transcendentals=0,
                           bytes_accessed=bytes_accessed)

    kernel = functools.partial(_dilate_res_kernel, C=C, H=H, W=W, d1=d1, d2=d2)

    return pl.pallas_call(
        kernel,
        out_shape=jax.ShapeDtypeStruct((N, C, H, W), x.dtype),
        grid=grid,
        in_specs=[
            pl.BlockSpec(memory_space=pltpu.MemorySpace.SMEM),  # w1 (scalars)
            pl.BlockSpec(memory_space=pltpu.MemorySpace.SMEM),  # b1
            pl.BlockSpec(memory_space=pltpu.MemorySpace.SMEM),  # w2
            pl.BlockSpec(memory_space=pltpu.MemorySpace.SMEM),  # b2
            pl.BlockSpec((nb, C, H, W), lambda n: (n, 0, 0, 0)),  # x (unpadded)
        ],
        out_specs=pl.BlockSpec((nb, C, H, W), lambda n: (n, 0, 0, 0)),
        scratch_shapes=[
            pltpu.VMEM((nb, C, H + 2 * d1, W + 2 * d1), jnp.float32),  # padded x
            pltpu.VMEM((nb, C, H + 2 * d2, W + 2 * d2), jnp.float32),  # padded act
        ],
        compiler_params=pltpu.CompilerParams(dimension_semantics=("parallel",)),
        cost_estimate=cost,
    )(w1_flat, b1, w2_flat, b2, x)


# ---------------- parameter setup (plain-JAX glue) ----------------

def spectral_normalize(w, key, n_power_iterations=1, eps=1e-12):
    """Mimics torch.nn.utils.spectral_norm forward-time weight normalization."""
    c_out = w.shape[0]
    w_mat = w.reshape(c_out, -1)
    u = jax.random.normal(key, (c_out,), dtype=w.dtype)
    u = u / (jnp.linalg.norm(u) + eps)
    v = None
    for _ in range(n_power_iterations):
        v = w_mat.T @ u
        v = v / (jnp.linalg.norm(v) + eps)
        u = w_mat @ v
        u = u / (jnp.linalg.norm(u) + eps)
    sigma = u @ (w_mat @ v)
    return w / sigma


def reference_forward(x, w1, b1, w2, b2, d1, d2):
    def conv(inp, w, b, d):
        y = jax.lax.conv_general_dilated(
            inp, w, window_strides=(1, 1), padding=((d, d), (d, d)),
            rhs_dilation=(d, d), dimension_numbers=("NCHW", "OIHW", "NCHW"))
        return y + b[None, :, None, None]

    y = conv(x, w1, b1, d1)
    y = jnp.where(y >= 0.0, y, 0.2 * y)
    y = conv(y, w2, b2, d2)
    return x + y


if __name__ == "__main__":
    key = jax.random.PRNGKey(0)
    k_x, k_w1, k_b1, k_w2, k_b2, k_u1, k_u2 = jax.random.split(key, 7)

    N, dim, H, W = 2, 4, 16, 16
    d1, d2 = 5, 3

    x = jax.random.normal(k_x, (N, dim, H, W), jnp.float32)
    w1 = jax.random.normal(k_w1, (dim, dim, 3, 3), jnp.float32) * 0.2
    b1 = jax.random.normal(k_b1, (dim,), jnp.float32) * 0.1
    w2 = jax.random.normal(k_w2, (dim, dim, 3, 3), jnp.float32) * 0.2
    b2 = jax.random.normal(k_b2, (dim,), jnp.float32) * 0.1

    # SpectralNorm is weight preprocessing; applied once here (glue, not hot path).
    w1_sn = spectral_normalize(w1, k_u1)
    w2_sn = spectral_normalize(w2, k_u2)

    out = dilate_res_block(x, w1_sn, b1, w2_sn, b2, d1=d1, d2=d2)
    out = jax.block_until_ready(out)

    ref = reference_forward(x, w1_sn, b1, w2_sn, b2, d1, d2)
    assert out.shape == ref.shape and out.dtype == ref.dtype
    if not bool(jnp.allclose(out, ref, atol=1e-4, rtol=1e-4)):
        raise AssertionError("Pallas kernel does not match reference conv result")

    print("KERNEL_OK")
</pallas_src>

<mosaic_0001>
module attributes {stable_mosaic.version = 11 : i64} {
  func.func @_dilate_res_kernel(%arg0: i32, %arg1: memref<144xf32, #tpu.memory_space<smem>>, %arg2: memref<4xf32, #tpu.memory_space<smem>>, %arg3: memref<144xf32, #tpu.memory_space<smem>>, %arg4: memref<4xf32, #tpu.memory_space<smem>>, %arg5: memref<1x4x16x16xf32, #tpu.memory_space<vmem>>, %arg6: memref<1x4x16x16xf32, #tpu.memory_space<vmem>>, %arg7: memref<1x4x26x26xf32, #tpu.memory_space<vmem>>, %arg8: memref<1x4x22x22xf32, #tpu.memory_space<vmem>>) attributes {dimension_semantics = [#tpu.dimension_semantics<parallel>], iteration_bounds = array<i64: 2>, scalar_prefetch = 0 : i64, scratch_operands = 2 : i64, tpu.core_type = #tpu.core_type<tc>, window_params = [{transform_indices = @transform_0, window_bounds = array<i64: 144>}, {transform_indices = @transform_1, window_bounds = array<i64: 4>}, {transform_indices = @transform_2, window_bounds = array<i64: 144>}, {transform_indices = @transform_3, window_bounds = array<i64: 4>}, {transform_indices = @transform_4, window_bounds = array<i64: 1, 4, 16, 16>}, {transform_indices = @transform_5, window_bounds = array<i64: 1, 4, 16, 16>}]} {
    %cst = arith.constant 0.000000e+00 : f32
    %0 = vector.broadcast %cst : f32 to vector<1x4x26x26xf32>
    %c0 = arith.constant 0 : index
    %c0_0 = arith.constant 0 : index
    %c0_1 = arith.constant 0 : index
    %c0_2 = arith.constant 0 : index
    %1 = vector.load %arg7[%c0, %c0_0, %c0_1, %c0_2] : memref<1x4x26x26xf32, #tpu.memory_space<vmem>>, vector<1x4x26x26xf32>
    tpu.vector_store %arg7[%c0, %c0_0, %c0_1, %c0_2], %0 {strides = array<i32>} : memref<1x4x26x26xf32, #tpu.memory_space<vmem>>, vector<1x4x26x26xf32>,
    %cst_3 = arith.constant 0.000000e+00 : f32
    %2 = vector.broadcast %cst_3 : f32 to vector<1x4x22x22xf32>
    %c0_4 = arith.constant 0 : index
    %c0_5 = arith.constant 0 : index
    %c0_6 = arith.constant 0 : index
    %c0_7 = arith.constant 0 : index
    %3 = vector.load %arg8[%c0_4, %c0_5, %c0_6, %c0_7] : memref<1x4x22x22xf32, #tpu.memory_space<vmem>>, vector<1x4x22x22xf32>
    tpu.vector_store %arg8[%c0_4, %c0_5, %c0_6, %c0_7], %2 {strides = array<i32>} : memref<1x4x22x22xf32, #tpu.memory_space<vmem>>, vector<1x4x22x22xf32>,
    %c0_8 = arith.constant 0 : index
    %c0_9 = arith.constant 0 : index
    %c0_10 = arith.constant 0 : index
    %c0_11 = arith.constant 0 : index
    %4 = vector.load %arg5[%c0_8, %c0_9, %c0_10, %c0_11] : memref<1x4x16x16xf32, #tpu.memory_space<vmem>>, vector<1x4x16x16xf32>
    %c0_12 = arith.constant 0 : index
    %c0_13 = arith.constant 0 : index
    %c5 = arith.constant 5 : index
    %c5_14 = arith.constant 5 : index
    %5 = vector.load %arg7[%c0_12, %c0_13, %c5, %c5_14] : memref<1x4x26x26xf32, #tpu.memory_space<vmem>>, vector<1x4x16x16xf32>
    tpu.vector_store %arg7[%c0_12, %c0_13, %c5, %c5_14], %4 {strides = array<i32>} : memref<1x4x26x26xf32, #tpu.memory_space<vmem>>, vector<1x4x16x16xf32>,
    %cst_15 = arith.constant 0.000000e+00 : f32
    %6 = vector.broadcast %cst_15 : f32 to vector<1x16x16xf32>
    %cst_16 = arith.constant 0.000000e+00 : f32
    %7 = vector.broadcast %cst_16 : f32 to vector<1x16x16xf32>
    %cst_17 = arith.constant 0.000000e+00 : f32
    %8 = vector.broadcast %cst_17 : f32 to vector<1x16x16xf32>
    %cst_18 = arith.constant 0.000000e+00 : f32
    %9 = vector.broadcast %cst_18 : f32 to vector<1x16x16xf32>
    %c0_19 = arith.constant 0 : index
    %c0_20 = arith.constant 0 : index
    %c0_21 = arith.constant 0 : index
    %c0_22 = arith.constant 0 : index
    %10 = vector.load %arg7[%c0_19, %c0_20, %c0_21, %c0_22] : memref<1x4x26x26xf32, #tpu.memory_space<vmem>>, vector<1x1x16x16xf32>
    %11 = vector.shape_cast %10 : vector<1x1x16x16xf32> to vector<1x16x16xf32>
    %c0_23 = arith.constant 0 : index
    %12 = memref.load %arg1[%c0_23] : memref<144xf32, #tpu.memory_space<smem>>
    %13 = vector.broadcast %12 : f32 to vector<1x16x16xf32>
    %14 = arith.mulf %13, %11 : vector<1x16x16xf32>
    %15 = arith.addf %6, %14 : vector<1x16x16xf32>
    %c36 = arith.constant 36 : index
    %16 = memref.load %arg1[%c36] : memref<144xf32, #tpu.memory_space<smem>>
    %17 = vector.broadcast %16 : f32 to vector<1x16x16xf32>
    %18 = arith.mulf %17, %11 : vector<1x16x16xf32>
    %19 = arith.addf %7, %18 : vector<1x16x16xf32>
    %c72 = arith.constant 72 : index
    %20 = memref.load %arg1[%c72] : memref<144xf32, #tpu.memory_space<smem>>
    %21 = vector.broadcast %20 : f32 to vector<1x16x16xf32>
    %22 = arith.mulf %21, %11 : vector<1x16x16xf32>
    %23 = arith.addf %8, %22 : vector<1x16x16xf32>
    %c108 = arith.constant 108 : index
    %24 = memref.load %arg1[%c108] : memref<144xf32, #tpu.memory_space<smem>>
    %25 = vector.broadcast %24 : f32 to vector<1x16x16xf32>
    %26 = arith.mulf %25, %11 : vector<1x16x16xf32>
    %27 = arith.addf %9, %26 : vector<1x16x16xf32>
    %c0_24 = arith.constant 0 : index
    %c0_25 = arith.constant 0 : index
    %c0_26 = arith.constant 0 : index
    %c5_27 = arith.constant 5 : index
    %28 = vector.load %arg7[%c0_24, %c0_25, %c0_26, %c5_27] : memref<1x4x26x26xf32, #tpu.memory_space<vmem>>, vector<1x1x16x16xf32>
    %29 = vector.shape_cast %28 : vector<1x1x16x16xf32> to vector<1x16x16xf32>
    %c1 = arith.constant 1 : index
    %30 = memref.load %arg1[%c1] : memref<144xf32, #tpu.memory_space<smem>>
    %31 = vector.broadcast %30 : f32 to vector<1x16x16xf32>
    %32 = arith.mulf %31, %29 : vector<1x16x16xf32>
    %33 = arith.addf %15, %32 : vector<1x16x16xf32>
    %c37 = arith.constant 37 : index
    %34 = memref.load %arg1[%c37] : memref<144xf32, #tpu.memory_space<smem>>
    %35 = vector.broadcast %34 : f32 to vector<1x16x16xf32>
    %36 = arith.mulf %35, %29 : vector<1x16x16xf32>
    %37 = arith.addf %19, %36 : vector<1x16x16xf32>
    %c73 = arith.constant 73 : index
    %38 = memref.load %arg1[%c73] : memref<144xf32, #tpu.memory_space<smem>>
    %39 = vector.broadcast %38 : f32 to vector<1x16x16xf32>
    %40 = arith.mulf %39, %29 : vector<1x16x16xf32>
    %41 = arith.addf %23, %40 : vector<1x16x16xf32>
    %c109 = arith.constant 109 : index
    %42 = memref.load %arg1[%c109] : memref<144xf32, #tpu.memory_space<smem>>
    %43 = vector.broadcast %42 : f32 to vector<1x16x16xf32>
    %44 = arith.mulf %43, %29 : vector<1x16x16xf32>
    %45 = arith.addf %27, %44 : vector<1x16x16xf32>
    %c0_28 = arith.constant 0 : index
    %c0_29 = arith.constant 0 : index
    %c0_30 = arith.constant 0 : index
    %c10 = arith.constant 10 : index
    %46 = vector.load %arg7[%c0_28, %c0_29, %c0_30, %c10] : memref<1x4x26x26xf32, #tpu.memory_space<vmem>>, vector<1x1x16x16xf32>
    %47 = vector.shape_cast %46 : vector<1x1x16x16xf32> to vector<1x16x16xf32>
    %c2 = arith.constant 2 : index
    %48 = memref.load %arg1[%c2] : memref<144xf32, #tpu.memory_space<smem>>
    %49 = vector.broadcast %48 : f32 to vector<1x16x16xf32>
    %50 = arith.mulf %49, %47 : vector<1x16x16xf32>
    %51 = arith.addf %33, %50 : vector<1x16x16xf32>
    %c38 = arith.constant 38 : index
    %52 = memref.load %arg1[%c38] : memref<144xf32, #tpu.memory_space<smem>>
    %53 = vector.broadcast %52 : f32 to vector<1x16x16xf32>
    %54 = arith.mulf %53, %47 : vector<1x16x16xf32>
    %55 = arith.addf %37, %54 : vector<1x16x16xf32>
    %c74 = arith.constant 74 : index
    %56 = memref.load %arg1[%c74] : memref<144xf32, #tpu.memory_space<smem>>
    %57 = vector.broadcast %56 : f32 to vector<1x16x16xf32>
    %58 = arith.mulf %57, %47 : vector<1x16x16xf32>
    %59 = arith.addf %41, %58 : vector<1x16x16xf32>
    %c110 = arith.constant 110 : index
    %60 = memref.load %arg1[%c110] : memref<144xf32, #tpu.memory_space<smem>>
    %61 = vector.broadcast %60 : f32 to vector<1x16x16xf32>
    %62 = arith.mulf %61, %47 : vector<1x16x16xf32>
    %63 = arith.addf %45, %62 : vector<1x16x16xf32>
    %c0_31 = arith.constant 0 : index
    %c0_32 = arith.constant 0 : index
    %c5_33 = arith.constant 5 : index
    %c0_34 = arith.constant 0 : index
    %64 = vector.load %arg7[%c0_31, %c0_32, %c5_33, %c0_34] : memref<1x4x26x26xf32, #tpu.memory_space<vmem>>, vector<1x1x16x16xf32>
    %65 = vector.shape_cast %64 : vector<1x1x16x16xf32> to vector<1x16x16xf32>
    %c3 = arith.constant 3 : index
    %66 = memref.load %arg1[%c3] : memref<144xf32, #tpu.memory_space<smem>>
    %67 = vector.broadcast %66 : f32 to vector<1x16x16xf32>
    %68 = arith.mulf %67, %65 : vector<1x16x16xf32>
    %69 = arith.addf %51, %68 : vector<1x16x16xf32>
    %c39 = arith.constant 39 : index
    %70 = memref.load %arg1[%c39] : memref<144xf32, #tpu.memory_space<smem>>
    %71 = vector.broadcast %70 : f32 to vector<1x16x16xf32>
    %72 = arith.mulf %71, %65 : vector<1x16x16xf32>
    %73 = arith.addf %55, %72 : vector<1x16x16xf32>
    %c75 = arith.constant 75 : index
    %74 = memref.load %arg1[%c75] : memref<144xf32, #tpu.memory_space<smem>>
    %75 = vector.broadcast %74 : f32 to vector<1x16x16xf32>
    %76 = arith.mulf %75, %65 : vector<1x16x16xf32>
    %77 = arith.addf %59, %76 : vector<1x16x16xf32>
    %c111 = arith.constant 111 : index
    %78 = memref.load %arg1[%c111] : memref<144xf32, #tpu.memory_space<smem>>
    %79 = vector.broadcast %78 : f32 to vector<1x16x16xf32>
    %80 = arith.mulf %79, %65 : vector<1x16x16xf32>
    %81 = arith.addf %63, %80 : vector<1x16x16xf32>
    %c0_35 = arith.constant 0 : index
    %c0_36 = arith.constant 0 : index
    %c5_37 = arith.constant 5 : index
    %c5_38 = arith.constant 5 : index
    %82 = vector.load %arg7[%c0_35, %c0_36, %c5_37, %c5_38] : memref<1x4x26x26xf32, #tpu.memory_space<vmem>>, vector<1x1x16x16xf32>
    %83 = vector.shape_cast %82 : vector<1x1x16x16xf32> to vector<1x16x16xf32>
    %c4 = arith.constant 4 : index
    %84 = memref.load %arg1[%c4] : memref<144xf32, #tpu.memory_space<smem>>
    %85 = vector.broadcast %84 : f32 to vector<1x16x16xf32>
    %86 = arith.mulf %85, %83 : vector<1x16x16xf32>
    %87 = arith.addf %69, %86 : vector<1x16x16xf32>
    %c40 = arith.constant 40 : index
    %88 = memref.load %arg1[%c40] : memref<144xf32, #tpu.memory_space<smem>>
    %89 = vector.broadcast %88 : f32 to vector<1x16x16xf32>
    %90 = arith.mulf %89, %83 : vector<1x16x16xf32>
    %91 = arith.addf %73, %90 : vector<1x16x16xf32>
    %c76 = arith.constant 76 : index
    %92 = memref.load %arg1[%c76] : memref<144xf32, #tpu.memory_space<smem>>
    %93 = vector.broadcast %92 : f32 to vector<1x16x16xf32>
    %94 = arith.mulf %93, %83 : vector<1x16x16xf32>
    %95 = arith.addf %77, %94 : vector<1x16x16xf32>
    %c112 = arith.constant 112 : index
    %96 = memref.load %arg1[%c112] : memref<144xf32, #tpu.memory_space<smem>>
    %97 = vector.broadcast %96 : f32 to vector<1x16x16xf32>
    %98 = arith.mulf %97, %83 : vector<1x16x16xf32>
    %99 = arith.addf %81, %98 : vector<1x16x16xf32>
    %c0_39 = arith.constant 0 : index
    %c0_40 = arith.constant 0 : index
    %c5_41 = arith.constant 5 : index
    %c10_42 = arith.constant 10 : index
    %100 = vector.load %arg7[%c0_39, %c0_40, %c5_41, %c10_42] : memref<1x4x26x26xf32, #tpu.memory_space<vmem>>, vector<1x1x16x16xf32>
    %101 = vector.shape_cast %100 : vector<1x1x16x16xf32> to vector<1x16x16xf32>
    %c5_43 = arith.constant 5 : index
    %102 = memref.load %arg1[%c5_43] : memref<144xf32, #tpu.memory_space<smem>>
    %103 = vector.broadcast %102 : f32 to vector<1x16x16xf32>
    %104 = arith.mulf %103, %101 : vector<1x16x16xf32>
    %105 = arith.addf %87, %104 : vector<1x16x16xf32>
    %c41 = arith.constant 41 : index
    %106 = memref.load %arg1[%c41] : memref<144xf32, #tpu.memory_space<smem>>
    %107 = vector.broadcast %106 : f32 to vector<1x16x16xf32>
    %108 = arith.mulf %107, %101 : vector<1x16x16xf32>
    %109 = arith.addf %91, %108 : vector<1x16x16xf32>
    %c77 = arith.constant 77 : index
    %110 = memref.load %arg1[%c77] : memref<144xf32, #tpu.memory_space<smem>>
    %111 = vector.broadcast %110 : f32 to vector<1x16x16xf32>
    %112 = arith.mulf %111, %101 : vector<1x16x16xf32>
    %113 = arith.addf %95, %112 : vector<1x16x16xf32>
    %c113 = arith.constant 113 : index
    %114 = memref.load %arg1[%c113] : memref<144xf32, #tpu.memory_space<smem>>
    %115 = vector.broadcast %114 : f32 to vector<1x16x16xf32>
    %116 = arith.mulf %115, %101 : vector<1x16x16xf32>
    %117 = arith.addf %99, %116 : vector<1x16x16xf32>
    %c0_44 = arith.constant 0 : index
    %c0_45 = arith.constant 0 : index
    %c10_46 = arith.constant 10 : index
    %c0_47 = arith.constant 0 : index
    %118 = vector.load %arg7[%c0_44, %c0_45, %c10_46, %c0_47] : memref<1x4x26x26xf32, #tpu.memory_space<vmem>>, vector<1x1x16x16xf32>
    %119 = vector.shape_cast %118 : vector<1x1x16x16xf32> to vector<1x16x16xf32>
    %c6 = arith.constant 6 : index
    %120 = memref.load %arg1[%c6] : memref<144xf32, #tpu.memory_space<smem>>
    %121 = vector.broadcast %120 : f32 to vector<1x16x16xf32>
    %122 = arith.mulf %121, %119 : vector<1x16x16xf32>
    %123 = arith.addf %105, %122 : vector<1x16x16xf32>
    %c42 = arith.constant 42 : index
    %124 = memref.load %arg1[%c42] : memref<144xf32, #tpu.memory_space<smem>>
    %125 = vector.broadcast %124 : f32 to vector<1x16x16xf32>
    %126 = arith.mulf %125, %119 : vector<1x16x16xf32>
    %127 = arith.addf %109, %126 : vector<1x16x16xf32>
    %c78 = arith.constant 78 : index
    %128 = memref.load %arg1[%c78] : memref<144xf32, #tpu.memory_space<smem>>
    %129 = vector.broadcast %128 : f32 to vector<1x16x16xf32>
    %130 = arith.mulf %129, %119 : vector<1x16x16xf32>
    %131 = arith.addf %113, %130 : vector<1x16x16xf32>
    %c114 = arith.constant 114 : index
    %132 = memref.load %arg1[%c114] : memref<144xf32, #tpu.memory_space<smem>>
    %133 = vector.broadcast %132 : f32 to vector<1x16x16xf32>
    %134 = arith.mulf %133, %119 : vector<1x16x16xf32>
    %135 = arith.addf %117, %134 : vector<1x16x16xf32>
    %c0_48 = arith.constant 0 : index
    %c0_49 = arith.constant 0 : index
    %c10_50 = arith.constant 10 : index
    %c5_51 = arith.constant 5 : index
    %136 = vector.load %arg7[%c0_48, %c0_49, %c10_50, %c5_51] : memref<1x4x26x26xf32, #tpu.memory_space<vmem>>, vector<1x1x16x16xf32>
    %137 = vector.shape_cast %136 : vector<1x1x16x16xf32> to vector<1x16x16xf32>
    %c7 = arith.constant 7 : index
    %138 = memref.load %arg1[%c7] : memref<144xf32, #tpu.memory_space<smem>>
    %139 = vector.broadcast %138 : f32 to vector<1x16x16xf32>
    %140 = arith.mulf %139, %137 : vector<1x16x16xf32>
    %141 = arith.addf %123, %140 : vector<1x16x16xf32>
    %c43 = arith.constant 43 : index
    %142 = memref.load %arg1[%c43] : memref<144xf32, #tpu.memory_space<smem>>
    %143 = vector.broadcast %142 : f32 to vector<1x16x16xf32>
    %144 = arith.mulf %143, %137 : vector<1x16x16xf32>
    %145 = arith.addf %127, %144 : vector<1x16x16xf32>
    %c79 = arith.constant 79 : index
    %146 = memref.load %arg1[%c79] : memref<144xf32, #tpu.memory_space<smem>>
    %147 = vector.broadcast %146 : f32 to vector<1x16x16xf32>
    %148 = arith.mulf %147, %137 : vector<1x16x16xf32>
    %149 = arith.addf %131, %148 : vector<1x16x16xf32>
    %c115 = arith.constant 115 : index
    %150 = memref.load %arg1[%c115] : memref<144xf32, #tpu.memory_space<smem>>
    %151 = vector.broadcast %150 : f32 to vector<1x16x16xf32>
    %152 = arith.mulf %151, %137 : vector<1x16x16xf32>
    %153 = arith.addf %135, %152 : vector<1x16x16xf32>
    %c0_52 = arith.constant 0 : index
    %c0_53 = arith.constant 0 : index
    %c10_54 = arith.constant 10 : index
    %c10_55 = arith.constant 10 : index
    %154 = vector.load %arg7[%c0_52, %c0_53, %c10_54, %c10_55] : memref<1x4x26x26xf32, #tpu.memory_space<vmem>>, vector<1x1x16x16xf32>
    %155 = vector.shape_cast %154 : vector<1x1x16x16xf32> to vector<1x16x16xf32>
    %c8 = arith.constant 8 : index
    %156 = memref.load %arg1[%c8] : memref<144xf32, #tpu.memory_space<smem>>
    %157 = vector.broadcast %156 : f32 to vector<1x16x16xf32>
    %158 = arith.mulf %157, %155 : vector<1x16x16xf32>
    %159 = arith.addf %141, %158 : vector<1x16x16xf32>
    %c44 = arith.constant 44 : index
    %160 = memref.load %arg1[%c44] : memref<144xf32, #tpu.memory_space<smem>>
    %161 = vector.broadcast %160 : f32 to vector<1x16x16xf32>
    %162 = arith.mulf %161, %155 : vector<1x16x16xf32>
    %163 = arith.addf %145, %162 : vector<1x16x16xf32>
    %c80 = arith.constant 80 : index
    %164 = memref.load %arg1[%c80] : memref<144xf32, #tpu.memory_space<smem>>
    %165 = vector.broadcast %164 : f32 to vector<1x16x16xf32>
    %166 = arith.mulf %165, %155 : vector<1x16x16xf32>
    %167 = arith.addf %149, %166 : vector<1x16x16xf32>
    %c116 = arith.constant 116 : index
    %168 = memref.load %arg1[%c116] : memref<144xf32, #tpu.memory_space<smem>>
    %169 = vector.broadcast %168 : f32 to vector<1x16x16xf32>
    %170 = arith.mulf %169, %155 : vector<1x16x16xf32>
    %171 = arith.addf %153, %170 : vector<1x16x16xf32>
    %c0_56 = arith.constant 0 : index
    %c1_57 = arith.constant 1 : index
    %c0_58 = arith.constant 0 : index
    %c0_59 = arith.constant 0 : index
    %172 = vector.load %arg7[%c0_56, %c1_57, %c0_58, %c0_59] : memref<1x4x26x26xf32, #tpu.memory_space<vmem>>, vector<1x1x16x16xf32>
    %173 = vector.shape_cast %172 : vector<1x1x16x16xf32> to vector<1x16x16xf32>
    %c9 = arith.constant 9 : index
    %174 = memref.load %arg1[%c9] : memref<144xf32, #tpu.memory_space<smem>>
    %175 = vector.broadcast %174 : f32 to vector<1x16x16xf32>
    %176 = arith.mulf %175, %173 : vector<1x16x16xf32>
    %177 = arith.addf %159, %176 : vector<1x16x16xf32>
    %c45 = arith.constant 45 : index
    %178 = memref.load %arg1[%c45] : memref<144xf32, #tpu.memory_space<smem>>
    %179 = vector.broadcast %178 : f32 to vector<1x16x16xf32>
    %180 = arith.mulf %179, %173 : vector<1x16x16xf32>
    %181 = arith.addf %163, %180 : vector<1x16x16xf32>
    %c81 = arith.constant 81 : index
    %182 = memref.load %arg1[%c81] : memref<144xf32, #tpu.memory_space<smem>>
    %183 = vector.broadcast %182 : f32 to vector<1x16x16xf32>
    %184 = arith.mulf %183, %173 : vector<1x16x16xf32>
    %185 = arith.addf %167, %184 : vector<1x16x16xf32>
    %c117 = arith.constant 117 : index
    %186 = memref.load %arg1[%c117] : memref<144xf32, #tpu.memory_space<smem>>
    %187 = vector.broadcast %186 : f32 to vector<1x16x16xf32>
    %188 = arith.mulf %187, %173 : vector<1x16x16xf32>
    %189 = arith.addf %171, %188 : vector<1x16x16xf32>
    %c0_60 = arith.constant 0 : index
    %c1_61 = arith.constant 1 : index
    %c0_62 = arith.constant 0 : index
    %c5_63 = arith.constant 5 : index
    %190 = vector.load %arg7[%c0_60, %c1_61, %c0_62, %c5_63] : memref<1x4x26x26xf32, #tpu.memory_space<vmem>>, vector<1x1x16x16xf32>
    %191 = vector.shape_cast %190 : vector<1x1x16x16xf32> to vector<1x16x16xf32>
    %c10_64 = arith.constant 10 : index
    %192 = memref.load %arg1[%c10_64] : memref<144xf32, #tpu.memory_space<smem>>
    %193 = vector.broadcast %192 : f32 to vector<1x16x16xf32>
    %194 = arith.mulf %193, %191 : vector<1x16x16xf32>
    %195 = arith.addf %177, %194 : vector<1x16x16xf32>
    %c46 = arith.constant 46 : index
    %196 = memref.load %arg1[%c46] : memref<144xf32, #tpu.memory_space<smem>>
    %197 = vector.broadcast %196 : f32 to vector<1x16x16xf32>
    %198 = arith.mulf %197, %191 : vector<1x16x16xf32>
    %199 = arith.addf %181, %198 : vector<1x16x16xf32>
    %c82 = arith.constant 82 : index
    %200 = memref.load %arg1[%c82] : memref<144xf32, #tpu.memory_space<smem>>
    %201 = vector.broadcast %200 : f32 to vector<1x16x16xf32>
    %202 = arith.mulf %201, %191 : vector<1x16x16xf32>
    %203 = arith.addf %185, %202 : vector<1x16x16xf32>
    %c118 = arith.constant 118 : index
    %204 = memref.load %arg1[%c118] : memref<144xf32, #tpu.memory_space<smem>>
    %205 = vector.broadcast %204 : f32 to vector<1x16x16xf32>
    %206 = arith.mulf %205, %191 : vector<1x16x16xf32>
    %207 = arith.addf %189, %206 : vector<1x16x16xf32>
    %c0_65 = arith.constant 0 : index
    %c1_66 = arith.constant 1 : index
    %c0_67 = arith.constant 0 : index
    %c10_68 = arith.constant 10 : index
    %208 = vector.load %arg7[%c0_65, %c1_66, %c0_67, %c10_68] : memref<1x4x26x26xf32, #tpu.memory_space<vmem>>, vector<1x1x16x16xf32>
    %209 = vector.shape_cast %208 : vector<1x1x16x16xf32> to vector<1x16x16xf32>
    %c11 = arith.constant 11 : index
    %210 = memref.load %arg1[%c11] : memref<144xf32, #tpu.memory_space<smem>>
    %211 = vector.broadcast %210 : f32 to vector<1x16x16xf32>
    %212 = arith.mulf %211, %209 : vector<1x16x16xf32>
    %213 = arith.addf %195, %212 : vector<1x16x16xf32>
    %c47 = arith.constant 47 : index
    %214 = memref.load %arg1[%c47] : memref<144xf32, #tpu.memory_space<smem>>
    %215 = vector.broadcast %214 : f32 to vector<1x16x16xf32>
    %216 = arith.mulf %215, %209 : vector<1x16x16xf32>
    %217 = arith.addf %199, %216 : vector<1x16x16xf32>
    %c83 = arith.constant 83 : index
    %218 = memref.load %arg1[%c83] : memref<144xf32, #tpu.memory_space<smem>>
    %219 = vector.broadcast %218 : f32 to vector<1x16x16xf32>
    %220 = arith.mulf %219, %209 : vector<1x16x16xf32>
    %221 = arith.addf %203, %220 : vector<1x16x16xf32>
    %c119 = arith.constant 119 : index
    %222 = memref.load %arg1[%c119] : memref<144xf32, #tpu.memory_space<smem>>
    %223 = vector.broadcast %222 : f32 to vector<1x16x16xf32>
    %224 = arith.mulf %223, %209 : vector<1x16x16xf32>
    %225 = arith.addf %207, %224 : vector<1x16x16xf32>
    %c0_69 = arith.constant 0 : index
    %c1_70 = arith.constant 1 : index
    %c5_71 = arith.constant 5 : index
    %c0_72 = arith.constant 0 : index
    %226 = vector.load %arg7[%c0_69, %c1_70, %c5_71, %c0_72] : memref<1x4x26x26xf32, #tpu.memory_space<vmem>>, vector<1x1x16x16xf32>
    %227 = vector.shape_cast %226 : vector<1x1x16x16xf32> to vector<1x16x16xf32>
    %c12 = arith.constant 12 : index
    %228 = memref.load %arg1[%c12] : memref<144xf32, #tpu.memory_space<smem>>
    %229 = vector.broadcast %228 : f32 to vector<1x16x16xf32>
    %230 = arith.mulf %229, %227 : vector<1x16x16xf32>
    %231 = arith.addf %213, %230 : vector<1x16x16xf32>
    %c48 = arith.constant 48 : index
    %232 = memref.load %arg1[%c48] : memref<144xf32, #tpu.memory_space<smem>>
    %233 = vector.broadcast %232 : f32 to vector<1x16x16xf32>
    %234 = arith.mulf %233, %227 : vector<1x16x16xf32>
    %235 = arith.addf %217, %234 : vector<1x16x16xf32>
    %c84 = arith.constant 84 : index
    %236 = memref.load %arg1[%c84] : memref<144xf32, #tpu.memory_space<smem>>
    %237 = vector.broadcast %236 : f32 to vector<1x16x16xf32>
    %238 = arith.mulf %237, %227 : vector<1x16x16xf32>
    %239 = arith.addf %221, %238 : vector<1x16x16xf32>
    %c120 = arith.constant 120 : index
    %240 = memref.load %arg1[%c120] : memref<144xf32, #tpu.memory_space<smem>>
    %241 = vector.broadcast %240 : f32 to vector<1x16x16xf32>
    %242 = arith.mulf %241, %227 : vector<1x16x16xf32>
    %243 = arith.addf %225, %242 : vector<1x16x16xf32>
    %c0_73 = arith.constant 0 : index
    %c1_74 = arith.constant 1 : index
    %c5_75 = arith.constant 5 : index
    %c5_76 = arith.constant 5 : index
    %244 = vector.load %arg7[%c0_73, %c1_74, %c5_75, %c5_76] : memref<1x4x26x26xf32, #tpu.memory_space<vmem>>, vector<1x1x16x16xf32>
    %245 = vector.shape_cast %244 : vector<1x1x16x16xf32> to vector<1x16x16xf32>
    %c13 = arith.constant 13 : index
    %246 = memref.load %arg1[%c13] : memref<144xf32, #tpu.memory_space<smem>>
    %247 = vector.broadcast %246 : f32 to vector<1x16x16xf32>
    %248 = arith.mulf %247, %245 : vector<1x16x16xf32>
    %249 = arith.addf %231, %248 : vector<1x16x16xf32>
    %c49 = arith.constant 49 : index
    %250 = memref.load %arg1[%c49] : memref<144xf32, #tpu.memory_space<smem>>
    %251 = vector.broadcast %250 : f32 to vector<1x16x16xf32>
    %252 = arith.mulf %251, %245 : vector<1x16x16xf32>
    %253 = arith.addf %235, %252 : vector<1x16x16xf32>
    %c85 = arith.constant 85 : index
    %254 = memref.load %arg1[%c85] : memref<144xf32, #tpu.memory_space<smem>>
    %255 = vector.broadcast %254 : f32 to vector<1x16x16xf32>
    %256 = arith.mulf %255, %245 : vector<1x16x16xf32>
    %257 = arith.addf %239, %256 : vector<1x16x16xf32>
    %c121 = arith.constant 121 : index
    %258 = memref.load %arg1[%c121] : memref<144xf32, #tpu.memory_space<smem>>
    %259 = vector.broadcast %258 : f32 to vector<1x16x16xf32>
    %260 = arith.mulf %259, %245 : vector<1x16x16xf32>
    %261 = arith.addf %243, %260 : vector<1x16x16xf32>
    %c0_77 = arith.constant 0 : index
    %c1_78 = arith.constant 1 : index
    %c5_79 = arith.constant 5 : index
    %c10_80 = arith.constant 10 : index
    %262 = vector.load %arg7[%c0_77, %c1_78, %c5_79, %c10_80] : memref<1x4x26x26xf32, #tpu.memory_space<vmem>>, vector<1x1x16x16xf32>
    %263 = vector.shape_cast %262 : vector<1x1x16x16xf32> to vector<1x16x16xf32>
    %c14 = arith.constant 14 : index
    %264 = memref.load %arg1[%c14] : memref<144xf32, #tpu.memory_space<smem>>
    %265 = vector.broadcast %264 : f32 to vector<1x16x16xf32>
    %266 = arith.mulf %265, %263 : vector<1x16x16xf32>
    %267 = arith.addf %249, %266 : vector<1x16x16xf32>
    %c50 = arith.constant 50 : index
    %268 = memref.load %arg1[%c50] : memref<144xf32, #tpu.memory_space<smem>>
    %269 = vector.broadcast %268 : f32 to vector<1x16x16xf32>
    %270 = arith.mulf %269, %263 : vector<1x16x16xf32>
    %271 = arith.addf %253, %270 : vector<1x16x16xf32>
    %c86 = arith.constant 86 : index
    %272 = memref.load %arg1[%c86] : memref<144xf32, #tpu.memory_space<smem>>
    %273 = vector.broadcast %272 : f32 to vector<1x16x16xf32>
    %274 = arith.mulf %273, %263 : vector<1x16x16xf32>
    %275 = arith.addf %257, %274 : vector<1x16x16xf32>
    %c122 = arith.constant 122 : index
    %276 = memref.load %arg1[%c122] : memref<144xf32, #tpu.memory_space<smem>>
    %277 = vector.broadcast %276 : f32 to vector<1x16x16xf32>
    %278 = arith.mulf %277, %263 : vector<1x16x16xf32>
    %279 = arith.addf %261, %278 : vector<1x16x16xf32>
    %c0_81 = arith.constant 0 : index
    %c1_82 = arith.constant 1 : index
    %c10_83 = arith.constant 10 : index
    %c0_84 = arith.constant 0 : index
    %280 = vector.load %arg7[%c0_81, %c1_82, %c10_83, %c0_84] : memref<1x4x26x26xf32, #tpu.memory_space<vmem>>, vector<1x1x16x16xf32>
    %281 = vector.shape_cast %280 : vector<1x1x16x16xf32> to vector<1x16x16xf32>
    %c15 = arith.constant 15 : index
    %282 = memref.load %arg1[%c15] : memref<144xf32, #tpu.memory_space<smem>>
    %283 = vector.broadcast %282 : f32 to vector<1x16x16xf32>
    %284 = arith.mulf %283, %281 : vector<1x16x16xf32>
    %285 = arith.addf %267, %284 : vector<1x16x16xf32>
    %c51 = arith.constant 51 : index
    %286 = memref.load %arg1[%c51] : memref<144xf32, #tpu.memory_space<smem>>
    %287 = vector.broadcast %286 : f32 to vector<1x16x16xf32>
    %288 = arith.mulf %287, %281 : vector<1x16x16xf32>
    %289 = arith.addf %271, %288 : vector<1x16x16xf32>
    %c87 = arith.constant 87 : index
    %290 = memref.load %arg1[%c87] : memref<144xf32, #tpu.memory_space<smem>>
    %291 = vector.broadcast %290 : f32 to vector<1x16x16xf32>
    %292 = arith.mulf %291, %281 : vector<1x16x16xf32>
    %293 = arith.addf %275, %292 : vector<1x16x16xf32>
    %c123 = arith.constant 123 : index
    %294 = memref.load %arg1[%c123] : memref<144xf32, #tpu.memory_space<smem>>
    %295 = vector.broadcast %294 : f32 to vector<1x16x16xf32>
    %296 = arith.mulf %295, %281 : vector<1x16x16xf32>
    %297 = arith.addf %279, %296 : vector<1x16x16xf32>
    %c0_85 = arith.constant 0 : index
    %c1_86 = arith.constant 1 : index
    %c10_87 = arith.constant 10 : index
    %c5_88 = arith.constant 5 : index
    %298 = vector.load %arg7[%c0_85, %c1_86, %c10_87, %c5_88] : memref<1x4x26x26xf32, #tpu.memory_space<vmem>>, vector<1x1x16x16xf32>
    %299 = vector.shape_cast %298 : vector<1x1x16x16xf32> to vector<1x16x16xf32>
    %c16 = arith.constant 16 : index
    %300 = memref.load %arg1[%c16] : memref<144xf32, #tpu.memory_space<smem>>
    %301 = vector.broadcast %300 : f32 to vector<1x16x16xf32>
    %302 = arith.mulf %301, %299 : vector<1x16x16xf32>
    %303 = arith.addf %285, %302 : vector<1x16x16xf32>
    %c52 = arith.constant 52 : index
    %304 = memref.load %arg1[%c52] : memref<144xf32, #tpu.memory_space<smem>>
    %305 = vector.broadcast %304 : f32 to vector<1x16x16xf32>
    %306 = arith.mulf %305, %299 : vector<1x16x16xf32>
    %307 = arith.addf %289, %306 : vector<1x16x16xf32>
    %c88 = arith.constant 88 : index
    %308 = memref.load %arg1[%c88] : memref<144xf32, #tpu.memory_space<smem>>
    %309 = vector.broadcast %308 : f32 to vector<1x16x16xf32>
    %310 = arith.mulf %309, %299 : vector<1x16x16xf32>
    %311 = arith.addf %293, %310 : vector<1x16x16xf32>
    %c124 = arith.constant 124 : index
    %312 = memref.load %arg1[%c124] : memref<144xf32, #tpu.memory_space<smem>>
    %313 = vector.broadcast %312 : f32 to vector<1x16x16xf32>
    %314 = arith.mulf %313, %299 : vector<1x16x16xf32>
    %315 = arith.addf %297, %314 : vector<1x16x16xf32>
    %c0_89 = arith.constant 0 : index
    %c1_90 = arith.constant 1 : index
    %c10_91 = arith.constant 10 : index
    %c10_92 = arith.constant 10 : index
    %316 = vector.load %arg7[%c0_89, %c1_90, %c10_91, %c10_92] : memref<1x4x26x26xf32, #tpu.memory_space<vmem>>, vector<1x1x16x16xf32>
    %317 = vector.shape_cast %316 : vector<1x1x16x16xf32> to vector<1x16x16xf32>
    %c17 = arith.constant 17 : index
    %318 = memref.load %arg1[%c17] : memref<144xf32, #tpu.memory_space<smem>>
    %319 = vector.broadcast %318 : f32 to vector<1x16x16xf32>
    %320 = arith.mulf %319, %317 : vector<1x16x16xf32>
    %321 = arith.addf %303, %320 : vector<1x16x16xf32>
    %c53 = arith.constant 53 : index
    %322 = memref.load %arg1[%c53] : memref<144xf32, #tpu.memory_space<smem>>
    %323 = vector.broadcast %322 : f32 to vector<1x16x16xf32>
    %324 = arith.mulf %323, %317 : vector<1x16x16xf32>
    %325 = arith.addf %307, %324 : vector<1x16x16xf32>
    %c89 = arith.constant 89 : index
    %326 = memref.load %arg1[%c89] : memref<144xf32, #tpu.memory_space<smem>>
    %327 = vector.broadcast %326 : f32 to vector<1x16x16xf32>
    %328 = arith.mulf %327, %317 : vector<1x16x16xf32>
    %329 = arith.addf %311, %328 : vector<1x16x16xf32>
    %c125 = arith.constant 125 : index
    %330 = memref.load %arg1[%c125] : memref<144xf32, #tpu.memory_space<smem>>
    %331 = vector.broadcast %330 : f32 to vector<1x16x16xf32>
    %332 = arith.mulf %331, %317 : vector<1x16x16xf32>
    %333 = arith.addf %315, %332 : vector<1x16x16xf32>
    %c0_93 = arith.constant 0 : index
    %c2_94 = arith.constant 2 : index
    %c0_95 = arith.constant 0 : index
    %c0_96 = arith.constant 0 : index
    %334 = vector.load %arg7[%c0_93, %c2_94, %c0_95, %c0_96] : memref<1x4x26x26xf32, #tpu.memory_space<vmem>>, vector<1x1x16x16xf32>
    %335 = vector.shape_cast %334 : vector<1x1x16x16xf32> to vector<1x16x16xf32>
    %c18 = arith.constant 18 : index
    %336 = memref.load %arg1[%c18] : memref<144xf32, #tpu.memory_space<smem>>
    %337 = vector.broadcast %336 : f32 to vector<1x16x16xf32>
    %338 = arith.mulf %337, %335 : vector<1x16x16xf32>
    %339 = arith.addf %321, %338 : vector<1x16x16xf32>
    %c54 = arith.constant 54 : index
    %340 = memref.load %arg1[%c54] : memref<144xf32, #tpu.memory_space<smem>>
    %341 = vector.broadcast %340 : f32 to vector<1x16x16xf32>
    %342 = arith.mulf %341, %335 : vector<1x16x16xf32>
    %343 = arith.addf %325, %342 : vector<1x16x16xf32>
    %c90 = arith.constant 90 : index
    %344 = memref.load %arg1[%c90] : memref<144xf32, #tpu.memory_space<smem>>
    %345 = vector.broadcast %344 : f32 to vector<1x16x16xf32>
    %346 = arith.mulf %345, %335 : vector<1x16x16xf32>
    %347 = arith.addf %329, %346 : vector<1x16x16xf32>
    %c126 = arith.constant 126 : index
    %348 = memref.load %arg1[%c126] : memref<144xf32, #tpu.memory_space<smem>>
    %349 = vector.broadcast %348 : f32 to vector<1x16x16xf32>
    %350 = arith.mulf %349, %335 : vector<1x16x16xf32>
    %351 = arith.addf %333, %350 : vector<1x16x16xf32>
    %c0_97 = arith.constant 0 : index
    %c2_98 = arith.constant 2 : index
    %c0_99 = arith.constant 0 : index
    %c5_100 = arith.constant 5 : index
    %352 = vector.load %arg7[%c0_97, %c2_98, %c0_99, %c5_100] : memref<1x4x26x26xf32, #tpu.memory_space<vmem>>, vector<1x1x16x16xf32>
    %353 = vector.shape_cast %352 : vector<1x1x16x16xf32> to vector<1x16x16xf32>
    %c19 = arith.constant 19 : index
    %354 = memref.load %arg1[%c19] : memref<144xf32, #tpu.memory_space<smem>>
    %355 = vector.broadcast %354 : f32 to vector<1x16x16xf32>
    %356 = arith.mulf %355, %353 : vector<1x16x16xf32>
    %357 = arith.addf %339, %356 : vector<1x16x16xf32>
    %c55 = arith.constant 55 : index
    %358 = memref.load %arg1[%c55] : memref<144xf32, #tpu.memory_space<smem>>
    %359 = vector.broadcast %358 : f32 to vector<1x16x16xf32>
    %360 = arith.mulf %359, %353 : vector<1x16x16xf32>
    %361 = arith.addf %343, %360 : vector<1x16x16xf32>
    %c91 = arith.constant 91 : index
    %362 = memref.load %arg1[%c91] : memref<144xf32, #tpu.memory_space<smem>>
    %363 = vector.broadcast %362 : f32 to vector<1x16x16xf32>
    %364 = arith.mulf %363, %353 : vector<1x16x16xf32>
    %365 = arith.addf %347, %364 : vector<1x16x16xf32>
    %c127 = arith.constant 127 : index
    %366 = memref.load %arg1[%c127] : memref<144xf32, #tpu.memory_space<smem>>
    %367 = vector.broadcast %366 : f32 to vector<1x16x16xf32>
    %368 = arith.mulf %367, %353 : vector<1x16x16xf32>
    %369 = arith.addf %351, %368 : vector<1x16x16xf32>
    %c0_101 = arith.constant 0 : index
    %c2_102 = arith.constant 2 : index
    %c0_103 = arith.constant 0 : index
    %c10_104 = arith.constant 10 : index
    %370 = vector.load %arg7[%c0_101, %c2_102, %c0_103, %c10_104] : memref<1x4x26x26xf32, #tpu.memory_space<vmem>>, vector<1x1x16x16xf32>
    %371 = vector.shape_cast %370 : vector<1x1x16x16xf32> to vector<1x16x16xf32>
    %c20 = arith.constant 20 : index
    %372 = memref.load %arg1[%c20] : memref<144xf32, #tpu.memory_space<smem>>
    %373 = vector.broadcast %372 : f32 to vector<1x16x16xf32>
    %374 = arith.mulf %373, %371 : vector<1x16x16xf32>
    %375 = arith.addf %357, %374 : vector<1x16x16xf32>
    %c56 = arith.constant 56 : index
    %376 = memref.load %arg1[%c56] : memref<144xf32, #tpu.memory_space<smem>>
    %377 = vector.broadcast %376 : f32 to vector<1x16x16xf32>
    %378 = arith.mulf %377, %371 : vector<1x16x16xf32>
    %379 = arith.addf %361, %378 : vector<1x16x16xf32>
    %c92 = arith.constant 92 : index
    %380 = memref.load %arg1[%c92] : memref<144xf32, #tpu.memory_space<smem>>
    %381 = vector.broadcast %380 : f32 to vector<1x16x16xf32>
    %382 = arith.mulf %381, %371 : vector<1x16x16xf32>
    %383 = arith.addf %365, %382 : vector<1x16x16xf32>
    %c128 = arith.constant 128 : index
    %384 = memref.load %arg1[%c128] : memref<144xf32, #tpu.memory_space<smem>>
    %385 = vector.broadcast %384 : f32 to vector<1x16x16xf32>
    %386 = arith.mulf %385, %371 : vector<1x16x16xf32>
    %387 = arith.addf %369, %386 : vector<1x16x16xf32>
    %c0_105 = arith.constant 0 : index
    %c2_106 = arith.constant 2 : index
    %c5_107 = arith.constant 5 : index
    %c0_108 = arith.constant 0 : index
    %388 = vector.load %arg7[%c0_105, %c2_106, %c5_107, %c0_108] : memref<1x4x26x26xf32, #tpu.memory_space<vmem>>, vector<1x1x16x16xf32>
    %389 = vector.shape_cast %388 : vector<1x1x16x16xf32> to vector<1x16x16xf32>
    %c21 = arith.constant 21 : index
    %390 = memref.load %arg1[%c21] : memref<144xf32, #tpu.memory_space<smem>>
    %391 = vector.broadcast %390 : f32 to vector<1x16x16xf32>
    %392 = arith.mulf %391, %389 : vector<1x16x16xf32>
    %393 = arith.addf %375, %392 : vector<1x16x16xf32>
    %c57 = arith.constant 57 : index
    %394 = memref.load %arg1[%c57] : memref<144xf32, #tpu.memory_space<smem>>
    %395 = vector.broadcast %394 : f32 to vector<1x16x16xf32>
    %396 = arith.mulf %395, %389 : vector<1x16x16xf32>
    %397 = arith.addf %379, %396 : vector<1x16x16xf32>
    %c93 = arith.constant 93 : index
    %398 = memref.load %arg1[%c93] : memref<144xf32, #tpu.memory_space<smem>>
    %399 = vector.broadcast %398 : f32 to vector<1x16x16xf32>
    %400 = arith.mulf %399, %389 : vector<1x16x16xf32>
    %401 = arith.addf %383, %400 : vector<1x16x16xf32>
    %c129 = arith.constant 129 : index
    %402 = memref.load %arg1[%c129] : memref<144xf32, #tpu.memory_space<smem>>
    %403 = vector.broadcast %402 : f32 to vector<1x16x16xf32>
    %404 = arith.mulf %403, %389 : vector<1x16x16xf32>
    %405 = arith.addf %387, %404 : vector<1x16x16xf32>
    %c0_109 = arith.constant 0 : index
    %c2_110 = arith.constant 2 : index
    %c5_111 = arith.constant 5 : index
    %c5_112 = arith.constant 5 : index
    %406 = vector.load %arg7[%c0_109, %c2_110, %c5_111, %c5_112] : memref<1x4x26x26xf32, #tpu.memory_space<vmem>>, vector<1x1x16x16xf32>
    %407 = vector.shape_cast %406 : vector<1x1x16x16xf32> to vector<1x16x16xf32>
    %c22 = arith.constant 22 : index
    %408 = memref.load %arg1[%c22] : memref<144xf32, #tpu.memory_space<smem>>
    %409 = vector.broadcast %408 : f32 to vector<1x16x16xf32>
    %410 = arith.mulf %409, %407 : vector<1x16x16xf32>
    %411 = arith.addf %393, %410 : vector<1x16x16xf32>
    %c58 = arith.constant 58 : index
    %412 = memref.load %arg1[%c58] : memref<144xf32, #tpu.memory_space<smem>>
    %413 = vector.broadcast %412 : f32 to vector<1x16x16xf32>
    %414 = arith.mulf %413, %407 : vector<1x16x16xf32>
    %415 = arith.addf %397, %414 : vector<1x16x16xf32>
    %c94 = arith.constant 94 : index
    %416 = memref.load %arg1[%c94] : memref<144xf32, #tpu.memory_space<smem>>
    %417 = vector.broadcast %416 : f32 to vector<1x16x16xf32>
    %418 = arith.mulf %417, %407 : vector<1x16x16xf32>
    %419 = arith.addf %401, %418 : vector<1x16x16xf32>
    %c130 = arith.constant 130 : index
    %420 = memref.load %arg1[%c130] : memref<144xf32, #tpu.memory_space<smem>>
    %421 = vector.broadcast %420 : f32 to vector<1x16x16xf32>
    %422 = arith.mulf %421, %407 : vector<1x16x16xf32>
    %423 = arith.addf %405, %422 : vector<1x16x16xf32>
    %c0_113 = arith.constant 0 : index
    %c2_114 = arith.constant 2 : index
    %c5_115 = arith.constant 5 : index
    %c10_116 = arith.constant 10 : index
    %424 = vector.load %arg7[%c0_113, %c2_114, %c5_115, %c10_116] : memref<1x4x26x26xf32, #tpu.memory_space<vmem>>, vector<1x1x16x16xf32>
    %425 = vector.shape_cast %424 : vector<1x1x16x16xf32> to vector<1x16x16xf32>
    %c23 = arith.constant 23 : index
    %426 = memref.load %arg1[%c23] : memref<144xf32, #tpu.memory_space<smem>>
    %427 = vector.broadcast %426 : f32 to vector<1x16x16xf32>
    %428 = arith.mulf %427, %425 : vector<1x16x16xf32>
    %429 = arith.addf %411, %428 : vector<1x16x16xf32>
    %c59 = arith.constant 59 : index
    %430 = memref.load %arg1[%c59] : memref<144xf32, #tpu.memory_space<smem>>
    %431 = vector.broadcast %430 : f32 to vector<1x16x16xf32>
    %432 = arith.mulf %431, %425 : vector<1x16x16xf32>
    %433 = arith.addf %415, %432 : vector<1x16x16xf32>
    %c95 = arith.constant 95 : index
    %434 = memref.load %arg1[%c95] : memref<144xf32, #tpu.memory_space<smem>>
    %435 = vector.broadcast %434 : f32 to vector<1x16x16xf32>
    %436 = arith.mulf %435, %425 : vector<1x16x16xf32>
    %437 = arith.addf %419, %436 : vector<1x16x16xf32>
    %c131 = arith.constant 131 : index
    %438 = memref.load %arg1[%c131] : memref<144xf32, #tpu.memory_space<smem>>
    %439 = vector.broadcast %438 : f32 to vector<1x16x16xf32>
    %440 = arith.mulf %439, %425 : vector<1x16x16xf32>
    %441 = arith.addf %423, %440 : vector<1x16x16xf32>
    %c0_117 = arith.constant 0 : index
    %c2_118 = arith.constant 2 : index
    %c10_119 = arith.constant 10 : index
    %c0_120 = arith.constant 0 : index
    %442 = vector.load %arg7[%c0_117, %c2_118, %c10_119, %c0_120] : memref<1x4x26x26xf32, #tpu.memory_space<vmem>>, vector<1x1x16x16xf32>
    %443 = vector.shape_cast %442 : vector<1x1x16x16xf32> to vector<1x16x16xf32>
    %c24 = arith.constant 24 : index
    %444 = memref.load %arg1[%c24] : memref<144xf32, #tpu.memory_space<smem>>
    %445 = vector.broadcast %444 : f32 to vector<1x16x16xf32>
    %446 = arith.mulf %445, %443 : vector<1x16x16xf32>
    %447 = arith.addf %429, %446 : vector<1x16x16xf32>
    %c60 = arith.constant 60 : index
    %448 = memref.load %arg1[%c60] : memref<144xf32, #tpu.memory_space<smem>>
    %449 = vector.broadcast %448 : f32 to vector<1x16x16xf32>
    %450 = arith.mulf %449, %443 : vector<1x16x16xf32>
    %451 = arith.addf %433, %450 : vector<1x16x16xf32>
    %c96 = arith.constant 96 : index
    %452 = memref.load %arg1[%c96] : memref<144xf32, #tpu.memory_space<smem>>
    %453 = vector.broadcast %452 : f32 to vector<1x16x16xf32>
    %454 = arith.mulf %453, %443 : vector<1x16x16xf32>
    %455 = arith.addf %437, %454 : vector<1x16x16xf32>
    %c132 = arith.constant 132 : index
    %456 = memref.load %arg1[%c132] : memref<144xf32, #tpu.memory_space<smem>>
    %457 = vector.broadcast %456 : f32 to vector<1x16x16xf32>
    %458 = arith.mulf %457, %443 : vector<1x16x16xf32>
    %459 = arith.addf %441, %458 : vector<1x16x16xf32>
    %c0_121 = arith.constant 0 : index
    %c2_122 = arith.constant 2 : index
    %c10_123 = arith.constant 10 : index
    %c5_124 = arith.constant 5 : index
    %460 = vector.load %arg7[%c0_121, %c2_122, %c10_123, %c5_124] : memref<1x4x26x26xf32, #tpu.memory_space<vmem>>, vector<1x1x16x16xf32>
    %461 = vector.shape_cast %460 : vector<1x1x16x16xf32> to vector<1x16x16xf32>
    %c25 = arith.constant 25 : index
    %462 = memref.load %arg1[%c25] : memref<144xf32, #tpu.memory_space<smem>>
    %463 = vector.broadcast %462 : f32 to vector<1x16x16xf32>
    %464 = arith.mulf %463, %461 : vector<1x16x16xf32>
    %465 = arith.addf %447, %464 : vector<1x16x16xf32>
    %c61 = arith.constant 61 : index
    %466 = memref.load %arg1[%c61] : memref<144xf32, #tpu.memory_space<smem>>
    %467 = vector.broadcast %466 : f32 to vector<1x16x16xf32>
    %468 = arith.mulf %467, %461 : vector<1x16x16xf32>
    %469 = arith.addf %451, %468 : vector<1x16x16xf32>
    %c97 = arith.constant 97 : index
    %470 = memref.load %arg1[%c97] : memref<144xf32, #tpu.memory_space<smem>>
    %471 = vector.broadcast %470 : f32 to vector<1x16x16xf32>
    %472 = arith.mulf %471, %461 : vector<1x16x16xf32>
    %473 = arith.addf %455, %472 : vector<1x16x16xf32>
    %c133 = arith.constant 133 : index
    %474 = memref.load %arg1[%c133] : memref<144xf32, #tpu.memory_space<smem>>
    %475 = vector.broadcast %474 : f32 to vector<1x16x16xf32>
    %476 = arith.mulf %475, %461 : vector<1x16x16xf32>
    %477 = arith.addf %459, %476 : vector<1x16x16xf32>
    %c0_125 = arith.constant 0 : index
    %c2_126 = arith.constant 2 : index
    %c10_127 = arith.constant 10 : index
    %c10_128 = arith.constant 10 : index
    %478 = vector.load %arg7[%c0_125, %c2_126, %c10_127, %c10_128] : memref<1x4x26x26xf32, #tpu.memory_space<vmem>>, vector<1x1x16x16xf32>
    %479 = vector.shape_cast %478 : vector<1x1x16x16xf32> to vector<1x16x16xf32>
    %c26 = arith.constant 26 : index
    %480 = memref.load %arg1[%c26] : memref<144xf32, #tpu.memory_space<smem>>
    %481 = vector.broadcast %480 : f32 to vector<1x16x16xf32>
    %482 = arith.mulf %481, %479 : vector<1x16x16xf32>
    %483 = arith.addf %465, %482 : vector<1x16x16xf32>
    %c62 = arith.constant 62 : index
    %484 = memref.load %arg1[%c62] : memref<144xf32, #tpu.memory_space<smem>>
    %485 = vector.broadcast %484 : f32 to vector<1x16x16xf32>
    %486 = arith.mulf %485, %479 : vector<1x16x16xf32>
    %487 = arith.addf %469, %486 : vector<1x16x16xf32>
    %c98 = arith.constant 98 : index
    %488 = memref.load %arg1[%c98] : memref<144xf32, #tpu.memory_space<smem>>
    %489 = vector.broadcast %488 : f32 to vector<1x16x16xf32>
    %490 = arith.mulf %489, %479 : vector<1x16x16xf32>
    %491 = arith.addf %473, %490 : vector<1x16x16xf32>
    %c134 = arith.constant 134 : index
    %492 = memref.load %arg1[%c134] : memref<144xf32, #tpu.memory_space<smem>>
    %493 = vector.broadcast %492 : f32 to vector<1x16x16xf32>
    %494 = arith.mulf %493, %479 : vector<1x16x16xf32>
    %495 = arith.addf %477, %494 : vector<1x16x16xf32>
    %c0_129 = arith.constant 0 : index
    %c3_130 = arith.constant 3 : index
    %c0_131 = arith.constant 0 : index
    %c0_132 = arith.constant 0 : index
    %496 = vector.load %arg7[%c0_129, %c3_130, %c0_131, %c0_132] : memref<1x4x26x26xf32, #tpu.memory_space<vmem>>, vector<1x1x16x16xf32>
    %497 = vector.shape_cast %496 : vector<1x1x16x16xf32> to vector<1x16x16xf32>
    %c27 = arith.constant 27 : index
    %498 = memref.load %arg1[%c27] : memref<144xf32, #tpu.memory_space<smem>>
    %499 = vector.broadcast %498 : f32 to vector<1x16x16xf32>
    %500 = arith.mulf %499, %497 : vector<1x16x16xf32>
    %501 = arith.addf %483, %500 : vector<1x16x16xf32>
    %c63 = arith.constant 63 : index
    %502 = memref.load %arg1[%c63] : memref<144xf32, #tpu.memory_space<smem>>
    %503 = vector.broadcast %502 : f32 to vector<1x16x16xf32>
    %504 = arith.mulf %503, %497 : vector<1x16x16xf32>
    %505 = arith.addf %487, %504 : vector<1x16x16xf32>
    %c99 = arith.constant 99 : index
    %506 = memref.load %arg1[%c99] : memref<144xf32, #tpu.memory_space<smem>>
    %507 = vector.broadcast %506 : f32 to vector<1x16x16xf32>
    %508 = arith.mulf %507, %497 : vector<1x16x16xf32>
    %509 = arith.addf %491, %508 : vector<1x16x16xf32>
    %c135 = arith.constant 135 : index
    %510 = memref.load %arg1[%c135] : memref<144xf32, #tpu.memory_space<smem>>
    %511 = vector.broadcast %510 : f32 to vector<1x16x16xf32>
    %512 = arith.mulf %511, %497 : vector<1x16x16xf32>
    %513 = arith.addf %495, %512 : vector<1x16x16xf32>
    %c0_133 = arith.constant 0 : index
    %c3_134 = arith.constant 3 : index
    %c0_135 = arith.constant 0 : index
    %c5_136 = arith.constant 5 : index
    %514 = vector.load %arg7[%c0_133, %c3_134, %c0_135, %c5_136] : memref<1x4x26x26xf32, #tpu.memory_space<vmem>>, vector<1x1x16x16xf32>
    %515 = vector.shape_cast %514 : vector<1x1x16x16xf32> to vector<1x16x16xf32>
    %c28 = arith.constant 28 : index
    %516 = memref.load %arg1[%c28] : memref<144xf32, #tpu.memory_space<smem>>
    %517 = vector.broadcast %516 : f32 to vector<1x16x16xf32>
    %518 = arith.mulf %517, %515 : vector<1x16x16xf32>
    %519 = arith.addf %501, %518 : vector<1x16x16xf32>
    %c64 = arith.constant 64 : index
    %520 = memref.load %arg1[%c64] : memref<144xf32, #tpu.memory_space<smem>>
    %521 = vector.broadcast %520 : f32 to vector<1x16x16xf32>
    %522 = arith.mulf %521, %515 : vector<1x16x16xf32>
    %523 = arith.addf %505, %522 : vector<1x16x16xf32>
    %c100 = arith.constant 100 : index
    %524 = memref.load %arg1[%c100] : memref<144xf32, #tpu.memory_space<smem>>
    %525 = vector.broadcast %524 : f32 to vector<1x16x16xf32>
    %526 = arith.mulf %525, %515 : vector<1x16x16xf32>
    %527 = arith.addf %509, %526 : vector<1x16x16xf32>
    %c136 = arith.constant 136 : index
    %528 = memref.load %arg1[%c136] : memref<144xf32, #tpu.memory_space<smem>>
    %529 = vector.broadcast %528 : f32 to vector<1x16x16xf32>
    %530 = arith.mulf %529, %515 : vector<1x16x16xf32>
    %531 = arith.addf %513, %530 : vector<1x16x16xf32>
    %c0_137 = arith.constant 0 : index
    %c3_138 = arith.constant 3 : index
    %c0_139 = arith.constant 0 : index
    %c10_140 = arith.constant 10 : index
    %532 = vector.load %arg7[%c0_137, %c3_138, %c0_139, %c10_140] : memref<1x4x26x26xf32, #tpu.memory_space<vmem>>, vector<1x1x16x16xf32>
    %533 = vector.shape_cast %532 : vector<1x1x16x16xf32> to vector<1x16x16xf32>
    %c29 = arith.constant 29 : index
    %534 = memref.load %arg1[%c29] : memref<144xf32, #tpu.memory_space<smem>>
    %535 = vector.broadcast %534 : f32 to vector<1x16x16xf32>
    %536 = arith.mulf %535, %533 : vector<1x16x16xf32>
    %537 = arith.addf %519, %536 : vector<1x16x16xf32>
    %c65 = arith.constant 65 : index
    %538 = memref.load %arg1[%c65] : memref<144xf32, #tpu.memory_space<smem>>
    %539 = vector.broadcast %538 : f32 to vector<1x16x16xf32>
    %540 = arith.mulf %539, %533 : vector<1x16x16xf32>
    %541 = arith.addf %523, %540 : vector<1x16x16xf32>
    %c101 = arith.constant 101 : index
    %542 = memref.load %arg1[%c101] : memref<144xf32, #tpu.memory_space<smem>>
    %543 = vector.broadcast %542 : f32 to vector<1x16x16xf32>
    %544 = arith.mulf %543, %533 : vector<1x16x16xf32>
    %545 = arith.addf %527, %544 : vector<1x16x16xf32>
    %c137 = arith.constant 137 : index
    %546 = memref.load %arg1[%c137] : memref<144xf32, #tpu.memory_space<smem>>
    %547 = vector.broadcast %546 : f32 to vector<1x16x16xf32>
    %548 = arith.mulf %547, %533 : vector<1x16x16xf32>
    %549 = arith.addf %531, %548 : vector<1x16x16xf32>
    %c0_141 = arith.constant 0 : index
    %c3_142 = arith.constant 3 : index
    %c5_143 = arith.constant 5 : index
    %c0_144 = arith.constant 0 : index
    %550 = vector.load %arg7[%c0_141, %c3_142, %c5_143, %c0_144] : memref<1x4x26x26xf32, #tpu.memory_space<vmem>>, vector<1x1x16x16xf32>
    %551 = vector.shape_cast %550 : vector<1x1x16x16xf32> to vector<1x16x16xf32>
    %c30 = arith.constant 30 : index
    %552 = memref.load %arg1[%c30] : memref<144xf32, #tpu.memory_space<smem>>
    %553 = vector.broadcast %552 : f32 to vector<1x16x16xf32>
    %554 = arith.mulf %553, %551 : vector<1x16x16xf32>
    %555 = arith.addf %537, %554 : vector<1x16x16xf32>
    %c66 = arith.constant 66 : index
    %556 = memref.load %arg1[%c66] : memref<144xf32, #tpu.memory_space<smem>>
    %557 = vector.broadcast %556 : f32 to vector<1x16x16xf32>
    %558 = arith.mulf %557, %551 : vector<1x16x16xf32>
    %559 = arith.addf %541, %558 : vector<1x16x16xf32>
    %c102 = arith.constant 102 : index
    %560 = memref.load %arg1[%c102] : memref<144xf32, #tpu.memory_space<smem>>
    %561 = vector.broadcast %560 : f32 to vector<1x16x16xf32>
    %562 = arith.mulf %561, %551 : vector<1x16x16xf32>
    %563 = arith.addf %545, %562 : vector<1x16x16xf32>
    %c138 = arith.constant 138 : index
    %564 = memref.load %arg1[%c138] : memref<144xf32, #tpu.memory_space<smem>>
    %565 = vector.broadcast %564 : f32 to vector<1x16x16xf32>
    %566 = arith.mulf %565, %551 : vector<1x16x16xf32>
    %567 = arith.addf %549, %566 : vector<1x16x16xf32>
    %c0_145 = arith.constant 0 : index
    %c3_146 = arith.constant 3 : index
    %c5_147 = arith.constant 5 : index
    %c5_148 = arith.constant 5 : index
    %568 = vector.load %arg7[%c0_145, %c3_146, %c5_147, %c5_148] : memref<1x4x26x26xf32, #tpu.memory_space<vmem>>, vector<1x1x16x16xf32>
    %569 = vector.shape_cast %568 : vector<1x1x16x16xf32> to vector<1x16x16xf32>
    %c31 = arith.constant 31 : index
    %570 = memref.load %arg1[%c31] : memref<144xf32, #tpu.memory_space<smem>>
    %571 = vector.broadcast %570 : f32 to vector<1x16x16xf32>
    %572 = arith.mulf %571, %569 : vector<1x16x16xf32>
    %573 = arith.addf %555, %572 : vector<1x16x16xf32>
    %c67 = arith.constant 67 : index
    %574 = memref.load %arg1[%c67] : memref<144xf32, #tpu.memory_space<smem>>
    %575 = vector.broadcast %574 : f32 to vector<1x16x16xf32>
    %576 = arith.mulf %575, %569 : vector<1x16x16xf32>
    %577 = arith.addf %559, %576 : vector<1x16x16xf32>
    %c103 = arith.constant 103 : index
    %578 = memref.load %arg1[%c103] : memref<144xf32, #tpu.memory_space<smem>>
    %579 = vector.broadcast %578 : f32 to vector<1x16x16xf32>
    %580 = arith.mulf %579, %569 : vector<1x16x16xf32>
    %581 = arith.addf %563, %580 : vector<1x16x16xf32>
    %c139 = arith.constant 139 : index
    %582 = memref.load %arg1[%c139] : memref<144xf32, #tpu.memory_space<smem>>
    %583 = vector.broadcast %582 : f32 to vector<1x16x16xf32>
    %584 = arith.mulf %583, %569 : vector<1x16x16xf32>
    %585 = arith.addf %567, %584 : vector<1x16x16xf32>
    %c0_149 = arith.constant 0 : index
    %c3_150 = arith.constant 3 : index
    %c5_151 = arith.constant 5 : index
    %c10_152 = arith.constant 10 : index
    %586 = vector.load %arg7[%c0_149, %c3_150, %c5_151, %c10_152] : memref<1x4x26x26xf32, #tpu.memory_space<vmem>>, vector<1x1x16x16xf32>
    %587 = vector.shape_cast %586 : vector<1x1x16x16xf32> to vector<1x16x16xf32>
    %c32 = arith.constant 32 : index
    %588 = memref.load %arg1[%c32] : memref<144xf32, #tpu.memory_space<smem>>
    %589 = vector.broadcast %588 : f32 to vector<1x16x16xf32>
    %590 = arith.mulf %589, %587 : vector<1x16x16xf32>
    %591 = arith.addf %573, %590 : vector<1x16x16xf32>
    %c68 = arith.constant 68 : index
    %592 = memref.load %arg1[%c68] : memref<144xf32, #tpu.memory_space<smem>>
    %593 = vector.broadcast %592 : f32 to vector<1x16x16xf32>
    %594 = arith.mulf %593, %587 : vector<1x16x16xf32>
    %595 = arith.addf %577, %594 : vector<1x16x16xf32>
    %c104 = arith.constant 104 : index
    %596 = memref.load %arg1[%c104] : memref<144xf32, #tpu.memory_space<smem>>
    %597 = vector.broadcast %596 : f32 to vector<1x16x16xf32>
    %598 = arith.mulf %597, %587 : vector<1x16x16xf32>
    %599 = arith.addf %581, %598 : vector<1x16x16xf32>
    %c140 = arith.constant 140 : index
    %600 = memref.load %arg1[%c140] : memref<144xf32, #tpu.memory_space<smem>>
    %601 = vector.broadcast %600 : f32 to vector<1x16x16xf32>
    %602 = arith.mulf %601, %587 : vector<1x16x16xf32>
    %603 = arith.addf %585, %602 : vector<1x16x16xf32>
    %c0_153 = arith.constant 0 : index
    %c3_154 = arith.constant 3 : index
    %c10_155 = arith.constant 10 : index
    %c0_156 = arith.constant 0 : index
    %604 = vector.load %arg7[%c0_153, %c3_154, %c10_155, %c0_156] : memref<1x4x26x26xf32, #tpu.memory_space<vmem>>, vector<1x1x16x16xf32>
    %605 = vector.shape_cast %604 : vector<1x1x16x16xf32> to vector<1x16x16xf32>
    %c33 = arith.constant 33 : index
    %606 = memref.load %arg1[%c33] : memref<144xf32, #tpu.memory_space<smem>>
    %607 = vector.broadcast %606 : f32 to vector<1x16x16xf32>
    %608 = arith.mulf %607, %605 : vector<1x16x16xf32>
    %609 = arith.addf %591, %608 : vector<1x16x16xf32>
    %c69 = arith.constant 69 : index
    %610 = memref.load %arg1[%c69] : memref<144xf32, #tpu.memory_space<smem>>
    %611 = vector.broadcast %610 : f32 to vector<1x16x16xf32>
    %612 = arith.mulf %611, %605 : vector<1x16x16xf32>
    %613 = arith.addf %595, %612 : vector<1x16x16xf32>
    %c105 = arith.constant 105 : index
    %614 = memref.load %arg1[%c105] : memref<144xf32, #tpu.memory_space<smem>>
    %615 = vector.broadcast %614 : f32 to vector<1x16x16xf32>
    %616 = arith.mulf %615, %605 : vector<1x16x16xf32>
    %617 = arith.addf %599, %616 : vector<1x16x16xf32>
    %c141 = arith.constant 141 : index
    %618 = memref.load %arg1[%c141] : memref<144xf32, #tpu.memory_space<smem>>
    %619 = vector.broadcast %618 : f32 to vector<1x16x16xf32>
    %620 = arith.mulf %619, %605 : vector<1x16x16xf32>
    %621 = arith.addf %603, %620 : vector<1x16x16xf32>
    %c0_157 = arith.constant 0 : index
    %c3_158 = arith.constant 3 : index
    %c10_159 = arith.constant 10 : index
    %c5_160 = arith.constant 5 : index
    %622 = vector.load %arg7[%c0_157, %c3_158, %c10_159, %c5_160] : memref<1x4x26x26xf32, #tpu.memory_space<vmem>>, vector<1x1x16x16xf32>
    %623 = vector.shape_cast %622 : vector<1x1x16x16xf32> to vector<1x16x16xf32>
    %c34 = arith.constant 34 : index
    %624 = memref.load %arg1[%c34] : memref<144xf32, #tpu.memory_space<smem>>
    %625 = vector.broadcast %624 : f32 to vector<1x16x16xf32>
    %626 = arith.mulf %625, %623 : vector<1x16x16xf32>
    %627 = arith.addf %609, %626 : vector<1x16x16xf32>
    %c70 = arith.constant 70 : index
    %628 = memref.load %arg1[%c70] : memref<144xf32, #tpu.memory_space<smem>>
    %629 = vector.broadcast %628 : f32 to vector<1x16x16xf32>
    %630 = arith.mulf %629, %623 : vector<1x16x16xf32>
    %631 = arith.addf %613, %630 : vector<1x16x16xf32>
    %c106 = arith.constant 106 : index
    %632 = memref.load %arg1[%c106] : memref<144xf32, #tpu.memory_space<smem>>
    %633 = vector.broadcast %632 : f32 to vector<1x16x16xf32>
    %634 = arith.mulf %633, %623 : vector<1x16x16xf32>
    %635 = arith.addf %617, %634 : vector<1x16x16xf32>
    %c142 = arith.constant 142 : index
    %636 = memref.load %arg1[%c142] : memref<144xf32, #tpu.memory_space<smem>>
    %637 = vector.broadcast %636 : f32 to vector<1x16x16xf32>
    %638 = arith.mulf %637, %623 : vector<1x16x16xf32>
    %639 = arith.addf %621, %638 : vector<1x16x16xf32>
    %c0_161 = arith.constant 0 : index
    %c3_162 = arith.constant 3 : index
    %c10_163 = arith.constant 10 : index
    %c10_164 = arith.constant 10 : index
    %640 = vector.load %arg7[%c0_161, %c3_162, %c10_163, %c10_164] : memref<1x4x26x26xf32, #tpu.memory_space<vmem>>, vector<1x1x16x16xf32>
    %641 = vector.shape_cast %640 : vector<1x1x16x16xf32> to vector<1x16x16xf32>
    %c35 = arith.constant 35 : index
    %642 = memref.load %arg1[%c35] : memref<144xf32, #tpu.memory_space<smem>>
    %643 = vector.broadcast %642 : f32 to vector<1x16x16xf32>
    %644 = arith.mulf %643, %641 : vector<1x16x16xf32>
    %645 = arith.addf %627, %644 : vector<1x16x16xf32>
    %c71 = arith.constant 71 : index
    %646 = memref.load %arg1[%c71] : memref<144xf32, #tpu.memory_space<smem>>
    %647 = vector.broadcast %646 : f32 to vector<1x16x16xf32>
    %648 = arith.mulf %647, %641 : vector<1x16x16xf32>
    %649 = arith.addf %631, %648 : vector<1x16x16xf32>
    %c107 = arith.constant 107 : index
    %650 = memref.load %arg1[%c107] : memref<144xf32, #tpu.memory_space<smem>>
    %651 = vector.broadcast %650 : f32 to vector<1x16x16xf32>
    %652 = arith.mulf %651, %641 : vector<1x16x16xf32>
    %653 = arith.addf %635, %652 : vector<1x16x16xf32>
    %c143 = arith.constant 143 : index
    %654 = memref.load %arg1[%c143] : memref<144xf32, #tpu.memory_space<smem>>
    %655 = vector.broadcast %654 : f32 to vector<1x16x16xf32>
    %656 = arith.mulf %655, %641 : vector<1x16x16xf32>
    %657 = arith.addf %639, %656 : vector<1x16x16xf32>
    %c0_165 = arith.constant 0 : index
    %658 = memref.load %arg2[%c0_165] : memref<4xf32, #tpu.memory_space<smem>>
    %659 = vector.broadcast %658 : f32 to vector<1x16x16xf32>
    %660 = arith.addf %645, %659 : vector<1x16x16xf32>
    %cst_166 = arith.constant 0.000000e+00 : f32
    %661 = vector.broadcast %cst_166 : f32 to vector<1x16x16xf32>
    %662 = arith.cmpf oge, %660, %661 : vector<1x16x16xf32>
    %cst_167 = arith.constant 2.000000e-01 : f32
    %663 = vector.broadcast %cst_167 : f32 to vector<1x16x16xf32>
    %664 = arith.mulf %663, %660 : vector<1x16x16xf32>
    %665 = arith.select %662, %660, %664 : vector<1x16x16xi1>, vector<1x16x16xf32>
    %c0_168 = arith.constant 0 : index
    %c0_169 = arith.constant 0 : index
    %c3_170 = arith.constant 3 : index
    %c3_171 = arith.constant 3 : index
    %666 = vector.load %arg8[%c0_168, %c0_169, %c3_170, %c3_171] : memref<1x4x22x22xf32, #tpu.memory_space<vmem>>, vector<1x1x16x16xf32>
    %667 = vector.shape_cast %666 : vector<1x1x16x16xf32> to vector<1x16x16xf32>
    %668 = vector.shape_cast %665 : vector<1x16x16xf32> to vector<1x1x16x16xf32>
    tpu.vector_store %arg8[%c0_168, %c0_169, %c3_170, %c3_171], %668 {strides = array<i32>} : memref<1x4x22x22xf32, #tpu.memory_space<vmem>>, vector<1x1x16x16xf32>,
    %c1_172 = arith.constant 1 : index
    %669 = memref.load %arg2[%c1_172] : memref<4xf32, #tpu.memory_space<smem>>
    %670 = vector.broadcast %669 : f32 to vector<1x16x16xf32>
    %671 = arith.addf %649, %670 : vector<1x16x16xf32>
    %cst_173 = arith.constant 0.000000e+00 : f32
    %672 = vector.broadcast %cst_173 : f32 to vector<1x16x16xf32>
    %673 = arith.cmpf oge, %671, %672 : vector<1x16x16xf32>
    %cst_174 = arith.constant 2.000000e-01 : f32
    %674 = vector.broadcast %cst_174 : f32 to vector<1x16x16xf32>
    %675 = arith.mulf %674, %671 : vector<1x16x16xf32>
    %676 = arith.select %673, %671, %675 : vector<1x16x16xi1>, vector<1x16x16xf32>
    %c0_175 = arith.constant 0 : index
    %c1_176 = arith.constant 1 : index
    %c3_177 = arith.constant 3 : index
    %c3_178 = arith.constant 3 : index
    %677 = vector.load %arg8[%c0_175, %c1_176, %c3_177, %c3_178] : memref<1x4x22x22xf32, #tpu.memory_space<vmem>>, vector<1x1x16x16xf32>
    %678 = vector.shape_cast %677 : vector<1x1x16x16xf32> to vector<1x16x16xf32>
    %679 = vector.shape_cast %676 : vector<1x16x16xf32> to vector<1x1x16x16xf32>
    tpu.vector_store %arg8[%c0_175, %c1_176, %c3_177, %c3_178], %679 {strides = array<i32>} : memref<1x4x22x22xf32, #tpu.memory_space<vmem>>, vector<1x1x16x16xf32>,
    %c2_179 = arith.constant 2 : index
    %680 = memref.load %arg2[%c2_179] : memref<4xf32, #tpu.memory_space<smem>>
    %681 = vector.broadcast %680 : f32 to vector<1x16x16xf32>
    %682 = arith.addf %653, %681 : vector<1x16x16xf32>
    %cst_180 = arith.constant 0.000000e+00 : f32
    %683 = vector.broadcast %cst_180 : f32 to vector<1x16x16xf32>
    %684 = arith.cmpf oge, %682, %683 : vector<1x16x16xf32>
    %cst_181 = arith.constant 2.000000e-01 : f32
    %685 = vector.broadcast %cst_181 : f32 to vector<1x16x16xf32>
    %686 = arith.mulf %685, %682 : vector<1x16x16xf32>
    %687 = arith.select %684, %682, %686 : vector<1x16x16xi1>, vector<1x16x16xf32>
    %c0_182 = arith.constant 0 : index
    %c2_183 = arith.constant 2 : index
    %c3_184 = arith.constant 3 : index
    %c3_185 = arith.constant 3 : index
    %688 = vector.load %arg8[%c0_182, %c2_183, %c3_184, %c3_185] : memref<1x4x22x22xf32, #tpu.memory_space<vmem>>, vector<1x1x16x16xf32>
    %689 = vector.shape_cast %688 : vector<1x1x16x16xf32> to vector<1x16x16xf32>
    %690 = vector.shape_cast %687 : vector<1x16x16xf32> to vector<1x1x16x16xf32>
    tpu.vector_store %arg8[%c0_182, %c2_183, %c3_184, %c3_185], %690 {strides = array<i32>} : memref<1x4x22x22xf32, #tpu.memory_space<vmem>>, vector<1x1x16x16xf32>,
    %c3_186 = arith.constant 3 : index
    %691 = memref.load %arg2[%c3_186] : memref<4xf32, #tpu.memory_space<smem>>
    %692 = vector.broadcast %691 : f32 to vector<1x16x16xf32>
    %693 = arith.addf %657, %692 : vector<1x16x16xf32>
    %cst_187 = arith.constant 0.000000e+00 : f32
    %694 = vector.broadcast %cst_187 : f32 to vector<1x16x16xf32>
    %695 = arith.cmpf oge, %693, %694 : vector<1x16x16xf32>
    %cst_188 = arith.constant 2.000000e-01 : f32
    %696 = vector.broadcast %cst_188 : f32 to vector<1x16x16xf32>
    %697 = arith.mulf %696, %693 : vector<1x16x16xf32>
    %698 = arith.select %695, %693, %697 : vector<1x16x16xi1>, vector<1x16x16xf32>
    %c0_189 = arith.constant 0 : index
    %c3_190 = arith.constant 3 : index
    %c3_191 = arith.constant 3 : index
    %c3_192 = arith.constant 3 : index
    %699 = vector.load %arg8[%c0_189, %c3_190, %c3_191, %c3_192] : memref<1x4x22x22xf32, #tpu.memory_space<vmem>>, vector<1x1x16x16xf32>
    %700 = vector.shape_cast %699 : vector<1x1x16x16xf32> to vector<1x16x16xf32>
    %701 = vector.shape_cast %698 : vector<1x16x16xf32> to vector<1x1x16x16xf32>
    tpu.vector_store %arg8[%c0_189, %c3_190, %c3_191, %c3_192], %701 {strides = array<i32>} : memref<1x4x22x22xf32, #tpu.memory_space<vmem>>, vector<1x1x16x16xf32>,
    %cst_193 = arith.constant 0.000000e+00 : f32
    %702 = vector.broadcast %cst_193 : f32 to vector<1x16x16xf32>
    %cst_194 = arith.constant 0.000000e+00 : f32
    %703 = vector.broadcast %cst_194 : f32 to vector<1x16x16xf32>
    %cst_195 = arith.constant 0.000000e+00 : f32
    %704 = vector.broadcast %cst_195 : f32 to vector<1x16x16xf32>
    %cst_196 = arith.constant 0.000000e+00 : f32
    %705 = vector.broadcast %cst_196 : f32 to vector<1x16x16xf32>
    %c0_197 = arith.constant 0 : index
    %c0_198 = arith.constant 0 : index
    %c0_199 = arith.constant 0 : index
    %c0_200 = arith.constant 0 : index
    %706 = vector.load %arg8[%c0_197, %c0_198, %c0_199, %c0_200] : memref<1x4x22x22xf32, #tpu.memory_space<vmem>>, vector<1x1x16x16xf32>
    %707 = vector.shape_cast %706 : vector<1x1x16x16xf32> to vector<1x16x16xf32>
    %c0_201 = arith.constant 0 : index
    %708 = memref.load %arg3[%c0_201] : memref<144xf32, #tpu.memory_space<smem>>
    %709 = vector.broadcast %708 : f32 to vector<1x16x16xf32>
    %710 = arith.mulf %709, %707 : vector<1x16x16xf32>
    %711 = arith.addf %702, %710 : vector<1x16x16xf32>
    %c36_202 = arith.constant 36 : index
    %712 = memref.load %arg3[%c36_202] : memref<144xf32, #tpu.memory_space<smem>>
    %713 = vector.broadcast %712 : f32 to vector<1x16x16xf32>
    %714 = arith.mulf %713, %707 : vector<1x16x16xf32>
    %715 = arith.addf %703, %714 : vector<1x16x16xf32>
    %c72_203 = arith.constant 72 : index
    %716 = memref.load %arg3[%c72_203] : memref<144xf32, #tpu.memory_space<smem>>
    %717 = vector.broadcast %716 : f32 to vector<1x16x16xf32>
    %718 = arith.mulf %717, %707 : vector<1x16x16xf32>
    %719 = arith.addf %704, %718 : vector<1x16x16xf32>
    %c108_204 = arith.constant 108 : index
    %720 = memref.load %arg3[%c108_204] : memref<144xf32, #tpu.memory_space<smem>>
    %721 = vector.broadcast %720 : f32 to vector<1x16x16xf32>
    %722 = arith.mulf %721, %707 : vector<1x16x16xf32>
    %723 = arith.addf %705, %722 : vector<1x16x16xf32>
    %c0_205 = arith.constant 0 : index
    %c0_206 = arith.constant 0 : index
    %c0_207 = arith.constant 0 : index
    %c3_208 = arith.constant 3 : index
    %724 = vector.load %arg8[%c0_205, %c0_206, %c0_207, %c3_208] : memref<1x4x22x22xf32, #tpu.memory_space<vmem>>, vector<1x1x16x16xf32>
    %725 = vector.shape_cast %724 : vector<1x1x16x16xf32> to vector<1x16x16xf32>
    %c1_209 = arith.constant 1 : index
    %726 = memref.load %arg3[%c1_209] : memref<144xf32, #tpu.memory_space<smem>>
    %727 = vector.broadcast %726 : f32 to vector<1x16x16xf32>
    %728 = arith.mulf %727, %725 : vector<1x16x16xf32>
    %729 = arith.addf %711, %728 : vector<1x16x16xf32>
    %c37_210 = arith.constant 37 : index
    %730 = memref.load %arg3[%c37_210] : memref<144xf32, #tpu.memory_space<smem>>
    %731 = vector.broadcast %730 : f32 to vector<1x16x16xf32>
    %732 = arith.mulf %731, %725 : vector<1x16x16xf32>
    %733 = arith.addf %715, %732 : vector<1x16x16xf32>
    %c73_211 = arith.constant 73 : index
    %734 = memref.load %arg3[%c73_211] : memref<144xf32, #tpu.memory_space<smem>>
    %735 = vector.broadcast %734 : f32 to vector<1x16x16xf32>
    %736 = arith.mulf %735, %725 : vector<1x16x16xf32>
    %737 = arith.addf %719, %736 : vector<1x16x16xf32>
    %c109_212 = arith.constant 109 : index
    %738 = memref.load %arg3[%c109_212] : memref<144xf32, #tpu.memory_space<smem>>
    %739 = vector.broadcast %738 : f32 to vector<1x16x16xf32>
    %740 = arith.mulf %739, %725 : vector<1x16x16xf32>
    %741 = arith.addf %723, %740 : vector<1x16x16xf32>
    %c0_213 = arith.constant 0 : index
    %c0_214 = arith.constant 0 : index
    %c0_215 = arith.constant 0 : index
    %c6_216 = arith.constant 6 : index
    %742 = vector.load %arg8[%c0_213, %c0_214, %c0_215, %c6_216] : memref<1x4x22x22xf32, #tpu.memory_space<vmem>>, vector<1x1x16x16xf32>
    %743 = vector.shape_cast %742 : vector<1x1x16x16xf32> to vector<1x16x16xf32>
    %c2_217 = arith.constant 2 : index
    %744 = memref.load %arg3[%c2_217] : memref<144xf32, #tpu.memory_space<smem>>
    %745 = vector.broadcast %744 : f32 to vector<1x16x16xf32>
    %746 = arith.mulf %745, %743 : vector<1x16x16xf32>
    %747 = arith.addf %729, %746 : vector<1x16x16xf32>
    %c38_218 = arith.constant 38 : index
    %748 = memref.load %arg3[%c38_218] : memref<144xf32, #tpu.memory_space<smem>>
    %749 = vector.broadcast %748 : f32 to vector<1x16x16xf32>
    %750 = arith.mulf %749, %743 : vector<1x16x16xf32>
    %751 = arith.addf %733, %750 : vector<1x16x16xf32>
    %c74_219 = arith.constant 74 : index
    %752 = memref.load %arg3[%c74_219] : memref<144xf32, #tpu.memory_space<smem>>
    %753 = vector.broadcast %752 : f32 to vector<1x16x16xf32>
    %754 = arith.mulf %753, %743 : vector<1x16x16xf32>
    %755 = arith.addf %737, %754 : vector<1x16x16xf32>
    %c110_220 = arith.constant 110 : index
    %756 = memref.load %arg3[%c110_220] : memref<144xf32, #tpu.memory_space<smem>>
    %757 = vector.broadcast %756 : f32 to vector<1x16x16xf32>
    %758 = arith.mulf %757, %743 : vector<1x16x16xf32>
    %759 = arith.addf %741, %758 : vector<1x16x16xf32>
    %c0_221 = arith.constant 0 : index
    %c0_222 = arith.constant 0 : index
    %c3_223 = arith.constant 3 : index
    %c0_224 = arith.constant 0 : index
    %760 = vector.load %arg8[%c0_221, %c0_222, %c3_223, %c0_224] : memref<1x4x22x22xf32, #tpu.memory_space<vmem>>, vector<1x1x16x16xf32>
    %761 = vector.shape_cast %760 : vector<1x1x16x16xf32> to vector<1x16x16xf32>
    %c3_225 = arith.constant 3 : index
    %762 = memref.load %arg3[%c3_225] : memref<144xf32, #tpu.memory_space<smem>>
    %763 = vector.broadcast %762 : f32 to vector<1x16x16xf32>
    %764 = arith.mulf %763, %761 : vector<1x16x16xf32>
    %765 = arith.addf %747, %764 : vector<1x16x16xf32>
    %c39_226 = arith.constant 39 : index
    %766 = memref.load %arg3[%c39_226] : memref<144xf32, #tpu.memory_space<smem>>
    %767 = vector.broadcast %766 : f32 to vector<1x16x16xf32>
    %768 = arith.mulf %767, %761 : vector<1x16x16xf32>
    %769 = arith.addf %751, %768 : vector<1x16x16xf32>
    %c75_227 = arith.constant 75 : index
    %770 = memref.load %arg3[%c75_227] : memref<144xf32, #tpu.memory_space<smem>>
    %771 = vector.broadcast %770 : f32 to vector<1x16x16xf32>
    %772 = arith.mulf %771, %761 : vector<1x16x16xf32>
    %773 = arith.addf %755, %772 : vector<1x16x16xf32>
    %c111_228 = arith.constant 111 : index
    %774 = memref.load %arg3[%c111_228] : memref<144xf32, #tpu.memory_space<smem>>
    %775 = vector.broadcast %774 : f32 to vector<1x16x16xf32>
    %776 = arith.mulf %775, %761 : vector<1x16x16xf32>
    %777 = arith.addf %759, %776 : vector<1x16x16xf32>
    %c0_229 = arith.constant 0 : index
    %c0_230 = arith.constant 0 : index
    %c3_231 = arith.constant 3 : index
    %c3_232 = arith.constant 3 : index
    %778 = vector.load %arg8[%c0_229, %c0_230, %c3_231, %c3_232] : memref<1x4x22x22xf32, #tpu.memory_space<vmem>>, vector<1x1x16x16xf32>
    %779 = vector.shape_cast %778 : vector<1x1x16x16xf32> to vector<1x16x16xf32>
    %c4_233 = arith.constant 4 : index
    %780 = memref.load %arg3[%c4_233] : memref<144xf32, #tpu.memory_space<smem>>
    %781 = vector.broadcast %780 : f32 to vector<1x16x16xf32>
    %782 = arith.mulf %781, %779 : vector<1x16x16xf32>
    %783 = arith.addf %765, %782 : vector<1x16x16xf32>
    %c40_234 = arith.constant 40 : index
    %784 = memref.load %arg3[%c40_234] : memref<144xf32, #tpu.memory_space<smem>>
    %785 = vector.broadcast %784 : f32 to vector<1x16x16xf32>
    %786 = arith.mulf %785, %779 : vector<1x16x16xf32>
    %787 = arith.addf %769, %786 : vector<1x16x16xf32>
    %c76_235 = arith.constant 76 : index
    %788 = memref.load %arg3[%c76_235] : memref<144xf32, #tpu.memory_space<smem>>
    %789 = vector.broadcast %788 : f32 to vector<1x16x16xf32>
    %790 = arith.mulf %789, %779 : vector<1x16x16xf32>
    %791 = arith.addf %773, %790 : vector<1x16x16xf32>
    %c112_236 = arith.constant 112 : index
    %792 = memref.load %arg3[%c112_236] : memref<144xf32, #tpu.memory_space<smem>>
    %793 = vector.broadcast %792 : f32 to vector<1x16x16xf32>
    %794 = arith.mulf %793, %779 : vector<1x16x16xf32>
    %795 = arith.addf %777, %794 : vector<1x16x16xf32>
    %c0_237 = arith.constant 0 : index
    %c0_238 = arith.constant 0 : index
    %c3_239 = arith.constant 3 : index
    %c6_240 = arith.constant 6 : index
    %796 = vector.load %arg8[%c0_237, %c0_238, %c3_239, %c6_240] : memref<1x4x22x22xf32, #tpu.memory_space<vmem>>, vector<1x1x16x16xf32>
    %797 = vector.shape_cast %796 : vector<1x1x16x16xf32> to vector<1x16x16xf32>
    %c5_241 = arith.constant 5 : index
    %798 = memref.load %arg3[%c5_241] : memref<144xf32, #tpu.memory_space<smem>>
    %799 = vector.broadcast %798 : f32 to vector<1x16x16xf32>
    %800 = arith.mulf %799, %797 : vector<1x16x16xf32>
    %801 = arith.addf %783, %800 : vector<1x16x16xf32>
    %c41_242 = arith.constant 41 : index
    %802 = memref.load %arg3[%c41_242] : memref<144xf32, #tpu.memory_space<smem>>
    %803 = vector.broadcast %802 : f32 to vector<1x16x16xf32>
    %804 = arith.mulf %803, %797 : vector<1x16x16xf32>
    %805 = arith.addf %787, %804 : vector<1x16x16xf32>
    %c77_243 = arith.constant 77 : index
    %806 = memref.load %arg3[%c77_243] : memref<144xf32, #tpu.memory_space<smem>>
    %807 = vector.broadcast %806 : f32 to vector<1x16x16xf32>
    %808 = arith.mulf %807, %797 : vector<1x16x16xf32>
    %809 = arith.addf %791, %808 : vector<1x16x16xf32>
    %c113_244 = arith.constant 113 : index
    %810 = memref.load %arg3[%c113_244] : memref<144xf32, #tpu.memory_space<smem>>
    %811 = vector.broadcast %810 : f32 to vector<1x16x16xf32>
    %812 = arith.mulf %811, %797 : vector<1x16x16xf32>
    %813 = arith.addf %795, %812 : vector<1x16x16xf32>
    %c0_245 = arith.constant 0 : index
    %c0_246 = arith.constant 0 : index
    %c6_247 = arith.constant 6 : index
    %c0_248 = arith.constant 0 : index
    %814 = vector.load %arg8[%c0_245, %c0_246, %c6_247, %c0_248] : memref<1x4x22x22xf32, #tpu.memory_space<vmem>>, vector<1x1x16x16xf32>
    %815 = vector.shape_cast %814 : vector<1x1x16x16xf32> to vector<1x16x16xf32>
    %c6_249 = arith.constant 6 : index
    %816 = memref.load %arg3[%c6_249] : memref<144xf32, #tpu.memory_space<smem>>
    %817 = vector.broadcast %816 : f32 to vector<1x16x16xf32>
    %818 = arith.mulf %817, %815 : vector<1x16x16xf32>
    %819 = arith.addf %801, %818 : vector<1x16x16xf32>
    %c42_250 = arith.constant 42 : index
    %820 = memref.load %arg3[%c42_250] : memref<144xf32, #tpu.memory_space<smem>>
    %821 = vector.broadcast %820 : f32 to vector<1x16x16xf32>
    %822 = arith.mulf %821, %815 : vector<1x16x16xf32>
    %823 = arith.addf %805, %822 : vector<1x16x16xf32>
    %c78_251 = arith.constant 78 : index
    %824 = memref.load %arg3[%c78_251] : memref<144xf32, #tpu.memory_space<smem>>
    %825 = vector.broadcast %824 : f32 to vector<1x16x16xf32>
    %826 = arith.mulf %825, %815 : vector<1x16x16xf32>
    %827 = arith.addf %809, %826 : vector<1x16x16xf32>
    %c114_252 = arith.constant 114 : index
    %828 = memref.load %arg3[%c114_252] : memref<144xf32, #tpu.memory_space<smem>>
    %829 = vector.broadcast %828 : f32 to vector<1x16x16xf32>
    %830 = arith.mulf %829, %815 : vector<1x16x16xf32>
    %831 = arith.addf %813, %830 : vector<1x16x16xf32>
    %c0_253 = arith.constant 0 : index
    %c0_254 = arith.constant 0 : index
    %c6_255 = arith.constant 6 : index
    %c3_256 = arith.constant 3 : index
    %832 = vector.load %arg8[%c0_253, %c0_254, %c6_255, %c3_256] : memref<1x4x22x22xf32, #tpu.memory_space<vmem>>, vector<1x1x16x16xf32>
    %833 = vector.shape_cast %832 : vector<1x1x16x16xf32> to vector<1x16x16xf32>
    %c7_257 = arith.constant 7 : index
    %834 = memref.load %arg3[%c7_257] : memref<144xf32, #tpu.memory_space<smem>>
    %835 = vector.broadcast %834 : f32 to vector<1x16x16xf32>
    %836 = arith.mulf %835, %833 : vector<1x16x16xf32>
    %837 = arith.addf %819, %836 : vector<1x16x16xf32>
    %c43_258 = arith.constant 43 : index
    %838 = memref.load %arg3[%c43_258] : memref<144xf32, #tpu.memory_space<smem>>
    %839 = vector.broadcast %838 : f32 to vector<1x16x16xf32>
    %840 = arith.mulf %839, %833 : vector<1x16x16xf32>
    %841 = arith.addf %823, %840 : vector<1x16x16xf32>
    %c79_259 = arith.constant 79 : index
    %842 = memref.load %arg3[%c79_259] : memref<144xf32, #tpu.memory_space<smem>>
    %843 = vector.broadcast %842 : f32 to vector<1x16x16xf32>
    %844 = arith.mulf %843, %833 : vector<1x16x16xf32>
    %845 = arith.addf %827, %844 : vector<1x16x16xf32>
    %c115_260 = arith.constant 115 : index
    %846 = memref.load %arg3[%c115_260] : memref<144xf32, #tpu.memory_space<smem>>
    %847 = vector.broadcast %846 : f32 to vector<1x16x16xf32>
    %848 = arith.mulf %847, %833 : vector<1x16x16xf32>
    %849 = arith.addf %831, %848 : vector<1x16x16xf32>
    %c0_261 = arith.constant 0 : index
    %c0_262 = arith.constant 0 : index
    %c6_263 = arith.constant 6 : index
    %c6_264 = arith.constant 6 : index
    %850 = vector.load %arg8[%c0_261, %c0_262, %c6_263, %c6_264] : memref<1x4x22x22xf32, #tpu.memory_space<vmem>>, vector<1x1x16x16xf32>
    %851 = vector.shape_cast %850 : vector<1x1x16x16xf32> to vector<1x16x16xf32>
    %c8_265 = arith.constant 8 : index
    %852 = memref.load %arg3[%c8_265] : memref<144xf32, #tpu.memory_space<smem>>
    %853 = vector.broadcast %852 : f32 to vector<1x16x16xf32>
    %854 = arith.mulf %853, %851 : vector<1x16x16xf32>
    %855 = arith.addf %837, %854 : vector<1x16x16xf32>
    %c44_266 = arith.constant 44 : index
    %856 = memref.load %arg3[%c44_266] : memref<144xf32, #tpu.memory_space<smem>>
    %857 = vector.broadcast %856 : f32 to vector<1x16x16xf32>
    %858 = arith.mulf %857, %851 : vector<1x16x16xf32>
    %859 = arith.addf %841, %858 : vector<1x16x16xf32>
    %c80_267 = arith.constant 80 : index
    %860 = memref.load %arg3[%c80_267] : memref<144xf32, #tpu.memory_space<smem>>
    %861 = vector.broadcast %860 : f32 to vector<1x16x16xf32>
    %862 = arith.mulf %861, %851 : vector<1x16x16xf32>
    %863 = arith.addf %845, %862 : vector<1x16x16xf32>
    %c116_268 = arith.constant 116 : index
    %864 = memref.load %arg3[%c116_268] : memref<144xf32, #tpu.memory_space<smem>>
    %865 = vector.broadcast %864 : f32 to vector<1x16x16xf32>
    %866 = arith.mulf %865, %851 : vector<1x16x16xf32>
    %867 = arith.addf %849, %866 : vector<1x16x16xf32>
    %c0_269 = arith.constant 0 : index
    %c1_270 = arith.constant 1 : index
    %c0_271 = arith.constant 0 : index
    %c0_272 = arith.constant 0 : index
    %868 = vector.load %arg8[%c0_269, %c1_270, %c0_271, %c0_272] : memref<1x4x22x22xf32, #tpu.memory_space<vmem>>, vector<1x1x16x16xf32>
    %869 = vector.shape_cast %868 : vector<1x1x16x16xf32> to vector<1x16x16xf32>
    %c9_273 = arith.constant 9 : index
    %870 = memref.load %arg3[%c9_273] : memref<144xf32, #tpu.memory_space<smem>>
    %871 = vector.broadcast %870 : f32 to vector<1x16x16xf32>
    %872 = arith.mulf %871, %869 : vector<1x16x16xf32>
    %873 = arith.addf %855, %872 : vector<1x16x16xf32>
    %c45_274 = arith.constant 45 : index
    %874 = memref.load %arg3[%c45_274] : memref<144xf32, #tpu.memory_space<smem>>
    %875 = vector.broadcast %874 : f32 to vector<1x16x16xf32>
    %876 = arith.mulf %875, %869 : vector<1x16x16xf32>
    %877 = arith.addf %859, %876 : vector<1x16x16xf32>
    %c81_275 = arith.constant 81 : index
    %878 = memref.load %arg3[%c81_275] : memref<144xf32, #tpu.memory_space<smem>>
    %879 = vector.broadcast %878 : f32 to vector<1x16x16xf32>
    %880 = arith.mulf %879, %869 : vector<1x16x16xf32>
    %881 = arith.addf %863, %880 : vector<1x16x16xf32>
    %c117_276 = arith.constant 117 : index
    %882 = memref.load %arg3[%c117_276] : memref<144xf32, #tpu.memory_space<smem>>
    %883 = vector.broadcast %882 : f32 to vector<1x16x16xf32>
    %884 = arith.mulf %883, %869 : vector<1x16x16xf32>
    %885 = arith.addf %867, %884 : vector<1x16x16xf32>
    %c0_277 = arith.constant 0 : index
    %c1_278 = arith.constant 1 : index
    %c0_279 = arith.constant 0 : index
    %c3_280 = arith.constant 3 : index
    %886 = vector.load %arg8[%c0_277, %c1_278, %c0_279, %c3_280] : memref<1x4x22x22xf32, #tpu.memory_space<vmem>>, vector<1x1x16x16xf32>
    %887 = vector.shape_cast %886 : vector<1x1x16x16xf32> to vector<1x16x16xf32>
    %c10_281 = arith.constant 10 : index
    %888 = memref.load %arg3[%c10_281] : memref<144xf32, #tpu.memory_space<smem>>
    %889 = vector.broadcast %888 : f32 to vector<1x16x16xf32>
    %890 = arith.mulf %889, %887 : vector<1x16x16xf32>
    %891 = arith.addf %873, %890 : vector<1x16x16xf32>
    %c46_282 = arith.constant 46 : index
    %892 = memref.load %arg3[%c46_282] : memref<144xf32, #tpu.memory_space<smem>>
    %893 = vector.broadcast %892 : f32 to vector<1x16x16xf32>
    %894 = arith.mulf %893, %887 : vector<1x16x16xf32>
    %895 = arith.addf %877, %894 : vector<1x16x16xf32>
    %c82_283 = arith.constant 82 : index
    %896 = memref.load %arg3[%c82_283] : memref<144xf32, #tpu.memory_space<smem>>
    %897 = vector.broadcast %896 : f32 to vector<1x16x16xf32>
    %898 = arith.mulf %897, %887 : vector<1x16x16xf32>
    %899 = arith.addf %881, %898 : vector<1x16x16xf32>
    %c118_284 = arith.constant 118 : index
    %900 = memref.load %arg3[%c118_284] : memref<144xf32, #tpu.memory_space<smem>>
    %901 = vector.broadcast %900 : f32 to vector<1x16x16xf32>
    %902 = arith.mulf %901, %887 : vector<1x16x16xf32>
    %903 = arith.addf %885, %902 : vector<1x16x16xf32>
    %c0_285 = arith.constant 0 : index
    %c1_286 = arith.constant 1 : index
    %c0_287 = arith.constant 0 : index
    %c6_288 = arith.constant 6 : index
    %904 = vector.load %arg8[%c0_285, %c1_286, %c0_287, %c6_288] : memref<1x4x22x22xf32, #tpu.memory_space<vmem>>, vector<1x1x16x16xf32>
    %905 = vector.shape_cast %904 : vector<1x1x16x16xf32> to vector<1x16x16xf32>
    %c11_289 = arith.constant 11 : index
    %906 = memref.load %arg3[%c11_289] : memref<144xf32, #tpu.memory_space<smem>>
    %907 = vector.broadcast %906 : f32 to vector<1x16x16xf32>
    %908 = arith.mulf %907, %905 : vector<1x16x16xf32>
    %909 = arith.addf %891, %908 : vector<1x16x16xf32>
    %c47_290 = arith.constant 47 : index
    %910 = memref.load %arg3[%c47_290] : memref<144xf32, #tpu.memory_space<smem>>
    %911 = vector.broadcast %910 : f32 to vector<1x16x16xf32>
    %912 = arith.mulf %911, %905 : vector<1x16x16xf32>
    %913 = arith.addf %895, %912 : vector<1x16x16xf32>
    %c83_291 = arith.constant 83 : index
    %914 = memref.load %arg3[%c83_291] : memref<144xf32, #tpu.memory_space<smem>>
    %915 = vector.broadcast %914 : f32 to vector<1x16x16xf32>
    %916 = arith.mulf %915, %905 : vector<1x16x16xf32>
    %917 = arith.addf %899, %916 : vector<1x16x16xf32>
    %c119_292 = arith.constant 119 : index
    %918 = memref.load %arg3[%c119_292] : memref<144xf32, #tpu.memory_space<smem>>
    %919 = vector.broadcast %918 : f32 to vector<1x16x16xf32>
    %920 = arith.mulf %919, %905 : vector<1x16x16xf32>
    %921 = arith.addf %903, %920 : vector<1x16x16xf32>
    %c0_293 = arith.constant 0 : index
    %c1_294 = arith.constant 1 : index
    %c3_295 = arith.constant 3 : index
    %c0_296 = arith.constant 0 : index
    %922 = vector.load %arg8[%c0_293, %c1_294, %c3_295, %c0_296] : memref<1x4x22x22xf32, #tpu.memory_space<vmem>>, vector<1x1x16x16xf32>
    %923 = vector.shape_cast %922 : vector<1x1x16x16xf32> to vector<1x16x16xf32>
    %c12_297 = arith.constant 12 : index
    %924 = memref.load %arg3[%c12_297] : memref<144xf32, #tpu.memory_space<smem>>
    %925 = vector.broadcast %924 : f32 to vector<1x16x16xf32>
    %926 = arith.mulf %925, %923 : vector<1x16x16xf32>
    %927 = arith.addf %909, %926 : vector<1x16x16xf32>
    %c48_298 = arith.constant 48 : index
    %928 = memref.load %arg3[%c48_298] : memref<144xf32, #tpu.memory_space<smem>>
    %929 = vector.broadcast %928 : f32 to vector<1x16x16xf32>
    %930 = arith.mulf %929, %923 : vector<1x16x16xf32>
    %931 = arith.addf %913, %930 : vector<1x16x16xf32>
    %c84_299 = arith.constant 84 : index
    %932 = memref.load %arg3[%c84_299] : memref<144xf32, #tpu.memory_space<smem>>
    %933 = vector.broadcast %932 : f32 to vector<1x16x16xf32>
    %934 = arith.mulf %933, %923 : vector<1x16x16xf32>
    %935 = arith.addf %917, %934 : vector<1x16x16xf32>
    %c120_300 = arith.constant 120 : index
    %936 = memref.load %arg3[%c120_300] : memref<144xf32, #tpu.memory_space<smem>>
    %937 = vector.broadcast %936 : f32 to vector<1x16x16xf32>
    %938 = arith.mulf %937, %923 : vector<1x16x16xf32>
    %939 = arith.addf %921, %938 : vector<1x16x16xf32>
    %c0_301 = arith.constant 0 : index
    %c1_302 = arith.constant 1 : index
    %c3_303 = arith.constant 3 : index
    %c3_304 = arith.constant 3 : index
    %940 = vector.load %arg8[%c0_301, %c1_302, %c3_303, %c3_304] : memref<1x4x22x22xf32, #tpu.memory_space<vmem>>, vector<1x1x16x16xf32>
    %941 = vector.shape_cast %940 : vector<1x1x16x16xf32> to vector<1x16x16xf32>
    %c13_305 = arith.constant 13 : index
    %942 = memref.load %arg3[%c13_305] : memref<144xf32, #tpu.memory_space<smem>>
    %943 = vector.broadcast %942 : f32 to vector<1x16x16xf32>
    %944 = arith.mulf %943, %941 : vector<1x16x16xf32>
    %945 = arith.addf %927, %944 : vector<1x16x16xf32>
    %c49_306 = arith.constant 49 : index
    %946 = memref.load %arg3[%c49_306] : memref<144xf32, #tpu.memory_space<smem>>
    %947 = vector.broadcast %946 : f32 to vector<1x16x16xf32>
    %948 = arith.mulf %947, %941 : vector<1x16x16xf32>
    %949 = arith.addf %931, %948 : vector<1x16x16xf32>
    %c85_307 = arith.constant 85 : index
    %950 = memref.load %arg3[%c85_307] : memref<144xf32, #tpu.memory_space<smem>>
    %951 = vector.broadcast %950 : f32 to vector<1x16x16xf32>
    %952 = arith.mulf %951, %941 : vector<1x16x16xf32>
    %953 = arith.addf %935, %952 : vector<1x16x16xf32>
    %c121_308 = arith.constant 121 : index
    %954 = memref.load %arg3[%c121_308] : memref<144xf32, #tpu.memory_space<smem>>
    %955 = vector.broadcast %954 : f32 to vector<1x16x16xf32>
    %956 = arith.mulf %955, %941 : vector<1x16x16xf32>
    %957 = arith.addf %939, %956 : vector<1x16x16xf32>
    %c0_309 = arith.constant 0 : index
    %c1_310 = arith.constant 1 : index
    %c3_311 = arith.constant 3 : index
    %c6_312 = arith.constant 6 : index
    %958 = vector.load %arg8[%c0_309, %c1_310, %c3_311, %c6_312] : memref<1x4x22x22xf32, #tpu.memory_space<vmem>>, vector<1x1x16x16xf32>
    %959 = vector.shape_cast %958 : vector<1x1x16x16xf32> to vector<1x16x16xf32>
    %c14_313 = arith.constant 14 : index
    %960 = memref.load %arg3[%c14_313] : memref<144xf32, #tpu.memory_space<smem>>
    %961 = vector.broadcast %960 : f32 to vector<1x16x16xf32>
    %962 = arith.mulf %961, %959 : vector<1x16x16xf32>
    %963 = arith.addf %945, %962 : vector<1x16x16xf32>
    %c50_314 = arith.constant 50 : index
    %964 = memref.load %arg3[%c50_314] : memref<144xf32, #tpu.memory_space<smem>>
    %965 = vector.broadcast %964 : f32 to vector<1x16x16xf32>
    %966 = arith.mulf %965, %959 : vector<1x16x16xf32>
    %967 = arith.addf %949, %966 : vector<1x16x16xf32>
    %c86_315 = arith.constant 86 : index
    %968 = memref.load %arg3[%c86_315] : memref<144xf32, #tpu.memory_space<smem>>
    %969 = vector.broadcast %968 : f32 to vector<1x16x16xf32>
    %970 = arith.mulf %969, %959 : vector<1x16x16xf32>
    %971 = arith.addf %953, %970 : vector<1x16x16xf32>
    %c122_316 = arith.constant 122 : index
    %972 = memref.load %arg3[%c122_316] : memref<144xf32, #tpu.memory_space<smem>>
    %973 = vector.broadcast %972 : f32 to vector<1x16x16xf32>
    %974 = arith.mulf %973, %959 : vector<1x16x16xf32>
    %975 = arith.addf %957, %974 : vector<1x16x16xf32>
    %c0_317 = arith.constant 0 : index
    %c1_318 = arith.constant 1 : index
    %c6_319 = arith.constant 6 : index
    %c0_320 = arith.constant 0 : index
    %976 = vector.load %arg8[%c0_317, %c1_318, %c6_319, %c0_320] : memref<1x4x22x22xf32, #tpu.memory_space<vmem>>, vector<1x1x16x16xf32>
    %977 = vector.shape_cast %976 : vector<1x1x16x16xf32> to vector<1x16x16xf32>
    %c15_321 = arith.constant 15 : index
    %978 = memref.load %arg3[%c15_321] : memref<144xf32, #tpu.memory_space<smem>>
    %979 = vector.broadcast %978 : f32 to vector<1x16x16xf32>
    %980 = arith.mulf %979, %977 : vector<1x16x16xf32>
    %981 = arith.addf %963, %980 : vector<1x16x16xf32>
    %c51_322 = arith.constant 51 : index
    %982 = memref.load %arg3[%c51_322] : memref<144xf32, #tpu.memory_space<smem>>
    %983 = vector.broadcast %982 : f32 to vector<1x16x16xf32>
    %984 = arith.mulf %983, %977 : vector<1x16x16xf32>
    %985 = arith.addf %967, %984 : vector<1x16x16xf32>
    %c87_323 = arith.constant 87 : index
    %986 = memref.load %arg3[%c87_323] : memref<144xf32, #tpu.memory_space<smem>>
    %987 = vector.broadcast %986 : f32 to vector<1x16x16xf32>
    %988 = arith.mulf %987, %977 : vector<1x16x16xf32>
    %989 = arith.addf %971, %988 : vector<1x16x16xf32>
    %c123_324 = arith.constant 123 : index
    %990 = memref.load %arg3[%c123_324] : memref<144xf32, #tpu.memory_space<smem>>
    %991 = vector.broadcast %990 : f32 to vector<1x16x16xf32>
    %992 = arith.mulf %991, %977 : vector<1x16x16xf32>
    %993 = arith.addf %975, %992 : vector<1x16x16xf32>
    %c0_325 = arith.constant 0 : index
    %c1_326 = arith.constant 1 : index
    %c6_327 = arith.constant 6 : index
    %c3_328 = arith.constant 3 : index
    %994 = vector.load %arg8[%c0_325, %c1_326, %c6_327, %c3_328] : memref<1x4x22x22xf32, #tpu.memory_space<vmem>>, vector<1x1x16x16xf32>
    %995 = vector.shape_cast %994 : vector<1x1x16x16xf32> to vector<1x16x16xf32>
    %c16_329 = arith.constant 16 : index
    %996 = memref.load %arg3[%c16_329] : memref<144xf32, #tpu.memory_space<smem>>
    %997 = vector.broadcast %996 : f32 to vector<1x16x16xf32>
    %998 = arith.mulf %997, %995 : vector<1x16x16xf32>
    %999 = arith.addf %981, %998 : vector<1x16x16xf32>
    %c52_330 = arith.constant 52 : index
    %1000 = memref.load %arg3[%c52_330] : memref<144xf32, #tpu.memory_space<smem>>
    %1001 = vector.broadcast %1000 : f32 to vector<1x16x16xf32>
    %1002 = arith.mulf %1001, %995 : vector<1x16x16xf32>
    %1003 = arith.addf %985, %1002 : vector<1x16x16xf32>
    %c88_331 = arith.constant 88 : index
    %1004 = memref.load %arg3[%c88_331] : memref<144xf32, #tpu.memory_space<smem>>
    %1005 = vector.broadcast %1004 : f32 to vector<1x16x16xf32>
    %1006 = arith.mulf %1005, %995 : vector<1x16x16xf32>
    %1007 = arith.addf %989, %1006 : vector<1x16x16xf32>
    %c124_332 = arith.constant 124 : index
    %1008 = memref.load %arg3[%c124_332] : memref<144xf32, #tpu.memory_space<smem>>
    %1009 = vector.broadcast %1008 : f32 to vector<1x16x16xf32>
    %1010 = arith.mulf %1009, %995 : vector<1x16x16xf32>
    %1011 = arith.addf %993, %1010 : vector<1x16x16xf32>
    %c0_333 = arith.constant 0 : index
    %c1_334 = arith.constant 1 : index
    %c6_335 = arith.constant 6 : index
    %c6_336 = arith.constant 6 : index
    %1012 = vector.load %arg8[%c0_333, %c1_334, %c6_335, %c6_336] : memref<1x4x22x22xf32, #tpu.memory_space<vmem>>, vector<1x1x16x16xf32>
    %1013 = vector.shape_cast %1012 : vector<1x1x16x16xf32> to vector<1x16x16xf32>
    %c17_337 = arith.constant 17 : index
    %1014 = memref.load %arg3[%c17_337] : memref<144xf32, #tpu.memory_space<smem>>
    %1015 = vector.broadcast %1014 : f32 to vector<1x16x16xf32>
    %1016 = arith.mulf %1015, %1013 : vector<1x16x16xf32>
    %1017 = arith.addf %999, %1016 : vector<1x16x16xf32>
    %c53_338 = arith.constant 53 : index
    %1018 = memref.load %arg3[%c53_338] : memref<144xf32, #tpu.memory_space<smem>>
    %1019 = vector.broadcast %1018 : f32 to vector<1x16x16xf32>
    %1020 = arith.mulf %1019, %1013 : vector<1x16x16xf32>
    %1021 = arith.addf %1003, %1020 : vector<1x16x16xf32>
    %c89_339 = arith.constant 89 : index
    %1022 = memref.load %arg3[%c89_339] : memref<144xf32, #tpu.memory_space<smem>>
    %1023 = vector.broadcast %1022 : f32 to vector<1x16x16xf32>
    %1024 = arith.mulf %1023, %1013 : vector<1x16x16xf32>
    %1025 = arith.addf %1007, %1024 : vector<1x16x16xf32>
    %c125_340 = arith.constant 125 : index
    %1026 = memref.load %arg3[%c125_340] : memref<144xf32, #tpu.memory_space<smem>>
    %1027 = vector.broadcast %1026 : f32 to vector<1x16x16xf32>
    %1028 = arith.mulf %1027, %1013 : vector<1x16x16xf32>
    %1029 = arith.addf %1011, %1028 : vector<1x16x16xf32>
    %c0_341 = arith.constant 0 : index
    %c2_342 = arith.constant 2 : index
    %c0_343 = arith.constant 0 : index
    %c0_344 = arith.constant 0 : index
    %1030 = vector.load %arg8[%c0_341, %c2_342, %c0_343, %c0_344] : memref<1x4x22x22xf32, #tpu.memory_space<vmem>>, vector<1x1x16x16xf32>
    %1031 = vector.shape_cast %1030 : vector<1x1x16x16xf32> to vector<1x16x16xf32>
    %c18_345 = arith.constant 18 : index
    %1032 = memref.load %arg3[%c18_345] : memref<144xf32, #tpu.memory_space<smem>>
    %1033 = vector.broadcast %1032 : f32 to vector<1x16x16xf32>
    %1034 = arith.mulf %1033, %1031 : vector<1x16x16xf32>
    %1035 = arith.addf %1017, %1034 : vector<1x16x16xf32>
    %c54_346 = arith.constant 54 : index
    %1036 = memref.load %arg3[%c54_346] : memref<144xf32, #tpu.memory_space<smem>>
    %1037 = vector.broadcast %1036 : f32 to vector<1x16x16xf32>
    %1038 = arith.mulf %1037, %1031 : vector<1x16x16xf32>
    %1039 = arith.addf %1021, %1038 : vector<1x16x16xf32>
    %c90_347 = arith.constant 90 : index
    %1040 = memref.load %arg3[%c90_347] : memref<144xf32, #tpu.memory_space<smem>>
    %1041 = vector.broadcast %1040 : f32 to vector<1x16x16xf32>
    %1042 = arith.mulf %1041, %1031 : vector<1x16x16xf32>
    %1043 = arith.addf %1025, %1042 : vector<1x16x16xf32>
    %c126_348 = arith.constant 126 : index
    %1044 = memref.load %arg3[%c126_348] : memref<144xf32, #tpu.memory_space<smem>>
    %1045 = vector.broadcast %1044 : f32 to vector<1x16x16xf32>
    %1046 = arith.mulf %1045, %1031 : vector<1x16x16xf32>
    %1047 = arith.addf %1029, %1046 : vector<1x16x16xf32>
    %c0_349 = arith.constant 0 : index
    %c2_350 = arith.constant 2 : index
    %c0_351 = arith.constant 0 : index
    %c3_352 = arith.constant 3 : index
    %1048 = vector.load %arg8[%c0_349, %c2_350, %c0_351, %c3_352] : memref<1x4x22x22xf32, #tpu.memory_space<vmem>>, vector<1x1x16x16xf32>
    %1049 = vector.shape_cast %1048 : vector<1x1x16x16xf32> to vector<1x16x16xf32>
    %c19_353 = arith.constant 19 : index
    %1050 = memref.load %arg3[%c19_353] : memref<144xf32, #tpu.memory_space<smem>>
    %1051 = vector.broadcast %1050 : f32 to vector<1x16x16xf32>
    %1052 = arith.mulf %1051, %1049 : vector<1x16x16xf32>
    %1053 = arith.addf %1035, %1052 : vector<1x16x16xf32>
    %c55_354 = arith.constant 55 : index
    %1054 = memref.load %arg3[%c55_354] : memref<144xf32, #tpu.memory_space<smem>>
    %1055 = vector.broadcast %1054 : f32 to vector<1x16x16xf32>
    %1056 = arith.mulf %1055, %1049 : vector<1x16x16xf32>
    %1057 = arith.addf %1039, %1056 : vector<1x16x16xf32>
    %c91_355 = arith.constant 91 : index
    %1058 = memref.load %arg3[%c91_355] : memref<144xf32, #tpu.memory_space<smem>>
    %1059 = vector.broadcast %1058 : f32 to vector<1x16x16xf32>
    %1060 = arith.mulf %1059, %1049 : vector<1x16x16xf32>
    %1061 = arith.addf %1043, %1060 : vector<1x16x16xf32>
    %c127_356 = arith.constant 127 : index
    %1062 = memref.load %arg3[%c127_356] : memref<144xf32, #tpu.memory_space<smem>>
    %1063 = vector.broadcast %1062 : f32 to vector<1x16x16xf32>
    %1064 = arith.mulf %1063, %1049 : vector<1x16x16xf32>
    %1065 = arith.addf %1047, %1064 : vector<1x16x16xf32>
    %c0_357 = arith.constant 0 : index
    %c2_358 = arith.constant 2 : index
    %c0_359 = arith.constant 0 : index
    %c6_360 = arith.constant 6 : index
    %1066 = vector.load %arg8[%c0_357, %c2_358, %c0_359, %c6_360] : memref<1x4x22x22xf32, #tpu.memory_space<vmem>>, vector<1x1x16x16xf32>
    %1067 = vector.shape_cast %1066 : vector<1x1x16x16xf32> to vector<1x16x16xf32>
    %c20_361 = arith.constant 20 : index
    %1068 = memref.load %arg3[%c20_361] : memref<144xf32, #tpu.memory_space<smem>>
    %1069 = vector.broadcast %1068 : f32 to vector<1x16x16xf32>
    %1070 = arith.mulf %1069, %1067 : vector<1x16x16xf32>
    %1071 = arith.addf %1053, %1070 : vector<1x16x16xf32>
    %c56_362 = arith.constant 56 : index
    %1072 = memref.load %arg3[%c56_362] : memref<144xf32, #tpu.memory_space<smem>>
    %1073 = vector.broadcast %1072 : f32 to vector<1x16x16xf32>
    %1074 = arith.mulf %1073, %1067 : vector<1x16x16xf32>
    %1075 = arith.addf %1057, %1074 : vector<1x16x16xf32>
    %c92_363 = arith.constant 92 : index
    %1076 = memref.load %arg3[%c92_363] : memref<144xf32, #tpu.memory_space<smem>>
    %1077 = vector.broadcast %1076 : f32 to vector<1x16x16xf32>
    %1078 = arith.mulf %1077, %1067 : vector<1x16x16xf32>
    %1079 = arith.addf %1061, %1078 : vector<1x16x16xf32>
    %c128_364 = arith.constant 128 : index
    %1080 = memref.load %arg3[%c128_364] : memref<144xf32, #tpu.memory_space<smem>>
    %1081 = vector.broadcast %1080 : f32 to vector<1x16x16xf32>
    %1082 = arith.mulf %1081, %1067 : vector<1x16x16xf32>
    %1083 = arith.addf %1065, %1082 : vector<1x16x16xf32>
    %c0_365 = arith.constant 0 : index
    %c2_366 = arith.constant 2 : index
    %c3_367 = arith.constant 3 : index
    %c0_368 = arith.constant 0 : index
    %1084 = vector.load %arg8[%c0_365, %c2_366, %c3_367, %c0_368] : memref<1x4x22x22xf32, #tpu.memory_space<vmem>>, vector<1x1x16x16xf32>
    %1085 = vector.shape_cast %1084 : vector<1x1x16x16xf32> to vector<1x16x16xf32>
    %c21_369 = arith.constant 21 : index
    %1086 = memref.load %arg3[%c21_369] : memref<144xf32, #tpu.memory_space<smem>>
    %1087 = vector.broadcast %1086 : f32 to vector<1x16x16xf32>
    %1088 = arith.mulf %1087, %1085 : vector<1x16x16xf32>
    %1089 = arith.addf %1071, %1088 : vector<1x16x16xf32>
    %c57_370 = arith.constant 57 : index
    %1090 = memref.load %arg3[%c57_370] : memref<144xf32, #tpu.memory_space<smem>>
    %1091 = vector.broadcast %1090 : f32 to vector<1x16x16xf32>
    %1092 = arith.mulf %1091, %1085 : vector<1x16x16xf32>
    %1093 = arith.addf %1075, %1092 : vector<1x16x16xf32>
    %c93_371 = arith.constant 93 : index
    %1094 = memref.load %arg3[%c93_371] : memref<144xf32, #tpu.memory_space<smem>>
    %1095 = vector.broadcast %1094 : f32 to vector<1x16x16xf32>
    %1096 = arith.mulf %1095, %1085 : vector<1x16x16xf32>
    %1097 = arith.addf %1079, %1096 : vector<1x16x16xf32>
    %c129_372 = arith.constant 129 : index
    %1098 = memref.load %arg3[%c129_372] : memref<144xf32, #tpu.memory_space<smem>>
    %1099 = vector.broadcast %1098 : f32 to vector<1x16x16xf32>
    %1100 = arith.mulf %1099, %1085 : vector<1x16x16xf32>
    %1101 = arith.addf %1083, %1100 : vector<1x16x16xf32>
    %c0_373 = arith.constant 0 : index
    %c2_374 = arith.constant 2 : index
    %c3_375 = arith.constant 3 : index
    %c3_376 = arith.constant 3 : index
    %1102 = vector.load %arg8[%c0_373, %c2_374, %c3_375, %c3_376] : memref<1x4x22x22xf32, #tpu.memory_space<vmem>>, vector<1x1x16x16xf32>
    %1103 = vector.shape_cast %1102 : vector<1x1x16x16xf32> to vector<1x16x16xf32>
    %c22_377 = arith.constant 22 : index
    %1104 = memref.load %arg3[%c22_377] : memref<144xf32, #tpu.memory_space<smem>>
    %1105 = vector.broadcast %1104 : f32 to vector<1x16x16xf32>
    %1106 = arith.mulf %1105, %1103 : vector<1x16x16xf32>
    %1107 = arith.addf %1089, %1106 : vector<1x16x16xf32>
    %c58_378 = arith.constant 58 : index
    %1108 = memref.load %arg3[%c58_378] : memref<144xf32, #tpu.memory_space<smem>>
    %1109 = vector.broadcast %1108 : f32 to vector<1x16x16xf32>
    %1110 = arith.mulf %1109, %1103 : vector<1x16x16xf32>
    %1111 = arith.addf %1093, %1110 : vector<1x16x16xf32>
    %c94_379 = arith.constant 94 : index
    %1112 = memref.load %arg3[%c94_379] : memref<144xf32, #tpu.memory_space<smem>>
    %1113 = vector.broadcast %1112 : f32 to vector<1x16x16xf32>
    %1114 = arith.mulf %1113, %1103 : vector<1x16x16xf32>
    %1115 = arith.addf %1097, %1114 : vector<1x16x16xf32>
    %c130_380 = arith.constant 130 : index
    %1116 = memref.load %arg3[%c130_380] : memref<144xf32, #tpu.memory_space<smem>>
    %1117 = vector.broadcast %1116 : f32 to vector<1x16x16xf32>
    %1118 = arith.mulf %1117, %1103 : vector<1x16x16xf32>
    %1119 = arith.addf %1101, %1118 : vector<1x16x16xf32>
    %c0_381 = arith.constant 0 : index
    %c2_382 = arith.constant 2 : index
    %c3_383 = arith.constant 3 : index
    %c6_384 = arith.constant 6 : index
    %1120 = vector.load %arg8[%c0_381, %c2_382, %c3_383, %c6_384] : memref<1x4x22x22xf32, #tpu.memory_space<vmem>>, vector<1x1x16x16xf32>
    %1121 = vector.shape_cast %1120 : vector<1x1x16x16xf32> to vector<1x16x16xf32>
    %c23_385 = arith.constant 23 : index
    %1122 = memref.load %arg3[%c23_385] : memref<144xf32, #tpu.memory_space<smem>>
    %1123 = vector.broadcast %1122 : f32 to vector<1x16x16xf32>
    %1124 = arith.mulf %1123, %1121 : vector<1x16x16xf32>
    %1125 = arith.addf %1107, %1124 : vector<1x16x16xf32>
    %c59_386 = arith.constant 59 : index
    %1126 = memref.load %arg3[%c59_386] : memref<144xf32, #tpu.memory_space<smem>>
    %1127 = vector.broadcast %1126 : f32 to vector<1x16x16xf32>
    %1128 = arith.mulf %1127, %1121 : vector<1x16x16xf32>
    %1129 = arith.addf %1111, %1128 : vector<1x16x16xf32>
    %c95_387 = arith.constant 95 : index
    %1130 = memref.load %arg3[%c95_387] : memref<144xf32, #tpu.memory_space<smem>>
    %1131 = vector.broadcast %1130 : f32 to vector<1x16x16xf32>
    %1132 = arith.mulf %1131, %1121 : vector<1x16x16xf32>
    %1133 = arith.addf %1115, %1132 : vector<1x16x16xf32>
    %c131_388 = arith.constant 131 : index
    %1134 = memref.load %arg3[%c131_388] : memref<144xf32, #tpu.memory_space<smem>>
    %1135 = vector.broadcast %1134 : f32 to vector<1x16x16xf32>
    %1136 = arith.mulf %1135, %1121 : vector<1x16x16xf32>
    %1137 = arith.addf %1119, %1136 : vector<1x16x16xf32>
    %c0_389 = arith.constant 0 : index
    %c2_390 = arith.constant 2 : index
    %c6_391 = arith.constant 6 : index
    %c0_392 = arith.constant 0 : index
    %1138 = vector.load %arg8[%c0_389, %c2_390, %c6_391, %c0_392] : memref<1x4x22x22xf32, #tpu.memory_space<vmem>>, vector<1x1x16x16xf32>
    %1139 = vector.shape_cast %1138 : vector<1x1x16x16xf32> to vector<1x16x16xf32>
    %c24_393 = arith.constant 24 : index
    %1140 = memref.load %arg3[%c24_393] : memref<144xf32, #tpu.memory_space<smem>>
    %1141 = vector.broadcast %1140 : f32 to vector<1x16x16xf32>
    %1142 = arith.mulf %1141, %1139 : vector<1x16x16xf32>
    %1143 = arith.addf %1125, %1142 : vector<1x16x16xf32>
    %c60_394 = arith.constant 60 : index
    %1144 = memref.load %arg3[%c60_394] : memref<144xf32, #tpu.memory_space<smem>>
    %1145 = vector.broadcast %1144 : f32 to vector<1x16x16xf32>
    %1146 = arith.mulf %1145, %1139 : vector<1x16x16xf32>
    %1147 = arith.addf %1129, %1146 : vector<1x16x16xf32>
    %c96_395 = arith.constant 96 : index
    %1148 = memref.load %arg3[%c96_395] : memref<144xf32, #tpu.memory_space<smem>>
    %1149 = vector.broadcast %1148 : f32 to vector<1x16x16xf32>
    %1150 = arith.mulf %1149, %1139 : vector<1x16x16xf32>
    %1151 = arith.addf %1133, %1150 : vector<1x16x16xf32>
    %c132_396 = arith.constant 132 : index
    %1152 = memref.load %arg3[%c132_396] : memref<144xf32, #tpu.memory_space<smem>>
    %1153 = vector.broadcast %1152 : f32 to vector<1x16x16xf32>
    %1154 = arith.mulf %1153, %1139 : vector<1x16x16xf32>
    %1155 = arith.addf %1137, %1154 : vector<1x16x16xf32>
    %c0_397 = arith.constant 0 : index
    %c2_398 = arith.constant 2 : index
    %c6_399 = arith.constant 6 : index
    %c3_400 = arith.constant 3 : index
    %1156 = vector.load %arg8[%c0_397, %c2_398, %c6_399, %c3_400] : memref<1x4x22x22xf32, #tpu.memory_space<vmem>>, vector<1x1x16x16xf32>
    %1157 = vector.shape_cast %1156 : vector<1x1x16x16xf32> to vector<1x16x16xf32>
    %c25_401 = arith.constant 25 : index
    %1158 = memref.load %arg3[%c25_401] : memref<144xf32, #tpu.memory_space<smem>>
    %1159 = vector.broadcast %1158 : f32 to vector<1x16x16xf32>
    %1160 = arith.mulf %1159, %1157 : vector<1x16x16xf32>
    %1161 = arith.addf %1143, %1160 : vector<1x16x16xf32>
    %c61_402 = arith.constant 61 : index
    %1162 = memref.load %arg3[%c61_402] : memref<144xf32, #tpu.memory_space<smem>>
    %1163 = vector.broadcast %1162 : f32 to vector<1x16x16xf32>
    %1164 = arith.mulf %1163, %1157 : vector<1x16x16xf32>
    %1165 = arith.addf %1147, %1164 : vector<1x16x16xf32>
    %c97_403 = arith.constant 97 : index
    %1166 = memref.load %arg3[%c97_403] : memref<144xf32, #tpu.memory_space<smem>>
    %1167 = vector.broadcast %1166 : f32 to vector<1x16x16xf32>
    %1168 = arith.mulf %1167, %1157 : vector<1x16x16xf32>
    %1169 = arith.addf %1151, %1168 : vector<1x16x16xf32>
    %c133_404 = arith.constant 133 : index
    %1170 = memref.load %arg3[%c133_404] : memref<144xf32, #tpu.memory_space<smem>>
    %1171 = vector.broadcast %1170 : f32 to vector<1x16x16xf32>
    %1172 = arith.mulf %1171, %1157 : vector<1x16x16xf32>
    %1173 = arith.addf %1155, %1172 : vector<1x16x16xf32>
    %c0_405 = arith.constant 0 : index
    %c2_406 = arith.constant 2 : index
    %c6_407 = arith.constant 6 : index
    %c6_408 = arith.constant 6 : index
    %1174 = vector.load %arg8[%c0_405, %c2_406, %c6_407, %c6_408] : memref<1x4x22x22xf32, #tpu.memory_space<vmem>>, vector<1x1x16x16xf32>
    %1175 = vector.shape_cast %1174 : vector<1x1x16x16xf32> to vector<1x16x16xf32>
    %c26_409 = arith.constant 26 : index
    %1176 = memref.load %arg3[%c26_409] : memref<144xf32, #tpu.memory_space<smem>>
    %1177 = vector.broadcast %1176 : f32 to vector<1x16x16xf32>
    %1178 = arith.mulf %1177, %1175 : vector<1x16x16xf32>
    %1179 = arith.addf %1161, %1178 : vector<1x16x16xf32>
    %c62_410 = arith.constant 62 : index
    %1180 = memref.load %arg3[%c62_410] : memref<144xf32, #tpu.memory_space<smem>>
    %1181 = vector.broadcast %1180 : f32 to vector<1x16x16xf32>
    %1182 = arith.mulf %1181, %1175 : vector<1x16x16xf32>
    %1183 = arith.addf %1165, %1182 : vector<1x16x16xf32>
    %c98_411 = arith.constant 98 : index
    %1184 = memref.load %arg3[%c98_411] : memref<144xf32, #tpu.memory_space<smem>>
    %1185 = vector.broadcast %1184 : f32 to vector<1x16x16xf32>
    %1186 = arith.mulf %1185, %1175 : vector<1x16x16xf32>
    %1187 = arith.addf %1169, %1186 : vector<1x16x16xf32>
    %c134_412 = arith.constant 134 : index
    %1188 = memref.load %arg3[%c134_412] : memref<144xf32, #tpu.memory_space<smem>>
    %1189 = vector.broadcast %1188 : f32 to vector<1x16x16xf32>
    %1190 = arith.mulf %1189, %1175 : vector<1x16x16xf32>
    %1191 = arith.addf %1173, %1190 : vector<1x16x16xf32>
    %c0_413 = arith.constant 0 : index
    %c3_414 = arith.constant 3 : index
    %c0_415 = arith.constant 0 : index
    %c0_416 = arith.constant 0 : index
    %1192 = vector.load %arg8[%c0_413, %c3_414, %c0_415, %c0_416] : memref<1x4x22x22xf32, #tpu.memory_space<vmem>>, vector<1x1x16x16xf32>
    %1193 = vector.shape_cast %1192 : vector<1x1x16x16xf32> to vector<1x16x16xf32>
    %c27_417 = arith.constant 27 : index
    %1194 = memref.load %arg3[%c27_417] : memref<144xf32, #tpu.memory_space<smem>>
    %1195 = vector.broadcast %1194 : f32 to vector<1x16x16xf32>
    %1196 = arith.mulf %1195, %1193 : vector<1x16x16xf32>
    %1197 = arith.addf %1179, %1196 : vector<1x16x16xf32>
    %c63_418 = arith.constant 63 : index
    %1198 = memref.load %arg3[%c63_418] : memref<144xf32, #tpu.memory_space<smem>>
    %1199 = vector.broadcast %1198 : f32 to vector<1x16x16xf32>
    %1200 = arith.mulf %1199, %1193 : vector<1x16x16xf32>
    %1201 = arith.addf %1183, %1200 : vector<1x16x16xf32>
    %c99_419 = arith.constant 99 : index
    %1202 = memref.load %arg3[%c99_419] : memref<144xf32, #tpu.memory_space<smem>>
    %1203 = vector.broadcast %1202 : f32 to vector<1x16x16xf32>
    %1204 = arith.mulf %1203, %1193 : vector<1x16x16xf32>
    %1205 = arith.addf %1187, %1204 : vector<1x16x16xf32>
    %c135_420 = arith.constant 135 : index
    %1206 = memref.load %arg3[%c135_420] : memref<144xf32, #tpu.memory_space<smem>>
    %1207 = vector.broadcast %1206 : f32 to vector<1x16x16xf32>
    %1208 = arith.mulf %1207, %1193 : vector<1x16x16xf32>
    %1209 = arith.addf %1191, %1208 : vector<1x16x16xf32>
    %c0_421 = arith.constant 0 : index
    %c3_422 = arith.constant 3 : index
    %c0_423 = arith.constant 0 : index
    %c3_424 = arith.constant 3 : index
    %1210 = vector.load %arg8[%c0_421, %c3_422, %c0_423, %c3_424] : memref<1x4x22x22xf32, #tpu.memory_space<vmem>>, vector<1x1x16x16xf32>
    %1211 = vector.shape_cast %1210 : vector<1x1x16x16xf32> to vector<1x16x16xf32>
    %c28_425 = arith.constant 28 : index
    %1212 = memref.load %arg3[%c28_425] : memref<144xf32, #tpu.memory_space<smem>>
    %1213 = vector.broadcast %1212 : f32 to vector<1x16x16xf32>
    %1214 = arith.mulf %1213, %1211 : vector<1x16x16xf32>
    %1215 = arith.addf %1197, %1214 : vector<1x16x16xf32>
    %c64_426 = arith.constant 64 : index
    %1216 = memref.load %arg3[%c64_426] : memref<144xf32, #tpu.memory_space<smem>>
    %1217 = vector.broadcast %1216 : f32 to vector<1x16x16xf32>
    %1218 = arith.mulf %1217, %1211 : vector<1x16x16xf32>
    %1219 = arith.addf %1201, %1218 : vector<1x16x16xf32>
    %c100_427 = arith.constant 100 : index
    %1220 = memref.load %arg3[%c100_427] : memref<144xf32, #tpu.memory_space<smem>>
    %1221 = vector.broadcast %1220 : f32 to vector<1x16x16xf32>
    %1222 = arith.mulf %1221, %1211 : vector<1x16x16xf32>
    %1223 = arith.addf %1205, %1222 : vector<1x16x16xf32>
    %c136_428 = arith.constant 136 : index
    %1224 = memref.load %arg3[%c136_428] : memref<144xf32, #tpu.memory_space<smem>>
    %1225 = vector.broadcast %1224 : f32 to vector<1x16x16xf32>
    %1226 = arith.mulf %1225, %1211 : vector<1x16x16xf32>
    %1227 = arith.addf %1209, %1226 : vector<1x16x16xf32>
    %c0_429 = arith.constant 0 : index
    %c3_430 = arith.constant 3 : index
    %c0_431 = arith.constant 0 : index
    %c6_432 = arith.constant 6 : index
    %1228 = vector.load %arg8[%c0_429, %c3_430, %c0_431, %c6_432] : memref<1x4x22x22xf32, #tpu.memory_space<vmem>>, vector<1x1x16x16xf32>
    %1229 = vector.shape_cast %1228 : vector<1x1x16x16xf32> to vector<1x16x16xf32>
    %c29_433 = arith.constant 29 : index
    %1230 = memref.load %arg3[%c29_433] : memref<144xf32, #tpu.memory_space<smem>>
    %1231 = vector.broadcast %1230 : f32 to vector<1x16x16xf32>
    %1232 = arith.mulf %1231, %1229 : vector<1x16x16xf32>
    %1233 = arith.addf %1215, %1232 : vector<1x16x16xf32>
    %c65_434 = arith.constant 65 : index
    %1234 = memref.load %arg3[%c65_434] : memref<144xf32, #tpu.memory_space<smem>>
    %1235 = vector.broadcast %1234 : f32 to vector<1x16x16xf32>
    %1236 = arith.mulf %1235, %1229 : vector<1x16x16xf32>
    %1237 = arith.addf %1219, %1236 : vector<1x16x16xf32>
    %c101_435 = arith.constant 101 : index
    %1238 = memref.load %arg3[%c101_435] : memref<144xf32, #tpu.memory_space<smem>>
    %1239 = vector.broadcast %1238 : f32 to vector<1x16x16xf32>
    %1240 = arith.mulf %1239, %1229 : vector<1x16x16xf32>
    %1241 = arith.addf %1223, %1240 : vector<1x16x16xf32>
    %c137_436 = arith.constant 137 : index
    %1242 = memref.load %arg3[%c137_436] : memref<144xf32, #tpu.memory_space<smem>>
    %1243 = vector.broadcast %1242 : f32 to vector<1x16x16xf32>
    %1244 = arith.mulf %1243, %1229 : vector<1x16x16xf32>
    %1245 = arith.addf %1227, %1244 : vector<1x16x16xf32>
    %c0_437 = arith.constant 0 : index
    %c3_438 = arith.constant 3 : index
    %c3_439 = arith.constant 3 : index
    %c0_440 = arith.constant 0 : index
    %1246 = vector.load %arg8[%c0_437, %c3_438, %c3_439, %c0_440] : memref<1x4x22x22xf32, #tpu.memory_space<vmem>>, vector<1x1x16x16xf32>
    %1247 = vector.shape_cast %1246 : vector<1x1x16x16xf32> to vector<1x16x16xf32>
    %c30_441 = arith.constant 30 : index
    %1248 = memref.load %arg3[%c30_441] : memref<144xf32, #tpu.memory_space<smem>>
    %1249 = vector.broadcast %1248 : f32 to vector<1x16x16xf32>
    %1250 = arith.mulf %1249, %1247 : vector<1x16x16xf32>
    %1251 = arith.addf %1233, %1250 : vector<1x16x16xf32>
    %c66_442 = arith.constant 66 : index
    %1252 = memref.load %arg3[%c66_442] : memref<144xf32, #tpu.memory_space<smem>>
    %1253 = vector.broadcast %1252 : f32 to vector<1x16x16xf32>
    %1254 = arith.mulf %1253, %1247 : vector<1x16x16xf32>
    %1255 = arith.addf %1237, %1254 : vector<1x16x16xf32>
    %c102_443 = arith.constant 102 : index
    %1256 = memref.load %arg3[%c102_443] : memref<144xf32, #tpu.memory_space<smem>>
    %1257 = vector.broadcast %1256 : f32 to vector<1x16x16xf32>
    %1258 = arith.mulf %1257, %1247 : vector<1x16x16xf32>
    %1259 = arith.addf %1241, %1258 : vector<1x16x16xf32>
    %c138_444 = arith.constant 138 : index
    %1260 = memref.load %arg3[%c138_444] : memref<144xf32, #tpu.memory_space<smem>>
    %1261 = vector.broadcast %1260 : f32 to vector<1x16x16xf32>
    %1262 = arith.mulf %1261, %1247 : vector<1x16x16xf32>
    %1263 = arith.addf %1245, %1262 : vector<1x16x16xf32>
    %c0_445 = arith.constant 0 : index
    %c3_446 = arith.constant 3 : index
    %c3_447 = arith.constant 3 : index
    %c3_448 = arith.constant 3 : index
    %1264 = vector.load %arg8[%c0_445, %c3_446, %c3_447, %c3_448] : memref<1x4x22x22xf32, #tpu.memory_space<vmem>>, vector<1x1x16x16xf32>
    %1265 = vector.shape_cast %1264 : vector<1x1x16x16xf32> to vector<1x16x16xf32>
    %c31_449 = arith.constant 31 : index
    %1266 = memref.load %arg3[%c31_449] : memref<144xf32, #tpu.memory_space<smem>>
    %1267 = vector.broadcast %1266 : f32 to vector<1x16x16xf32>
    %1268 = arith.mulf %1267, %1265 : vector<1x16x16xf32>
    %1269 = arith.addf %1251, %1268 : vector<1x16x16xf32>
    %c67_450 = arith.constant 67 : index
    %1270 = memref.load %arg3[%c67_450] : memref<144xf32, #tpu.memory_space<smem>>
    %1271 = vector.broadcast %1270 : f32 to vector<1x16x16xf32>
    %1272 = arith.mulf %1271, %1265 : vector<1x16x16xf32>
    %1273 = arith.addf %1255, %1272 : vector<1x16x16xf32>
    %c103_451 = arith.constant 103 : index
    %1274 = memref.load %arg3[%c103_451] : memref<144xf32, #tpu.memory_space<smem>>
    %1275 = vector.broadcast %1274 : f32 to vector<1x16x16xf32>
    %1276 = arith.mulf %1275, %1265 : vector<1x16x16xf32>
    %1277 = arith.addf %1259, %1276 : vector<1x16x16xf32>
    %c139_452 = arith.constant 139 : index
    %1278 = memref.load %arg3[%c139_452] : memref<144xf32, #tpu.memory_space<smem>>
    %1279 = vector.broadcast %1278 : f32 to vector<1x16x16xf32>
    %1280 = arith.mulf %1279, %1265 : vector<1x16x16xf32>
    %1281 = arith.addf %1263, %1280 : vector<1x16x16xf32>
    %c0_453 = arith.constant 0 : index
    %c3_454 = arith.constant 3 : index
    %c3_455 = arith.constant 3 : index
    %c6_456 = arith.constant 6 : index
    %1282 = vector.load %arg8[%c0_453, %c3_454, %c3_455, %c6_456] : memref<1x4x22x22xf32, #tpu.memory_space<vmem>>, vector<1x1x16x16xf32>
    %1283 = vector.shape_cast %1282 : vector<1x1x16x16xf32> to vector<1x16x16xf32>
    %c32_457 = arith.constant 32 : index
    %1284 = memref.load %arg3[%c32_457] : memref<144xf32, #tpu.memory_space<smem>>
    %1285 = vector.broadcast %1284 : f32 to vector<1x16x16xf32>
    %1286 = arith.mulf %1285, %1283 : vector<1x16x16xf32>
    %1287 = arith.addf %1269, %1286 : vector<1x16x16xf32>
    %c68_458 = arith.constant 68 : index
    %1288 = memref.load %arg3[%c68_458] : memref<144xf32, #tpu.memory_space<smem>>
    %1289 = vector.broadcast %1288 : f32 to vector<1x16x16xf32>
    %1290 = arith.mulf %1289, %1283 : vector<1x16x16xf32>
    %1291 = arith.addf %1273, %1290 : vector<1x16x16xf32>
    %c104_459 = arith.constant 104 : index
    %1292 = memref.load %arg3[%c104_459] : memref<144xf32, #tpu.memory_space<smem>>
    %1293 = vector.broadcast %1292 : f32 to vector<1x16x16xf32>
    %1294 = arith.mulf %1293, %1283 : vector<1x16x16xf32>
    %1295 = arith.addf %1277, %1294 : vector<1x16x16xf32>
    %c140_460 = arith.constant 140 : index
    %1296 = memref.load %arg3[%c140_460] : memref<144xf32, #tpu.memory_space<smem>>
    %1297 = vector.broadcast %1296 : f32 to vector<1x16x16xf32>
    %1298 = arith.mulf %1297, %1283 : vector<1x16x16xf32>
    %1299 = arith.addf %1281, %1298 : vector<1x16x16xf32>
    %c0_461 = arith.constant 0 : index
    %c3_462 = arith.constant 3 : index
    %c6_463 = arith.constant 6 : index
    %c0_464 = arith.constant 0 : index
    %1300 = vector.load %arg8[%c0_461, %c3_462, %c6_463, %c0_464] : memref<1x4x22x22xf32, #tpu.memory_space<vmem>>, vector<1x1x16x16xf32>
    %1301 = vector.shape_cast %1300 : vector<1x1x16x16xf32> to vector<1x16x16xf32>
    %c33_465 = arith.constant 33 : index
    %1302 = memref.load %arg3[%c33_465] : memref<144xf32, #tpu.memory_space<smem>>
    %1303 = vector.broadcast %1302 : f32 to vector<1x16x16xf32>
    %1304 = arith.mulf %1303, %1301 : vector<1x16x16xf32>
    %1305 = arith.addf %1287, %1304 : vector<1x16x16xf32>
    %c69_466 = arith.constant 69 : index
    %1306 = memref.load %arg3[%c69_466] : memref<144xf32, #tpu.memory_space<smem>>
    %1307 = vector.broadcast %1306 : f32 to vector<1x16x16xf32>
    %1308 = arith.mulf %1307, %1301 : vector<1x16x16xf32>
    %1309 = arith.addf %1291, %1308 : vector<1x16x16xf32>
    %c105_467 = arith.constant 105 : index
    %1310 = memref.load %arg3[%c105_467] : memref<144xf32, #tpu.memory_space<smem>>
    %1311 = vector.broadcast %1310 : f32 to vector<1x16x16xf32>
    %1312 = arith.mulf %1311, %1301 : vector<1x16x16xf32>
    %1313 = arith.addf %1295, %1312 : vector<1x16x16xf32>
    %c141_468 = arith.constant 141 : index
    %1314 = memref.load %arg3[%c141_468] : memref<144xf32, #tpu.memory_space<smem>>
    %1315 = vector.broadcast %1314 : f32 to vector<1x16x16xf32>
    %1316 = arith.mulf %1315, %1301 : vector<1x16x16xf32>
    %1317 = arith.addf %1299, %1316 : vector<1x16x16xf32>
    %c0_469 = arith.constant 0 : index
    %c3_470 = arith.constant 3 : index
    %c6_471 = arith.constant 6 : index
    %c3_472 = arith.constant 3 : index
    %1318 = vector.load %arg8[%c0_469, %c3_470, %c6_471, %c3_472] : memref<1x4x22x22xf32, #tpu.memory_space<vmem>>, vector<1x1x16x16xf32>
    %1319 = vector.shape_cast %1318 : vector<1x1x16x16xf32> to vector<1x16x16xf32>
    %c34_473 = arith.constant 34 : index
    %1320 = memref.load %arg3[%c34_473] : memref<144xf32, #tpu.memory_space<smem>>
    %1321 = vector.broadcast %1320 : f32 to vector<1x16x16xf32>
    %1322 = arith.mulf %1321, %1319 : vector<1x16x16xf32>
    %1323 = arith.addf %1305, %1322 : vector<1x16x16xf32>
    %c70_474 = arith.constant 70 : index
    %1324 = memref.load %arg3[%c70_474] : memref<144xf32, #tpu.memory_space<smem>>
    %1325 = vector.broadcast %1324 : f32 to vector<1x16x16xf32>
    %1326 = arith.mulf %1325, %1319 : vector<1x16x16xf32>
    %1327 = arith.addf %1309, %1326 : vector<1x16x16xf32>
    %c106_475 = arith.constant 106 : index
    %1328 = memref.load %arg3[%c106_475] : memref<144xf32, #tpu.memory_space<smem>>
    %1329 = vector.broadcast %1328 : f32 to vector<1x16x16xf32>
    %1330 = arith.mulf %1329, %1319 : vector<1x16x16xf32>
    %1331 = arith.addf %1313, %1330 : vector<1x16x16xf32>
    %c142_476 = arith.constant 142 : index
    %1332 = memref.load %arg3[%c142_476] : memref<144xf32, #tpu.memory_space<smem>>
    %1333 = vector.broadcast %1332 : f32 to vector<1x16x16xf32>
    %1334 = arith.mulf %1333, %1319 : vector<1x16x16xf32>
    %1335 = arith.addf %1317, %1334 : vector<1x16x16xf32>
    %c0_477 = arith.constant 0 : index
    %c3_478 = arith.constant 3 : index
    %c6_479 = arith.constant 6 : index
    %c6_480 = arith.constant 6 : index
    %1336 = vector.load %arg8[%c0_477, %c3_478, %c6_479, %c6_480] : memref<1x4x22x22xf32, #tpu.memory_space<vmem>>, vector<1x1x16x16xf32>
    %1337 = vector.shape_cast %1336 : vector<1x1x16x16xf32> to vector<1x16x16xf32>
    %c35_481 = arith.constant 35 : index
    %1338 = memref.load %arg3[%c35_481] : memref<144xf32, #tpu.memory_space<smem>>
    %1339 = vector.broadcast %1338 : f32 to vector<1x16x16xf32>
    %1340 = arith.mulf %1339, %1337 : vector<1x16x16xf32>
    %1341 = arith.addf %1323, %1340 : vector<1x16x16xf32>
    %c71_482 = arith.constant 71 : index
    %1342 = memref.load %arg3[%c71_482] : memref<144xf32, #tpu.memory_space<smem>>
    %1343 = vector.broadcast %1342 : f32 to vector<1x16x16xf32>
    %1344 = arith.mulf %1343, %1337 : vector<1x16x16xf32>
    %1345 = arith.addf %1327, %1344 : vector<1x16x16xf32>
    %c107_483 = arith.constant 107 : index
    %1346 = memref.load %arg3[%c107_483] : memref<144xf32, #tpu.memory_space<smem>>
    %1347 = vector.broadcast %1346 : f32 to vector<1x16x16xf32>
    %1348 = arith.mulf %1347, %1337 : vector<1x16x16xf32>
    %1349 = arith.addf %1331, %1348 : vector<1x16x16xf32>
    %c143_484 = arith.constant 143 : index
    %1350 = memref.load %arg3[%c143_484] : memref<144xf32, #tpu.memory_space<smem>>
    %1351 = vector.broadcast %1350 : f32 to vector<1x16x16xf32>
    %1352 = arith.mulf %1351, %1337 : vector<1x16x16xf32>
    %1353 = arith.addf %1335, %1352 : vector<1x16x16xf32>
    %c0_485 = arith.constant 0 : index
    %1354 = memref.load %arg4[%c0_485] : memref<4xf32, #tpu.memory_space<smem>>
    %1355 = vector.broadcast %1354 : f32 to vector<1x16x16xf32>
    %1356 = arith.addf %1341, %1355 : vector<1x16x16xf32>
    %c0_486 = arith.constant 0 : index
    %c0_487 = arith.constant 0 : index
    %c0_488 = arith.constant 0 : index
    %c0_489 = arith.constant 0 : index
    %1357 = vector.load %arg5[%c0_486, %c0_487, %c0_488, %c0_489] : memref<1x4x16x16xf32, #tpu.memory_space<vmem>>, vector<1x1x16x16xf32>
    %1358 = vector.shape_cast %1357 : vector<1x1x16x16xf32> to vector<1x16x16xf32>
    %1359 = arith.addf %1356, %1358 : vector<1x16x16xf32>
    %c0_490 = arith.constant 0 : index
    %c0_491 = arith.constant 0 : index
    %c0_492 = arith.constant 0 : index
    %c0_493 = arith.constant 0 : index
    %1360 = vector.load %arg6[%c0_490, %c0_491, %c0_492, %c0_493] : memref<1x4x16x16xf32, #tpu.memory_space<vmem>>, vector<1x1x16x16xf32>
    %1361 = vector.shape_cast %1360 : vector<1x1x16x16xf32> to vector<1x16x16xf32>
    %1362 = vector.shape_cast %1359 : vector<1x16x16xf32> to vector<1x1x16x16xf32>
    tpu.vector_store %arg6[%c0_490, %c0_491, %c0_492, %c0_493], %1362 {strides = array<i32>} : memref<1x4x16x16xf32, #tpu.memory_space<vmem>>, vector<1x1x16x16xf32>,
    %c1_494 = arith.constant 1 : index
    %1363 = memref.load %arg4[%c1_494] : memref<4xf32, #tpu.memory_space<smem>>
    %1364 = vector.broadcast %1363 : f32 to vector<1x16x16xf32>
    %1365 = arith.addf %1345, %1364 : vector<1x16x16xf32>
    %c0_495 = arith.constant 0 : index
    %c1_496 = arith.constant 1 : index
    %c0_497 = arith.constant 0 : index
    %c0_498 = arith.constant 0 : index
    %1366 = vector.load %arg5[%c0_495, %c1_496, %c0_497, %c0_498] : memref<1x4x16x16xf32, #tpu.memory_space<vmem>>, vector<1x1x16x16xf32>
    %1367 = vector.shape_cast %1366 : vector<1x1x16x16xf32> to vector<1x16x16xf32>
    %1368 = arith.addf %1365, %1367 : vector<1x16x16xf32>
    %c0_499 = arith.constant 0 : index
    %c1_500 = arith.constant 1 : index
    %c0_501 = arith.constant 0 : index
    %c0_502 = arith.constant 0 : index
    %1369 = vector.load %arg6[%c0_499, %c1_500, %c0_501, %c0_502] : memref<1x4x16x16xf32, #tpu.memory_space<vmem>>, vector<1x1x16x16xf32>
    %1370 = vector.shape_cast %1369 : vector<1x1x16x16xf32> to vector<1x16x16xf32>
    %1371 = vector.shape_cast %1368 : vector<1x16x16xf32> to vector<1x1x16x16xf32>
    tpu.vector_store %arg6[%c0_499, %c1_500, %c0_501, %c0_502], %1371 {strides = array<i32>} : memref<1x4x16x16xf32, #tpu.memory_space<vmem>>, vector<1x1x16x16xf32>,
    %c2_503 = arith.constant 2 : index
    %1372 = memref.load %arg4[%c2_503] : memref<4xf32, #tpu.memory_space<smem>>
    %1373 = vector.broadcast %1372 : f32 to vector<1x16x16xf32>
    %1374 = arith.addf %1349, %1373 : vector<1x16x16xf32>
    %c0_504 = arith.constant 0 : index
    %c2_505 = arith.constant 2 : index
    %c0_506 = arith.constant 0 : index
    %c0_507 = arith.constant 0 : index
    %1375 = vector.load %arg5[%c0_504, %c2_505, %c0_506, %c0_507] : memref<1x4x16x16xf32, #tpu.memory_space<vmem>>, vector<1x1x16x16xf32>
    %1376 = vector.shape_cast %1375 : vector<1x1x16x16xf32> to vector<1x16x16xf32>
    %1377 = arith.addf %1374, %1376 : vector<1x16x16xf32>
    %c0_508 = arith.constant 0 : index
    %c2_509 = arith.constant 2 : index
    %c0_510 = arith.constant 0 : index
    %c0_511 = arith.constant 0 : index
    %1378 = vector.load %arg6[%c0_508, %c2_509, %c0_510, %c0_511] : memref<1x4x16x16xf32, #tpu.memory_space<vmem>>, vector<1x1x16x16xf32>
    %1379 = vector.shape_cast %1378 : vector<1x1x16x16xf32> to vector<1x16x16xf32>
    %1380 = vector.shape_cast %1377 : vector<1x16x16xf32> to vector<1x1x16x16xf32>
    tpu.vector_store %arg6[%c0_508, %c2_509, %c0_510, %c0_511], %1380 {strides = array<i32>} : memref<1x4x16x16xf32, #tpu.memory_space<vmem>>, vector<1x1x16x16xf32>,
    %c3_512 = arith.constant 3 : index
    %1381 = memref.load %arg4[%c3_512] : memref<4xf32, #tpu.memory_space<smem>>
    %1382 = vector.broadcast %1381 : f32 to vector<1x16x16xf32>
    %1383 = arith.addf %1353, %1382 : vector<1x16x16xf32>
    %c0_513 = arith.constant 0 : index
    %c3_514 = arith.constant 3 : index
    %c0_515 = arith.constant 0 : index
    %c0_516 = arith.constant 0 : index
    %1384 = vector.load %arg5[%c0_513, %c3_514, %c0_515, %c0_516] : memref<1x4x16x16xf32, #tpu.memory_space<vmem>>, vector<1x1x16x16xf32>
    %1385 = vector.shape_cast %1384 : vector<1x1x16x16xf32> to vector<1x16x16xf32>
    %1386 = arith.addf %1383, %1385 : vector<1x16x16xf32>
    %c0_517 = arith.constant 0 : index
    %c3_518 = arith.constant 3 : index
    %c0_519 = arith.constant 0 : index
    %c0_520 = arith.constant 0 : index
    %1387 = vector.load %arg6[%c0_517, %c3_518, %c0_519, %c0_520] : memref<1x4x16x16xf32, #tpu.memory_space<vmem>>, vector<1x1x16x16xf32>
    %1388 = vector.shape_cast %1387 : vector<1x1x16x16xf32> to vector<1x16x16xf32>
    %1389 = vector.shape_cast %1386 : vector<1x16x16xf32> to vector<1x1x16x16xf32>
    tpu.vector_store %arg6[%c0_517, %c3_518, %c0_519, %c0_520], %1389 {strides = array<i32>} : memref<1x4x16x16xf32, #tpu.memory_space<vmem>>, vector<1x1x16x16xf32>,
    return
  }
  func.func @transform_0(%arg0: i32) -> i32 {
    %c0_i32 = arith.constant 0 : i32
    %c0_i32_0 = arith.constant 0 : i32
    return %c0_i32 : i32
  }
  func.func @transform_1(%arg0: i32) -> i32 {
    %c0_i32 = arith.constant 0 : i32
    %c0_i32_0 = arith.constant 0 : i32
    return %c0_i32 : i32
  }
  func.func @transform_2(%arg0: i32) -> i32 {
    %c0_i32 = arith.constant 0 : i32
    %c0_i32_0 = arith.constant 0 : i32
    return %c0_i32 : i32
  }
  func.func @transform_3(%arg0: i32) -> i32 {
    %c0_i32 = arith.constant 0 : i32
    %c0_i32_0 = arith.constant 0 : i32
    return %c0_i32 : i32
  }
  func.func @transform_4(%arg0: i32) -> (i32, i32, i32, i32) {
    %c0_i32 = arith.constant 0 : i32
    %c0_i32_0 = arith.constant 0 : i32
    %c0_i32_1 = arith.constant 0 : i32
    %c0_i32_2 = arith.constant 0 : i32
    return %arg0, %c0_i32, %c0_i32_0, %c0_i32_1 : i32, i32, i32, i32
  }
  func.func @transform_5(%arg0: i32) -> (i32, i32, i32, i32) {
    %c0_i32 = arith.constant 0 : i32
    %c0_i32_0 = arith.constant 0 : i32
    %c0_i32_1 = arith.constant 0 : i32
    %c0_i32_2 = arith.constant 0 : i32
    return %arg0, %c0_i32, %c0_i32_0, %c0_i32_1 : i32, i32, i32, i32
  }
}

</mosaic_0001>

<bundles_post_ra>
// kernel: tpu_custom_call.1
= control target key start
LH: loop header
LB: loop body
LE: loop exit
PB: predicated region body
PF: predicated region fallthrough
CT: control target
= control target key end

     0   :  { %10 = vsyncpa [#allocation7], 0  ;;  %s7009_s0 = inlined_call_operand.hbm [shape: f32[144], index: 0, kind: input, shape index: {}]   ;;  %s7010_s1 = inlined_call_operand.vmem [shape: f32[4], index: 1, kind: input, shape index: {}]   ;;  %s7011_s2 = inlined_call_operand.vmem [shape: f32[144], index: 2, kind: input, shape index: {}]   ;;  %s7012_s3 = inlined_call_operand.vmem [shape: f32[4], index: 3, kind: input, shape index: {}]   ;;  %s7013_s4 = inlined_call_operand.hbm [shape: f32[2,4,16,16], index: 4, kind: input, shape index: {}]   ;;  %s7014_s5 = inlined_call_operand.hbm [shape: f32[2,4,16,16], index: 5, kind: output, shape index: {}]  }
   0x1   :  { %11 = vsyncpa [#allocation8], 0 }
   0x2   :  { %12 = vsyncpa [#allocation11], 0 }
   0x3   :  { %13 = vsyncpa [#allocation5], 0 }
   0x4   :  { %15 = vsyncpa [#allocation5 + $0x1], 0 }
   0x5   :  { %16 = vsyncpa [#allocation6], 0 }
   0x6   :  { %18 = vsyncpa [#allocation6 + $0x1], 0  ;;  %s4591_s18 = smov 0   ;;  %s4593_s19 = smov 0  }
   0x7   :  { %s4595_s20 = smov 0   ;;  %s4597_s21 = smov 0  }
   0x8 LB: > { %s4612_s22 = sadd.s32 4294967295, %s4542_s21   ;;  %s3950_s23 = sadd.s32 4294967294, %s4542_s21   ;;  %s4542_s21 = sphi %s4597_s21, %s7038_s21   ;;  %s4538_s20 = sphi %s4595_s20, %s7037_s20   ;;  %s4534_s19 = sphi %s4593_s19, %s7036_s19   ;;  %s4530_s18 = sphi %s4591_s18, %s7035_s18  }
   0x9   : > { %p128_p0 = scmp.ne.s32.totalorder %s4534_s19, %s4530_s18  ;;  %p7015_p1 = scmp.eq.s32.totalorder %s4612_s22, 0 }
   0xa   : > { %p158_p3 = scmp.eq.s32.totalorder %s3950_s23, 1  ;;  %p3951_p5 = scmp.ge.s32.totalorder %s4542_s21, 1 }
   0xb   : > { %p4621_p4 = por %p7015_p1, %p128_p0  ;;  %p165_p7 = scmp.lt.s32.totalorder %s4542_s21, 3 }
   0xc   : > { %p4626_p6 = por %p158_p3, %p128_p0  ;;  %s198_s28 = sshll.u32 %s7011_s2, 4  ;;  %s199_s28 = int_to_ptr.vmem [resolvable:$true] %s198_s28 }
   0xd   : > { %s7018_s24 = scalar_select %p4621_p4, 1, 0 }
   0xe   : > { %s7019_s25 = scalar_select %p4626_p6, 1, 0 }
   0xf   : > { %p4634_p8 = pnand %p3951_p5, %p165_p7  ;;  %s187_s7 = sshll.u32 %s7010_s1, 4  ;;  %s4650_s7 = int_to_ptr.vmem [resolvable:$true] %s187_s7 }
  0x10   : > { %s209_s11 = sshll.u32 %s7012_s3, 4  ;;  %s4376_s12 = scalar_lea.vmem %s199_s28, 32  ;;  %s4655_s11 = int_to_ptr.vmem [resolvable:$true] %s209_s11 }
  0x11   : > { %p4298_p10 = pneg %p4634_p8  ;;  %p4377_p12 = scmp.ne.s32.totalorder %s199_s28, %s4376_s12 }
  0x12   : > { %p4384_p5 = scmp.lt.s32.totalorder %s199_s28, %s199_s28  ;;  %p4385_p7 = scmp.lt.s32.totalorder %s4376_s12, %s4376_s12 }
  0x13   : > { %p4646_p11 = pnand %p4298_p10, %p7015_p1 }
  0x14   : > { %p4386_p10 = por %p4385_p7, %p4384_p5 }
  0x15   : > { %p4378_p13 = pneg %p4646_p11 }
  0x17   : > { %p4379_p0 = pnand %p4378_p13, %p4377_p12 }
  0x19   : > { %p4380_p3 = pneg %p4379_p0 }
  0x1b   : > { %p4387_p9 = pnand %p4386_p10, %p4380_p3 }
  0x1d   : > { %4390 = shalt.err (!%p4387_p9)
}
  0x1e   : > { %s4544_s13 = smov [#allocation10]   ;;  %s4391_s16 = scalar_lea.hbm %s7009_s0, 32 }
  0x1f   : > { %4307 = dma.vmem_to_smem (!%p4646_p11), %s199_s28, 32, %s4544_s13, [#allocation11]  }
  0x20   : > { %p4392_p1 = scmp.ne.s32.totalorder %s7009_s0, %s4391_s16  ;;  %p4398_p9 = scmp.lt.u32.totalorder %s4391_s16, %s7009_s0 }
  0x22   : > { %p4394_p12 = pnand %p4392_p1, %p4378_p13 }
  0x24   : > { %p4395_p0 = pneg %p4394_p12 }
  0x26   : > { %p4400_p3 = pnand %p4398_p9, %p4395_p0 }
  0x28   : > { %4403 = shalt.err (!%p4400_p3)
}
  0x29   : > { %s4545_s30 = smov [#allocation4]   ;;  %s4404_s9 = scalar_lea.vmem %s4650_s7, 16 }
  0x2a   : > { %4301 = dma.hbm_to_smem (!%p4646_p11), %s7009_s0, 32, %s4545_s30, [#allocation7]  }
  0x2b   : > { %p4405_p1 = scmp.ne.s32.totalorder %s4650_s7, %s4404_s9  ;;  %p4412_p10 = scmp.lt.s32.totalorder %s4650_s7, %s4650_s7 }
  0x2c   : > { %p4413_p12 = scmp.lt.s32.totalorder %s4404_s9, %s4404_s9 }
  0x2d   : > { %p4407_p5 = pnand %p4405_p1, %p4378_p13 }
  0x2e   : > { %p4414_p0 = por %p4413_p12, %p4412_p10 }
  0x2f   : > { %p4408_p7 = pneg %p4407_p5 }
  0x31   : > { %p4415_p9 = pnand %p4414_p0, %p4408_p7 }
  0x33   : > { %4418 = shalt.err (!%p4415_p9)
}
  0x34   : > { %s4546_s10 = smov [#allocation9]   ;;  %s4419_s12 = scalar_lea.vmem %s4655_s11, 16 }
  0x35   : > { %4304 = dma.vmem_to_smem (!%p4646_p11), %s4650_s7, 16, %s4546_s10, [#allocation8]  }
  0x36   : > { %p4420_p3 = scmp.ne.s32.totalorder %s4655_s11, %s4419_s12  ;;  %p4427_p2 = scmp.lt.s32.totalorder %s4655_s11, %s4655_s11 }
  0x37   : > { %p4428_p10 = scmp.lt.s32.totalorder %s4419_s12, %s4419_s12 }
  0x38   : > { %p4422_p1 = pnand %p4420_p3, %p4378_p13 }
  0x39   : > { %p4429_p7 = por %p4428_p10, %p4427_p2 }
  0x3a   : > { %p4423_p5 = pneg %p4422_p1 }
  0x3c   : > { %p4430_p12 = pnand %p4429_p7, %p4423_p5 }
  0x3e   : > { %4433 = shalt.err (!%p4430_p12)
}
  0x3f   : > { %s4547_s13 = smov [#allocation12]   ;;  %s4702_s7 = sadd.s32 1, %s4542_s21  }
  0x40   : > { %4310 = dma.vmem_to_smem (!%p4646_p11), %s4655_s11, 16, %s4547_s13, [#allocation11]  }
  0x41   : > { %s112_s14 = ssub.s32 %s4542_s21, %s4702_s7  ;;  %s115_s15 = sadd.s32 1, %s4538_s20 }
  0x42   : > { %p113_p2 = scmp.eq.s32.totalorder %s112_s14, 0  ;;  %p122_p13 = scmp.ne.s32.totalorder %s4538_s20, %s4534_s19 }
  0x43   : > { %p123_p0 = scmp.eq.s32.totalorder %s4542_s21, 0  ;;  %p7022_p3 = scmp.eq.s32.totalorder %s4612_s22, 1 }
  0x44   : > { %s4711_s8 = scalar_select %p113_p2, %s4538_s20, %s115_s15  }
  0x45   : > { %p124_p9 = por %p123_p0, %p122_p13  ;;  %p4715_p1 = por %p7022_p3, %p122_p13 }
  0x46   : > { %p4323_p5 = scmp.lt.s32.totalorder %s4542_s21, 2  ;;  %s220_s17 = sand.u32 1, %s4538_s20  }
  0x47   : > { %s7023_s16 = scalar_select %p4715_p1, 1, 0 }
  0x48   : > { %s3957_s23 = sshll.u32 %s220_s17, 6  ;;  %s4276_s11 = sshll.u32 %s4542_s21, 10 }
  0x49   : > { %s4725_s30 = scalar_lea.hbm %s7013_s4, %s4276_s11  ;;  %s224_s28 = scalar_lea.vmem [#allocation13], %s3957_s23 }
  0x4a   : > { %s231_s6 = sshll.u32 %s224_s28, 4  ;;  %p4729_p11 = pnand %p4323_p5, %p124_p9  ;;  %s4727_s6 = int_to_ptr.vmem [resolvable:$true] %s231_s6 }
  0x4b   : > { %s4733_s10 = scalar_lea.sflag [#allocation5], %s220_s17  ;;  %s4434_s12 = scalar_lea.hbm %s4725_s30, 1024 }
  0x4c   : > { %p4435_p10 = scmp.ne.s32.totalorder %s4725_s30, %s4434_s12  ;;  %p4436_p7 = pneg %p4729_p11 }
  0x4d   : > { %s4439_s15 = scalar_lea.hbm %s7013_s4, 2048  ;;  %p4440_p13 = scmp.lt.u32.totalorder %s4725_s30, %s7013_s4 }
  0x4e   : > { %p4437_p12 = pnand %p4436_p7, %p4435_p10  ;;  %p4441_p0 = scmp.lt.u32.totalorder %s4439_s15, %s4434_s12 }
  0x4f   : > { %p4443_p3 = scmp.lt.u32.totalorder %s4434_s12, %s4725_s30 }
  0x50   : > { %p4438_p2 = pneg %p4437_p12  ;;  %p4442_p9 = por %p4441_p0, %p4440_p13 }
  0x52   : > { %p4444_p5 = por %p4443_p3, %p4442_p9 }
  0x54   : > { %p4445_p6 = pnand %p4444_p5, %p4438_p2 }
  0x56   : > { %4448 = shalt.err (!%p4445_p6)
}
  0x57   : > { %s4449_s17 = scalar_lea.vmem %s4727_s6, 1024  ;;  %s4548_s26 = smov [#allocation13]  }
  0x58   : > { %p4450_p10 = scmp.ne.s32.totalorder %s4727_s6, %s4449_s17  ;;  %s4454_s27 = sshll.u32 %s4548_s26, 4  ;;  %s4455_s27 = int_to_ptr.vmem [resolvable:$false] %s4454_s27 }
  0x59   : > { %s4456_s28 = scalar_lea.vmem %s4455_s27, 2048  ;;  %p4457_p4 = scmp.lt.s32.totalorder %s4727_s6, %s4455_s27 }
  0x5a   : > { %p4452_p12 = pnand %p4450_p10, %p4436_p7  ;;  %p4458_p13 = scmp.lt.s32.totalorder %s4456_s28, %s4449_s17 }
  0x5c   : > { %p4453_p1 = pneg %p4452_p12  ;;  %p4459_p0 = por %p4458_p13, %p4457_p4 }
  0x5e   : > { %p4460_p9 = pnand %p4459_p0, %p4453_p1 }
  0x60   : > { %4463 = shalt.err (!%p4460_p9)
}
  0x61   : > { %s4549_s12 = smov 128   ;;  %s4550_s13 = smov 8  }
  0x62   : > { %4314 = dma.hbm_to_vmem [thread:$0]  (!%p4729_p11), %s4725_s30, 1024, %s4727_s6, %s4733_s10, %s4549_s12, %s4549_s12, %s4550_s13  }
  0x63   : > { %243 = sbr.rel (%p4634_p8) target bundleno = 1381 (0x565), region = 40  ;;  %p7025_p6 = scmp.eq.s32.totalorder (!%p4634_p8), %s4612_s22, 0 }
  0x6a   : > { %4509 = dma.done.wait (%p7025_p6), [#allocation7], 32   ;;  %p7026_p7 = pmov %p7025_p6 }
  0x6b   : > { %p7027_p4 = pmov %p7025_p6 }
  0x6c   : > { %4511 = vsyncadd (%p7026_p7), [#allocation7], 4294967264 }
  0x6d   : > { %4513 = dma.done.wait (%p7027_p4), [#allocation8], 16   ;;  %p7028_p1 = pmov %p7027_p4 }
  0x6f   : > { %4515 = vsyncadd (%p7028_p1), [#allocation8], 4294967280  ;;  %p7029_p2 = pmov %p7028_p1 }
  0x70   : > { %p7030_p11 = pmov %p7028_p1 }
  0x71   : > { %4517 = dma.done.wait (%p7029_p2), [#allocation11], 48  }
  0x72   : > { %4519 = vsyncadd (%p7030_p11), [#allocation11], 4294967248  ;;  %s4776_s29 = sand.u32 1, %s4534_s19   ;;  %p7031_p8 = scmp.ne.s32.totalorder %s7018_s24, 0 }
  0x73   : > { %s3965_s30 = sshll.u32 %s4776_s29, 6  ;;  %s262_s6 = scalar_lea.sflag [#allocation5], %s4776_s29 }
  0x74   : > { %s4782_s9 = scalar_lea.vmem [#allocation13], %s3965_s30 }
  0x75   : > { %4521 = dma.done.wait (%p7031_p8), %s262_s6, 1024  }
  0x76   : > { %4523 = vsyncadd (%p7031_p8), %s262_s6, 4294966272 }
  0x77   : > { %270 = sfence }
  0x78   : > { %v325_v0 = vld [vmem:[%s4782_s9] sm:$0xff]  ;;  %v327_v1 = vld [vmem:[%s4782_s9 + $0x10] sm:$0xff]  ;;  %vm293_vm0 = vcmask 211968   ;;  %s4551_s10 = smov 5   ;;  %vm297_vm1 = vcmask 205824   ;;  %v326_v2 = vld [vmem:[%s4782_s9 + $0x8] sm:$0xff] }
  0x79   : > { %341 = vrot.lane.b32.xlu0 %v325_v0, %s4551_s10  ;;  %345 = vrot.lane.b32.xlu1 %v327_v1, %s4551_s10  ;;  %v328_v3 = vld [vmem:[%s4782_s9 + $0x18] sm:$0xff]  ;;  %v4552_v4 = vmov 0.0   ;;  %v329_v5 = vld [vmem:[%s4782_s9 + $0x20] sm:$0xff]  ;;  %vm365_vm2 = vcmask 171048   ;;  %s3970_s24 = sld [smem:[#allocation4 + $0x1]]  ;;  %s3971_s14 = sld [smem:[#allocation4 + $0x25]] }
  0x7a   : > { %294 = vst.msk [vmem:[#allocation2] sm:$0xff] %vm293_vm0, %v4552_v4  ;;  %295 = vst.msk [vmem:[#allocation2 + $0x8] sm:$0xff] %vm293_vm0, %v4552_v4  ;;  %v330_v6 = vld [vmem:[%s4782_s9 + $0x28] sm:$0xff]  ;;  %v331_v7 = vld [vmem:[%s4782_s9 + $0x30] sm:$0xff]  ;;  %s3972_s15 = sld [smem:[#allocation4 + $0x49]]  ;;  %s3973_s23 = sld [smem:[#allocation4 + $0x6d]] }
  0x7b   : > { %296 = vst.msk [vmem:[#allocation2 + $0x10] sm:$0xff] %vm293_vm0, %v4552_v4  ;;  %299 = vst.msk [vmem:[#allocation2 + $0x20] sm:$0xff] %vm293_vm0, %v4552_v4  ;;  %v332_v8 = vld [vmem:[%s4782_s9 + $0x38] sm:$0xff]  ;;  %s4553_s11 = smov 123   ;;  %s3974_s17 = sld [smem:[#allocation4 + $0x2]]  ;;  %vm311_vm3 = vcmask 179200  }
  0x7c   : > { %300 = vst.msk [vmem:[#allocation2 + $0x28] sm:$0xff] %vm293_vm0, %v4552_v4  ;;  %301 = vst.msk [vmem:[#allocation2 + $0x30] sm:$0xff] %vm293_vm0, %v4552_v4  ;;  %s3975_s26 = sld [smem:[#allocation4 + $0x26]]  ;;  %s3976_s27 = sld [smem:[#allocation4 + $0x4a]]  ;;  %vm314_vm4 = vcmask 177152   ;;  %vm2051_vm13 = vcmask 154648  }
  0x7d   : > { %303 = vst.msk [vmem:[#allocation2 + $0x40] sm:$0xff] %vm293_vm0, %v4552_v4  ;;  %304 = vst.msk [vmem:[#allocation2 + $0x48] sm:$0xff] %vm293_vm0, %v4552_v4  ;;  %343 = vrot.lane.b32.xlu0 %v326_v2, %s4551_s10  ;;  %347 = vrot.lane.b32.xlu1 %v328_v3, %s4551_s10  ;;  %s3977_s28 = sld [smem:[#allocation4 + $0x6e]]  ;;  %s4554_s12 = smov 118   ;;  %vm3781_vm14 = vcmask 130048  }
  0x7e   : > { %305 = vst.msk [vmem:[#allocation2 + $0x50] sm:$0xff] %vm293_vm0, %v4552_v4  ;;  %307 = vst.msk [vmem:[#allocation2 + $0x60] sm:$0xff] %vm293_vm0, %v4552_v4  ;;  %s3982_s13 = sld [smem:[#allocation4 + $0x4]]  ;;  %s3983_s6 = sld [smem:[#allocation4 + $0x28]] }
  0x7f   : > { %308 = vst.msk [vmem:[#allocation2 + $0x68] sm:$0xff] %vm293_vm0, %v4552_v4  ;;  %309 = vst.msk [vmem:[#allocation2 + $0x70] sm:$0xff] %vm293_vm0, %v4552_v4  ;;  %v401_v13 = vstv %s3970_s24  ;;  %v415_v18 = vstv %s3971_s14  ;;  %s3985_s24 = sld [smem:[#allocation4 + $0x70]]  ;;  %s3986_s14 = sld [smem:[#allocation4 + $0x5]] }
  0x80   : > { %298 = vst.msk [vmem:[#allocation2 + $0x18] sm:$0x3] %vm297_vm1, %v4552_v4  ;;  %302 = vst.msk [vmem:[#allocation2 + $0x38] sm:$0x3] %vm297_vm1, %v4552_v4  ;;  %v429_v24 = vstv %s3972_s15  ;;  %v443_v27 = vstv %s3973_s23  ;;  %s3987_s15 = sld [smem:[#allocation4 + $0x29]]  ;;  %s3988_s23 = sld [smem:[#allocation4 + $0x4d]] }
  0x81   : > { %306 = vst.msk [vmem:[#allocation2 + $0x58] sm:$0x3] %vm297_vm1, %v4552_v4  ;;  %310 = vst.msk [vmem:[#allocation2 + $0x78] sm:$0x3] %vm297_vm1, %v4552_v4  ;;  %349 = vrot.lane.b32.xlu0 %v329_v5, %s4551_s10  ;;  %351 = vrot.lane.b32.xlu1 %v330_v6, %s4551_s10  ;;  %v457_v30 = vstv %s3974_s17  ;;  %s3989_s17 = sld [smem:[#allocation4 + $0x71]]  ;;  %p7032_p5 = scmp.ne.s32.totalorder %s7023_s16, 0 }
  0x82   : > { %v471_v33 = vstv %s3975_s26  ;;  %v485_v36 = vstv %s3976_s27  ;;  %s3994_s26 = sld [smem:[#allocation4 + $0x7]]  ;;  %s3995_s27 = sld [smem:[#allocation4 + $0x2b]]  ;;  %312 = vst.msk [vmem:[#allocation3] sm:$0xff] %vm311_vm3, %v4552_v4  ;;  %313 = vst.msk [vmem:[#allocation3 + $0x8] sm:$0xff] %vm311_vm3, %v4552_v4 }
  0x83   : > { %v499_v39 = vstv %s3977_s28  ;;  %s3996_s28 = sld [smem:[#allocation4 + $0x4f]]  ;;  %316 = vst.msk [vmem:[#allocation3 + $0x18] sm:$0xff] %vm311_vm3, %v4552_v4  ;;  %317 = vst.msk [vmem:[#allocation3 + $0x20] sm:$0xff] %vm311_vm3, %v4552_v4 }
  0x84   : > { %v539_v43 = vstv %s3982_s13  ;;  %v553_v47 = vstv %s3983_s6  ;;  %s3997_s13 = sld [smem:[#allocation4 + $0x73]]  ;;  %s3998_s6 = sld [smem:[#allocation4 + $0x8]]  ;;  %319 = vst.msk [vmem:[#allocation3 + $0x30] sm:$0xff] %vm311_vm3, %v4552_v4  ;;  %320 = vst.msk [vmem:[#allocation3 + $0x38] sm:$0xff] %vm311_vm3, %v4552_v4 }
  0x85   : > { %353 = vrot.lane.b32.xlu0 %v331_v7, %s4551_s10  ;;  %355 = vrot.lane.b32.xlu1 %v332_v8, %s4551_s10  ;;  %s3984_s10 = sld [smem:[#allocation4 + $0x4c]]  ;;  %v581_v53 = vstv %s3985_s24  ;;  %v595_v56 = vstv %s3986_s14  ;;  %s4000_s24 = sld [smem:[#allocation4 + $0x50]]  ;;  %322 = vst.msk [vmem:[#allocation3 + $0x48] sm:$0xff] %vm311_vm3, %v4552_v4  ;;  %323 = vst.msk [vmem:[#allocation3 + $0x50] sm:$0xff] %vm311_vm3, %v4552_v4 }
  0x86   : > { %v609_v59 = vstv %s3987_s15  ;;  %v623_v62 = vstv %s3988_s23  ;;  %s4001_s14 = sld [smem:[#allocation4 + $0x74]]  ;;  %s4006_s15 = sld [smem:[#allocation4 + $0xa]]  ;;  %315 = vst.msk [vmem:[#allocation3 + $0x10] sm:$0x3f] %vm314_vm4, %v4552_v4  ;;  %318 = vst.msk [vmem:[#allocation3 + $0x28] sm:$0x3f] %vm314_vm4, %v4552_v4 }
  0x87   : > { %v637_v1 = vstv %s3989_s17  ;;  %s4007_s23 = sld [smem:[#allocation4 + $0x2e]]  ;;  %s4008_s17 = sld [smem:[#allocation4 + $0x52]]  ;;  %321 = vst.msk [vmem:[#allocation3 + $0x40] sm:$0x3f] %vm314_vm4, %v4552_v4  ;;  %324 = vst.msk [vmem:[#allocation3 + $0x58] sm:$0x3f] %vm314_vm4, %v4552_v4 }
  0x88   : > { %v677_v6 = vstv %s3994_s26  ;;  %s4009_s26 = sld [smem:[#allocation4 + $0x76]] }
  0x8b   : > { %v567_v50 = vstv %s3984_s10  ;;  %s3999_s10 = sld [smem:[#allocation4 + $0x2c]] }
  0xeb   : > { %v342_v9 = vpop.permute.xlu0 %341  ;;  %v346_v10 = vpop.permute.xlu1 %345 }
  0xec   : > { %366 = vst.msk [vmem:[#allocation2 + $0x5] sm:$0xff] %vm365_vm2, %v342_v9  ;;  %368 = vst.msk [vmem:[#allocation2 + $0x25] sm:$0xff] %vm365_vm2, %v346_v10  ;;  %v691_v10 = vstv %s3995_s27  ;;  %s4010_s27 = sld [smem:[#allocation4 + $0xb]] }
  0xef   : > { %v344_v11 = vpop.permute.xlu0 %343  ;;  %v348_v12 = vpop.permute.xlu1 %347 }
  0xf0   : > { %367 = vst.msk [vmem:[#allocation2 + $0xd] sm:$0xff] %vm365_vm2, %v344_v11  ;;  %369 = vst.msk [vmem:[#allocation2 + $0x2d] sm:$0xff] %vm365_vm2, %v348_v12 }
  0xf3   : > { %v4840_v14 = vld [vmem:[#allocation2] sm:$0xff]  ;;  %v350_v15 = vpop.permute.xlu0 %349  ;;  %v352_v16 = vpop.permute.xlu1 %351 }
  0xf4   : > { %v402_v17 = vmul.f32 %v401_v13, %v4840_v14  ;;  %370 = vst.msk [vmem:[#allocation2 + $0x45] sm:$0xff] %vm365_vm2, %v350_v15  ;;  %371 = vst.msk [vmem:[#allocation2 + $0x4d] sm:$0xff] %vm365_vm2, %v352_v16  ;;  %v416_v23 = vmul.f32 %v415_v18, %v4840_v14  ;;  %v430_v26 = vmul.f32 %v429_v24, %v4840_v14  ;;  %v4876_v42 = vld [vmem:[#allocation2 + $0x5] sm:$0xff] }
  0xf5   : > { %v444_v29 = vmul.f32 %v443_v27, %v4840_v14  ;;  %v458_v32 = vmul.f32 %v457_v30, %v4840_v14  ;;  %v472_v35 = vmul.f32 %v471_v33, %v4840_v14  ;;  %v486_v38 = vmul.f32 %v485_v36, %v4840_v14 }
  0xf6   : > { %406 = vrot.lane.b32.xlu0 %v402_v17, %s4553_s11  ;;  %v500_v41 = vmul.f32 %v499_v39, %v4840_v14  ;;  %v540_v45 = vmul.f32 %v539_v43, %v4876_v42  ;;  %v554_v49 = vmul.f32 %v553_v47, %v4876_v42  ;;  %v568_v52 = vmul.f32 %v567_v50, %v4876_v42 }
  0xf7   : > { %v4846_v19 = vld [vmem:[#allocation2 + $0x8] sm:$0xff]  ;;  %v354_v20 = vpop.permute.xlu0 %353  ;;  %v356_v21 = vpop.permute.xlu1 %355  ;;  %v582_v55 = vmul.f32 %v581_v53, %v4876_v42  ;;  %v596_v58 = vmul.f32 %v595_v56, %v4876_v42  ;;  %v610_v61 = vmul.f32 %v609_v59, %v4876_v42  ;;  %v624_v0 = vmul.f32 %v623_v62, %v4876_v42  ;;  %v4918_v9 = vld [vmem:[#allocation2 + $0x12] sm:$0xff] }
  0xf8   : > { %v403_v22 = vmul.f32 %v401_v13, %v4846_v19  ;;  %372 = vst.msk [vmem:[#allocation2 + $0x65] sm:$0xff] %vm365_vm2, %v354_v20  ;;  %373 = vst.msk [vmem:[#allocation2 + $0x6d] sm:$0xff] %vm365_vm2, %v356_v21  ;;  %v417_v25 = vmul.f32 %v415_v18, %v4846_v19  ;;  %v431_v28 = vmul.f32 %v429_v24, %v4846_v19  ;;  %v4882_v46 = vld [vmem:[#allocation2 + $0xd] sm:$0xff]  ;;  %v705_v13 = vstv %s3996_s28  ;;  %s4011_s28 = sld [smem:[#allocation4 + $0x2f]] }
  0xf9   : > { %v445_v31 = vmul.f32 %v443_v27, %v4846_v19  ;;  %v459_v34 = vmul.f32 %v457_v30, %v4846_v19  ;;  %v473_v37 = vmul.f32 %v471_v33, %v4846_v19  ;;  %v487_v40 = vmul.f32 %v485_v36, %v4846_v19  ;;  %v4912_v5 = vld [vmem:[#allocation2 + $0xa] sm:$0xff] }
  0xfa   : > { %408 = vrot.lane.b32.xlu1 %v403_v22, %s4553_s11  ;;  %420 = vrot.lane.b32.xlu0 %v416_v23, %s4553_s11  ;;  %v501_v44 = vmul.f32 %v499_v39, %v4846_v19  ;;  %v541_v48 = vmul.f32 %v539_v43, %v4882_v46  ;;  %v555_v51 = vmul.f32 %v553_v47, %v4882_v46  ;;  %v719_v17 = vstv %s3997_s13  ;;  %s4012_s13 = sld [smem:[#allocation4 + $0x53]] }
  0xfb   : > { %v569_v54 = vmul.f32 %v567_v50, %v4882_v46  ;;  %v583_v57 = vmul.f32 %v581_v53, %v4882_v46  ;;  %v597_v60 = vmul.f32 %v595_v56, %v4882_v46  ;;  %v611_v63 = vmul.f32 %v609_v59, %v4882_v46 }
  0xfc   : > { %v625_v2 = vmul.f32 %v623_v62, %v4882_v46  ;;  %v638_v3 = vmul.f32 %v637_v1, %v4876_v42  ;;  %v639_v7 = vmul.f32 %v637_v1, %v4882_v46  ;;  %v678_v8 = vmul.f32 %v677_v6, %v4912_v5 }
  0xfd   : > { %v679_v11 = vmul.f32 %v677_v6, %v4918_v9  ;;  %v692_v12 = vmul.f32 %v691_v10, %v4912_v5  ;;  %v693_v15 = vmul.f32 %v691_v10, %v4918_v9  ;;  %v706_v16 = vmul.f32 %v705_v13, %v4912_v5 }
  0xfe   : > { %422 = vrot.lane.b32.xlu1 %v417_v25, %s4553_s11  ;;  %434 = vrot.lane.b32.xlu0 %v430_v26, %s4553_s11  ;;  %v707_v18 = vmul.f32 %v705_v13, %v4918_v9  ;;  %v720_v20 = vmul.f32 %v719_v17, %v4912_v5  ;;  %v733_v21 = vstv %s3998_s6  ;;  %v721_v22 = vmul.f32 %v719_v17, %v4918_v9  ;;  %s4972_s6 = sld [smem:[#allocation4 + $0x77]] }
  0xff   : > { %v734_v23 = vmul.f32 %v733_v21, %v4912_v5  ;;  %v747_v24 = vstv %s3999_s10  ;;  %v735_v25 = vmul.f32 %v733_v21, %v4918_v9  ;;  %v761_v27 = vstv %s4000_s24  ;;  %s4978_s10 = sld [smem:[#allocation4 + $0xd]]  ;;  %s4980_s24 = sld [smem:[#allocation4]] }
 0x100   : > { %v748_v26 = vmul.f32 %v747_v24, %v4912_v5  ;;  %v775_v30 = vstv %s4001_s14  ;;  %v763_v33 = vmul.f32 %v761_v27, %v4918_v9  ;;  %v900_v56 = vstv %s4012_s13  ;;  %s4987_s14 = sld [smem:[#allocation4 + $0x31]] }
 0x101   : > { %v777_v36 = vmul.f32 %v775_v30, %v4918_v9  ;;  %s5011_s13 = sld [smem:[#allocation4 + $0x79]] }
 0x102   : > { %436 = vrot.lane.b32.xlu1 %v431_v28, %s4553_s11  ;;  %448 = vrot.lane.b32.xlu0 %v444_v29, %s4553_s11  ;;  %v749_v28 = vmul.f32 %v747_v24, %v4918_v9  ;;  %v762_v29 = vmul.f32 %v761_v27, %v4912_v5 }
 0x105   : > { %v377_v6 = vstv %s4980_s24  ;;  %s5044_s24 = sld [smem:[#allocation4 + $0x6f]] }
 0x106   : > { %450 = vrot.lane.b32.xlu1 %v445_v31, %s4553_s11  ;;  %462 = vrot.lane.b32.xlu0 %v458_v32, %s4554_s12  ;;  %v4946_v31 = vld [vmem:[#allocation2 + $0x20] sm:$0xff]  ;;  %v816_v32 = vstv %s4006_s15  ;;  %s4989_s15 = sld [smem:[#allocation4 + $0x24]]  ;;  %v378_v13 = vmul.f32 %v377_v6, %v4840_v14 }
 0x10a   : > { %464 = vrot.lane.b32.xlu1 %v459_v34, %s4554_s12  ;;  %476 = vrot.lane.b32.xlu0 %v472_v35, %s4554_s12  ;;  %v776_v34 = vmul.f32 %v775_v30, %v4912_v5  ;;  %v817_v35 = vmul.f32 %v816_v32, %v4946_v31 }
 0x10e   : > { %478 = vrot.lane.b32.xlu1 %v473_v37, %s4554_s12  ;;  %490 = vrot.lane.b32.xlu0 %v486_v38, %s4554_s12  ;;  %v4954_v37 = vld [vmem:[#allocation2 + $0x28] sm:$0xff]  ;;  %v830_v38 = vstv %s4007_s23  ;;  %s4993_s23 = sld [smem:[#allocation4 + $0x3]] }
 0x10f   : > { %v818_v39 = vmul.f32 %v816_v32, %v4954_v37  ;;  %v832_v43 = vmul.f32 %v830_v38, %v4954_v37 }
 0x112   : > { %492 = vrot.lane.b32.xlu1 %v487_v40, %s4554_s12  ;;  %504 = vrot.lane.b32.xlu0 %v500_v41, %s4554_s12  ;;  %v831_v40 = vmul.f32 %v830_v38, %v4946_v31  ;;  %v844_v41 = vstv %s4008_s17  ;;  %s4995_s17 = sld [smem:[#allocation4 + $0x48]] }
 0x113   : > { %v846_v47 = vmul.f32 %v844_v41, %v4954_v37 }
 0x114   : > { %v515_v17 = vstv %s4993_s23  ;;  %s5086_s23 = sld [smem:[#allocation4 + $0x7a]] }
 0x116   : > { %506 = vrot.lane.b32.xlu1 %v501_v44, %s4554_s12  ;;  %544 = vrot.lane.b32.xlu0 %v540_v45, %s4553_s11  ;;  %v845_v44 = vmul.f32 %v844_v41, %v4946_v31  ;;  %v858_v45 = vstv %s4009_s26  ;;  %s4999_s26 = sld [smem:[#allocation4 + $0x55]] }
 0x117   : > { %v860_v50 = vmul.f32 %v858_v45, %v4954_v37 }
 0x11a   : > { %546 = vrot.lane.b32.xlu1 %v541_v48, %s4553_s11  ;;  %558 = vrot.lane.b32.xlu0 %v554_v49, %s4553_s11  ;;  %v859_v48 = vmul.f32 %v858_v45, %v4946_v31  ;;  %v872_v49 = vstv %s4010_s27  ;;  %s5007_s27 = sld [smem:[#allocation4 + $0x6c]] }
 0x11e   : > { %560 = vrot.lane.b32.xlu1 %v555_v51, %s4553_s11  ;;  %572 = vrot.lane.b32.xlu0 %v568_v52, %s4553_s11  ;;  %v873_v51 = vmul.f32 %v872_v49, %v4946_v31  ;;  %v886_v52 = vstv %s4011_s28  ;;  %s5009_s28 = sld [smem:[#allocation4 + $0x27]] }
 0x11f   : > { %v888_v59 = vmul.f32 %v886_v52, %v4954_v37 }
 0x120   : > { %v395_v30 = vstv %s5007_s27  ;;  %s5114_s27 = sld [smem:[#allocation4 + $0x6]] }
 0x122   : > { %574 = vrot.lane.b32.xlu1 %v569_v54, %s4553_s11  ;;  %586 = vrot.lane.b32.xlu0 %v582_v55, %s4553_s11  ;;  %v874_v54 = vmul.f32 %v872_v49, %v4954_v37  ;;  %v887_v55 = vmul.f32 %v886_v52, %v4946_v31 }
 0x124   : > { %v521_v32 = vstv %s5009_s28  ;;  %s5121_s28 = sld [smem:[#allocation4 + $0x58]] }
 0x125   : > { %v522_v49 = vmul.f32 %v521_v32, %v4876_v42 }
 0x126   : > { %588 = vrot.lane.b32.xlu1 %v583_v57, %s4553_s11  ;;  %600 = vrot.lane.b32.xlu0 %v596_v58, %s4554_s12 }
 0x12a   : > { %602 = vrot.lane.b32.xlu1 %v597_v60, %s4554_s12  ;;  %614 = vrot.lane.b32.xlu0 %v610_v61, %s4554_s12  ;;  %v901_v60 = vmul.f32 %v900_v56, %v4946_v31  ;;  %v914_v61 = vstv %s4972_s6  ;;  %s5026_s6 = sld [smem:[#allocation4 + $0xe]] }
 0x12b   : > { %v915_v1 = vmul.f32 %v914_v61, %v4946_v31  ;;  %v916_v10 = vmul.f32 %v914_v61, %v4954_v37 }
 0x12e   : > { %616 = vrot.lane.b32.xlu1 %v611_v63, %s4554_s12  ;;  %628 = vrot.lane.b32.xlu0 %v624_v0, %s4554_s12  ;;  %v902_v0 = vmul.f32 %v900_v56, %v4954_v37 }
 0x132   : > { %630 = vrot.lane.b32.xlu1 %v625_v2, %s4554_s12  ;;  %642 = vrot.lane.b32.xlu0 %v638_v3, %s4554_s12  ;;  %v5001_v2 = vld [vmem:[#allocation2 + $0x25] sm:$0xff]  ;;  %v954_v3 = vstv %s4978_s10  ;;  %s5029_s10 = sld [smem:[#allocation4 + $0x4b]] }
 0x136   : > { %644 = vrot.lane.b32.xlu1 %v639_v7, %s4554_s12  ;;  %682 = vrot.lane.b32.xlu0 %v678_v8, %s4553_s11 }
 0x13a   : > { %684 = vrot.lane.b32.xlu1 %v679_v11, %s4553_s11  ;;  %696 = vrot.lane.b32.xlu0 %v692_v12, %s4553_s11  ;;  %v955_v11 = vmul.f32 %v954_v3, %v5001_v2  ;;  %v5019_v12 = vld [vmem:[#allocation2 + $0x2d] sm:$0xff] }
 0x13e   : > { %698 = vrot.lane.b32.xlu1 %v693_v15, %s4553_s11  ;;  %710 = vrot.lane.b32.xlu0 %v706_v16, %s4553_s11  ;;  %v968_v15 = vstv %s4987_s14  ;;  %v383_v16 = vstv %s4989_s15  ;;  %s5053_s14 = sld [smem:[#allocation4 + $0x32]]  ;;  %s5069_s15 = sld [smem:[#allocation4 + $0x56]] }
 0x13f   : > { %v969_v24 = vmul.f32 %v968_v15, %v5001_v2  ;;  %v384_v27 = vmul.f32 %v383_v16, %v4840_v14  ;;  %v385_v38 = vmul.f32 %v383_v16, %v4846_v19 }
 0x142   : > { %712 = vrot.lane.b32.xlu1 %v707_v18, %s4553_s11  ;;  %724 = vrot.lane.b32.xlu0 %v720_v20, %s4553_s11  ;;  %v389_v20 = vstv %s4995_s17  ;;  %s5100_s17 = sld [smem:[#allocation4 + $0x10]] }
 0x143   : > { %v391_v56 = vmul.f32 %v389_v20, %v4846_v19 }
 0x146   : > { %726 = vrot.lane.b32.xlu1 %v721_v22, %s4553_s11  ;;  %738 = vrot.lane.b32.xlu0 %v734_v23, %s4554_s12  ;;  %v956_v23 = vmul.f32 %v954_v3, %v5019_v12 }
 0x14a   : > { %740 = vrot.lane.b32.xlu1 %v735_v25, %s4554_s12  ;;  %752 = vrot.lane.b32.xlu0 %v748_v26, %s4554_s12  ;;  %v982_v25 = vstv %s4999_s26  ;;  %v379_v26 = vmul.f32 %v377_v6, %v4846_v19  ;;  %s5110_s26 = sld [smem:[#allocation4 + $0x34]] }
 0x14e   : > { %754 = vrot.lane.b32.xlu1 %v749_v28, %s4554_s12  ;;  %766 = vrot.lane.b32.xlu0 %v762_v29, %s4554_s12  ;;  %v516_v29 = vmul.f32 %v515_v17, %v4876_v42 }
 0x152   : > { %768 = vrot.lane.b32.xlu1 %v763_v33, %s4554_s12  ;;  %780 = vrot.lane.b32.xlu0 %v776_v34, %s4554_s12 }
 0x156   : > { %782 = vrot.lane.b32.xlu1 %v777_v36, %s4554_s12  ;;  %821 = vrot.lane.b32.xlu0 %v817_v35, %s4553_s11  ;;  %v996_v35 = vstv %s5011_s13  ;;  %s5125_s13 = sld [smem:[#allocation4 + $0x2a]] }
 0x157   : > { %v997_v61 = vmul.f32 %v996_v35, %v5001_v2 }
 0x15a   : > { %823 = vrot.lane.b32.xlu1 %v818_v39, %s4553_s11  ;;  %835 = vrot.lane.b32.xlu0 %v831_v40, %s4553_s11  ;;  %v390_v39 = vmul.f32 %v389_v20, %v4840_v14  ;;  %v1024_v20 = vstv %s5053_s14  ;;  %s5149_s14 = sld [smem:[#allocation4 + $0x72]] }
 0x15e   : > { %837 = vrot.lane.b32.xlu1 %v832_v43, %s4553_s11  ;;  %849 = vrot.lane.b32.xlu0 %v845_v44, %s4553_s11  ;;  %v970_v43 = vmul.f32 %v968_v15, %v5019_v12  ;;  %v983_v44 = vmul.f32 %v982_v25, %v5001_v2 }
 0x162   : > { %851 = vrot.lane.b32.xlu1 %v846_v47, %s4553_s11  ;;  %863 = vrot.lane.b32.xlu0 %v859_v48, %s4553_s11  ;;  %v517_v48 = vmul.f32 %v515_v17, %v4882_v46  ;;  %v998_v17 = vmul.f32 %v996_v35, %v5019_v12  ;;  %v1026_v35 = vmul.f32 %v1024_v20, %v5019_v12 }
 0x166   : > { %865 = vrot.lane.b32.xlu1 %v860_v50, %s4553_s11  ;;  %877 = vrot.lane.b32.xlu0 %v873_v51, %s4554_s12  ;;  %v1010_v50 = vstv %s5026_s6  ;;  %v527_v51 = vstv %s5029_s10  ;;  %s5129_s6 = sld [smem:[#allocation4 + $0x7c]]  ;;  %s5137_s10 = sld [smem:[#allocation4 + $0x4e]] }
 0x168   : > { %v407_v53 = vpop.permute.xlu0 %406 }
 0x169   : > { %v412_v18 = vadd.f32 %v407_v53, %v378_v13  ;;  %v397_v13 = vmul.f32 %v395_v30, %v4846_v19 }
 0x16a   : > { %879 = vrot.lane.b32.xlu1 %v874_v54, %s4554_s12  ;;  %891 = vrot.lane.b32.xlu0 %v887_v55, %s4554_s12 }
 0x16c   : > { %v409_v57 = vpop.permute.xlu1 %408  ;;  %v421_v58 = vpop.permute.xlu0 %420 }
 0x16d   : > { %v413_v33 = vadd.f32 %v409_v57, %v379_v26  ;;  %v426_v34 = vadd.f32 %v421_v58, %v384_v27  ;;  %v396_v57 = vmul.f32 %v395_v30, %v4840_v14  ;;  %v533_v14 = vstv %s5044_s24  ;;  %s5142_s24 = sld [smem:[#allocation4 + $0x11]] }
 0x16e   : > { %893 = vrot.lane.b32.xlu1 %v888_v59, %s4554_s12  ;;  %905 = vrot.lane.b32.xlu0 %v901_v60, %s4554_s12  ;;  %v984_v60 = vmul.f32 %v982_v25, %v5019_v12 }
 0x170   : > { %v423_v62 = vpop.permute.xlu1 %422  ;;  %v435_v63 = vpop.permute.xlu0 %434 }
 0x171   : > { %v427_v52 = vadd.f32 %v423_v62, %v385_v38  ;;  %v440_v53 = vadd.f32 %v435_v63, %v390_v39  ;;  %v523_v62 = vmul.f32 %v521_v32, %v4882_v46  ;;  %v528_v63 = vmul.f32 %v527_v51, %v4876_v42 }
 0x172   : > { %907 = vrot.lane.b32.xlu1 %v902_v0, %s4554_s12  ;;  %919 = vrot.lane.b32.xlu0 %v915_v1, %s4554_s12  ;;  %v1038_v32 = vstv %s5069_s15  ;;  %v1052_v39 = vstv %s5086_s23  ;;  %s5158_s15 = sld [smem:[#allocation4 + $0x35]]  ;;  %s5174_s23 = sld [smem:[#allocation4 + $0x59]] }
 0x173   : > { %v1039_v38 = vmul.f32 %v1038_v32, %v5001_v2 }
 0x174   : > { %v5013_v7 = vpop.permute.xlu1 %436  ;;  %v5015_v8 = vpop.permute.xlu0 %448 }
 0x175   : > { %v441_v3 = vadd.f32 %v5013_v7, %v391_v56  ;;  %v454_v6 = vadd.f32 %v5015_v8, %v396_v57  ;;  %v529_v7 = vmul.f32 %v527_v51, %v4882_v46  ;;  %v534_v8 = vmul.f32 %v533_v14, %v4876_v42  ;;  %v5131_v51 = vld [vmem:[#allocation2 + $0x32] sm:$0xff] }
 0x176   : > { %921 = vrot.lane.b32.xlu1 %v916_v10, %s4554_s12  ;;  %959 = vrot.lane.b32.xlu0 %v955_v11, %s4553_s11  ;;  %v535_v42 = vmul.f32 %v533_v14, %v4882_v46 }
 0x178   : > { %v5032_v21 = vpop.permute.xlu1 %450  ;;  %v463_v22 = vpop.permute.xlu0 %462 }
 0x179   : > { %v468_v28 = vadd.f32 %v463_v22, %v412_v18  ;;  %v1011_v18 = vmul.f32 %v1010_v50, %v5001_v2  ;;  %v455_v19 = vadd.f32 %v5032_v21, %v397_v13 }
 0x17a   : > { %961 = vrot.lane.b32.xlu1 %v956_v23, %s4553_s11  ;;  %973 = vrot.lane.b32.xlu0 %v969_v24, %s4553_s11 }
 0x17b   : > { %v5047_v36 = vadd.f32 %v516_v29, %v468_v28  ;;  %v1012_v28 = vmul.f32 %v1010_v50, %v5019_v12  ;;  %v1025_v29 = vmul.f32 %v1024_v20, %v5001_v2 }
 0x17c   : > { %v465_v40 = vpop.permute.xlu1 %464  ;;  %v477_v41 = vpop.permute.xlu0 %476 }
 0x17d   : > { %v469_v45 = vadd.f32 %v465_v40, %v413_v33  ;;  %v482_v47 = vadd.f32 %v477_v41, %v426_v34  ;;  %v1040_v41 = vmul.f32 %v1038_v32, %v5019_v12 }
 0x17e   : > { %975 = vrot.lane.b32.xlu1 %v970_v43, %s4553_s11  ;;  %987 = vrot.lane.b32.xlu0 %v983_v44, %s4553_s11  ;;  %v1053_v43 = vmul.f32 %v1052_v39, %v5001_v2  ;;  %v5118_v44 = vld [vmem:[#allocation2 + $0x2a] sm:$0xff] }
 0x17f   : > { %v5061_v54 = vadd.f32 %v517_v48, %v469_v45  ;;  %v5063_v55 = vadd.f32 %v522_v49, %v482_v47  ;;  %v1092_v45 = vstv %s5100_s17  ;;  %v1054_v49 = vmul.f32 %v1052_v39, %v5019_v12  ;;  %s5190_s17 = sld [smem:[#allocation4 + $0x7d]] }
 0x180   : > { %v479_v58 = vpop.permute.xlu1 %478  ;;  %v491_v59 = vpop.permute.xlu0 %490  ;;  %v1093_v50 = vmul.f32 %v1092_v45, %v5118_v44 }
 0x181   : > { %v483_v0 = vadd.f32 %v479_v58, %v427_v52  ;;  %v496_v1 = vadd.f32 %v491_v59, %v440_v53  ;;  %v1106_v52 = vstv %s5110_s26  ;;  %v653_v53 = vstv %s5114_s27  ;;  %s5204_s26 = sld [smem:[#allocation4 + $0x13]]  ;;  %s5214_s27 = sld [smem:[#allocation4 + $0x37]] }
 0x182   : > { %989 = vrot.lane.b32.xlu1 %v984_v60, %s4553_s11  ;;  %1001 = vrot.lane.b32.xlu0 %v997_v61, %s4553_s11  ;;  %v1094_v59 = vmul.f32 %v1092_v45, %v5131_v51  ;;  %v1107_v60 = vmul.f32 %v1106_v52, %v5118_v44  ;;  %v1108_v13 = vmul.f32 %v1106_v52, %v5131_v51 }
 0x183   : > { %v5078_v10 = vadd.f32 %v523_v62, %v483_v0  ;;  %v5080_v11 = vadd.f32 %v528_v63, %v496_v1  ;;  %v1120_v0 = vstv %s5121_s28  ;;  %v654_v1 = vmul.f32 %v653_v53, %v4912_v5  ;;  %s5218_s28 = sld [smem:[#allocation4 + $0x9]] }
 0x184   : > { %v493_v15 = vpop.permute.xlu1 %492  ;;  %v505_v16 = vpop.permute.xlu0 %504  ;;  %v659_v62 = vstv %s5125_s13  ;;  %v655_v20 = vmul.f32 %v653_v53, %v4918_v9  ;;  %s5225_s13 = sld [smem:[#allocation4 + $0x5b]] }
 0x185   : > { %v497_v22 = vadd.f32 %v493_v15, %v441_v3  ;;  %v510_v23 = vadd.f32 %v505_v16, %v454_v6  ;;  %v1121_v15 = vmul.f32 %v1120_v0, %v5118_v44  ;;  %v1134_v16 = vstv %s5129_s6  ;;  %s5229_s6 = sld [smem:[#allocation4 + $0x2d]] }
 0x186   : > { %1003 = vrot.lane.b32.xlu1 %v998_v17, %s4553_s11  ;;  %1015 = vrot.lane.b32.xlu0 %v1011_v18, %s4554_s12 }
 0x187   : > { %v5093_v24 = vadd.f32 %v529_v7, %v497_v22  ;;  %v5095_v25 = vadd.f32 %v534_v8, %v510_v23 }
 0x188   : > { %v507_v26 = vpop.permute.xlu1 %506  ;;  %v545_v27 = vpop.permute.xlu0 %544 }
 0x189   : > { %v511_v30 = vadd.f32 %v507_v26, %v455_v19  ;;  %v550_v56 = vadd.f32 %v545_v27, %v5047_v36  ;;  %v1122_v27 = vmul.f32 %v1120_v0, %v5131_v51 }
 0x18a   : > { %1017 = vrot.lane.b32.xlu1 %v1012_v28, %s4554_s12  ;;  %1029 = vrot.lane.b32.xlu0 %v1025_v29, %s4554_s12  ;;  %v1135_v28 = vmul.f32 %v1134_v16, %v5118_v44  ;;  %v1148_v29 = vstv %s5142_s24  ;;  %s5241_s24 = sld [smem:[#allocation4 + $0x51]] }
 0x18b   : > { %v5105_v21 = vadd.f32 %v535_v42, %v511_v30  ;;  %v671_v42 = vstv %s5149_s14  ;;  %s5246_s14 = sld [smem:[#allocation4 + $0x14]] }
 0x18c   : > { %v547_v33 = vpop.permute.xlu1 %546  ;;  %v559_v34 = vpop.permute.xlu0 %558 }
 0x18d   : > { %v551_v36 = vadd.f32 %v547_v33, %v5061_v54  ;;  %v564_v63 = vadd.f32 %v559_v34, %v5063_v55  ;;  %v660_v54 = vmul.f32 %v659_v62, %v4912_v5  ;;  %v665_v55 = vstv %s5137_s10  ;;  %s5233_s10 = sld [smem:[#allocation4 + $0x7f]] }
 0x18e   : > { %1031 = vrot.lane.b32.xlu1 %v1026_v35, %s4554_s12  ;;  %1043 = vrot.lane.b32.xlu0 %v1039_v38, %s4554_s12 }
 0x190   : > { %v561_v46 = vpop.permute.xlu1 %560  ;;  %v573_v40 = vpop.permute.xlu0 %572 }
 0x191   : > { %v565_v22 = vadd.f32 %v561_v46, %v5078_v10  ;;  %v578_v23 = vadd.f32 %v573_v40, %v5080_v11  ;;  %v661_v10 = vmul.f32 %v659_v62, %v4918_v9  ;;  %v666_v11 = vmul.f32 %v665_v55, %v4912_v5 }
 0x192   : > { %1045 = vrot.lane.b32.xlu1 %v1040_v41, %s4554_s12  ;;  %1057 = vrot.lane.b32.xlu0 %v1053_v43, %s4554_s12  ;;  %v1136_v40 = vmul.f32 %v1134_v16, %v5131_v51  ;;  %v1149_v41 = vmul.f32 %v1148_v29, %v5118_v44  ;;  %v1162_v43 = vstv %s5158_s15  ;;  %v1190_v62 = vstv %s5190_s17  ;;  %s5253_s15 = sld [smem:[#allocation4 + $0x75]]  ;;  %s5278_s17 = sld [smem:[#allocation4 + $0x5c]] }
 0x193   : > { %v1164_v0 = vmul.f32 %v1162_v43, %v5131_v51 }
 0x194   : > { %v575_v47 = vpop.permute.xlu1 %574  ;;  %v587_v48 = vpop.permute.xlu0 %586 }
 0x195   : > { %v579_v33 = vadd.f32 %v575_v47, %v5093_v24  ;;  %v592_v34 = vadd.f32 %v587_v48, %v5095_v25  ;;  %v667_v24 = vmul.f32 %v665_v55, %v4918_v9  ;;  %v672_v25 = vmul.f32 %v671_v42, %v4912_v5 }
 0x196   : > { %1059 = vrot.lane.b32.xlu1 %v1054_v49, %s4554_s12  ;;  %1097 = vrot.lane.b32.xlu0 %v1093_v50, %s4553_s11  ;;  %v673_v5 = vmul.f32 %v671_v42, %v4918_v9  ;;  %v792_v55 = vstv %s5218_s28  ;;  %s5318_s28 = sld [smem:[#allocation4 + $0x3a]] }
 0x198   : > { %v589_v57 = vpop.permute.xlu1 %588  ;;  %v601_v58 = vpop.permute.xlu0 %600 }
 0x199   : > { %v606_v61 = vadd.f32 %v601_v58, %v550_v56  ;;  %v593_v47 = vadd.f32 %v589_v57, %v5105_v21  ;;  %v1150_v56 = vmul.f32 %v1148_v29, %v5131_v51  ;;  %v1163_v58 = vmul.f32 %v1162_v43, %v5118_v44 }
 0x19a   : > { %1099 = vrot.lane.b32.xlu1 %v1094_v59, %s4553_s11  ;;  %1111 = vrot.lane.b32.xlu0 %v1107_v60, %s4553_s11  ;;  %v1176_v60 = vstv %s5174_s23  ;;  %v1259_v29 = vstv %s5225_s13  ;;  %s5262_s23 = sld [smem:[#allocation4 + $0x38]]  ;;  %v794_v43 = vmul.f32 %v792_v55, %v4954_v37  ;;  %s5322_s13 = sld [smem:[#allocation4 + $0xc]] }
 0x19b   : > { %v5153_v14 = vadd.f32 %v654_v1, %v606_v61  ;;  %v1177_v1 = vmul.f32 %v1176_v60, %v5118_v44 }
 0x19c   : > { %v603_v3 = vpop.permute.xlu1 %602  ;;  %v615_v6 = vpop.permute.xlu0 %614 }
 0x19d   : > { %v607_v17 = vadd.f32 %v603_v3, %v551_v36  ;;  %v620_v18 = vadd.f32 %v615_v6, %v564_v63  ;;  %v1178_v63 = vmul.f32 %v1176_v60, %v5131_v51  ;;  %v1191_v3 = vmul.f32 %v1190_v62, %v5118_v44  ;;  %v5222_v6 = vld [vmem:[#allocation2 + $0x40] sm:$0xff] }
 0x19e   : > { %1113 = vrot.lane.b32.xlu1 %v1108_v13, %s4553_s11  ;;  %1125 = vrot.lane.b32.xlu0 %v1121_v15, %s4553_s11  ;;  %v1231_v13 = vstv %s5204_s26  ;;  %s5294_s26 = sld [smem:[#allocation4 + $0x80]] }
 0x19f   : > { %v5167_v7 = vadd.f32 %v655_v20, %v607_v17  ;;  %v5169_v8 = vadd.f32 %v660_v54, %v620_v18  ;;  %v1192_v17 = vmul.f32 %v1190_v62, %v5131_v51  ;;  %v1232_v18 = vmul.f32 %v1231_v13, %v5222_v6  ;;  %v5235_v20 = vld [vmem:[#allocation2 + $0x48] sm:$0xff] }
 0x1a0   : > { %v617_v19 = vpop.permute.xlu1 %616  ;;  %v629_v26 = vpop.permute.xlu0 %628  ;;  %v1245_v54 = vstv %s5214_s27  ;;  %s5308_s27 = sld [smem:[#allocation4 + $0x16]] }
 0x1a1   : > { %v621_v30 = vadd.f32 %v617_v19, %v565_v22  ;;  %v634_v32 = vadd.f32 %v629_v26, %v578_v23  ;;  %v1233_v26 = vmul.f32 %v1231_v13, %v5235_v20 }
 0x1a2   : > { %1127 = vrot.lane.b32.xlu1 %v1122_v27, %s4553_s11  ;;  %1139 = vrot.lane.b32.xlu0 %v1135_v28, %s4553_s11  ;;  %v1246_v27 = vmul.f32 %v1245_v54, %v5222_v6 }
 0x1a3   : > { %v5183_v35 = vadd.f32 %v661_v10, %v621_v30  ;;  %v5185_v38 = vadd.f32 %v666_v11, %v634_v32  ;;  %v793_v30 = vmul.f32 %v792_v55, %v4946_v31  ;;  %v798_v32 = vstv %s5229_s6  ;;  %s5329_s6 = sld [smem:[#allocation4 + $0x5e]] }
 0x1a4   : > { %v631_v39 = vpop.permute.xlu1 %630  ;;  %v643_v46 = vpop.permute.xlu0 %642 }
 0x1a5   : > { %v635_v45 = vadd.f32 %v631_v39, %v579_v33  ;;  %v648_v49 = vadd.f32 %v643_v46, %v592_v34  ;;  %v1247_v34 = vmul.f32 %v1245_v54, %v5235_v20  ;;  %v1260_v39 = vmul.f32 %v1259_v29, %v5222_v6 }
 0x1a6   : > { %1141 = vrot.lane.b32.xlu1 %v1136_v40, %s4553_s11  ;;  %1153 = vrot.lane.b32.xlu0 %v1149_v41, %s4554_s12  ;;  %v1273_v46 = vstv %s5233_s10  ;;  %s5333_s10 = sld [smem:[#allocation4 + $0x30]] }
 0x1a7   : > { %v5197_v48 = vadd.f32 %v667_v24, %v635_v45  ;;  %v5199_v50 = vadd.f32 %v672_v25, %v648_v49 }
 0x1a8   : > { %v645_v52 = vpop.permute.xlu1 %644  ;;  %v683_v53 = vpop.permute.xlu0 %682 }
 0x1a9   : > { %v649_v59 = vadd.f32 %v645_v52, %v593_v47  ;;  %v688_v22 = vadd.f32 %v683_v53, %v5153_v14  ;;  %v1261_v53 = vmul.f32 %v1259_v29, %v5235_v20 }
 0x1aa   : > { %1155 = vrot.lane.b32.xlu1 %v1150_v56, %s4554_s12  ;;  %1167 = vrot.lane.b32.xlu0 %v1163_v58, %s4554_s12  ;;  %v1274_v56 = vmul.f32 %v1273_v46, %v5222_v6  ;;  %v1287_v58 = vstv %s5246_s14  ;;  %s5345_s14 = sld [smem:[#allocation4 + $0x54]] }
 0x1ab   : > { %v5209_v21 = vadd.f32 %v673_v5, %v649_v59  ;;  %v810_v5 = vstv %s5253_s15  ;;  %s5350_s15 = sld [smem:[#allocation4 + $0x17]] }
 0x1ac   : > { %v685_v57 = vpop.permute.xlu1 %684  ;;  %v697_v61 = vpop.permute.xlu0 %696 }
 0x1ad   : > { %v689_v14 = vadd.f32 %v685_v57, %v5167_v7  ;;  %v702_v10 = vadd.f32 %v697_v61, %v5169_v8  ;;  %v799_v7 = vmul.f32 %v798_v32, %v4946_v31  ;;  %v804_v8 = vstv %s5241_s24  ;;  %s5337_s24 = sld [smem:[#allocation4 + $0x82]] }
 0x1ae   : > { %1169 = vrot.lane.b32.xlu1 %v1164_v0, %s4554_s12  ;;  %1181 = vrot.lane.b32.xlu0 %v1177_v1, %s4554_s12 }
 0x1b0   : > { %v699_v9 = vpop.permute.xlu1 %698  ;;  %v711_v36 = vpop.permute.xlu0 %710 }
 0x1b1   : > { %v703_v45 = vadd.f32 %v699_v9, %v5183_v35  ;;  %v716_v49 = vadd.f32 %v711_v36, %v5185_v38  ;;  %v800_v35 = vmul.f32 %v798_v32, %v4954_v37  ;;  %v805_v38 = vmul.f32 %v804_v8, %v4946_v31 }
 0x1b2   : > { %1183 = vrot.lane.b32.xlu1 %v1178_v63, %s4554_s12  ;;  %1195 = vrot.lane.b32.xlu0 %v1191_v3, %s4554_s12  ;;  %v1275_v36 = vmul.f32 %v1273_v46, %v5235_v20  ;;  %v1288_v63 = vmul.f32 %v1287_v58, %v5222_v6  ;;  %v1301_v3 = vstv %s5262_s23  ;;  %v1329_v32 = vstv %s5294_s26  ;;  %s5357_s23 = sld [smem:[#allocation4 + $0x78]]  ;;  %s5382_s26 = sld [smem:[#allocation4 + $0x5f]] }
 0x1b3   : > { %v1303_v29 = vmul.f32 %v1301_v3, %v5235_v20 }
 0x1b4   : > { %v713_v15 = vpop.permute.xlu1 %712  ;;  %v725_v16 = vpop.permute.xlu0 %724 }
 0x1b5   : > { %v717_v57 = vadd.f32 %v713_v15, %v5197_v48  ;;  %v730_v61 = vadd.f32 %v725_v16, %v5199_v50  ;;  %v806_v48 = vmul.f32 %v804_v8, %v4954_v37  ;;  %v811_v50 = vmul.f32 %v810_v5, %v4946_v31 }
 0x1b6   : > { %1197 = vrot.lane.b32.xlu1 %v1192_v17, %s4554_s12  ;;  %1236 = vrot.lane.b32.xlu0 %v1232_v18, %s4553_s11  ;;  %v812_v31 = vmul.f32 %v810_v5, %v4954_v37  ;;  %v930_v8 = vstv %s5322_s13  ;;  %s5422_s13 = sld [smem:[#allocation4 + $0x3d]] }
 0x1b8   : > { %v727_v23 = vpop.permute.xlu1 %726  ;;  %v739_v19 = vpop.permute.xlu0 %738 }
 0x1b9   : > { %v744_v28 = vadd.f32 %v739_v19, %v688_v22  ;;  %v731_v15 = vadd.f32 %v727_v23, %v5209_v21  ;;  %v1289_v22 = vmul.f32 %v1287_v58, %v5235_v20  ;;  %v1302_v19 = vmul.f32 %v1301_v3, %v5222_v6 }
 0x1ba   : > { %1238 = vrot.lane.b32.xlu1 %v1233_v26, %s4553_s11  ;;  %1250 = vrot.lane.b32.xlu0 %v1246_v27, %s4553_s11  ;;  %v1315_v27 = vstv %s5278_s17  ;;  %v1397_v58 = vstv %s5329_s6  ;;  %s5366_s17 = sld [smem:[#allocation4 + $0x3b]]  ;;  %v932_v3 = vmul.f32 %v930_v8, %v5019_v12  ;;  %s5426_s6 = sld [smem:[#allocation4 + $0xf]] }
 0x1bb   : > { %v5257_v11 = vadd.f32 %v793_v30, %v744_v28  ;;  %v1316_v30 = vmul.f32 %v1315_v27, %v5222_v6 }
 0x1bc   : > { %v741_v42 = vpop.permute.xlu1 %740  ;;  %v753_v33 = vpop.permute.xlu0 %752 }
 0x1bd   : > { %v745_v40 = vadd.f32 %v741_v42, %v689_v14  ;;  %v758_v41 = vadd.f32 %v753_v33, %v702_v10  ;;  %v1317_v10 = vmul.f32 %v1315_v27, %v5235_v20  ;;  %v1330_v42 = vmul.f32 %v1329_v32, %v5222_v6  ;;  %v5326_v33 = vld [vmem:[#allocation2 + $0x45] sm:$0xff] }
 0x1be   : > { %1252 = vrot.lane.b32.xlu1 %v1247_v34, %s4553_s11  ;;  %1264 = vrot.lane.b32.xlu0 %v1260_v39, %s4553_s11  ;;  %v1369_v34 = vstv %s5308_s27  ;;  %s5398_s27 = sld [smem:[#allocation4 + $0x83]] }
 0x1bf   : > { %v5271_v24 = vadd.f32 %v794_v43, %v745_v40  ;;  %v5273_v25 = vadd.f32 %v799_v7, %v758_v41  ;;  %v1331_v40 = vmul.f32 %v1329_v32, %v5235_v20  ;;  %v1370_v41 = vmul.f32 %v1369_v34, %v5326_v33  ;;  %v5339_v43 = vld [vmem:[#allocation2 + $0x4d] sm:$0xff] }
 0x1c0   : > { %v755_v47 = vpop.permute.xlu1 %754  ;;  %v767_v52 = vpop.permute.xlu0 %766  ;;  %v1383_v7 = vstv %s5318_s28  ;;  %s5412_s28 = sld [smem:[#allocation4 + $0x19]] }
 0x1c1   : > { %v759_v59 = vadd.f32 %v755_v47, %v703_v45  ;;  %v772_v60 = vadd.f32 %v767_v52, %v716_v49  ;;  %v1371_v52 = vmul.f32 %v1369_v34, %v5339_v43 }
 0x1c2   : > { %1266 = vrot.lane.b32.xlu1 %v1261_v53, %s4553_s11  ;;  %1278 = vrot.lane.b32.xlu0 %v1274_v56, %s4553_s11  ;;  %v1384_v53 = vmul.f32 %v1383_v7, %v5326_v33 }
 0x1c3   : > { %v5287_v0 = vadd.f32 %v800_v35, %v759_v59  ;;  %v5289_v1 = vadd.f32 %v805_v38, %v772_v60  ;;  %v931_v59 = vmul.f32 %v930_v8, %v5001_v2  ;;  %v936_v60 = vstv %s5333_s10  ;;  %s5433_s10 = sld [smem:[#allocation4 + $0x61]] }
 0x1c4   : > { %v769_v62 = vpop.permute.xlu1 %768  ;;  %v781_v9 = vpop.permute.xlu0 %780 }
 0x1c5   : > { %v773_v13 = vadd.f32 %v769_v62, %v717_v57  ;;  %v786_v17 = vadd.f32 %v781_v9, %v730_v61  ;;  %v1385_v61 = vmul.f32 %v1383_v7, %v5339_v43  ;;  %v1398_v62 = vmul.f32 %v1397_v58, %v5326_v33 }
 0x1c6   : > { %1280 = vrot.lane.b32.xlu1 %v1275_v36, %s4553_s11  ;;  %1292 = vrot.lane.b32.xlu0 %v1288_v63, %s4554_s12  ;;  %v1411_v9 = vstv %s5337_s24  ;;  %s5437_s24 = sld [smem:[#allocation4 + $0x33]] }
 0x1c7   : > { %v5301_v16 = vadd.f32 %v806_v48, %v773_v13  ;;  %v5303_v18 = vadd.f32 %v811_v50, %v786_v17 }
 0x1c8   : > { %v783_v54 = vpop.permute.xlu1 %782  ;;  %v822_v55 = vpop.permute.xlu0 %821 }
 0x1c9   : > { %v787_v26 = vadd.f32 %v783_v54, %v731_v15  ;;  %v827_v45 = vadd.f32 %v822_v55, %v5257_v11  ;;  %v1399_v55 = vmul.f32 %v1397_v58, %v5339_v43 }
 0x1ca   : > { %1294 = vrot.lane.b32.xlu1 %v1289_v22, %s4554_s12  ;;  %1306 = vrot.lane.b32.xlu0 %v1302_v19, %s4554_s12  ;;  %v1412_v22 = vmul.f32 %v1411_v9, %v5326_v33  ;;  %v1425_v19 = vstv %s5350_s15  ;;  %s5449_s15 = sld [smem:[#allocation4 + $0x57]] }
 0x1cb   : > { %v5313_v21 = vadd.f32 %v812_v31, %v787_v26  ;;  %v948_v31 = vstv %s5357_s23  ;;  %s5454_s23 = sld [smem:[#allocation4 + $0x1a]] }
 0x1cc   : > { %v824_v23 = vpop.permute.xlu1 %823  ;;  %v836_v28 = vpop.permute.xlu0 %835 }
 0x1cd   : > { %v828_v11 = vadd.f32 %v824_v23, %v5271_v24  ;;  %v841_v35 = vadd.f32 %v836_v28, %v5273_v25  ;;  %v937_v24 = vmul.f32 %v936_v60, %v5001_v2  ;;  %v942_v25 = vstv %s5345_s14  ;;  %s5441_s14 = sld [smem:[#allocation4 + $0x85]] }
 0x1ce   : > { %1308 = vrot.lane.b32.xlu1 %v1303_v29, %s4554_s12  ;;  %1320 = vrot.lane.b32.xlu0 %v1316_v30, %s4554_s12 }
 0x1d0   : > { %v838_v37 = vpop.permute.xlu1 %837  ;;  %v850_v14 = vpop.permute.xlu0 %849 }
 0x1d1   : > { %v842_v13 = vadd.f32 %v838_v37, %v5287_v0  ;;  %v855_v17 = vadd.f32 %v850_v14, %v5289_v1  ;;  %v938_v0 = vmul.f32 %v936_v60, %v5019_v12  ;;  %v943_v1 = vmul.f32 %v942_v25, %v5001_v2 }
 0x1d2   : > { %1322 = vrot.lane.b32.xlu1 %v1317_v10, %s4554_s12  ;;  %1334 = vrot.lane.b32.xlu0 %v1330_v42, %s4554_s12  ;;  %v1413_v14 = vmul.f32 %v1411_v9, %v5339_v43  ;;  %v1426_v10 = vmul.f32 %v1425_v19, %v5326_v33  ;;  %v1439_v42 = vstv %s5366_s17  ;;  %v1467_v60 = vstv %s5398_s27  ;;  %s5461_s17 = sld [smem:[#allocation4 + $0x7b]]  ;;  %s5486_s27 = sld [smem:[#allocation4 + $0x62]] }
 0x1d3   : > { %v1441_v58 = vmul.f32 %v1439_v42, %v5339_v43 }
 0x1d4   : > { %v852_v39 = vpop.permute.xlu1 %851  ;;  %v864_v46 = vpop.permute.xlu0 %863 }
 0x1d5   : > { %v856_v23 = vadd.f32 %v852_v39, %v5301_v16  ;;  %v869_v28 = vadd.f32 %v864_v46, %v5303_v18  ;;  %v944_v16 = vmul.f32 %v942_v25, %v5019_v12  ;;  %v949_v18 = vmul.f32 %v948_v31, %v5001_v2 }
 0x1d6   : > { %1336 = vrot.lane.b32.xlu1 %v1331_v40, %s4554_s12  ;;  %1374 = vrot.lane.b32.xlu0 %v1370_v41, %s4553_s11  ;;  %v950_v2 = vmul.f32 %v948_v31, %v5019_v12  ;;  %v1068_v25 = vstv %s5426_s6  ;;  %s5526_s6 = sld [smem:[#allocation4 + $0x40]] }
 0x1d8   : > { %v866_v49 = vpop.permute.xlu1 %865  ;;  %v878_v47 = vpop.permute.xlu0 %877 }
 0x1d9   : > { %v883_v56 = vadd.f32 %v878_v47, %v827_v45  ;;  %v870_v39 = vadd.f32 %v866_v49, %v5313_v21  ;;  %v1427_v45 = vmul.f32 %v1425_v19, %v5339_v43  ;;  %v1440_v47 = vmul.f32 %v1439_v42, %v5326_v33 }
 0x1da   : > { %1376 = vrot.lane.b32.xlu1 %v1371_v52, %s4553_s11  ;;  %1388 = vrot.lane.b32.xlu0 %v1384_v53, %s4553_s11  ;;  %v1453_v53 = vstv %s5382_s26  ;;  %v1535_v19 = vstv %s5433_s10  ;;  %s5470_s26 = sld [smem:[#allocation4 + $0x3e]]  ;;  %v1070_v42 = vmul.f32 %v1068_v25, %v5131_v51  ;;  %s5530_s10 = sld [smem:[#allocation4 + $0x12]] }
 0x1db   : > { %v5361_v38 = vadd.f32 %v931_v59, %v883_v56  ;;  %v1454_v59 = vmul.f32 %v1453_v53, %v5326_v33 }
 0x1dc   : > { %v880_v5 = vpop.permute.xlu1 %879  ;;  %v892_v57 = vpop.permute.xlu0 %891 }
 0x1dd   : > { %v884_v36 = vadd.f32 %v880_v5, %v828_v11  ;;  %v897_v63 = vadd.f32 %v892_v57, %v841_v35  ;;  %v1455_v35 = vmul.f32 %v1453_v53, %v5339_v43  ;;  %v1468_v5 = vmul.f32 %v1467_v60, %v5326_v33  ;;  %v5430_v57 = vld [vmem:[#allocation2 + $0x4a] sm:$0xff] }
 0x1de   : > { %1390 = vrot.lane.b32.xlu1 %v1385_v61, %s4553_s11  ;;  %1402 = vrot.lane.b32.xlu0 %v1398_v62, %s4553_s11  ;;  %v1507_v61 = vstv %s5412_s28  ;;  %s5502_s28 = sld [smem:[#allocation4 + $0x86]] }
 0x1df   : > { %v5375_v48 = vadd.f32 %v932_v3, %v884_v36  ;;  %v5377_v50 = vadd.f32 %v937_v24, %v897_v63  ;;  %v1469_v36 = vmul.f32 %v1467_v60, %v5339_v43  ;;  %v1508_v63 = vmul.f32 %v1507_v61, %v5430_v57  ;;  %v5443_v3 = vld [vmem:[#allocation2 + $0x52] sm:$0xff] }
 0x1e0   : > { %v894_v15 = vpop.permute.xlu1 %893  ;;  %v906_v54 = vpop.permute.xlu0 %905  ;;  %v1521_v24 = vstv %s5422_s13  ;;  %s5516_s13 = sld [smem:[#allocation4 + $0x1c]] }
 0x1e1   : > { %v898_v26 = vadd.f32 %v894_v15, %v842_v13  ;;  %v911_v27 = vadd.f32 %v906_v54, %v855_v17  ;;  %v1509_v54 = vmul.f32 %v1507_v61, %v5443_v3 }
 0x1e2   : > { %1404 = vrot.lane.b32.xlu1 %v1399_v55, %s4553_s11  ;;  %1416 = vrot.lane.b32.xlu0 %v1412_v22, %s4553_s11  ;;  %v1522_v55 = vmul.f32 %v1521_v24, %v5430_v57 }
 0x1e3   : > { %v5391_v29 = vadd.f32 %v938_v0, %v898_v26  ;;  %v5393_v30 = vadd.f32 %v943_v1, %v911_v27  ;;  %v1069_v26 = vmul.f32 %v1068_v25, %v5118_v44  ;;  %v1074_v27 = vstv %s5437_s24  ;;  %s5537_s24 = sld [smem:[#allocation4 + $0x64]] }
 0x1e4   : > { %v908_v32 = vpop.permute.xlu1 %907  ;;  %v920_v37 = vpop.permute.xlu0 %919 }
 0x1e5   : > { %v912_v34 = vadd.f32 %v908_v32, %v856_v23  ;;  %v925_v40 = vadd.f32 %v920_v37, %v869_v28  ;;  %v1523_v28 = vmul.f32 %v1521_v24, %v5443_v3  ;;  %v1536_v32 = vmul.f32 %v1535_v19, %v5430_v57 }
 0x1e6   : > { %1418 = vrot.lane.b32.xlu1 %v1413_v14, %s4553_s11  ;;  %1430 = vrot.lane.b32.xlu0 %v1426_v10, %s4554_s12  ;;  %v1549_v37 = vstv %s5441_s14  ;;  %s5541_s14 = sld [smem:[#allocation4 + $0x36]] }
 0x1e7   : > { %v5405_v46 = vadd.f32 %v944_v16, %v912_v34  ;;  %v5407_v41 = vadd.f32 %v949_v18, %v925_v40 }
 0x1e8   : > { %v922_v7 = vpop.permute.xlu1 %921  ;;  %v960_v8 = vpop.permute.xlu0 %959 }
 0x1e9   : > { %v926_v52 = vadd.f32 %v922_v7, %v870_v39  ;;  %v965_v13 = vadd.f32 %v960_v8, %v5361_v38  ;;  %v1537_v8 = vmul.f32 %v1535_v19, %v5443_v3 }
 0x1ea   : > { %1432 = vrot.lane.b32.xlu1 %v1427_v45, %s4554_s12  ;;  %1444 = vrot.lane.b32.xlu0 %v1440_v47, %s4554_s12  ;;  %v1550_v45 = vmul.f32 %v1549_v37, %v5430_v57  ;;  %v1563_v47 = vstv %s5454_s23  ;;  %s5553_s23 = sld [smem:[#allocation4 + $0x5a]] }
 0x1eb   : > { %v5417_v21 = vadd.f32 %v950_v2, %v926_v52  ;;  %v1086_v2 = vstv %s5461_s17  ;;  %s5558_s17 = sld [smem:[#allocation4 + $0x1d]] }
 0x1ec   : > { %v962_v49 = vpop.permute.xlu1 %961  ;;  %v974_v56 = vpop.permute.xlu0 %973 }
 0x1ed   : > { %v966_v38 = vadd.f32 %v962_v49, %v5375_v48  ;;  %v979_v0 = vadd.f32 %v974_v56, %v5377_v50  ;;  %v1075_v48 = vmul.f32 %v1074_v27, %v5118_v44  ;;  %v1080_v50 = vstv %s5449_s15  ;;  %s5545_s15 = sld [smem:[#allocation4 + $0x88]] }
 0x1ee   : > { %1446 = vrot.lane.b32.xlu1 %v1441_v58, %s4554_s12  ;;  %1458 = vrot.lane.b32.xlu0 %v1454_v59, %s4554_s12 }
 0x1f0   : > { %v976_v12 = vpop.permute.xlu1 %975  ;;  %v988_v11 = vpop.permute.xlu0 %987 }
 0x1f1   : > { %v980_v34 = vadd.f32 %v976_v12, %v5391_v29  ;;  %v993_v40 = vadd.f32 %v988_v11, %v5393_v30  ;;  %v1076_v29 = vmul.f32 %v1074_v27, %v5131_v51  ;;  %v1081_v30 = vmul.f32 %v1080_v50, %v5118_v44 }
 0x1f2   : > { %1460 = vrot.lane.b32.xlu1 %v1455_v35, %s4554_s12  ;;  %1472 = vrot.lane.b32.xlu0 %v1468_v5, %s4554_s12  ;;  %v1551_v11 = vmul.f32 %v1549_v37, %v5443_v3  ;;  %v1564_v35 = vmul.f32 %v1563_v47, %v5430_v57  ;;  %v1577_v5 = vstv %s5470_s26  ;;  %v1605_v27 = vstv %s5502_s28  ;;  %s5565_s26 = sld [smem:[#allocation4 + $0x7e]]  ;;  %s5590_s28 = sld [smem:[#allocation4 + $0x65]] }
 0x1f3   : > { %v1579_v19 = vmul.f32 %v1577_v5, %v5443_v3 }
 0x1f4   : > { %v990_v62 = vpop.permute.xlu1 %989  ;;  %v1002_v9 = vpop.permute.xlu0 %1001 }
 0x1f5   : > { %v994_v49 = vadd.f32 %v990_v62, %v5405_v46  ;;  %v1007_v56 = vadd.f32 %v1002_v9, %v5407_v41  ;;  %v1082_v46 = vmul.f32 %v1080_v50, %v5131_v51  ;;  %v1087_v41 = vmul.f32 %v1086_v2, %v5118_v44 }
 0x1f6   : > { %1474 = vrot.lane.b32.xlu1 %v1469_v36, %s4554_s12  ;;  %1512 = vrot.lane.b32.xlu0 %v1508_v63, %s4553_s11  ;;  %v1088_v44 = vmul.f32 %v1086_v2, %v5131_v51  ;;  %v1207_v50 = vstv %s5530_s10  ;;  %s5630_s10 = sld [smem:[#allocation4 + $0x43]] }
 0x1f8   : > { %v1004_v17 = vpop.permute.xlu1 %1003  ;;  %v1016_v15 = vpop.permute.xlu0 %1015 }
 0x1f9   : > { %v1021_v22 = vadd.f32 %v1016_v15, %v965_v13  ;;  %v1008_v62 = vadd.f32 %v1004_v17, %v5417_v21  ;;  %v1565_v13 = vmul.f32 %v1563_v47, %v5443_v3  ;;  %v1578_v15 = vmul.f32 %v1577_v5, %v5430_v57 }
 0x1fa   : > { %1514 = vrot.lane.b32.xlu1 %v1509_v54, %s4553_s11  ;;  %1526 = vrot.lane.b32.xlu0 %v1522_v55, %s4553_s11  ;;  %v1591_v55 = vstv %s5486_s27  ;;  %v1674_v47 = vstv %s5537_s24  ;;  %s5574_s27 = sld [smem:[#allocation4 + $0x41]]  ;;  %v1209_v5 = vmul.f32 %v1207_v50, %v5235_v20  ;;  %s5634_s24 = sld [smem:[#allocation4 + $0x15]] }
 0x1fb   : > { %v5465_v1 = vadd.f32 %v1069_v26, %v1021_v22  ;;  %v1592_v26 = vmul.f32 %v1591_v55, %v5430_v57 }
 0x1fc   : > { %v1018_v31 = vpop.permute.xlu1 %1017  ;;  %v1030_v23 = vpop.permute.xlu0 %1029 }
 0x1fd   : > { %v1022_v14 = vadd.f32 %v1018_v31, %v966_v38  ;;  %v1035_v10 = vadd.f32 %v1030_v23, %v979_v0  ;;  %v1593_v0 = vmul.f32 %v1591_v55, %v5443_v3  ;;  %v1606_v31 = vmul.f32 %v1605_v27, %v5430_v57  ;;  %v5534_v23 = vld [vmem:[#allocation2 + $0x60] sm:$0xff] }
 0x1fe   : > { %1528 = vrot.lane.b32.xlu1 %v1523_v28, %s4553_s11  ;;  %1540 = vrot.lane.b32.xlu0 %v1536_v32, %s4553_s11  ;;  %v1646_v28 = vstv %s5516_s13  ;;  %s5606_s13 = sld [smem:[#allocation4 + $0x89]] }
 0x1ff   : > { %v5479_v16 = vadd.f32 %v1070_v42, %v1022_v14  ;;  %v5481_v18 = vadd.f32 %v1075_v48, %v1035_v10  ;;  %v1607_v14 = vmul.f32 %v1605_v27, %v5443_v3  ;;  %v1647_v10 = vmul.f32 %v1646_v28, %v5534_v23  ;;  %v5547_v42 = vld [vmem:[#allocation2 + $0x68] sm:$0xff] }
 0x200   : > { %v1032_v39 = vpop.permute.xlu1 %1031  ;;  %v1044_v7 = vpop.permute.xlu0 %1043  ;;  %v1660_v48 = vstv %s5526_s6  ;;  %s5620_s6 = sld [smem:[#allocation4 + $0x1f]] }
 0x201   : > { %v1036_v52 = vadd.f32 %v1032_v39, %v980_v34  ;;  %v1049_v53 = vadd.f32 %v1044_v7, %v993_v40  ;;  %v1648_v7 = vmul.f32 %v1646_v28, %v5547_v42 }
 0x202   : > { %1542 = vrot.lane.b32.xlu1 %v1537_v8, %s4553_s11  ;;  %1554 = vrot.lane.b32.xlu0 %v1550_v45, %s4553_s11  ;;  %v1661_v8 = vmul.f32 %v1660_v48, %v5534_v23 }
 0x203   : > { %v5495_v58 = vadd.f32 %v1076_v29, %v1036_v52  ;;  %v5497_v59 = vadd.f32 %v1081_v30, %v1049_v53  ;;  %v1208_v52 = vmul.f32 %v1207_v50, %v5222_v6  ;;  %v1213_v53 = vstv %s5541_s14  ;;  %s5641_s14 = sld [smem:[#allocation4 + $0x67]] }
 0x204   : > { %v1046_v60 = vpop.permute.xlu1 %1045  ;;  %v1058_v12 = vpop.permute.xlu0 %1057 }
 0x205   : > { %v1050_v61 = vadd.f32 %v1046_v60, %v994_v49  ;;  %v1063_v36 = vadd.f32 %v1058_v12, %v1007_v56  ;;  %v1662_v56 = vmul.f32 %v1660_v48, %v5547_v42  ;;  %v1675_v60 = vmul.f32 %v1674_v47, %v5534_v23 }
 0x206   : > { %1556 = vrot.lane.b32.xlu1 %v1551_v11, %s4553_s11  ;;  %1568 = vrot.lane.b32.xlu0 %v1564_v35, %s4554_s12  ;;  %v1688_v12 = vstv %s5545_s15  ;;  %s5645_s15 = sld [smem:[#allocation4 + $0x39]] }
 0x207   : > { %v5509_v9 = vadd.f32 %v1082_v46, %v1050_v61  ;;  %v5511_v63 = vadd.f32 %v1087_v41, %v1063_v36 }
 0x208   : > { %v1060_v24 = vpop.permute.xlu1 %1059  ;;  %v1098_v25 = vpop.permute.xlu0 %1097 }
 0x209   : > { %v1064_v54 = vadd.f32 %v1060_v24, %v1008_v62  ;;  %v1103_v34 = vadd.f32 %v1098_v25, %v5465_v1  ;;  %v1676_v25 = vmul.f32 %v1674_v47, %v5547_v42 }
 0x20a   : > { %1570 = vrot.lane.b32.xlu1 %v1565_v13, %s4554_s12  ;;  %1582 = vrot.lane.b32.xlu0 %v1578_v15, %s4554_s12  ;;  %v1689_v13 = vmul.f32 %v1688_v12, %v5534_v23  ;;  %v1702_v15 = vstv %s5558_s17  ;;  %s5657_s17 = sld [smem:[#allocation4 + $0x5d]] }
 0x20b   : > { %v5521_v21 = vadd.f32 %v1088_v44, %v1064_v54  ;;  %v1225_v44 = vstv %s5565_s26  ;;  %s5662_s26 = sld [smem:[#allocation4 + $0x20]] }
 0x20c   : > { %v1100_v17 = vpop.permute.xlu1 %1099  ;;  %v1112_v22 = vpop.permute.xlu0 %1111 }
 0x20d   : > { %v1104_v1 = vadd.f32 %v1100_v17, %v5479_v16  ;;  %v1117_v29 = vadd.f32 %v1112_v22, %v5481_v18  ;;  %v1214_v16 = vmul.f32 %v1213_v53, %v5222_v6  ;;  %v1219_v18 = vstv %s5553_s23  ;;  %s5649_s23 = sld [smem:[#allocation4 + $0x8b]] }
 0x20e   : > { %1584 = vrot.lane.b32.xlu1 %v1579_v19, %s4554_s12  ;;  %1596 = vrot.lane.b32.xlu0 %v1592_v26, %s4554_s12 }
 0x210   : > { %v1114_v51 = vpop.permute.xlu1 %1113  ;;  %v1126_v38 = vpop.permute.xlu0 %1125 }
 0x211   : > { %v1118_v61 = vadd.f32 %v1114_v51, %v5495_v58  ;;  %v1131_v36 = vadd.f32 %v1126_v38, %v5497_v59  ;;  %v1215_v58 = vmul.f32 %v1213_v53, %v5235_v20  ;;  %v1220_v59 = vmul.f32 %v1219_v18, %v5222_v6 }
 0x212   : > { %1598 = vrot.lane.b32.xlu1 %v1593_v0, %s4554_s12  ;;  %1610 = vrot.lane.b32.xlu0 %v1606_v31, %s4554_s12  ;;  %v1690_v38 = vmul.f32 %v1688_v12, %v5547_v42  ;;  %v1703_v0 = vmul.f32 %v1702_v15, %v5534_v23  ;;  %v1716_v31 = vstv %s5574_s27  ;;  %v1744_v53 = vstv %s5606_s13  ;;  %s5669_s27 = sld [smem:[#allocation4 + $0x81]]  ;;  %s5694_s13 = sld [smem:[#allocation4 + $0x68]] }
 0x213   : > { %v1718_v47 = vmul.f32 %v1716_v31, %v5547_v42 }
 0x214   : > { %v1128_v32 = vpop.permute.xlu1 %1127  ;;  %v1140_v37 = vpop.permute.xlu0 %1139 }
 0x215   : > { %v1132_v17 = vadd.f32 %v1128_v32, %v5509_v9  ;;  %v1145_v22 = vadd.f32 %v1140_v37, %v5511_v63  ;;  %v1221_v9 = vmul.f32 %v1219_v18, %v5235_v20  ;;  %v1226_v63 = vmul.f32 %v1225_v44, %v5222_v6 }
 0x216   : > { %1612 = vrot.lane.b32.xlu1 %v1607_v14, %s4554_s12  ;;  %1651 = vrot.lane.b32.xlu0 %v1647_v10, %s4553_s11  ;;  %v1227_v6 = vmul.f32 %v1225_v44, %v5235_v20  ;;  %v1345_v18 = vstv %s5634_s24  ;;  %s5734_s24 = sld [smem:[#allocation4 + $0x46]] }
 0x218   : > { %v1142_v40 = vpop.permute.xlu1 %1141  ;;  %v1154_v39 = vpop.permute.xlu0 %1153 }
 0x219   : > { %v1159_v45 = vadd.f32 %v1154_v39, %v1103_v34  ;;  %v1146_v32 = vadd.f32 %v1142_v40, %v5521_v21  ;;  %v1704_v34 = vmul.f32 %v1702_v15, %v5547_v42  ;;  %v1717_v39 = vmul.f32 %v1716_v31, %v5534_v23 }
 0x21a   : > { %1653 = vrot.lane.b32.xlu1 %v1648_v7, %s4553_s11  ;;  %1665 = vrot.lane.b32.xlu0 %v1661_v8, %s4553_s11  ;;  %v1730_v8 = vstv %s5590_s28  ;;  %v1812_v15 = vstv %s5641_s14  ;;  %s5678_s28 = sld [smem:[#allocation4 + $0x44]]  ;;  %v1347_v31 = vmul.f32 %v1345_v18, %v5339_v43  ;;  %s5738_s14 = sld [smem:[#allocation4 + $0x18]] }
 0x21b   : > { %v5569_v30 = vadd.f32 %v1208_v52, %v1159_v45  ;;  %v1731_v52 = vmul.f32 %v1730_v8, %v5534_v23 }
 0x21c   : > { %v1156_v2 = vpop.permute.xlu1 %1155  ;;  %v1168_v49 = vpop.permute.xlu0 %1167 }
 0x21d   : > { %v1160_v11 = vadd.f32 %v1156_v2, %v1104_v1  ;;  %v1173_v35 = vadd.f32 %v1168_v49, %v1117_v29  ;;  %v1732_v29 = vmul.f32 %v1730_v8, %v5547_v42  ;;  %v1745_v2 = vmul.f32 %v1744_v53, %v5534_v23  ;;  %v5638_v49 = vld [vmem:[#allocation2 + $0x65] sm:$0xff] }
 0x21e   : > { %1667 = vrot.lane.b32.xlu1 %v1662_v56, %s4553_s11  ;;  %1679 = vrot.lane.b32.xlu0 %v1675_v60, %s4553_s11  ;;  %v1784_v56 = vstv %s5620_s6  ;;  %s5710_s6 = sld [smem:[#allocation4 + $0x8c]] }
 0x21f   : > { %v5583_v46 = vadd.f32 %v1209_v5, %v1160_v11  ;;  %v5585_v41 = vadd.f32 %v1214_v16, %v1173_v35  ;;  %v1746_v11 = vmul.f32 %v1744_v53, %v5547_v42  ;;  %v1785_v35 = vmul.f32 %v1784_v56, %v5638_v49  ;;  %v5651_v5 = vld [vmem:[#allocation2 + $0x6d] sm:$0xff] }
 0x220   : > { %v1170_v62 = vpop.permute.xlu1 %1169  ;;  %v1182_v24 = vpop.permute.xlu0 %1181  ;;  %v1798_v16 = vstv %s5630_s10  ;;  %s5724_s10 = sld [smem:[#allocation4 + $0x22]] }
 0x221   : > { %v1174_v54 = vadd.f32 %v1170_v62, %v1118_v61  ;;  %v1187_v55 = vadd.f32 %v1182_v24, %v1131_v36  ;;  %v1786_v24 = vmul.f32 %v1784_v56, %v5651_v5 }
 0x222   : > { %1681 = vrot.lane.b32.xlu1 %v1676_v25, %s4553_s11  ;;  %1693 = vrot.lane.b32.xlu0 %v1689_v13, %s4553_s11  ;;  %v1799_v25 = vmul.f32 %v1798_v16, %v5638_v49 }
 0x223   : > { %v5599_v19 = vadd.f32 %v1215_v58, %v1174_v54  ;;  %v5601_v26 = vadd.f32 %v1220_v59, %v1187_v55  ;;  %v1346_v54 = vmul.f32 %v1345_v18, %v5326_v33  ;;  %v1351_v55 = vstv %s5645_s15  ;;  %s5745_s15 = sld [smem:[#allocation4 + $0x6a]] }
 0x224   : > { %v1184_v27 = vpop.permute.xlu1 %1183  ;;  %v1196_v51 = vpop.permute.xlu0 %1195 }
 0x225   : > { %v1188_v28 = vadd.f32 %v1184_v27, %v1132_v17  ;;  %v1201_v14 = vadd.f32 %v1196_v51, %v1145_v22  ;;  %v1800_v22 = vmul.f32 %v1798_v16, %v5651_v5  ;;  %v1813_v27 = vmul.f32 %v1812_v15, %v5638_v49 }
 0x226   : > { %1695 = vrot.lane.b32.xlu1 %v1690_v38, %s4553_s11  ;;  %1707 = vrot.lane.b32.xlu0 %v1703_v0, %s4554_s12  ;;  %v1826_v51 = vstv %s5649_s23  ;;  %s5749_s23 = sld [smem:[#allocation4 + $0x3c]] }
 0x227   : > { %v5613_v37 = vadd.f32 %v1221_v9, %v1188_v28  ;;  %v5615_v10 = vadd.f32 %v1226_v63, %v1201_v14 }
 0x228   : > { %v1198_v48 = vpop.permute.xlu1 %1197  ;;  %v1237_v50 = vpop.permute.xlu0 %1236 }
 0x229   : > { %v1202_v7 = vadd.f32 %v1198_v48, %v1146_v32  ;;  %v1242_v61 = vadd.f32 %v1237_v50, %v5569_v30  ;;  %v1814_v50 = vmul.f32 %v1812_v15, %v5651_v5 }
 0x22a   : > { %1709 = vrot.lane.b32.xlu1 %v1704_v34, %s4554_s12  ;;  %1721 = vrot.lane.b32.xlu0 %v1717_v39, %s4554_s12  ;;  %v1827_v34 = vmul.f32 %v1826_v51, %v5638_v49  ;;  %v1840_v39 = vstv %s5662_s26  ;;  %s5761_s26 = sld [smem:[#allocation4 + $0x60]] }
 0x22b   : > { %v5625_v21 = vadd.f32 %v1227_v6, %v1202_v7  ;;  %v1363_v6 = vstv %s5669_s27  ;;  %s5766_s27 = sld [smem:[#allocation4 + $0x23]] }
 0x22c   : > { %v1239_v40 = vpop.permute.xlu1 %1238  ;;  %v1251_v45 = vpop.permute.xlu0 %1250 }
 0x22d   : > { %v1243_v30 = vadd.f32 %v1239_v40, %v5583_v46  ;;  %v1256_v58 = vadd.f32 %v1251_v45, %v5585_v41  ;;  %v1352_v46 = vmul.f32 %v1351_v55, %v5326_v33  ;;  %v1357_v41 = vstv %s5657_s17  ;;  %s5753_s17 = sld [smem:[#allocation4 + $0x8e]] }
 0x22e   : > { %1723 = vrot.lane.b32.xlu1 %v1718_v47, %s4554_s12  ;;  %1735 = vrot.lane.b32.xlu0 %v1731_v52, %s4554_s12 }
 0x230   : > { %v1253_v20 = vpop.permute.xlu1 %1252  ;;  %v1265_v1 = vpop.permute.xlu0 %1264 }
 0x231   : > { %v1257_v28 = vadd.f32 %v1253_v20, %v5599_v19  ;;  %v1270_v14 = vadd.f32 %v1265_v1, %v5601_v26  ;;  %v1353_v19 = vmul.f32 %v1351_v55, %v5339_v43  ;;  %v1358_v26 = vmul.f32 %v1357_v41, %v5326_v33 }
 0x232   : > { %1737 = vrot.lane.b32.xlu1 %v1732_v29, %s4554_s12  ;;  %1749 = vrot.lane.b32.xlu0 %v1745_v2, %s4554_s12  ;;  %v1828_v1 = vmul.f32 %v1826_v51, %v5651_v5  ;;  %v1841_v29 = vmul.f32 %v1840_v39, %v5638_v49  ;;  %v1854_v2 = vstv %s5678_s28  ;;  %v1882_v55 = vstv %s5710_s6  ;;  %s5773_s28 = sld [smem:[#allocation4 + $0x84]]  ;;  %s5798_s6 = sld [smem:[#allocation4 + $0x6b]] }
 0x233   : > { %v1856_v15 = vmul.f32 %v1854_v2, %v5651_v5 }
 0x234   : > { %v1267_v60 = vpop.permute.xlu1 %1266  ;;  %v1279_v12 = vpop.permute.xlu0 %1278 }
 0x235   : > { %v1271_v40 = vadd.f32 %v1267_v60, %v5613_v37  ;;  %v1284_v45 = vadd.f32 %v1279_v12, %v5615_v10  ;;  %v1359_v37 = vmul.f32 %v1357_v41, %v5339_v43  ;;  %v1364_v10 = vmul.f32 %v1363_v6, %v5326_v33 }
 0x236   : > { %1751 = vrot.lane.b32.xlu1 %v1746_v11, %s4554_s12  ;;  %1789 = vrot.lane.b32.xlu0 %v1785_v35, %s4553_s11  ;;  %v1365_v33 = vmul.f32 %v1363_v6, %v5339_v43  ;;  %v1483_v41 = vstv %s5738_s14  ;;  %s5857_s14 = sld [smem:[#allocation4 + $0x63]] }
 0x238   : > { %v1281_v36 = vpop.permute.xlu1 %1280  ;;  %v1293_v62 = vpop.permute.xlu0 %1292 }
 0x239   : > { %v1298_v13 = vadd.f32 %v1293_v62, %v1242_v61  ;;  %v1285_v60 = vadd.f32 %v1281_v36, %v5625_v21  ;;  %v1842_v61 = vmul.f32 %v1840_v39, %v5651_v5  ;;  %v1855_v62 = vmul.f32 %v1854_v2, %v5638_v49 }
 0x23a   : > { %1791 = vrot.lane.b32.xlu1 %v1786_v24, %s4553_s11  ;;  %1803 = vrot.lane.b32.xlu0 %v1799_v25, %s4553_s11  ;;  %v1868_v25 = vstv %s5694_s13  ;;  %v1950_v39 = vstv %s5745_s15  ;;  %s5782_s13 = sld [smem:[#allocation4 + $0x47]]  ;;  %v1485_v2 = vmul.f32 %v1483_v41, %v5443_v3 }
 0x23b   : > { %v5673_v59 = vadd.f32 %v1346_v54, %v1298_v13  ;;  %v1869_v54 = vmul.f32 %v1868_v25, %v5638_v49  ;;  %s5862_s15 = sld [smem:[#allocation4 + $0x87]] }
 0x23c   : > { %v1295_v44 = vpop.permute.xlu1 %1294  ;;  %v1307_v17 = vpop.permute.xlu0 %1306 }
 0x23d   : > { %v1299_v38 = vadd.f32 %v1295_v44, %v1243_v30  ;;  %v1312_v0 = vadd.f32 %v1307_v17, %v1256_v58  ;;  %v1870_v58 = vmul.f32 %v1868_v25, %v5651_v5  ;;  %v1883_v44 = vmul.f32 %v1882_v55, %v5638_v49  ;;  %v5742_v17 = vld [vmem:[#allocation2 + $0x6a] sm:$0xff] }
 0x23e   : > { %1805 = vrot.lane.b32.xlu1 %v1800_v22, %s4553_s11  ;;  %1817 = vrot.lane.b32.xlu0 %v1813_v27, %s4553_s11  ;;  %v1922_v22 = vstv %s5724_s10  ;;  %s5814_s10 = sld [smem:[#allocation4 + $0x8f]] }
 0x23f   : > { %v5687_v9 = vadd.f32 %v1347_v31, %v1299_v38  ;;  %v5689_v63 = vadd.f32 %v1352_v46, %v1312_v0  ;;  %v1884_v38 = vmul.f32 %v1882_v55, %v5651_v5  ;;  %v1923_v0 = vmul.f32 %v1922_v22, %v5742_v17  ;;  %v5755_v31 = vld [vmem:[#allocation2 + $0x72] sm:$0xff] }
 0x240   : > { %v1309_v32 = vpop.permute.xlu1 %1308  ;;  %v1321_v48 = vpop.permute.xlu0 %1320  ;;  %v1936_v46 = vstv %s5734_s24  ;;  %s5852_s24 = sld [smem:[#allocation4 + $0x3f]] }
 0x241   : > { %v1313_v7 = vadd.f32 %v1309_v32, %v1257_v28  ;;  %v1326_v8 = vadd.f32 %v1321_v48, %v1270_v14  ;;  %v1924_v48 = vmul.f32 %v1922_v22, %v5755_v31 }
 0x242   : > { %1819 = vrot.lane.b32.xlu1 %v1814_v50, %s4553_s11  ;;  %1831 = vrot.lane.b32.xlu0 %v1827_v34, %s4553_s11  ;;  %v1937_v50 = vmul.f32 %v1936_v46, %v5742_v17 }
 0x243   : > { %v5703_v47 = vadd.f32 %v1353_v19, %v1313_v7  ;;  %v5705_v52 = vadd.f32 %v1358_v26, %v1326_v8  ;;  %v1484_v7 = vmul.f32 %v1483_v41, %v5430_v57  ;;  %v1489_v8 = vstv %s5749_s23  ;;  %s4087_s23 = sld [smem:[#allocation4 + $0x42]] }
 0x244   : > { %v1323_v53 = vpop.permute.xlu1 %1322  ;;  %v1335_v20 = vpop.permute.xlu0 %1334 }
 0x245   : > { %v1327_v56 = vadd.f32 %v1323_v53, %v1271_v40  ;;  %v1340_v11 = vadd.f32 %v1335_v20, %v1284_v45  ;;  %v1938_v45 = vmul.f32 %v1936_v46, %v5755_v31  ;;  %v1951_v53 = vmul.f32 %v1950_v39, %v5742_v17 }
 0x246   : > { %1833 = vrot.lane.b32.xlu1 %v1828_v1, %s4553_s11  ;;  %1845 = vrot.lane.b32.xlu0 %v1841_v29, %s4554_s12  ;;  %v1964_v20 = vstv %s5753_s17  ;;  %s5880_s17 = sld [smem:[#allocation4 + $0x66]] }
 0x247   : > { %v5717_v12 = vadd.f32 %v1359_v37, %v1327_v56  ;;  %v5719_v35 = vadd.f32 %v1364_v10, %v1340_v11 }
 0x248   : > { %v1337_v16 = vpop.permute.xlu1 %1336  ;;  %v1375_v18 = vpop.permute.xlu0 %1374 }
 0x249   : > { %v1341_v24 = vadd.f32 %v1337_v16, %v1285_v60  ;;  %v1380_v28 = vadd.f32 %v1375_v18, %v5673_v59  ;;  %v1952_v18 = vmul.f32 %v1950_v39, %v5755_v31 }
 0x24a   : > { %1847 = vrot.lane.b32.xlu1 %v1842_v61, %s4554_s12  ;;  %1859 = vrot.lane.b32.xlu0 %v1855_v62, %s4554_s12  ;;  %v1965_v61 = vmul.f32 %v1964_v20, %v5742_v17  ;;  %v1978_v62 = vstv %s5766_s27  ;;  %s4098_s27 = sld [smem:[#allocation4 + $0x21]] }
 0x24b   : > { %v5729_v21 = vadd.f32 %v1365_v33, %v1341_v24  ;;  %v1501_v33 = vstv %s5773_s28  ;;  %s4099_s28 = sld [smem:[#allocation4 + $0x45]] }
 0x24c   : > { %v1377_v36 = vpop.permute.xlu1 %1376  ;;  %v1389_v13 = vpop.permute.xlu0 %1388 }
 0x24d   : > { %v1381_v59 = vadd.f32 %v1377_v36, %v5687_v9  ;;  %v1394_v19 = vadd.f32 %v1389_v13, %v5689_v63  ;;  %v1490_v9 = vmul.f32 %v1489_v8, %v5430_v57  ;;  %v1495_v63 = vstv %s5761_s26  ;;  %s5883_s26 = sld [smem:[#allocation4 + $0x8a]] }
 0x24e   : > { %1861 = vrot.lane.b32.xlu1 %v1856_v15, %s4554_s12  ;;  %1873 = vrot.lane.b32.xlu0 %v1869_v54, %s4554_s12 }
 0x250   : > { %v1391_v43 = vpop.permute.xlu1 %1390  ;;  %v1403_v30 = vpop.permute.xlu0 %1402 }
 0x251   : > { %v1395_v56 = vadd.f32 %v1391_v43, %v5703_v47  ;;  %v1408_v11 = vadd.f32 %v1403_v30, %v5705_v52  ;;  %v1491_v47 = vmul.f32 %v1489_v8, %v5443_v3  ;;  %v1496_v52 = vmul.f32 %v1495_v63, %v5430_v57 }
 0x252   : > { %1875 = vrot.lane.b32.xlu1 %v1870_v58, %s4554_s12  ;;  %1887 = vrot.lane.b32.xlu0 %v1883_v44, %s4554_s12  ;;  %v1966_v30 = vmul.f32 %v1964_v20, %v5755_v31  ;;  %v1979_v58 = vmul.f32 %v1978_v62, %v5742_v17  ;;  %v1992_v44 = vstv %s5782_s13  ;;  %v2020_v8 = vstv %s5814_s10  ;;  %s5894_s13 = sld [smem:[#allocation4 + $0x69]]  ;;  %s2033_s10 = sld [smem:[#allocation9]] }
 0x253   : > { %v1994_v39 = vmul.f32 %v1992_v44, %v5755_v31 }
 0x254   : > { %v1405_v27 = vpop.permute.xlu1 %1404  ;;  %v1417_v51 = vpop.permute.xlu0 %1416 }
 0x255   : > { %v1409_v36 = vadd.f32 %v1405_v27, %v5717_v12  ;;  %v1422_v13 = vadd.f32 %v1417_v51, %v5719_v35  ;;  %v1497_v12 = vmul.f32 %v1495_v63, %v5443_v3  ;;  %v1502_v35 = vmul.f32 %v1501_v33, %v5430_v57 }
 0x256   : > { %1889 = vrot.lane.b32.xlu1 %v1884_v38, %s4554_s12  ;;  %1927 = vrot.lane.b32.xlu0 %v1923_v0, %s4553_s11  ;;  %v1503_v57 = vmul.f32 %v1501_v33, %v5443_v3 }
 0x258   : > { %v1419_v14 = vpop.permute.xlu1 %1418  ;;  %v1431_v32 = vpop.permute.xlu0 %1430 }
 0x259   : > { %v1436_v34 = vadd.f32 %v1431_v32, %v1380_v28  ;;  %v1423_v27 = vadd.f32 %v1419_v14, %v5729_v21  ;;  %v1980_v28 = vmul.f32 %v1978_v62, %v5755_v31  ;;  %v1993_v32 = vmul.f32 %v1992_v44, %v5742_v17 }
 0x25a   : > { %1929 = vrot.lane.b32.xlu1 %v1924_v48, %s4553_s11  ;;  %1941 = vrot.lane.b32.xlu0 %v1937_v50, %s4553_s11  ;;  %v2006_v50 = vstv %s5798_s6  ;;  %v1640_v44 = vstv %s5862_s15  ;;  %s5897_s6 = sld [smem:[#allocation4 + $0x8d]]  ;;  %s4555_s15 = smov 3  }
 0x25b   : > { %v5777_v26 = vadd.f32 %v1484_v7, %v1436_v34  ;;  %v2007_v7 = vmul.f32 %v2006_v50, %v5742_v17 }
 0x25c   : > { %v1433_v6 = vpop.permute.xlu1 %1432  ;;  %v1445_v40 = vpop.permute.xlu0 %1444 }
 0x25d   : > { %v1437_v1 = vadd.f32 %v1433_v6, %v1381_v59  ;;  %v1450_v29 = vadd.f32 %v1445_v40, %v1394_v19  ;;  %v2008_v19 = vmul.f32 %v2006_v50, %v5755_v31  ;;  %v2021_v6 = vmul.f32 %v2020_v8, %v5742_v17 }
 0x25e   : > { %1943 = vrot.lane.b32.xlu1 %v1938_v45, %s4553_s11  ;;  %1955 = vrot.lane.b32.xlu0 %v1951_v53, %s4553_s11  ;;  %v2022_v53 = vmul.f32 %v2020_v8, %v5755_v31 }
 0x25f   : > { %v5791_v37 = vadd.f32 %v1485_v2, %v1437_v1  ;;  %v5793_v10 = vadd.f32 %v1490_v9, %v1450_v29 }
 0x260   : > { %v1447_v60 = vpop.permute.xlu1 %1446  ;;  %v1459_v16 = vpop.permute.xlu0 %1458 }
 0x261   : > { %v1451_v24 = vadd.f32 %v1447_v60, %v1395_v56  ;;  %v1464_v25 = vadd.f32 %v1459_v16, %v1408_v11  ;;  %v1628_v56 = vstv %s5852_s24  ;;  %s5912_s24 = sld [smem:[#allocation9 + $0x2]] }
 0x262   : > { %1957 = vrot.lane.b32.xlu1 %v1952_v18, %s4553_s11  ;;  %1969 = vrot.lane.b32.xlu0 %v1965_v61, %s4553_s11 }
 0x263   : > { %v5807_v15 = vadd.f32 %v1491_v47, %v1451_v24  ;;  %v5809_v54 = vadd.f32 %v1496_v52, %v1464_v25  ;;  %v1629_v25 = vmul.f32 %v1628_v56, %v5534_v23  ;;  %v1634_v47 = vstv %s5857_s14  ;;  %s5919_s14 = sld [smem:[#allocation9 + $0x3]] }
 0x264   : > { %v1461_v55 = vpop.permute.xlu1 %1460  ;;  %v1473_v43 = vpop.permute.xlu0 %1472 }
 0x265   : > { %v1465_v22 = vadd.f32 %v1461_v55, %v1409_v36  ;;  %v1478_v38 = vadd.f32 %v1473_v43, %v1422_v13 }
 0x266   : > { %1971 = vrot.lane.b32.xlu1 %v1966_v30, %s4553_s11  ;;  %1983 = vrot.lane.b32.xlu0 %v1979_v58, %s4554_s12  ;;  %s5838_s11 = sld [smem:[#allocation4 + $0x1b]]  ;;  %v1630_v30 = vmul.f32 %v1628_v56, %v5547_v42  ;;  %v1635_v58 = vmul.f32 %v1634_v47, %v5534_v23 }
 0x267   : > { %v5821_v51 = vadd.f32 %v1497_v12, %v1465_v22  ;;  %v5823_v0 = vadd.f32 %v1502_v35, %v1478_v38 }
 0x268   : > { %v1475_v46 = vpop.permute.xlu1 %1474  ;;  %v1513_v41 = vpop.permute.xlu0 %1512 }
 0x269   : > { %v1479_v48 = vadd.f32 %v1475_v46, %v1423_v27  ;;  %v1518_v1 = vadd.f32 %v1513_v41, %v5777_v26  ;;  %v1636_v41 = vmul.f32 %v1634_v47, %v5547_v42 }
 0x26a   : > { %1985 = vrot.lane.b32.xlu1 %v1980_v28, %s4554_s12  ;;  %1997 = vrot.lane.b32.xlu0 %v1993_v32, %s4554_s12  ;;  %v1641_v28 = vmul.f32 %v1640_v44, %v5534_v23 }
 0x26b   : > { %v5831_v21 = vadd.f32 %v1503_v57, %v1479_v48 }
 0x26c   : > { %v1515_v14 = vpop.permute.xlu1 %1514  ;;  %v1527_v34 = vpop.permute.xlu0 %1526  ;;  %v1622_v20 = vstv %s5838_s11  ;;  %s5910_s11 = sld [smem:[#allocation9 + $0x1]] }
 0x26d   : > { %v1623_v63 = vmul.f32 %v1622_v20, %v5534_v23  ;;  %v1519_v11 = vadd.f32 %v1515_v14, %v5791_v37  ;;  %v1532_v60 = vadd.f32 %v1527_v34, %v5793_v10  ;;  %v1624_v26 = vmul.f32 %v1622_v20, %v5547_v42 }
 0x26e   : > { %1999 = vrot.lane.b32.xlu1 %v1994_v39, %s4554_s12  ;;  %2011 = vrot.lane.b32.xlu0 %v2007_v7, %s4554_s12 }
 0x270   : > { %v1529_v3 = vpop.permute.xlu1 %1528  ;;  %v1541_v59 = vpop.permute.xlu0 %1540 }
 0x271   : > { %v1533_v52 = vadd.f32 %v1529_v3, %v5807_v15  ;;  %v1546_v33 = vadd.f32 %v1541_v59, %v5809_v54 }
 0x272   : > { %2013 = vrot.lane.b32.xlu1 %v2008_v19, %s4554_s12  ;;  %2025 = vrot.lane.b32.xlu0 %v2021_v6, %s4554_s12 }
 0x274   : > { %v1543_v40 = vpop.permute.xlu1 %1542  ;;  %v1555_v45 = vpop.permute.xlu0 %1554 }
 0x275   : > { %v1547_v22 = vadd.f32 %v1543_v40, %v5821_v51  ;;  %v1560_v38 = vadd.f32 %v1555_v45, %v5823_v0  ;;  %v1642_v51 = vmul.f32 %v1640_v44, %v5547_v42  ;;  %v1766_v42 = vstv %s4087_s23  ;;  %s4117_s23 = sld [smem:[#allocation10 + $0x25]] }
 0x276   : > { %2027 = vrot.lane.b32.xlu1 %v2022_v53, %s4554_s12  ;;  %s4086_s12 = sld [smem:[#allocation4 + $0x1e]] }
 0x278   : > { %v1557_v29 = vpop.permute.xlu1 %1556  ;;  %v1569_v2 = vpop.permute.xlu0 %1568 }
 0x279   : > { %v1574_v9 = vadd.f32 %v1569_v2, %v1518_v1  ;;  %v1561_v32 = vadd.f32 %v1557_v29, %v5831_v21 }
 0x27b   : > { %v1625_v16 = vadd.f32 %v1623_v63, %v1574_v9 }
 0x27c   : > { %v1571_v18 = vpop.permute.xlu1 %1570  ;;  %v1583_v61 = vpop.permute.xlu0 %1582  ;;  %v1760_v6 = vstv %s4086_s12  ;;  %s4116_s12 = sld [smem:[#allocation10 + $0x1]] }
 0x27d   : > { %v1575_v62 = vadd.f32 %v1571_v18, %v1519_v11  ;;  %v1588_v24 = vadd.f32 %v1583_v61, %v1532_v60  ;;  %v1761_v53 = vmul.f32 %v1760_v6, %v5638_v49  ;;  %v1762_v11 = vmul.f32 %v1760_v6, %v5651_v5 }
 0x27e   : > { %v1767_v60 = vmul.f32 %v1766_v42, %v5638_v49 }
 0x27f   : > { %v1626_v36 = vadd.f32 %v1624_v26, %v1575_v62  ;;  %v1631_v13 = vadd.f32 %v1629_v25, %v1588_v24 }
 0x280   : > { %v1585_v37 = vpop.permute.xlu1 %1584  ;;  %v1597_v55 = vpop.permute.xlu0 %1596 }
 0x281   : > { %v1589_v10 = vadd.f32 %v1585_v37, %v1533_v52  ;;  %v1602_v43 = vadd.f32 %v1597_v55, %v1546_v33  ;;  %v1768_v33 = vmul.f32 %v1766_v42, %v5651_v5 }
 0x283   : > { %v1632_v12 = vadd.f32 %v1630_v30, %v1589_v10  ;;  %v1637_v35 = vadd.f32 %v1635_v58, %v1602_v43 }
 0x284   : > { %v1599_v15 = vpop.permute.xlu1 %1598  ;;  %v1611_v27 = vpop.permute.xlu0 %1610 }
 0x285   : > { %v1603_v54 = vadd.f32 %v1599_v15, %v1547_v22  ;;  %v1616_v46 = vadd.f32 %v1611_v27, %v1560_v38 }
 0x287   : > { %v1638_v48 = vadd.f32 %v1636_v41, %v1603_v54  ;;  %v1643_v50 = vadd.f32 %v1641_v28, %v1616_v46 }
 0x288   : > { %v1613_v57 = vpop.permute.xlu1 %1612  ;;  %v1652_v14 = vpop.permute.xlu0 %1651 }
 0x289   : > { %v1617_v34 = vadd.f32 %v1613_v57, %v1561_v32  ;;  %v1657_v23 = vadd.f32 %v1652_v14, %v1625_v16  ;;  %v1772_v16 = vstv %s5880_s17  ;;  %s5935_s17 = sld [smem:[#allocation10 + $0x49]] }
 0x28a   : > { %v1774_v38 = vmul.f32 %v1772_v16, %v5651_v5 }
 0x28b   : > { %v1644_v0 = vadd.f32 %v1642_v51, %v1617_v34 }
 0x28c   : > { %v1654_v39 = vpop.permute.xlu1 %1653  ;;  %v1666_v7 = vpop.permute.xlu0 %1665 }
 0x28d   : > { %v1658_v20 = vadd.f32 %v1654_v39, %v1626_v36  ;;  %v1671_v1 = vadd.f32 %v1666_v7, %v1631_v13  ;;  %v1773_v36 = vmul.f32 %v1772_v16, %v5638_v49  ;;  %v1778_v13 = vstv %s5883_s26  ;;  %s4119_s26 = sld [smem:[#allocation10 + $0x6d]] }
 0x28e   : > { %v1780_v28 = vmul.f32 %v1778_v13, %v5651_v5  ;;  %v1898_v39 = vstv %s4098_s27  ;;  %v1904_v5 = vstv %s4099_s28  ;;  %s4556_s27 = smov 125   ;;  %s4120_s28 = sld [smem:[#allocation10 + $0x2]] }
 0x28f   : > { %v1905_v42 = vmul.f32 %v1904_v5, %v5742_v17  ;;  %v1906_v16 = vmul.f32 %v1904_v5, %v5755_v31 }
 0x290   : > { %v1668_v8 = vpop.permute.xlu1 %1667  ;;  %v1680_v3 = vpop.permute.xlu0 %1679 }
 0x291   : > { %v1672_v18 = vadd.f32 %v1668_v8, %v1632_v12  ;;  %v1685_v61 = vadd.f32 %v1680_v3, %v1637_v35  ;;  %v1779_v12 = vmul.f32 %v1778_v13, %v5638_v49  ;;  %v1899_v3 = vmul.f32 %v1898_v39, %v5742_v17 }
 0x294   : > { %v1682_v59 = vpop.permute.xlu1 %1681  ;;  %v1694_v19 = vpop.permute.xlu0 %1693 }
 0x295   : > { %v1686_v37 = vadd.f32 %v1682_v59, %v1638_v48  ;;  %v1699_v55 = vadd.f32 %v1694_v19, %v1643_v50 }
 0x298   : > { %v1696_v21 = vpop.permute.xlu1 %1695  ;;  %v1708_v40 = vpop.permute.xlu0 %1707 }
 0x299   : > { %v1713_v45 = vadd.f32 %v1708_v40, %v1657_v23  ;;  %v1700_v35 = vadd.f32 %v1696_v21, %v1644_v0 }
 0x29b   : > { %v1763_v29 = vadd.f32 %v1761_v53, %v1713_v45  ;;  %v1900_v53 = vmul.f32 %v1898_v39, %v5755_v31 }
 0x29c   : > { %v1710_v2 = vpop.permute.xlu1 %1709  ;;  %v1722_v9 = vpop.permute.xlu0 %1721 }
 0x29d   : > { %v1714_v63 = vadd.f32 %v1710_v2, %v1658_v20  ;;  %v1727_v56 = vadd.f32 %v1722_v9, %v1671_v1  ;;  %v1910_v20 = vstv %s5894_s13  ;;  %s4121_s13 = sld [smem:[#allocation10 + $0x26]] }
 0x29e   : > { %v1912_v13 = vmul.f32 %v1910_v20, %v5755_v31 }
 0x29f   : > { %v1764_v62 = vadd.f32 %v1762_v11, %v1714_v63  ;;  %v1769_v24 = vadd.f32 %v1767_v60, %v1727_v56 }
 0x2a0   : > { %v1724_v26 = vpop.permute.xlu1 %1723  ;;  %v1736_v25 = vpop.permute.xlu0 %1735 }
 0x2a1   : > { %v1728_v47 = vadd.f32 %v1724_v26, %v1672_v18  ;;  %v1741_v52 = vadd.f32 %v1736_v25, %v1685_v61  ;;  %v1911_v18 = vmul.f32 %v1910_v20, %v5742_v17  ;;  %v1916_v61 = vstv %s5897_s6  ;;  %s4122_s6 = sld [smem:[#allocation10 + $0x4a]] }
 0x2a3   : > { %v1770_v10 = vadd.f32 %v1768_v33, %v1728_v47  ;;  %v1775_v43 = vadd.f32 %v1773_v36, %v1741_v52 }
 0x2a4   : > { %v1738_v30 = vpop.permute.xlu1 %1737  ;;  %v1750_v58 = vpop.permute.xlu0 %1749 }
 0x2a5   : > { %v1742_v44 = vadd.f32 %v1738_v30, %v1686_v37  ;;  %v1755_v22 = vadd.f32 %v1750_v58, %v1699_v55  ;;  %v1917_v37 = vmul.f32 %v1916_v61, %v5742_v17 }
 0x2a7   : > { %v1776_v15 = vadd.f32 %v1774_v38, %v1742_v44  ;;  %v1781_v27 = vadd.f32 %v1779_v12, %v1755_v22  ;;  %v1918_v22 = vmul.f32 %v1916_v61, %v5755_v31 }
 0x2a8   : > { %v1752_v54 = vpop.permute.xlu1 %1751  ;;  %v1790_v46 = vpop.permute.xlu0 %1789 }
 0x2a9   : > { %v1756_v41 = vadd.f32 %v1752_v54, %v1700_v35  ;;  %v1795_v49 = vadd.f32 %v1790_v46, %v1763_v29 }
 0x2ab   : > { %v1782_v32 = vadd.f32 %v1780_v28, %v1756_v41  ;;  %v2034_v28 = vstv %s2033_s10  ;;  %s4123_s10 = sld [smem:[#allocation10 + $0x6e]] }
 0x2ac   : > { %v1792_v48 = vpop.permute.xlu1 %1791  ;;  %v1804_v50 = vpop.permute.xlu0 %1803 }
 0x2ad   : > { %v1796_v59 = vadd.f32 %v1792_v48, %v1764_v62  ;;  %v1809_v19 = vadd.f32 %v1804_v50, %v1769_v24 }
 0x2b0   : > { %v1806_v57 = vpop.permute.xlu1 %1805  ;;  %v1818_v14 = vpop.permute.xlu0 %1817 }
 0x2b1   : > { %v1810_v1 = vadd.f32 %v1806_v57, %v1770_v10  ;;  %v1823_v29 = vadd.f32 %v1818_v14, %v1775_v43 }
 0x2b4   : > { %v1820_v34 = vpop.permute.xlu1 %1819  ;;  %v1832_v51 = vpop.permute.xlu0 %1831 }
 0x2b5   : > { %v1824_v62 = vadd.f32 %v1820_v34, %v1776_v15  ;;  %v1837_v24 = vadd.f32 %v1832_v51, %v1781_v27  ;;  %v2055_v34 = vstv %s5910_s11  ;;  %s4557_s11 = smov 122  }
 0x2b8   : > { %v1834_v0 = vpop.permute.xlu1 %1833  ;;  %v1846_v7 = vpop.permute.xlu0 %1845 }
 0x2b9   : > { %v1851_v8 = vadd.f32 %v1846_v7, %v1795_v49  ;;  %v1838_v55 = vadd.f32 %v1834_v0, %v1782_v32 }
 0x2bb   : > { %v1901_v6 = vadd.f32 %v1899_v3, %v1851_v8 }
 0x2bc   : > { %v1848_v23 = vpop.permute.xlu1 %1847  ;;  %v1860_v21 = vpop.permute.xlu0 %1859 }
 0x2bd   : > { %v1852_v40 = vadd.f32 %v1848_v23, %v1796_v59  ;;  %v1865_v45 = vadd.f32 %v1860_v21, %v1809_v19 }
 0x2bf   : > { %v1902_v2 = vadd.f32 %v1900_v53, %v1852_v40  ;;  %v1907_v9 = vadd.f32 %v1905_v42, %v1865_v45 }
 0x2c0   : > { %v1862_v63 = vpop.permute.xlu1 %1861  ;;  %v1874_v56 = vpop.permute.xlu0 %1873 }
 0x2c1   : > { %v1866_v11 = vadd.f32 %v1862_v63, %v1810_v1  ;;  %v1879_v60 = vadd.f32 %v1874_v56, %v1823_v29 }
 0x2c3   : > { %v1908_v26 = vadd.f32 %v1906_v16, %v1866_v11  ;;  %v1913_v25 = vadd.f32 %v1911_v18, %v1879_v60 }
 0x2c4   : > { %v1876_v47 = vpop.permute.xlu1 %1875  ;;  %v1888_v52 = vpop.permute.xlu0 %1887 }
 0x2c5   : > { %v1880_v33 = vadd.f32 %v1876_v47, %v1824_v62  ;;  %v1893_v36 = vadd.f32 %v1888_v52, %v1837_v24 }
 0x2c7   : > { %v1914_v10 = vadd.f32 %v1912_v13, %v1880_v33  ;;  %v1919_v43 = vadd.f32 %v1917_v37, %v1893_v36 }
 0x2c8   : > { %v1890_v30 = vpop.permute.xlu1 %1889  ;;  %v1928_v58 = vpop.permute.xlu0 %1927 }
 0x2c9   : > { %v1894_v44 = vadd.f32 %v1890_v30, %v1838_v55  ;;  %v1933_v17 = vadd.f32 %v1928_v58, %v1901_v6  ;;  %v2076_v6 = vstv %s5912_s24  ;;  %s4128_s24 = sld [smem:[#allocation10 + $0x4]] }
 0x2cb   : > { %v5908_v38 = vadd.f32 %v1918_v22, %v1894_v44  ;;  %v2144_v22 = vstv %s4116_s12  ;;  %s4131_s12 = sld [smem:[#allocation10 + $0x70]] }
 0x2cc   : > { %v1930_v12 = vpop.permute.xlu1 %1929  ;;  %v1942_v35 = vpop.permute.xlu0 %1941 }
 0x2cd   : > { %v1934_v31 = vadd.f32 %v1930_v12, %v1902_v2  ;;  %v1947_v50 = vadd.f32 %v1942_v35, %v1907_v9  ;;  %v2097_v9 = vstv %s5919_s14  ;;  %s4129_s14 = sld [smem:[#allocation10 + $0x28]] }
 0x2d0   : > { %v1944_v15 = vpop.permute.xlu1 %1943  ;;  %v1956_v27 = vpop.permute.xlu0 %1955 }
 0x2d1   : > { %v1948_v7 = vadd.f32 %v1944_v15, %v1908_v26  ;;  %v1961_v8 = vadd.f32 %v1956_v27, %v1913_v25  ;;  %v2158_v27 = vstv %s4117_s23  ;;  %s4132_s23 = sld [smem:[#allocation10 + $0x5]] }
 0x2d4   : > { %v1958_v54 = vpop.permute.xlu1 %1957  ;;  %v1970_v46 = vpop.permute.xlu0 %1969 }
 0x2d5   : > { %v1962_v45 = vadd.f32 %v1958_v54, %v1914_v10  ;;  %v1975_v42 = vadd.f32 %v1970_v46, %v1919_v43 }
 0x2d8   : > { %v1972_v41 = vpop.permute.xlu1 %1971  ;;  %v1984_v32 = vpop.permute.xlu0 %1983 }
 0x2d9   : > { %v1989_v48 = vadd.f32 %v1984_v32, %v1933_v17  ;;  %v1976_v61 = vadd.f32 %v1972_v41, %v5908_v38  ;;  %v2172_v32 = vstv %s5935_s17  ;;  %s4133_s17 = sld [smem:[#allocation10 + $0x29]] }
 0x2db   : > { %v2035_v57 = vadd.f32 %v2034_v28, %v1989_v48 }
 0x2dc   : > { %v1986_v14 = vpop.permute.xlu1 %1985  ;;  %v1998_v51 = vpop.permute.xlu0 %1997 }
 0x2dd   : > { %v1990_v39 = vadd.f32 %v1986_v14, %v1934_v31  ;;  %v2003_v49 = vadd.f32 %v1998_v51, %v1947_v50  ;;  %vm2037_vm5 = vcmp.ge.f32.partialorder %v2035_v57, 0.0  ;;  %v2039_v0 = vmul.f32 0.2, %v2035_v57 }
 0x2de   : > { %v2200_v51 = vstv %s4120_s28  ;;  %s4135_s28 = sld [smem:[#allocation10 + $0x71]] }
 0x2df   : > { %v2036_v3 = vadd.f32 %v2034_v28, %v1990_v39  ;;  %v2056_v5 = vadd.f32 %v2055_v34, %v2003_v49  ;;  %v2041_v59 = vsel %vm2037_vm5, %v2035_v57, %v2039_v0  ;;  %v2186_v57 = vstv %s4119_s26  ;;  %s4134_s26 = sld [smem:[#allocation10 + $0x4d]] }
 0x2e0   : > { %v2000_v19 = vpop.permute.xlu1 %1999  ;;  %v2012_v23 = vpop.permute.xlu0 %2011  ;;  %2045 = vrot.lane.b32.xlu0 %v2041_v59, %s4555_s15  ;;  %v2214_v0 = vstv %s4121_s13  ;;  %s4140_s13 = sld [smem:[#allocation10 + $0x7]] }
 0x2e1   : > { %v2004_v4 = vadd.f32 %v2000_v19, %v1948_v7  ;;  %v2017_v21 = vadd.f32 %v2012_v23, %v1961_v8  ;;  %vm2038_vm6 = vcmp.ge.f32.partialorder %v2036_v3, 0.0  ;;  %v2040_v40 = vmul.f32 0.2, %v2036_v3 }
 0x2e2   : > { %vm2058_vm7 = vcmp.ge.f32.partialorder %v2056_v5, 0.0  ;;  %v2060_v53 = vmul.f32 0.2, %v2056_v5  ;;  %v2242_v19 = vstv %s4123_s10  ;;  %s4142_s10 = sld [smem:[#allocation10 + $0x4f]] }
 0x2e3   : > { %v2057_v20 = vadd.f32 %v2055_v34, %v2004_v4  ;;  %v2077_v1 = vadd.f32 %v2076_v6, %v2017_v21  ;;  %v2042_v29 = vsel %vm2038_vm6, %v2036_v3, %v2040_v40  ;;  %v2228_v3 = vstv %s4122_s6  ;;  %s4141_s6 = sld [smem:[#allocation10 + $0x2b]] }
 0x2e4   : > { %v2014_v2 = vpop.permute.xlu1 %2013  ;;  %2047 = vrot.lane.b32.xlu1 %v2042_v29, %s4555_s15  ;;  %v2026_v63 = vpop.permute.xlu0 %2025  ;;  %v2062_v56 = vsel %vm2058_vm7, %v2056_v5, %v2060_v53  ;;  %v2282_v21 = vstv %s4128_s24  ;;  %s4143_s24 = sld [smem:[#allocation10 + $0x73]] }
 0x2e5   : > { %v2018_v11 = vadd.f32 %v2014_v2, %v1962_v45  ;;  %v2031_v60 = vadd.f32 %v2026_v63, %v1975_v42  ;;  %2066 = vrot.lane.b32.xlu0 %v2062_v56, %s4555_s15  ;;  %vm2059_vm8 = vcmp.ge.f32.partialorder %v2057_v20, 0.0  ;;  %v2061_v16 = vmul.f32 0.2, %v2057_v20 }
 0x2e6   : > { %vm2079_vm9 = vcmp.ge.f32.partialorder %v2077_v1, 0.0  ;;  %v2081_v18 = vmul.f32 0.2, %v2077_v1  ;;  %v2296_v42 = vstv %s4129_s14  ;;  %v2324_v63 = vstv %s4131_s12  ;;  %s4144_s14 = sld [smem:[#allocation10 + $0x8]] }
 0x2e7   : > { %v2078_v62 = vadd.f32 %v2076_v6, %v2018_v11  ;;  %v2098_v24 = vadd.f32 %v2097_v9, %v2031_v60  ;;  %v2063_v26 = vsel %vm2059_vm8, %v2057_v20, %v2061_v16  ;;  %v2338_v60 = vstv %s4132_s23  ;;  %s4146_s12 = sld [smem:[#allocation10 + $0x50]]  ;;  %s4147_s23 = sld [smem:[#allocation10 + $0x74]] }
 0x2e8   : > { %v2028_v25 = vpop.permute.xlu1 %2027  ;;  %2068 = vrot.lane.b32.xlu1 %v2063_v26, %s4555_s15  ;;  %v2083_v47 = vsel %vm2079_vm9, %v2077_v1, %v2081_v18  ;;  %v2366_v26 = vstv %s4134_s26  ;;  %s4153_s26 = sld [smem:[#allocation10 + $0x2e]] }
 0x2e9   : > { %v2032_v52 = vadd.f32 %v2028_v25, %v1976_v61  ;;  %2087 = vrot.lane.b32.xlu0 %v2083_v47, %s4555_s15  ;;  %vm2080_vm10 = vcmp.ge.f32.partialorder %v2078_v62, 0.0  ;;  %v2082_v33 = vmul.f32 0.2, %v2078_v62  ;;  %vm2100_vm11 = vcmp.ge.f32.partialorder %v2098_v24, 0.0 }
 0x2ea   : > { %v2102_v36 = vmul.f32 0.2, %v2098_v24  ;;  %v2352_v61 = vstv %s4133_s17  ;;  %s4152_s17 = sld [smem:[#allocation10 + $0xa]] }
 0x2eb   : > { %v2099_v13 = vadd.f32 %v2097_v9, %v2032_v52  ;;  %v2084_v37 = vsel %vm2080_vm10, %v2078_v62, %v2082_v33  ;;  %v2380_v52 = vstv %s4135_s28  ;;  %s4154_s28 = sld [smem:[#allocation10 + $0x52]] }
 0x2ec   : > { %2089 = vrot.lane.b32.xlu1 %v2084_v37, %s4555_s15  ;;  %v2104_v55 = vsel %vm2100_vm11, %v2098_v24, %v2102_v36  ;;  %v2420_v37 = vstv %s4140_s13  ;;  %s4155_s13 = sld [smem:[#allocation10 + $0x76]] }
 0x2ed   : > { %2108 = vrot.lane.b32.xlu0 %v2104_v55, %s4555_s15  ;;  %vm2101_vm12 = vcmp.ge.f32.partialorder %v2099_v13, 0.0  ;;  %v2103_v10 = vmul.f32 0.2, %v2099_v13 }
 0x2ef   : > { %v2105_v43 = vsel %vm2101_vm12, %v2099_v13, %v2103_v10 }
 0x2f0   : > { %2110 = vrot.lane.b32.xlu1 %v2105_v43, %s4555_s15  ;;  %s4130_s15 = sld [smem:[#allocation10 + $0x4c]] }
 0x2f6   : > { %v2310_v29 = vstv %s4130_s15  ;;  %s4145_s15 = sld [smem:[#allocation10 + $0x2c]] }
 0x352   : > { %v2046_v30 = vpop.permute.xlu0 %2045 }
 0x353   : > { %2052 = vst.msk [vmem:[#allocation3 + $0x3] sm:$0xff] %vm2051_vm13, %v2046_v30  ;;  %v2434_v30 = vstv %s4141_s6  ;;  %s4156_s6 = sld [smem:[#allocation10 + $0xb]] }
 0x356   : > { %v2048_v58 = vpop.permute.xlu1 %2047 }
 0x357   : > { %2053 = vst.msk [vmem:[#allocation3 + $0xb] sm:$0xff] %vm2051_vm13, %v2048_v58  ;;  %v2067_v44 = vpop.permute.xlu0 %2066 }
 0x358   : > { %2073 = vst.msk [vmem:[#allocation3 + $0x1b] sm:$0xff] %vm2051_vm13, %v2067_v44 }
 0x35a   : > { %v5937_v38 = vld [vmem:[#allocation3] sm:$0xff]  ;;  %v2069_v12 = vpop.permute.xlu1 %2068 }
 0x35b   : > { %2074 = vst.msk [vmem:[#allocation3 + $0x23] sm:$0xff] %vm2051_vm13, %v2069_v12  ;;  %v2088_v35 = vpop.permute.xlu0 %2087  ;;  %v2145_v15 = vmul.f32 %v2144_v22, %v5937_v38  ;;  %v2159_v28 = vmul.f32 %v2158_v27, %v5937_v38  ;;  %v2173_v50 = vmul.f32 %v2172_v32, %v5937_v38  ;;  %v2187_v34 = vmul.f32 %v2186_v57, %v5937_v38  ;;  %v5975_v4 = vld [vmem:[#allocation3 + $0x3] sm:$0xff] }
 0x35c   : > { %2094 = vst.msk [vmem:[#allocation3 + $0x33] sm:$0xff] %vm2051_vm13, %v2088_v35  ;;  %v2201_v49 = vmul.f32 %v2200_v51, %v5937_v38  ;;  %v2215_v8 = vmul.f32 %v2214_v0, %v5937_v38  ;;  %v2229_v59 = vmul.f32 %v2228_v3, %v5937_v38  ;;  %v2243_v23 = vmul.f32 %v2242_v19, %v5937_v38 }
 0x35d   : > { %2149 = vrot.lane.b32.xlu0 %v2145_v15, %s4556_s27  ;;  %v2283_v45 = vmul.f32 %v2282_v21, %v5975_v4  ;;  %v2297_v1 = vmul.f32 %v2296_v42, %v5975_v4  ;;  %v2311_v9 = vmul.f32 %v2310_v29, %v5975_v4  ;;  %v2325_v11 = vmul.f32 %v2324_v63, %v5975_v4 }
 0x35e   : > { %v5943_v54 = vld [vmem:[#allocation3 + $0x8] sm:$0xff]  ;;  %v2090_v46 = vpop.permute.xlu1 %2089  ;;  %v2339_v18 = vmul.f32 %v2338_v60, %v5975_v4  ;;  %v2353_v24 = vmul.f32 %v2352_v61, %v5975_v4  ;;  %v2367_v47 = vmul.f32 %v2366_v26, %v5975_v4  ;;  %v2381_v36 = vmul.f32 %v2380_v52, %v5975_v4 }
 0x35f   : > { %2095 = vst.msk [vmem:[#allocation3 + $0x3b] sm:$0xff] %vm2051_vm13, %v2090_v46  ;;  %v2109_v17 = vpop.permute.xlu0 %2108  ;;  %v2146_v41 = vmul.f32 %v2144_v22, %v5943_v54  ;;  %v2160_v31 = vmul.f32 %v2158_v27, %v5943_v54  ;;  %v2174_v14 = vmul.f32 %v2172_v32, %v5943_v54  ;;  %v2188_v39 = vmul.f32 %v2186_v57, %v5943_v54  ;;  %v5981_v53 = vld [vmem:[#allocation3 + $0xb] sm:$0xff] }
 0x360   : > { %2115 = vst.msk [vmem:[#allocation3 + $0x4b] sm:$0xff] %vm2051_vm13, %v2109_v17  ;;  %v2202_v7 = vmul.f32 %v2200_v51, %v5943_v54  ;;  %v2216_v5 = vmul.f32 %v2214_v0, %v5943_v54  ;;  %v2230_v6 = vmul.f32 %v2228_v3, %v5943_v54  ;;  %v2244_v40 = vmul.f32 %v2242_v19, %v5943_v54  ;;  %v6011_v13 = vld [vmem:[#allocation3 + $0x6] sm:$0xff]  ;;  %v6017_v43 = vld [vmem:[#allocation3 + $0xe] sm:$0xff] }
 0x361   : > { %2151 = vrot.lane.b32.xlu1 %v2146_v41, %s4556_s27  ;;  %2163 = vrot.lane.b32.xlu0 %v2159_v28, %s4556_s27  ;;  %v2284_v20 = vmul.f32 %v2282_v21, %v5981_v53  ;;  %v2298_v2 = vmul.f32 %v2296_v42, %v5981_v53  ;;  %v2312_v56 = vmul.f32 %v2310_v29, %v5981_v53  ;;  %v2448_v22 = vstv %s4142_s10  ;;  %s4157_s10 = sld [smem:[#allocation10 + $0x2f]] }
 0x362   : > { %v2111_v48 = vpop.permute.xlu1 %2110  ;;  %v2326_v16 = vmul.f32 %v2324_v63, %v5981_v53  ;;  %v2340_v62 = vmul.f32 %v2338_v60, %v5981_v53  ;;  %v2354_v25 = vmul.f32 %v2352_v61, %v5981_v53  ;;  %v2368_v33 = vmul.f32 %v2366_v26, %v5981_v53  ;;  %v6053_v3 = vld [vmem:[#allocation3 + $0x20] sm:$0xff] }
 0x363   : > { %2116 = vst.msk [vmem:[#allocation3 + $0x53] sm:$0xff] %vm2051_vm13, %v2111_v48  ;;  %v2382_v55 = vmul.f32 %v2380_v52, %v5981_v53  ;;  %v2421_v10 = vmul.f32 %v2420_v37, %v6011_v13  ;;  %v2422_v58 = vmul.f32 %v2420_v37, %v6017_v43  ;;  %v2435_v44 = vmul.f32 %v2434_v30, %v6011_v13  ;;  %v6100_v52 = vld [vmem:[#allocation3 + $0x1b] sm:$0xff] }
 0x364   : > { %v2436_v12 = vmul.f32 %v2434_v30, %v6017_v43  ;;  %v2449_v35 = vmul.f32 %v2448_v22, %v6011_v13  ;;  %v2462_v15 = vstv %s4143_s24  ;;  %v2450_v27 = vmul.f32 %v2448_v22, %v6017_v43  ;;  %s4158_s24 = sld [smem:[#allocation10 + $0x53]] }
 0x365   : > { %2165 = vrot.lane.b32.xlu1 %v2160_v31, %s4556_s27  ;;  %2177 = vrot.lane.b32.xlu0 %v2173_v50, %s4556_s27  ;;  %v2463_v46 = vmul.f32 %v2462_v15, %v6011_v13  ;;  %v2476_v17 = vstv %s4144_s14  ;;  %v2464_v41 = vmul.f32 %v2462_v15, %v6017_v43  ;;  %v2490_v32 = vstv %s4145_s15  ;;  %s6071_s14 = sld [smem:[#allocation10 + $0x77]]  ;;  %s6077_s15 = sld [smem:[#allocation10 + $0xd]] }
 0x366   : > { %v2477_v28 = vmul.f32 %v2476_v17, %v6011_v13  ;;  %v2478_v48 = vmul.f32 %v2476_v17, %v6017_v43  ;;  %v2491_v31 = vmul.f32 %v2490_v32, %v6011_v13  ;;  %v2504_v50 = vstv %s4146_s12  ;;  %s6079_s12 = sld [smem:[#allocation10]] }
 0x367   : > { %v2492_v57 = vmul.f32 %v2490_v32, %v6017_v43  ;;  %v2506_v51 = vmul.f32 %v2504_v50, %v6017_v43  ;;  %v2558_v0 = vstv %s4152_s17  ;;  %s6088_s17 = sld [smem:[#allocation10 + $0x24]] }
 0x369   : > { %2179 = vrot.lane.b32.xlu1 %v2174_v14, %s4556_s27  ;;  %2191 = vrot.lane.b32.xlu0 %v2187_v34, %s4556_s27  ;;  %v2505_v14 = vmul.f32 %v2504_v50, %v6011_v13  ;;  %v2518_v34 = vstv %s4147_s23  ;;  %s6086_s23 = sld [smem:[#allocation10 + $0x31]] }
 0x36d   : > { %2193 = vrot.lane.b32.xlu1 %v2188_v39, %s4556_s27  ;;  %2205 = vrot.lane.b32.xlu0 %v2201_v49, %s4557_s11  ;;  %v2519_v39 = vmul.f32 %v2518_v34, %v6011_v13  ;;  %v6047_v49 = vld [vmem:[#allocation3 + $0x18] sm:$0xff] }
 0x36f   : > { %v2710_v22 = vstv %s6086_s23  ;;  %s6152_s23 = sld [smem:[#allocation10 + $0x32]] }
 0x371   : > { %2207 = vrot.lane.b32.xlu1 %v2202_v7, %s4557_s11  ;;  %2219 = vrot.lane.b32.xlu0 %v2215_v8, %s4557_s11  ;;  %v2520_v7 = vmul.f32 %v2518_v34, %v6017_v43  ;;  %v2559_v8 = vmul.f32 %v2558_v0, %v6047_v49 }
 0x375   : > { %2221 = vrot.lane.b32.xlu1 %v2216_v5, %s4557_s11  ;;  %2233 = vrot.lane.b32.xlu0 %v2229_v59, %s4557_s11  ;;  %v2572_v5 = vstv %s4153_s26  ;;  %v2560_v59 = vmul.f32 %v2558_v0, %v6053_v3  ;;  %s6092_s26 = sld [smem:[#allocation10 + $0x3]] }
 0x376   : > { %v2573_v19 = vmul.f32 %v2572_v5, %v6047_v49 }
 0x379   : > { %2235 = vrot.lane.b32.xlu1 %v2230_v6, %s4557_s11  ;;  %2247 = vrot.lane.b32.xlu0 %v2243_v23, %s4557_s11  ;;  %v2586_v6 = vstv %s4154_s28  ;;  %v2574_v23 = vmul.f32 %v2572_v5, %v6053_v3  ;;  %s6094_s28 = sld [smem:[#allocation10 + $0x48]] }
 0x37a   : > { %v2587_v21 = vmul.f32 %v2586_v6, %v6047_v49 }
 0x37d   : > { %2249 = vrot.lane.b32.xlu1 %v2244_v40, %s4557_s11  ;;  %2287 = vrot.lane.b32.xlu0 %v2283_v45, %s4556_s27  ;;  %v2600_v40 = vstv %s4155_s13  ;;  %v2588_v45 = vmul.f32 %v2586_v6, %v6053_v3  ;;  %s6098_s13 = sld [smem:[#allocation10 + $0x55]] }
 0x37e   : > { %v2601_v42 = vmul.f32 %v2600_v40, %v6047_v49 }
 0x381   : > { %2289 = vrot.lane.b32.xlu1 %v2284_v20, %s4556_s27  ;;  %2301 = vrot.lane.b32.xlu0 %v2297_v1, %s4556_s27  ;;  %v2614_v20 = vstv %s4156_s6  ;;  %v2602_v1 = vmul.f32 %v2600_v40, %v6053_v3  ;;  %s6106_s6 = sld [smem:[#allocation10 + $0x6c]] }
 0x382   : > { %v2615_v29 = vmul.f32 %v2614_v20, %v6047_v49  ;;  %v2616_v63 = vmul.f32 %v2614_v20, %v6053_v3 }
 0x383   : > { %v2724_v32 = vstv %s6098_s13  ;;  %s6209_s13 = sld [smem:[#allocation10 + $0x34]] }
 0x385   : > { %2303 = vrot.lane.b32.xlu1 %v2298_v2, %s4556_s27  ;;  %2315 = vrot.lane.b32.xlu0 %v2311_v9, %s4556_s27  ;;  %v2628_v2 = vstv %s4157_s10  ;;  %s6108_s10 = sld [smem:[#allocation10 + $0x27]] }
 0x389   : > { %2317 = vrot.lane.b32.xlu1 %v2312_v56, %s4556_s27  ;;  %2329 = vrot.lane.b32.xlu0 %v2325_v11, %s4556_s27  ;;  %v2629_v56 = vmul.f32 %v2628_v2, %v6047_v49  ;;  %v2642_v11 = vstv %s4158_s24  ;;  %s6110_s24 = sld [smem:[#allocation10 + $0x79]] }
 0x38a   : > { %v2643_v61 = vmul.f32 %v2642_v11, %v6047_v49 }
 0x38b   : > { %v2264_v34 = vstv %s6108_s10  ;;  %s6220_s10 = sld [smem:[#allocation10 + $0x58]] }
 0x38d   : > { %2331 = vrot.lane.b32.xlu1 %v2326_v16, %s4556_s27  ;;  %2343 = vrot.lane.b32.xlu0 %v2339_v18, %s4557_s11  ;;  %v2630_v18 = vmul.f32 %v2628_v2, %v6053_v3 }
 0x38f   : > { %v2738_v0 = vstv %s6110_s24  ;;  %s6224_s24 = sld [smem:[#allocation10 + $0x2a]] }
 0x391   : > { %2345 = vrot.lane.b32.xlu1 %v2340_v62, %s4557_s11  ;;  %2357 = vrot.lane.b32.xlu0 %v2353_v24, %s4557_s11  ;;  %v2656_v62 = vstv %s6071_s14  ;;  %s6125_s14 = sld [smem:[#allocation10 + $0xe]] }
 0x395   : > { %2359 = vrot.lane.b32.xlu1 %v2354_v25, %s4557_s11  ;;  %2371 = vrot.lane.b32.xlu0 %v2367_v47, %s4557_s11  ;;  %v2644_v25 = vmul.f32 %v2642_v11, %v6053_v3  ;;  %v2657_v47 = vmul.f32 %v2656_v62, %v6047_v49 }
 0x397   : > { %v2752_v20 = vstv %s6125_s14  ;;  %s6228_s14 = sld [smem:[#allocation10 + $0x7c]] }
 0x399   : > { %2373 = vrot.lane.b32.xlu1 %v2368_v33, %s4557_s11  ;;  %2385 = vrot.lane.b32.xlu0 %v2381_v36, %s4557_s11  ;;  %v2696_v33 = vstv %s6077_s15  ;;  %v2120_v36 = vstv %s6079_s12  ;;  %s6128_s15 = sld [smem:[#allocation10 + $0x4b]]  ;;  %s6143_s12 = sld [smem:[#allocation10 + $0x6f]] }
 0x39a   : > { %v2697_v30 = vmul.f32 %v2696_v33, %v6100_v52 }
 0x39d   : > { %2387 = vrot.lane.b32.xlu1 %v2382_v55, %s4557_s11  ;;  %2425 = vrot.lane.b32.xlu0 %v2421_v10, %s4556_s27  ;;  %v2658_v10 = vmul.f32 %v2656_v62, %v6053_v3 }
 0x3a1   : > { %2427 = vrot.lane.b32.xlu1 %v2422_v58, %s4556_s27  ;;  %2439 = vrot.lane.b32.xlu0 %v2435_v44, %s4556_s27  ;;  %v6118_v58 = vld [vmem:[#allocation3 + $0x23] sm:$0xff]  ;;  %v2121_v44 = vmul.f32 %v2120_v36, %v5937_v38 }
 0x3a2   : > { %v2712_v6 = vmul.f32 %v2710_v22, %v6118_v58 }
 0x3a5   : > { %2441 = vrot.lane.b32.xlu1 %v2436_v12, %s4556_s27  ;;  %2453 = vrot.lane.b32.xlu0 %v2449_v35, %s4556_s27  ;;  %v2126_v12 = vstv %s6088_s17  ;;  %v2258_v35 = vstv %s6092_s26  ;;  %s6168_s17 = sld [smem:[#allocation10 + $0x56]]  ;;  %s6185_s26 = sld [smem:[#allocation10 + $0x7a]] }
 0x3a9   : > { %2455 = vrot.lane.b32.xlu1 %v2450_v27, %s4556_s27  ;;  %2467 = vrot.lane.b32.xlu0 %v2463_v46, %s4556_s27  ;;  %v2132_v27 = vstv %s6094_s28  ;;  %s6199_s28 = sld [smem:[#allocation10 + $0x10]] }
 0x3aa   : > { %v2133_v5 = vmul.f32 %v2132_v27, %v5937_v38 }
 0x3ad   : > { %2469 = vrot.lane.b32.xlu1 %v2464_v41, %s4556_s27  ;;  %2481 = vrot.lane.b32.xlu0 %v2477_v28, %s4557_s11  ;;  %v2698_v41 = vmul.f32 %v2696_v33, %v6118_v58  ;;  %v2711_v28 = vmul.f32 %v2710_v22, %v6100_v52 }
 0x3b1   : > { %2483 = vrot.lane.b32.xlu1 %v2478_v48, %s4557_s11  ;;  %2495 = vrot.lane.b32.xlu0 %v2491_v31, %s4557_s11  ;;  %v2122_v48 = vmul.f32 %v2120_v36, %v5943_v54  ;;  %v2127_v31 = vmul.f32 %v2126_v12, %v5937_v38 }
 0x3b5   : > { %2497 = vrot.lane.b32.xlu1 %v2492_v57, %s4557_s11  ;;  %2509 = vrot.lane.b32.xlu0 %v2505_v14, %s4557_s11  ;;  %v2259_v57 = vmul.f32 %v2258_v35, %v5975_v4  ;;  %v2138_v14 = vstv %s6106_s6  ;;  %s6213_s6 = sld [smem:[#allocation10 + $0x6]] }
 0x3b6   : > { %v2139_v11 = vmul.f32 %v2138_v14, %v5937_v38  ;;  %v2276_v38 = vstv %s6143_s12  ;;  %s6241_s12 = sld [smem:[#allocation10 + $0x11]] }
 0x3b9   : > { %2511 = vrot.lane.b32.xlu1 %v2506_v51, %s4557_s11  ;;  %2523 = vrot.lane.b32.xlu0 %v2519_v39, %s4557_s11 }
 0x3bd   : > { %2525 = vrot.lane.b32.xlu1 %v2520_v7, %s4557_s11  ;;  %2563 = vrot.lane.b32.xlu0 %v2559_v8, %s4556_s27  ;;  %v2128_v8 = vmul.f32 %v2126_v12, %v5943_v54  ;;  %v2740_v12 = vmul.f32 %v2738_v0, %v6118_v58 }
 0x3c1   : > { %2565 = vrot.lane.b32.xlu1 %v2560_v59, %s4556_s27  ;;  %2577 = vrot.lane.b32.xlu0 %v2573_v19, %s4556_s27 }
 0x3c5   : > { %2579 = vrot.lane.b32.xlu1 %v2574_v23, %s4556_s27  ;;  %2591 = vrot.lane.b32.xlu0 %v2587_v21, %s4556_s27  ;;  %v2725_v23 = vmul.f32 %v2724_v32, %v6100_v52 }
 0x3c9   : > { %2593 = vrot.lane.b32.xlu1 %v2588_v45, %s4556_s27  ;;  %2605 = vrot.lane.b32.xlu0 %v2601_v42, %s4556_s27  ;;  %v2260_v45 = vmul.f32 %v2258_v35, %v5981_v53  ;;  %v2265_v42 = vmul.f32 %v2264_v34, %v5975_v4  ;;  %v2753_v35 = vmul.f32 %v2752_v20, %v6100_v52 }
 0x3cd   : > { %2607 = vrot.lane.b32.xlu1 %v2602_v1, %s4556_s27  ;;  %2619 = vrot.lane.b32.xlu0 %v2615_v29, %s4557_s11  ;;  %v2270_v1 = vstv %s6128_s15  ;;  %s6236_s15 = sld [smem:[#allocation10 + $0x4e]] }
 0x3cf   : > { %v2150_v9 = vpop.permute.xlu0 %2149 }
 0x3d0   : > { %v2155_v15 = vadd.f32 %v2150_v9, %v2121_v44 }
 0x3d1   : > { %2621 = vrot.lane.b32.xlu1 %v2616_v63, %s4557_s11  ;;  %2633 = vrot.lane.b32.xlu0 %v2629_v56, %s4557_s11  ;;  %v2134_v56 = vmul.f32 %v2132_v27, %v5943_v54 }
 0x3d3   : > { %v2152_v60 = vpop.permute.xlu1 %2151  ;;  %v2164_v16 = vpop.permute.xlu0 %2163 }
 0x3d4   : > { %v2156_v51 = vadd.f32 %v2152_v60, %v2122_v48  ;;  %v2169_v39 = vadd.f32 %v2164_v16, %v2127_v31  ;;  %v2754_v31 = vmul.f32 %v2752_v20, %v6118_v58  ;;  %v6230_v20 = vld [vmem:[#allocation3 + $0x26] sm:$0xff] }
 0x3d5   : > { %2635 = vrot.lane.b32.xlu1 %v2630_v18, %s4557_s11  ;;  %2647 = vrot.lane.b32.xlu0 %v2643_v61, %s4557_s11  ;;  %v2726_v18 = vmul.f32 %v2724_v32, %v6118_v58  ;;  %v2739_v61 = vmul.f32 %v2738_v0, %v6100_v52 }
 0x3d7   : > { %v2166_v24 = vpop.permute.xlu1 %2165  ;;  %v2178_v26 = vpop.permute.xlu0 %2177 }
 0x3d8   : > { %v2170_v29 = vadd.f32 %v2166_v24, %v2128_v8  ;;  %v2183_v2 = vadd.f32 %v2178_v26, %v2133_v5  ;;  %v2266_v24 = vmul.f32 %v2264_v34, %v5981_v53  ;;  %v2271_v26 = vmul.f32 %v2270_v1, %v5975_v4 }
 0x3d9   : > { %2649 = vrot.lane.b32.xlu1 %v2644_v25, %s4557_s11  ;;  %2661 = vrot.lane.b32.xlu0 %v2657_v47, %s4557_s11  ;;  %v2794_v8 = vstv %s6185_s26  ;;  %s6273_s26 = sld [smem:[#allocation10 + $0x59]] }
 0x3db   : > { %v6112_v37 = vpop.permute.xlu1 %2179  ;;  %v6114_v55 = vpop.permute.xlu0 %2191 }
 0x3dc   : > { %v2184_v47 = vadd.f32 %v6112_v37, %v2134_v56  ;;  %v2197_v33 = vadd.f32 %v6114_v55, %v2139_v11  ;;  %v2272_v37 = vmul.f32 %v2270_v1, %v5981_v53  ;;  %v2277_v55 = vmul.f32 %v2276_v38, %v5975_v4 }
 0x3dd   : > { %2663 = vrot.lane.b32.xlu1 %v2658_v10, %s4557_s11  ;;  %2701 = vrot.lane.b32.xlu0 %v2697_v30, %s4556_s27  ;;  %v2140_v30 = vmul.f32 %v2138_v14, %v5943_v54  ;;  %v2780_v14 = vstv %s6168_s17  ;;  %v2278_v4 = vmul.f32 %v2276_v38, %v5981_v53  ;;  %v2848_v1 = vstv %s6209_s13  ;;  %s6257_s17 = sld [smem:[#allocation10 + $0x35]]  ;;  %s6303_s13 = sld [smem:[#allocation10 + $0x13]] }
 0x3de   : > { %v2781_v0 = vmul.f32 %v2780_v14, %v6100_v52 }
 0x3df   : > { %v6131_v46 = vpop.permute.xlu1 %2193  ;;  %v2206_v17 = vpop.permute.xlu0 %2205 }
 0x3e0   : > { %v2211_v50 = vadd.f32 %v2206_v17, %v2155_v15  ;;  %v2766_v15 = vstv %s6152_s23  ;;  %v2198_v54 = vadd.f32 %v6131_v46, %v2140_v30  ;;  %s6248_s23 = sld [smem:[#allocation10 + $0x72]] }
 0x3e1   : > { %2703 = vrot.lane.b32.xlu1 %v2698_v41, %s4556_s27  ;;  %2715 = vrot.lane.b32.xlu0 %v2711_v28, %s4556_s27 }
 0x3e2   : > { %v6146_v7 = vadd.f32 %v2259_v57, %v2211_v50  ;;  %v2767_v50 = vmul.f32 %v2766_v15, %v6100_v52 }
 0x3e3   : > { %v2208_v59 = vpop.permute.xlu1 %2207  ;;  %v2220_v19 = vpop.permute.xlu0 %2219 }
 0x3e4   : > { %v2212_v21 = vadd.f32 %v2208_v59, %v2156_v51  ;;  %v2225_v40 = vadd.f32 %v2220_v19, %v2169_v39  ;;  %v2768_v39 = vmul.f32 %v2766_v15, %v6118_v58  ;;  %v2782_v59 = vmul.f32 %v2780_v14, %v6118_v58 }
 0x3e5   : > { %2717 = vrot.lane.b32.xlu1 %v2712_v6, %s4556_s27  ;;  %2729 = vrot.lane.b32.xlu0 %v2725_v23, %s4556_s27  ;;  %v2795_v19 = vmul.f32 %v2794_v8, %v6100_v52  ;;  %v6217_v6 = vld [vmem:[#allocation3 + $0x1e] sm:$0xff]  ;;  %v2834_v23 = vstv %s6199_s28  ;;  %s6289_s28 = sld [smem:[#allocation10 + $0x7d]] }
 0x3e6   : > { %v6160_v9 = vadd.f32 %v2260_v45, %v2212_v21  ;;  %v6162_v63 = vadd.f32 %v2265_v42, %v2225_v40  ;;  %v2796_v45 = vmul.f32 %v2794_v8, %v6118_v58  ;;  %v2835_v42 = vmul.f32 %v2834_v23, %v6217_v6 }
 0x3e7   : > { %v2222_v60 = vpop.permute.xlu1 %2221  ;;  %v2234_v16 = vpop.permute.xlu0 %2233  ;;  %v2414_v14 = vstv %s6248_s23  ;;  %s6345_s23 = sld [smem:[#allocation10 + $0x14]] }
 0x3e8   : > { %v2226_v62 = vadd.f32 %v2222_v60, %v2170_v29  ;;  %v2239_v25 = vadd.f32 %v2234_v16, %v2183_v2  ;;  %v2396_v29 = vstv %s6213_s6  ;;  %v2836_v60 = vmul.f32 %v2834_v23, %v6230_v20  ;;  %s6313_s6 = sld [smem:[#allocation10 + $0x37]] }
 0x3e9   : > { %2731 = vrot.lane.b32.xlu1 %v2726_v18, %s4556_s27  ;;  %2743 = vrot.lane.b32.xlu0 %v2739_v61, %s4556_s27  ;;  %v2849_v16 = vmul.f32 %v2848_v1, %v6217_v6  ;;  %v2862_v61 = vstv %s6220_s10  ;;  %s6317_s10 = sld [smem:[#allocation10 + $0x9]] }
 0x3ea   : > { %v6177_v36 = vadd.f32 %v2266_v24, %v2226_v62  ;;  %v6179_v10 = vadd.f32 %v2271_v26, %v2239_v25  ;;  %v2397_v62 = vmul.f32 %v2396_v29, %v6011_v13  ;;  %v2402_v25 = vstv %s6224_s24  ;;  %s6324_s24 = sld [smem:[#allocation10 + $0x5b]] }
 0x3eb   : > { %v2236_v44 = vpop.permute.xlu1 %2235  ;;  %v2248_v22 = vpop.permute.xlu0 %2247  ;;  %v2863_v30 = vmul.f32 %v2862_v61, %v6217_v6 }
 0x3ec   : > { %v2240_v27 = vadd.f32 %v2236_v44, %v2184_v47  ;;  %v2253_v17 = vadd.f32 %v2248_v22, %v2197_v33  ;;  %v2850_v33 = vmul.f32 %v2848_v1, %v6230_v20  ;;  %v2876_v44 = vstv %s6228_s14  ;;  %s6328_s14 = sld [smem:[#allocation10 + $0x2d]] }
 0x3ed   : > { %2745 = vrot.lane.b32.xlu1 %v2740_v12, %s4556_s27  ;;  %2757 = vrot.lane.b32.xlu0 %v2753_v35, %s4557_s11  ;;  %v2398_v35 = vmul.f32 %v2396_v29, %v6017_v43 }
 0x3ee   : > { %v6192_v41 = vadd.f32 %v2272_v37, %v2240_v27  ;;  %v6194_v28 = vadd.f32 %v2277_v55, %v2253_v17 }
 0x3ef   : > { %v2250_v32 = vpop.permute.xlu1 %2249  ;;  %v2288_v48 = vpop.permute.xlu0 %2287 }
 0x3f0   : > { %v2254_v57 = vadd.f32 %v2250_v32, %v2198_v54  ;;  %v2293_v2 = vadd.f32 %v2288_v48, %v6146_v7  ;;  %v2864_v32 = vmul.f32 %v2862_v61, %v6230_v20  ;;  %v2877_v48 = vmul.f32 %v2876_v44, %v6217_v6 }
 0x3f1   : > { %2759 = vrot.lane.b32.xlu1 %v2754_v31, %s4557_s11  ;;  %2771 = vrot.lane.b32.xlu0 %v2767_v50, %s4557_s11  ;;  %v2890_v31 = vstv %s6241_s12  ;;  %s6340_s12 = sld [smem:[#allocation10 + $0x51]] }
 0x3f2   : > { %v6204_v46 = vadd.f32 %v2278_v4, %v2254_v57  ;;  %v2892_v29 = vmul.f32 %v2890_v31, %v6230_v20 }
 0x3f3   : > { %v2290_v34 = vpop.permute.xlu1 %2289  ;;  %v2302_v51 = vpop.permute.xlu0 %2301 }
 0x3f4   : > { %v2294_v7 = vadd.f32 %v2290_v34, %v6160_v9  ;;  %v2307_v24 = vadd.f32 %v2302_v51, %v6162_v63  ;;  %v2403_v9 = vmul.f32 %v2402_v25, %v6011_v13  ;;  %v2408_v63 = vstv %s6236_s15  ;;  %s6332_s15 = sld [smem:[#allocation10 + $0x7f]] }
 0x3f5   : > { %2773 = vrot.lane.b32.xlu1 %v2768_v39, %s4557_s11  ;;  %2785 = vrot.lane.b32.xlu0 %v2781_v0, %s4557_s11 }
 0x3f7   : > { %v2304_v53 = vpop.permute.xlu1 %2303  ;;  %v2316_v5 = vpop.permute.xlu0 %2315 }
 0x3f8   : > { %v2308_v15 = vadd.f32 %v2304_v53, %v6177_v36  ;;  %v2321_v27 = vadd.f32 %v2316_v5, %v6179_v10  ;;  %v2404_v36 = vmul.f32 %v2402_v25, %v6017_v43  ;;  %v2409_v10 = vmul.f32 %v2408_v63, %v6011_v13 }
 0x3f9   : > { %2787 = vrot.lane.b32.xlu1 %v2782_v59, %s4557_s11  ;;  %2799 = vrot.lane.b32.xlu0 %v2795_v19, %s4557_s11  ;;  %v2878_v53 = vmul.f32 %v2876_v44, %v6230_v20  ;;  %v2891_v5 = vmul.f32 %v2890_v31, %v6217_v6  ;;  %v2904_v59 = vstv %s6257_s17  ;;  %s6352_s17 = sld [smem:[#allocation10 + $0x75]] }
 0x3fb   : > { %v2318_v21 = vpop.permute.xlu1 %2317  ;;  %v2330_v40 = vpop.permute.xlu0 %2329 }
 0x3fc   : > { %v2322_v4 = vadd.f32 %v2318_v21, %v6192_v41  ;;  %v2335_v34 = vadd.f32 %v2330_v40, %v6194_v28  ;;  %v2410_v41 = vmul.f32 %v2408_v63, %v6017_v43  ;;  %v2415_v28 = vmul.f32 %v2414_v14, %v6011_v13 }
 0x3fd   : > { %2801 = vrot.lane.b32.xlu1 %v2796_v45, %s4557_s11  ;;  %2839 = vrot.lane.b32.xlu0 %v2835_v42, %s4556_s27  ;;  %v2416_v13 = vmul.f32 %v2414_v14, %v6017_v43 }
 0x3ff   : > { %v2332_v56 = vpop.permute.xlu1 %2331  ;;  %v2344_v11 = vpop.permute.xlu0 %2343 }
 0x400   : > { %v2349_v18 = vadd.f32 %v2344_v11, %v2293_v2  ;;  %v2336_v21 = vadd.f32 %v2332_v56, %v6204_v46  ;;  %v2905_v2 = vmul.f32 %v2904_v59, %v6217_v6 }
 0x401   : > { %2841 = vrot.lane.b32.xlu1 %v2836_v60, %s4556_s27  ;;  %2853 = vrot.lane.b32.xlu0 %v2849_v16, %s4556_s27  ;;  %v2918_v60 = vstv %s6273_s26  ;;  %s6361_s26 = sld [smem:[#allocation10 + $0x38]] }
 0x402   : > { %v6252_v26 = vadd.f32 %v2397_v62, %v2349_v18  ;;  %v2906_v18 = vmul.f32 %v2904_v59, %v6230_v20  ;;  %v2919_v61 = vmul.f32 %v2918_v60, %v6217_v6  ;;  %v2932_v62 = vstv %s6289_s28  ;;  %s6377_s28 = sld [smem:[#allocation10 + $0x5c]] }
 0x403   : > { %v2346_v38 = vpop.permute.xlu1 %2345  ;;  %v2358_v47 = vpop.permute.xlu0 %2357  ;;  %v2934_v44 = vmul.f32 %v2932_v62, %v6230_v20 }
 0x404   : > { %v2350_v22 = vadd.f32 %v2346_v38, %v2294_v7  ;;  %v2363_v12 = vadd.f32 %v2358_v47, %v2307_v24  ;;  %v2920_v7 = vmul.f32 %v2918_v60, %v6230_v20  ;;  %v2933_v24 = vmul.f32 %v2932_v62, %v6217_v6  ;;  %v6321_v38 = vld [vmem:[#allocation3 + $0x30] sm:$0xff] }
 0x405   : > { %2855 = vrot.lane.b32.xlu1 %v2850_v33, %s4556_s27  ;;  %2867 = vrot.lane.b32.xlu0 %v2863_v30, %s4556_s27  ;;  %v2972_v47 = vstv %s6303_s13  ;;  %v2552_v60 = vstv %s6352_s17  ;;  %s6393_s13 = sld [smem:[#allocation10 + $0x80]]  ;;  %s6449_s17 = sld [smem:[#allocation10 + $0x17]] }
 0x406   : > { %v6266_v17 = vadd.f32 %v2398_v35, %v2350_v22  ;;  %v6268_v37 = vadd.f32 %v2403_v9, %v2363_v12  ;;  %v2973_v22 = vmul.f32 %v2972_v47, %v6321_v38  ;;  %v6334_v12 = vld [vmem:[#allocation3 + $0x38] sm:$0xff]  ;;  %v2986_v35 = vstv %s6313_s6  ;;  %s6407_s6 = sld [smem:[#allocation10 + $0x16]] }
 0x407   : > { %v2360_v55 = vpop.permute.xlu1 %2359  ;;  %v2372_v54 = vpop.permute.xlu0 %2371  ;;  %v2534_v9 = vstv %s6317_s10  ;;  %s6417_s10 = sld [smem:[#allocation10 + $0x3a]] }
 0x408   : > { %v2364_v50 = vadd.f32 %v2360_v55, %v2308_v15  ;;  %v2377_v57 = vadd.f32 %v2372_v54, %v2321_v27  ;;  %v2974_v55 = vmul.f32 %v2972_v47, %v6334_v12  ;;  %v2987_v54 = vmul.f32 %v2986_v35, %v6321_v38 }
 0x409   : > { %2869 = vrot.lane.b32.xlu1 %v2864_v32, %s4556_s27  ;;  %2881 = vrot.lane.b32.xlu0 %v2877_v48, %s4556_s27  ;;  %v3000_v48 = vstv %s6324_s24  ;;  %v2535_v31 = vmul.f32 %v2534_v9, %v6047_v49  ;;  %s6421_s24 = sld [smem:[#allocation10 + $0xc]] }
 0x40a   : > { %v6282_v51 = vadd.f32 %v2404_v36, %v2364_v50  ;;  %v6284_v39 = vadd.f32 %v2409_v10, %v2377_v57  ;;  %v2540_v50 = vstv %s6328_s14  ;;  %s6428_s14 = sld [smem:[#allocation10 + $0x5e]] }
 0x40b   : > { %v2374_v0 = vpop.permute.xlu1 %2373  ;;  %v2386_v8 = vpop.permute.xlu0 %2385 }
 0x40c   : > { %v2378_v19 = vadd.f32 %v2374_v0, %v2322_v4  ;;  %v2391_v23 = vadd.f32 %v2386_v8, %v2335_v34  ;;  %v2988_v4 = vmul.f32 %v2986_v35, %v6334_v12  ;;  %v3001_v34 = vmul.f32 %v3000_v48, %v6321_v38 }
 0x40d   : > { %2883 = vrot.lane.b32.xlu1 %v2878_v53, %s4556_s27  ;;  %2895 = vrot.lane.b32.xlu0 %v2891_v5, %s4557_s11  ;;  %v3014_v0 = vstv %s6332_s15  ;;  %v2536_v5 = vmul.f32 %v2534_v9, %v6053_v3  ;;  %s6432_s15 = sld [smem:[#allocation10 + $0x30]] }
 0x40e   : > { %v6296_v40 = vadd.f32 %v2410_v41, %v2378_v19  ;;  %v6298_v45 = vadd.f32 %v2415_v28, %v2391_v23 }
 0x40f   : > { %v2388_v42 = vpop.permute.xlu1 %2387  ;;  %v2426_v1 = vpop.permute.xlu0 %2425 }
 0x410   : > { %v2392_v11 = vadd.f32 %v2388_v42, %v2336_v21  ;;  %v2431_v63 = vadd.f32 %v2426_v1, %v6252_v26  ;;  %v3002_v42 = vmul.f32 %v3000_v48, %v6334_v12  ;;  %v3015_v1 = vmul.f32 %v3014_v0, %v6321_v38 }
 0x411   : > { %2897 = vrot.lane.b32.xlu1 %v2892_v29, %s4557_s11  ;;  %2909 = vrot.lane.b32.xlu0 %v2905_v2, %s4557_s11  ;;  %v3028_v29 = vstv %s6345_s23  ;;  %s6444_s23 = sld [smem:[#allocation10 + $0x54]] }
 0x412   : > { %v6308_v46 = vadd.f32 %v2416_v13, %v2392_v11  ;;  %v3030_v9 = vmul.f32 %v3028_v29, %v6334_v12 }
 0x413   : > { %v2428_v56 = vpop.permute.xlu1 %2427  ;;  %v2440_v16 = vpop.permute.xlu0 %2439 }
 0x414   : > { %v2432_v26 = vadd.f32 %v2428_v56, %v6266_v17  ;;  %v2445_v57 = vadd.f32 %v2440_v16, %v6268_v37  ;;  %v2541_v17 = vmul.f32 %v2540_v50, %v6047_v49  ;;  %v2546_v37 = vstv %s6340_s12  ;;  %s6436_s12 = sld [smem:[#allocation10 + $0x82]] }
 0x415   : > { %2911 = vrot.lane.b32.xlu1 %v2906_v18, %s4557_s11  ;;  %2923 = vrot.lane.b32.xlu0 %v2919_v61, %s4557_s11 }
 0x417   : > { %v2442_v43 = vpop.permute.xlu1 %2441  ;;  %v2454_v25 = vpop.permute.xlu0 %2453 }
 0x418   : > { %v2446_v59 = vadd.f32 %v2442_v43, %v6282_v51  ;;  %v2459_v19 = vadd.f32 %v2454_v25, %v6284_v39  ;;  %v2542_v51 = vmul.f32 %v2540_v50, %v6053_v3  ;;  %v2547_v39 = vmul.f32 %v2546_v37, %v6047_v49 }
 0x419   : > { %2925 = vrot.lane.b32.xlu1 %v2920_v7, %s4557_s11  ;;  %2937 = vrot.lane.b32.xlu0 %v2933_v24, %s4557_s11  ;;  %v3016_v43 = vmul.f32 %v3014_v0, %v6334_v12  ;;  %v3029_v25 = vmul.f32 %v3028_v29, %v6321_v38  ;;  %v3042_v7 = vstv %s6361_s26  ;;  %s6456_s26 = sld [smem:[#allocation10 + $0x78]] }
 0x41b   : > { %v2456_v33 = vpop.permute.xlu1 %2455  ;;  %v2468_v30 = vpop.permute.xlu0 %2467 }
 0x41c   : > { %v2460_v13 = vadd.f32 %v2456_v33, %v6296_v40  ;;  %v2473_v56 = vadd.f32 %v2468_v30, %v6298_v45  ;;  %v2548_v40 = vmul.f32 %v2546_v37, %v6053_v3  ;;  %v2553_v45 = vmul.f32 %v2552_v60, %v6047_v49 }
 0x41d   : > { %2939 = vrot.lane.b32.xlu1 %v2934_v44, %s4557_s11  ;;  %2977 = vrot.lane.b32.xlu0 %v2973_v22, %s4556_s27  ;;  %v2554_v49 = vmul.f32 %v2552_v60, %v6053_v3 }
 0x41f   : > { %v2470_v15 = vpop.permute.xlu1 %2469  ;;  %v2482_v27 = vpop.permute.xlu0 %2481 }
 0x420   : > { %v2487_v32 = vadd.f32 %v2482_v27, %v2431_v63  ;;  %v2474_v33 = vadd.f32 %v2470_v15, %v6308_v46  ;;  %v3043_v63 = vmul.f32 %v3042_v7, %v6321_v38 }
 0x421   : > { %2979 = vrot.lane.b32.xlu1 %v2974_v55, %s4556_s27  ;;  %2991 = vrot.lane.b32.xlu0 %v2987_v54, %s4556_s27  ;;  %v3056_v55 = vstv %s6377_s28  ;;  %s6465_s28 = sld [smem:[#allocation10 + $0x3b]] }
 0x422   : > { %v6356_v36 = vadd.f32 %v2535_v31, %v2487_v32  ;;  %v3044_v32 = vmul.f32 %v3042_v7, %v6334_v12  ;;  %v3057_v48 = vmul.f32 %v3056_v55, %v6321_v38  ;;  %v3070_v31 = vstv %s6393_s13  ;;  %s6481_s13 = sld [smem:[#allocation10 + $0x5f]] }
 0x423   : > { %v2484_v10 = vpop.permute.xlu1 %2483  ;;  %v2496_v14 = vpop.permute.xlu0 %2495  ;;  %v3072_v0 = vmul.f32 %v3070_v31, %v6334_v12 }
 0x424   : > { %v2488_v8 = vadd.f32 %v2484_v10, %v2432_v26  ;;  %v2501_v53 = vadd.f32 %v2496_v14, %v2445_v57  ;;  %v3058_v26 = vmul.f32 %v3056_v55, %v6334_v12  ;;  %v3071_v57 = vmul.f32 %v3070_v31, %v6321_v38  ;;  %v6425_v10 = vld [vmem:[#allocation3 + $0x33] sm:$0xff] }
 0x425   : > { %2993 = vrot.lane.b32.xlu1 %v2988_v4, %s4556_s27  ;;  %3005 = vrot.lane.b32.xlu0 %v3001_v34, %s4556_s27  ;;  %v3110_v14 = vstv %s6407_s6  ;;  %v2690_v55 = vstv %s6456_s26  ;;  %s6497_s6 = sld [smem:[#allocation10 + $0x83]]  ;;  %s6553_s26 = sld [smem:[#allocation10 + $0x1a]] }
 0x426   : > { %v6370_v23 = vadd.f32 %v2536_v5, %v2488_v8  ;;  %v6372_v41 = vadd.f32 %v2541_v17, %v2501_v53  ;;  %v3111_v8 = vmul.f32 %v3110_v14, %v6425_v10  ;;  %v6438_v53 = vld [vmem:[#allocation3 + $0x3b] sm:$0xff]  ;;  %v3124_v5 = vstv %s6417_s10  ;;  %s6511_s10 = sld [smem:[#allocation10 + $0x19]] }
 0x427   : > { %v2498_v28 = vpop.permute.xlu1 %2497  ;;  %v2510_v21 = vpop.permute.xlu0 %2509  ;;  %v2672_v17 = vstv %s6421_s24  ;;  %s6521_s24 = sld [smem:[#allocation10 + $0x3d]] }
 0x428   : > { %v2502_v2 = vadd.f32 %v2498_v28, %v2446_v59  ;;  %v2515_v11 = vadd.f32 %v2510_v21, %v2459_v19  ;;  %v3112_v28 = vmul.f32 %v3110_v14, %v6438_v53  ;;  %v3125_v21 = vmul.f32 %v3124_v5, %v6425_v10 }
 0x429   : > { %3007 = vrot.lane.b32.xlu1 %v3002_v42, %s4556_s27  ;;  %3019 = vrot.lane.b32.xlu0 %v3015_v1, %s4556_s27  ;;  %v3138_v1 = vstv %s6428_s14  ;;  %v2673_v29 = vmul.f32 %v2672_v17, %v6100_v52  ;;  %s6525_s14 = sld [smem:[#allocation10 + $0xf]] }
 0x42a   : > { %v6386_v16 = vadd.f32 %v2542_v51, %v2502_v2  ;;  %v6388_v18 = vadd.f32 %v2547_v39, %v2515_v11  ;;  %v2678_v2 = vstv %s6432_s15  ;;  %s6532_s15 = sld [smem:[#allocation10 + $0x61]] }
 0x42b   : > { %v2512_v61 = vpop.permute.xlu1 %2511  ;;  %v2524_v62 = vpop.permute.xlu0 %2523 }
 0x42c   : > { %v2516_v24 = vadd.f32 %v2512_v61, %v2460_v13  ;;  %v2529_v47 = vadd.f32 %v2524_v62, %v2473_v56  ;;  %v3126_v13 = vmul.f32 %v3124_v5, %v6438_v53  ;;  %v3139_v56 = vmul.f32 %v3138_v1, %v6425_v10 }
 0x42d   : > { %3021 = vrot.lane.b32.xlu1 %v3016_v43, %s4556_s27  ;;  %3033 = vrot.lane.b32.xlu0 %v3029_v25, %s4557_s11  ;;  %v3152_v61 = vstv %s6436_s12  ;;  %v2674_v25 = vmul.f32 %v2672_v17, %v6118_v58  ;;  %s6536_s12 = sld [smem:[#allocation10 + $0x33]] }
 0x42e   : > { %v6400_v30 = vadd.f32 %v2548_v40, %v2516_v24  ;;  %v6402_v44 = vadd.f32 %v2553_v45, %v2529_v47 }
 0x42f   : > { %v2526_v22 = vpop.permute.xlu1 %2525  ;;  %v2564_v35 = vpop.permute.xlu0 %2563 }
 0x430   : > { %v2530_v27 = vadd.f32 %v2526_v22, %v2474_v33  ;;  %v2569_v37 = vadd.f32 %v2564_v35, %v6356_v36  ;;  %v3140_v22 = vmul.f32 %v3138_v1, %v6438_v53  ;;  %v3153_v35 = vmul.f32 %v3152_v61, %v6425_v10 }
 0x431   : > { %3035 = vrot.lane.b32.xlu1 %v3030_v9, %s4557_s11  ;;  %3047 = vrot.lane.b32.xlu0 %v3043_v63, %s4557_s11  ;;  %v3166_v9 = vstv %s6449_s17  ;;  %s6548_s17 = sld [smem:[#allocation10 + $0x57]] }
 0x432   : > { %v6412_v46 = vadd.f32 %v2554_v49, %v2530_v27  ;;  %v3168_v17 = vmul.f32 %v3166_v9, %v6438_v53 }
 0x433   : > { %v2566_v15 = vpop.permute.xlu1 %2565  ;;  %v2578_v54 = vpop.permute.xlu0 %2577 }
 0x434   : > { %v2570_v36 = vadd.f32 %v2566_v15, %v6370_v23  ;;  %v2583_v11 = vadd.f32 %v2578_v54, %v6372_v41  ;;  %v2679_v23 = vmul.f32 %v2678_v2, %v6100_v52  ;;  %v2684_v41 = vstv %s6444_s23  ;;  %s6540_s23 = sld [smem:[#allocation10 + $0x85]] }
 0x435   : > { %3049 = vrot.lane.b32.xlu1 %v3044_v32, %s4557_s11  ;;  %3061 = vrot.lane.b32.xlu0 %v3057_v48, %s4557_s11 }
 0x437   : > { %v2580_v3 = vpop.permute.xlu1 %2579  ;;  %v2592_v50 = vpop.permute.xlu0 %2591 }
 0x438   : > { %v2584_v7 = vadd.f32 %v2580_v3, %v6386_v16  ;;  %v2597_v24 = vadd.f32 %v2592_v50, %v6388_v18  ;;  %v2680_v16 = vmul.f32 %v2678_v2, %v6118_v58  ;;  %v2685_v18 = vmul.f32 %v2684_v41, %v6100_v52 }
 0x439   : > { %3063 = vrot.lane.b32.xlu1 %v3058_v26, %s4557_s11  ;;  %3075 = vrot.lane.b32.xlu0 %v3071_v57, %s4557_s11  ;;  %v3154_v3 = vmul.f32 %v3152_v61, %v6438_v53  ;;  %v3167_v50 = vmul.f32 %v3166_v9, %v6425_v10  ;;  %v3180_v26 = vstv %s6465_s28  ;;  %s6560_s28 = sld [smem:[#allocation10 + $0x7b]] }
 0x43b   : > { %v2594_v4 = vpop.permute.xlu1 %2593  ;;  %v2606_v34 = vpop.permute.xlu0 %2605 }
 0x43c   : > { %v2598_v49 = vadd.f32 %v2594_v4, %v6400_v30  ;;  %v2611_v15 = vadd.f32 %v2606_v34, %v6402_v44  ;;  %v2686_v30 = vmul.f32 %v2684_v41, %v6118_v58  ;;  %v2691_v44 = vmul.f32 %v2690_v55, %v6100_v52 }
 0x43d   : > { %3077 = vrot.lane.b32.xlu1 %v3072_v0, %s4557_s11  ;;  %3115 = vrot.lane.b32.xlu0 %v3111_v8, %s4556_s27  ;;  %v2692_v52 = vmul.f32 %v2690_v55, %v6118_v58 }
 0x43f   : > { %v2608_v59 = vpop.permute.xlu1 %2607  ;;  %v2620_v19 = vpop.permute.xlu0 %2619 }
 0x440   : > { %v2625_v42 = vadd.f32 %v2620_v19, %v2569_v37  ;;  %v2612_v4 = vadd.f32 %v2608_v59, %v6412_v46  ;;  %v3181_v37 = vmul.f32 %v3180_v26, %v6425_v10 }
 0x441   : > { %3117 = vrot.lane.b32.xlu1 %v3112_v28, %s4556_s27  ;;  %3129 = vrot.lane.b32.xlu0 %v3125_v21, %s4556_s27  ;;  %v3194_v28 = vstv %s6481_s13  ;;  %s6569_s13 = sld [smem:[#allocation10 + $0x3e]] }
 0x442   : > { %v6460_v51 = vadd.f32 %v2673_v29, %v2625_v42  ;;  %v3182_v42 = vmul.f32 %v3180_v26, %v6438_v53  ;;  %v3195_v1 = vmul.f32 %v3194_v28, %v6425_v10  ;;  %v3208_v29 = vstv %s6497_s6  ;;  %s6585_s6 = sld [smem:[#allocation10 + $0x62]] }
 0x443   : > { %v2622_v39 = vpop.permute.xlu1 %2621  ;;  %v2634_v60 = vpop.permute.xlu0 %2633  ;;  %v3210_v61 = vmul.f32 %v3208_v29, %v6438_v53 }
 0x444   : > { %v2626_v62 = vadd.f32 %v2622_v39, %v2570_v36  ;;  %v2639_v43 = vadd.f32 %v2634_v60, %v2583_v11  ;;  %v3196_v36 = vmul.f32 %v3194_v28, %v6438_v53  ;;  %v3209_v11 = vmul.f32 %v3208_v29, %v6425_v10  ;;  %v6529_v39 = vld [vmem:[#allocation3 + $0x36] sm:$0xff] }
 0x445   : > { %3131 = vrot.lane.b32.xlu1 %v3126_v13, %s4556_s27  ;;  %3143 = vrot.lane.b32.xlu0 %v3139_v56, %s4556_s27  ;;  %v3248_v60 = vstv %s6511_s10  ;;  %v2828_v28 = vstv %s6560_s28  ;;  %s6601_s10 = sld [smem:[#allocation10 + $0x86]]  ;;  %s6657_s28 = sld [smem:[#allocation10 + $0x1d]] }
 0x446   : > { %v6474_v47 = vadd.f32 %v2674_v25, %v2626_v62  ;;  %v6476_v40 = vadd.f32 %v2679_v23, %v2639_v43  ;;  %v3249_v62 = vmul.f32 %v3248_v60, %v6529_v39  ;;  %v6542_v43 = vld [vmem:[#allocation3 + $0x3e] sm:$0xff]  ;;  %v3262_v25 = vstv %s6521_s24  ;;  %s6615_s24 = sld [smem:[#allocation10 + $0x1c]] }
 0x447   : > { %v2636_v45 = vpop.permute.xlu1 %2635  ;;  %v2648_v33 = vpop.permute.xlu0 %2647  ;;  %v2810_v23 = vstv %s6525_s14  ;;  %s6625_s14 = sld [smem:[#allocation10 + $0x40]] }
 0x448   : > { %v2640_v63 = vadd.f32 %v2636_v45, %v2584_v7  ;;  %v2653_v27 = vadd.f32 %v2648_v33, %v2597_v24  ;;  %v3250_v45 = vmul.f32 %v3248_v60, %v6542_v43  ;;  %v3263_v33 = vmul.f32 %v3262_v25, %v6529_v39 }
 0x449   : > { %3145 = vrot.lane.b32.xlu1 %v3140_v22, %s4556_s27  ;;  %3157 = vrot.lane.b32.xlu0 %v3153_v35, %s4556_s27  ;;  %v3276_v35 = vstv %s6532_s15  ;;  %v2811_v9 = vmul.f32 %v2810_v23, %v6217_v6  ;;  %s6629_s15 = sld [smem:[#allocation10 + $0x12]] }
 0x44a   : > { %v6490_v54 = vadd.f32 %v2680_v16, %v2640_v63  ;;  %v6492_v32 = vadd.f32 %v2685_v18, %v2653_v27  ;;  %v2816_v63 = vstv %s6536_s12  ;;  %s6636_s12 = sld [smem:[#allocation10 + $0x64]] }
 0x44b   : > { %v2650_v48 = vpop.permute.xlu1 %2649  ;;  %v2662_v31 = vpop.permute.xlu0 %2661 }
 0x44c   : > { %v2654_v57 = vadd.f32 %v2650_v48, %v2598_v49  ;;  %v2667_v14 = vadd.f32 %v2662_v31, %v2611_v15  ;;  %v3264_v49 = vmul.f32 %v3262_v25, %v6542_v43  ;;  %v3277_v15 = vmul.f32 %v3276_v35, %v6529_v39 }
 0x44d   : > { %3159 = vrot.lane.b32.xlu1 %v3154_v3, %s4556_s27  ;;  %3171 = vrot.lane.b32.xlu0 %v3167_v50, %s4557_s11  ;;  %v3290_v48 = vstv %s6540_s23  ;;  %v2812_v50 = vmul.f32 %v2810_v23, %v6230_v20  ;;  %s6640_s23 = sld [smem:[#allocation10 + $0x36]] }
 0x44e   : > { %v6504_v34 = vadd.f32 %v2686_v30, %v2654_v57  ;;  %v6506_v0 = vadd.f32 %v2691_v44, %v2667_v14 }
 0x44f   : > { %v2664_v8 = vpop.permute.xlu1 %2663  ;;  %v2702_v5 = vpop.permute.xlu0 %2701 }
 0x450   : > { %v2668_v19 = vadd.f32 %v2664_v8, %v2612_v4  ;;  %v2707_v41 = vadd.f32 %v2702_v5, %v6460_v51  ;;  %v3278_v8 = vmul.f32 %v3276_v35, %v6542_v43  ;;  %v3291_v5 = vmul.f32 %v3290_v48, %v6529_v39 }
 0x451   : > { %3173 = vrot.lane.b32.xlu1 %v3168_v17, %s4557_s11  ;;  %3185 = vrot.lane.b32.xlu0 %v3181_v37, %s4557_s11  ;;  %v3304_v17 = vstv %s6553_s26  ;;  %s6652_s26 = sld [smem:[#allocation10 + $0x5a]] }
 0x452   : > { %v6516_v46 = vadd.f32 %v2692_v52, %v2668_v19  ;;  %v3306_v23 = vmul.f32 %v3304_v17, %v6542_v43 }
 0x453   : > { %v2704_v59 = vpop.permute.xlu1 %2703  ;;  %v2716_v21 = vpop.permute.xlu0 %2715 }
 0x454   : > { %v2708_v51 = vadd.f32 %v2704_v59, %v6474_v47  ;;  %v2721_v27 = vadd.f32 %v2716_v21, %v6476_v40  ;;  %v2817_v47 = vmul.f32 %v2816_v63, %v6217_v6  ;;  %v2822_v40 = vstv %s6548_s17  ;;  %s6644_s17 = sld [smem:[#allocation10 + $0x88]] }
 0x455   : > { %3187 = vrot.lane.b32.xlu1 %v3182_v42, %s4557_s11  ;;  %3199 = vrot.lane.b32.xlu0 %v3195_v1, %s4557_s11 }
 0x457   : > { %v2718_v58 = vpop.permute.xlu1 %2717  ;;  %v2730_v2 = vpop.permute.xlu0 %2729 }
 0x458   : > { %v2722_v26 = vadd.f32 %v2718_v58, %v6490_v54  ;;  %v2735_v57 = vadd.f32 %v2730_v2, %v6492_v32  ;;  %v2818_v54 = vmul.f32 %v2816_v63, %v6230_v20  ;;  %v2823_v32 = vmul.f32 %v2822_v40, %v6217_v6 }
 0x459   : > { %3201 = vrot.lane.b32.xlu1 %v3196_v36, %s4557_s11  ;;  %3213 = vrot.lane.b32.xlu0 %v3209_v11, %s4557_s11  ;;  %v3292_v58 = vmul.f32 %v3290_v48, %v6542_v43  ;;  %v3305_v2 = vmul.f32 %v3304_v17, %v6529_v39  ;;  %v3318_v36 = vstv %s6569_s13  ;;  %s6664_s13 = sld [smem:[#allocation10 + $0x7e]] }
 0x45b   : > { %v2732_v13 = vpop.permute.xlu1 %2731  ;;  %v2744_v56 = vpop.permute.xlu0 %2743 }
 0x45c   : > { %v2736_v52 = vadd.f32 %v2732_v13, %v6504_v34  ;;  %v2749_v59 = vadd.f32 %v2744_v56, %v6506_v0  ;;  %v2824_v34 = vmul.f32 %v2822_v40, %v6230_v20  ;;  %v2829_v0 = vmul.f32 %v2828_v28, %v6217_v6 }
 0x45d   : > { %3215 = vrot.lane.b32.xlu1 %v3210_v61, %s4557_s11  ;;  %3253 = vrot.lane.b32.xlu0 %v3249_v62, %s4556_s27  ;;  %v2830_v6 = vmul.f32 %v2828_v28, %v6230_v20 }
 0x45f   : > { %v2746_v7 = vpop.permute.xlu1 %2745  ;;  %v2758_v24 = vpop.permute.xlu0 %2757 }
 0x460   : > { %v2763_v22 = vadd.f32 %v2758_v24, %v2707_v41  ;;  %v2750_v13 = vadd.f32 %v2746_v7, %v6516_v46  ;;  %v3319_v41 = vmul.f32 %v3318_v36, %v6529_v39 }
 0x461   : > { %3255 = vrot.lane.b32.xlu1 %v3250_v45, %s4556_s27  ;;  %3267 = vrot.lane.b32.xlu0 %v3263_v33, %s4556_s27  ;;  %v3332_v45 = vstv %s6585_s6  ;;  %s6671_s6 = sld [smem:[#allocation10 + $0x41]] }
 0x462   : > { %v6564_v16 = vadd.f32 %v2811_v9, %v2763_v22  ;;  %v3320_v22 = vmul.f32 %v3318_v36, %v6542_v43  ;;  %v3333_v35 = vmul.f32 %v3332_v45, %v6529_v39  ;;  %v3346_v9 = vstv %s6601_s10  ;;  %s6683_s10 = sld [smem:[#allocation10 + $0x65]] }
 0x463   : > { %v2760_v18 = vpop.permute.xlu1 %2759  ;;  %v2772_v55 = vpop.permute.xlu0 %2771  ;;  %v3348_v48 = vmul.f32 %v3346_v9, %v6542_v43 }
 0x464   : > { %v2764_v31 = vadd.f32 %v2760_v18, %v2708_v51  ;;  %v2777_v3 = vadd.f32 %v2772_v55, %v2721_v27  ;;  %v3334_v51 = vmul.f32 %v3332_v45, %v6542_v43  ;;  %v3347_v27 = vmul.f32 %v3346_v9, %v6529_v39  ;;  %v6633_v18 = vld [vmem:[#allocation3 + $0x48] sm:$0xff] }
 0x465   : > { %3269 = vrot.lane.b32.xlu1 %v3264_v49, %s4556_s27  ;;  %3281 = vrot.lane.b32.xlu0 %v3277_v15, %s4556_s27  ;;  %v3386_v55 = vstv %s6615_s24  ;;  %s6695_s24 = sld [smem:[#allocation10 + $0x89]] }
 0x466   : > { %v6578_v14 = vadd.f32 %v2812_v50, %v2764_v31  ;;  %v6580_v30 = vadd.f32 %v2817_v47, %v2777_v3  ;;  %v3387_v31 = vmul.f32 %v3386_v55, %v6633_v18  ;;  %v6646_v3 = vld [vmem:[#allocation3 + $0x50] sm:$0xff]  ;;  %v3400_v50 = vstv %s6625_s14  ;;  %s6705_s14 = sld [smem:[#allocation10 + $0x1f]] }
 0x467   : > { %v2774_v44 = vpop.permute.xlu1 %2773  ;;  %v2786_v4 = vpop.permute.xlu0 %2785  ;;  %v2948_v47 = vstv %s6629_s15  ;;  %s6713_s15 = sld [smem:[#allocation10 + $0x43]] }
 0x468   : > { %v2778_v37 = vadd.f32 %v2774_v44, %v2722_v26  ;;  %v2791_v19 = vadd.f32 %v2786_v4, %v2735_v57  ;;  %v3388_v44 = vmul.f32 %v3386_v55, %v6646_v3  ;;  %v3401_v4 = vmul.f32 %v3400_v50, %v6633_v18 }
 0x469   : > { %3283 = vrot.lane.b32.xlu1 %v3278_v8, %s4556_s27  ;;  %3295 = vrot.lane.b32.xlu0 %v3291_v5, %s4556_s27  ;;  %v3414_v5 = vstv %s6636_s12  ;;  %v2949_v17 = vmul.f32 %v2948_v47, %v6321_v38  ;;  %s6717_s12 = sld [smem:[#allocation10 + $0x15]] }
 0x46a   : > { %v6594_v21 = vadd.f32 %v2818_v54, %v2778_v37  ;;  %v6596_v42 = vadd.f32 %v2823_v32, %v2791_v19  ;;  %v2954_v37 = vstv %s6640_s23  ;;  %s6724_s23 = sld [smem:[#allocation10 + $0x67]] }
 0x46b   : > { %v2788_v1 = vpop.permute.xlu1 %2787  ;;  %v2800_v29 = vpop.permute.xlu0 %2799  ;;  %v2955_v36 = vmul.f32 %v2954_v37, %v6321_v38  ;;  %v2956_v45 = vmul.f32 %v2954_v37, %v6334_v12 }
 0x46c   : > { %v2792_v11 = vadd.f32 %v2788_v1, %v2736_v52  ;;  %v2805_v60 = vadd.f32 %v2800_v29, %v2749_v59  ;;  %v3402_v52 = vmul.f32 %v3400_v50, %v6646_v3  ;;  %v3415_v59 = vmul.f32 %v3414_v5, %v6633_v18 }
 0x46d   : > { %3297 = vrot.lane.b32.xlu1 %v3292_v58, %s4556_s27  ;;  %3309 = vrot.lane.b32.xlu0 %v3305_v2, %s4557_s11  ;;  %v3428_v1 = vstv %s6644_s17  ;;  %v2950_v2 = vmul.f32 %v2948_v47, %v6334_v12  ;;  %s6728_s17 = sld [smem:[#allocation10 + $0x39]] }
 0x46e   : > { %v6608_v56 = vadd.f32 %v2824_v34, %v2792_v11  ;;  %v6610_v61 = vadd.f32 %v2829_v0, %v2805_v60 }
 0x46f   : > { %v2802_v62 = vpop.permute.xlu1 %2801  ;;  %v2840_v25 = vpop.permute.xlu0 %2839 }
 0x470   : > { %v2806_v24 = vadd.f32 %v2802_v62, %v2750_v13  ;;  %v2845_v40 = vadd.f32 %v2840_v25, %v6564_v16  ;;  %v3416_v62 = vmul.f32 %v3414_v5, %v6646_v3  ;;  %v3429_v25 = vmul.f32 %v3428_v1, %v6633_v18 }
 0x471   : > { %3311 = vrot.lane.b32.xlu1 %v3306_v23, %s4557_s11  ;;  %3323 = vrot.lane.b32.xlu0 %v3319_v41, %s4557_s11  ;;  %v3442_v23 = vstv %s6657_s28  ;;  %s6740_s28 = sld [smem:[#allocation10 + $0x5d]] }
 0x472   : > { %v6620_v46 = vadd.f32 %v2830_v6, %v2806_v24  ;;  %v3444_v47 = vmul.f32 %v3442_v23, %v6646_v3 }
 0x473   : > { %v2842_v7 = vpop.permute.xlu1 %2841  ;;  %v2854_v33 = vpop.permute.xlu0 %2853 }
 0x474   : > { %v2846_v16 = vadd.f32 %v2842_v7, %v6578_v14  ;;  %v2859_v19 = vadd.f32 %v2854_v33, %v6580_v30  ;;  %v2960_v14 = vstv %s6652_s26  ;;  %s6732_s26 = sld [smem:[#allocation10 + $0x8b]] }
 0x475   : > { %3325 = vrot.lane.b32.xlu1 %v3320_v22, %s4557_s11  ;;  %3337 = vrot.lane.b32.xlu0 %v3333_v35, %s4557_s11 }
 0x477   : > { %v2856_v20 = vpop.permute.xlu1 %2855  ;;  %v2868_v63 = vpop.permute.xlu0 %2867 }
 0x478   : > { %v2860_v30 = vadd.f32 %v2856_v20, %v6594_v21  ;;  %v2873_v11 = vadd.f32 %v2868_v63, %v6596_v42  ;;  %v2961_v21 = vmul.f32 %v2960_v14, %v6321_v38  ;;  %v2966_v42 = vstv %s6664_s13  ;;  %s6744_s13 = sld [smem:[#allocation10 + $0x20]] }
 0x479   : > { %3339 = vrot.lane.b32.xlu1 %v3334_v51, %s4557_s11  ;;  %3351 = vrot.lane.b32.xlu0 %v3347_v27, %s4557_s11  ;;  %v3430_v20 = vmul.f32 %v3428_v1, %v6646_v3  ;;  %v3443_v63 = vmul.f32 %v3442_v23, %v6633_v18  ;;  %v3456_v51 = vstv %s6671_s6  ;;  %s6751_s6 = sld [smem:[#allocation10 + $0x81]] }
 0x47a   : > { %v3458_v5 = vmul.f32 %v3456_v51, %v6646_v3 }
 0x47b   : > { %v2870_v49 = vpop.permute.xlu1 %2869  ;;  %v2882_v15 = vpop.permute.xlu0 %2881 }
 0x47c   : > { %v2874_v6 = vadd.f32 %v2870_v49, %v6608_v56  ;;  %v2887_v7 = vadd.f32 %v2882_v15, %v6610_v61  ;;  %v2967_v56 = vmul.f32 %v2966_v42, %v6321_v38  ;;  %v2968_v38 = vmul.f32 %v2966_v42, %v6334_v12 }
 0x47d   : > { %3353 = vrot.lane.b32.xlu1 %v3348_v48, %s4557_s11  ;;  %3391 = vrot.lane.b32.xlu0 %v3387_v31, %s4556_s27  ;;  %v2962_v48 = vmul.f32 %v2960_v14, %v6334_v12  ;;  %v3092_v42 = vstv %s6728_s17  ;;  %s6804_s17 = sld [smem:[#allocation10 + $0x6a]] }
 0x47f   : > { %v2884_v26 = vpop.permute.xlu1 %2883  ;;  %v2896_v57 = vpop.permute.xlu0 %2895 }
 0x480   : > { %v2901_v8 = vadd.f32 %v2896_v57, %v2845_v40  ;;  %v2888_v61 = vadd.f32 %v2884_v26, %v6620_v46  ;;  %v3457_v40 = vmul.f32 %v3456_v51, %v6633_v18 }
 0x481   : > { %3393 = vrot.lane.b32.xlu1 %v3388_v44, %s4556_s27  ;;  %3405 = vrot.lane.b32.xlu0 %v3401_v4, %s4556_s27  ;;  %v3470_v4 = vstv %s6683_s10  ;;  %s6756_s10 = sld [smem:[#allocation10 + $0x44]] }
 0x482   : > { %v2951_v54 = vadd.f32 %v2949_v17, %v2901_v8  ;;  %v3471_v17 = vmul.f32 %v3470_v4, %v6633_v18 }
 0x483   : > { %v2898_v32 = vpop.permute.xlu1 %2897  ;;  %v2910_v28 = vpop.permute.xlu0 %2909 }
 0x484   : > { %v2902_v29 = vadd.f32 %v2898_v32, %v2846_v16  ;;  %v2915_v58 = vadd.f32 %v2910_v28, %v2859_v19  ;;  %v3484_v19 = vstv %s6695_s24  ;;  %v3472_v32 = vmul.f32 %v3470_v4, %v6646_v3  ;;  %s6766_s24 = sld [smem:[#allocation10 + $0x68]] }
 0x485   : > { %3407 = vrot.lane.b32.xlu1 %v3402_v52, %s4556_s27  ;;  %3419 = vrot.lane.b32.xlu0 %v3415_v59, %s4556_s27  ;;  %v3485_v28 = vmul.f32 %v3484_v19, %v6633_v18  ;;  %v6721_v52 = vld [vmem:[#allocation3 + $0x4b] sm:$0xff]  ;;  %v3104_v4 = vstv %s6751_s6  ;;  %s6824_s6 = sld [smem:[#allocation10 + $0x23]] }
 0x486   : > { %v2952_v60 = vadd.f32 %v2950_v2, %v2902_v29  ;;  %v2957_v34 = vadd.f32 %v2955_v36, %v2915_v58  ;;  %v3524_v29 = vstv %s6705_s14  ;;  %v3486_v36 = vmul.f32 %v3484_v19, %v6646_v3  ;;  %s6776_s14 = sld [smem:[#allocation10 + $0x8c]] }
 0x487   : > { %v2912_v0 = vpop.permute.xlu1 %2911  ;;  %v2924_v13 = vpop.permute.xlu0 %2923  ;;  %v3525_v14 = vmul.f32 %v3524_v29, %v6721_v52 }
 0x488   : > { %v2916_v41 = vadd.f32 %v2912_v0, %v2860_v30  ;;  %v2929_v24 = vadd.f32 %v2924_v13, %v2873_v11  ;;  %v6734_v30 = vld [vmem:[#allocation3 + $0x53] sm:$0xff]  ;;  %v3086_v0 = vstv %s6717_s12  ;;  %s6793_s12 = sld [smem:[#allocation10 + $0x46]] }
 0x489   : > { %3421 = vrot.lane.b32.xlu1 %v3416_v62, %s4556_s27  ;;  %3433 = vrot.lane.b32.xlu0 %v3429_v25, %s4556_s27  ;;  %v3526_v25 = vmul.f32 %v3524_v29, %v6734_v30  ;;  %v3088_v51 = vmul.f32 %v3086_v0, %v6438_v53 }
 0x48a   : > { %v2958_v33 = vadd.f32 %v2956_v45, %v2916_v41  ;;  %v2963_v22 = vadd.f32 %v2961_v21, %v2929_v24  ;;  %v3552_v45 = vstv %s6724_s23  ;;  %v3087_v21 = vmul.f32 %v3086_v0, %v6425_v10  ;;  %s6797_s23 = sld [smem:[#allocation10 + $0x18]] }
 0x48b   : > { %v2926_v35 = vpop.permute.xlu1 %2925  ;;  %v2938_v9 = vpop.permute.xlu0 %2937 }
 0x48c   : > { %v2930_v27 = vadd.f32 %v2926_v35, %v2874_v6  ;;  %v2943_v55 = vadd.f32 %v2938_v9, %v2887_v7  ;;  %v3553_v35 = vmul.f32 %v3552_v45, %v6721_v52  ;;  %v3566_v9 = vstv %s6732_s26  ;;  %s6808_s26 = sld [smem:[#allocation10 + $0x3c]] }
 0x48d   : > { %3435 = vrot.lane.b32.xlu1 %v3430_v20, %s4556_s27  ;;  %3447 = vrot.lane.b32.xlu0 %v3443_v63, %s4557_s11 }
 0x48e   : > { %v2964_v49 = vadd.f32 %v2962_v48, %v2930_v27  ;;  %v2969_v15 = vadd.f32 %v2967_v56, %v2943_v55  ;;  %v3093_v27 = vmul.f32 %v3092_v42, %v6425_v10  ;;  %v3098_v55 = vstv %s6740_s28  ;;  %s6812_s28 = sld [smem:[#allocation10 + $0x8e]] }
 0x48f   : > { %v2940_v31 = vpop.permute.xlu1 %2939  ;;  %v2978_v50 = vpop.permute.xlu0 %2977 }
 0x490   : > { %v2944_v57 = vadd.f32 %v2940_v31, %v2888_v61  ;;  %v2983_v44 = vadd.f32 %v2978_v50, %v2951_v54  ;;  %v3567_v31 = vmul.f32 %v3566_v9, %v6721_v52  ;;  %v3580_v50 = vstv %s6744_s13  ;;  %s6820_s13 = sld [smem:[#allocation10 + $0x60]] }
 0x491   : > { %3449 = vrot.lane.b32.xlu1 %v3444_v47, %s4557_s11  ;;  %3461 = vrot.lane.b32.xlu0 %v3457_v40, %s4557_s11  ;;  %v3582_v29 = vmul.f32 %v3580_v50, %v6734_v30 }
 0x492   : > { %v2970_v46 = vadd.f32 %v2968_v38, %v2944_v57  ;;  %v3094_v57 = vmul.f32 %v3092_v42, %v6438_v53 }
 0x493   : > { %v2980_v26 = vpop.permute.xlu1 %2979  ;;  %v2992_v8 = vpop.permute.xlu0 %2991 }
 0x494   : > { %v2984_v37 = vadd.f32 %v2980_v26, %v2952_v60  ;;  %v2997_v16 = vadd.f32 %v2992_v8, %v2957_v34  ;;  %v3538_v34 = vstv %s6713_s15  ;;  %s6785_s15 = sld [smem:[#allocation10 + $0x22]] }
 0x495   : > { %3463 = vrot.lane.b32.xlu1 %v3458_v5, %s4557_s11  ;;  %3475 = vrot.lane.b32.xlu0 %v3471_v17, %s4557_s11  ;;  %v3539_v23 = vmul.f32 %v3538_v34, %v6721_v52  ;;  %v3568_v5 = vmul.f32 %v3566_v9, %v6734_v30  ;;  %v3581_v17 = vmul.f32 %v3580_v50, %v6721_v52  ;;  %v3690_v50 = vstv %s6804_s17  ;;  %s6882_s17 = sld [smem:[#allocation10 + $0x87]] }
 0x497   : > { %v2994_v12 = vpop.permute.xlu1 %2993  ;;  %v3006_v54 = vpop.permute.xlu0 %3005 }
 0x498   : > { %v2998_v59 = vadd.f32 %v2994_v12, %v2958_v33  ;;  %v3011_v1 = vadd.f32 %v3006_v54, %v2963_v22  ;;  %v3540_v22 = vmul.f32 %v3538_v34, %v6734_v30  ;;  %v3100_v12 = vmul.f32 %v3098_v55, %v6438_v53 }
 0x499   : > { %3477 = vrot.lane.b32.xlu1 %v3472_v32, %s4557_s11  ;;  %3489 = vrot.lane.b32.xlu0 %v3485_v28, %s4557_s11  ;;  %v3105_v54 = vmul.f32 %v3104_v4, %v6425_v10 }
 0x49b   : > { %v3008_v58 = vpop.permute.xlu1 %3007  ;;  %v3020_v2 = vpop.permute.xlu0 %3019 }
 0x49c   : > { %v3012_v11 = vadd.f32 %v3008_v58, %v2964_v49  ;;  %v3025_v60 = vadd.f32 %v3020_v2, %v2969_v15  ;;  %v3554_v15 = vmul.f32 %v3552_v45, %v6734_v30 }
 0x49d   : > { %3491 = vrot.lane.b32.xlu1 %v3486_v36, %s4557_s11  ;;  %3529 = vrot.lane.b32.xlu0 %v3525_v14, %s4556_s27  ;;  %v3608_v14 = vstv %s6766_s24  ;;  %s6836_s24 = sld [smem:[#allocation10 + $0x47]] }
 0x49f   : > { %v3022_v13 = vpop.permute.xlu1 %3021  ;;  %v3034_v62 = vpop.permute.xlu0 %3033 }
 0x4a0   : > { %v3026_v41 = vadd.f32 %v3022_v13, %v2970_v46  ;;  %v3039_v24 = vadd.f32 %v3034_v62, %v2983_v44  ;;  %v3099_v44 = vmul.f32 %v3098_v55, %v6425_v10  ;;  %v3106_v10 = vmul.f32 %v3104_v4, %v6438_v53 }
 0x4a1   : > { %3531 = vrot.lane.b32.xlu1 %v3526_v25, %s4556_s27  ;;  %3543 = vrot.lane.b32.xlu0 %v3539_v23, %s4556_s27  ;;  %v3609_v13 = vmul.f32 %v3608_v14, %v6721_v52  ;;  %v3622_v23 = vstv %s6776_s14  ;;  %v3224_v55 = vstv %s6797_s23  ;;  %s6846_s14 = sld [smem:[#allocation10 + $0x6b]] }
 0x4a2   : > { %v3089_v6 = vadd.f32 %v3087_v21, %v3039_v24  ;;  %v3610_v24 = vmul.f32 %v3608_v14, %v6734_v30  ;;  %v3623_v45 = vmul.f32 %v3622_v23, %v6721_v52  ;;  %v6801_v21 = vld [vmem:[#allocation3 + $0x4e] sm:$0xff]  ;;  %s6879_s23 = sld [smem:[#allocation10 + $0x63]] }
 0x4a3   : > { %v3036_v7 = vpop.permute.xlu1 %3035  ;;  %v3048_v33 = vpop.permute.xlu0 %3047 }
 0x4a4   : > { %v3040_v20 = vadd.f32 %v3036_v7, %v2984_v37  ;;  %v3053_v63 = vadd.f32 %v3048_v33, %v2997_v16  ;;  %v3594_v37 = vstv %s6756_s10  ;;  %v3662_v7 = vstv %s6785_s15  ;;  %s6831_s10 = sld [smem:[#allocation10 + $0x84]]  ;;  %s6856_s15 = sld [smem:[#allocation10 + $0x8f]] }
 0x4a5   : > { %3545 = vrot.lane.b32.xlu1 %v3540_v22, %s4556_s27  ;;  %3557 = vrot.lane.b32.xlu0 %v3553_v35, %s4556_s27  ;;  %v3595_v58 = vmul.f32 %v3594_v37, %v6721_v52  ;;  %v3596_v0 = vmul.f32 %v3594_v37, %v6734_v30  ;;  %v3624_v35 = vmul.f32 %v3622_v23, %v6734_v30 }
 0x4a6   : > { %v3090_v48 = vadd.f32 %v3088_v51, %v3040_v20  ;;  %v3095_v56 = vadd.f32 %v3093_v27, %v3053_v63  ;;  %v3663_v9 = vmul.f32 %v3662_v7, %v6801_v21  ;;  %v6814_v20 = vld [vmem:[#allocation3 + $0x56] sm:$0xff]  ;;  %v3676_v27 = vstv %s6793_s12  ;;  %s4221_s12 = sld [smem:[#allocation10 + $0x3f]] }
 0x4a7   : > { %v3050_v61 = vpop.permute.xlu1 %3049  ;;  %v3062_v49 = vpop.permute.xlu0 %3061 }
 0x4a8   : > { %v3054_v47 = vadd.f32 %v3050_v61, %v2998_v59  ;;  %v3067_v40 = vadd.f32 %v3062_v49, %v3011_v1  ;;  %v3664_v61 = vmul.f32 %v3662_v7, %v6814_v20  ;;  %v3677_v49 = vmul.f32 %v3676_v27, %v6801_v21 }
 0x4a9   : > { %3559 = vrot.lane.b32.xlu1 %v3554_v15, %s4556_s27  ;;  %3571 = vrot.lane.b32.xlu0 %v3567_v31, %s4556_s27 }
 0x4aa   : > { %v3096_v38 = vadd.f32 %v3094_v57, %v3054_v47  ;;  %v3101_v46 = vadd.f32 %v3099_v44, %v3067_v40  ;;  %v3225_v47 = vmul.f32 %v3224_v55, %v6529_v39  ;;  %v3230_v40 = vstv %s6808_s26  ;;  %s4233_s26 = sld [smem:[#allocation10 + $0x42]] }
 0x4ab   : > { %v3064_v26 = vpop.permute.xlu1 %3063  ;;  %v3076_v8 = vpop.permute.xlu0 %3075  ;;  %v3231_v37 = vmul.f32 %v3230_v40, %v6529_v39  ;;  %v3242_v14 = vstv %s6831_s10  ;;  %s4245_s10 = sld [smem:[#allocation10 + $0x45]] }
 0x4ac   : > { %v3068_v16 = vadd.f32 %v3064_v26, %v3012_v11  ;;  %v3081_v19 = vadd.f32 %v3076_v8, %v3025_v60  ;;  %v3704_v26 = vstv %s6812_s28  ;;  %s6893_s28 = sld [smem:[#allocation10 + $0x66]] }
 0x4ad   : > { %3573 = vrot.lane.b32.xlu1 %v3568_v5, %s4556_s27  ;;  %3585 = vrot.lane.b32.xlu0 %v3581_v17, %s4557_s11  ;;  %v3226_v17 = vmul.f32 %v3224_v55, %v6542_v43 }
 0x4ae   : > { %v3102_v32 = vadd.f32 %v3100_v12, %v3068_v16  ;;  %v3107_v28 = vadd.f32 %v3105_v54, %v3081_v19  ;;  %v3236_v16 = vstv %s6820_s13  ;;  %s6896_s13 = sld [smem:[#allocation10 + $0x8a]] }
 0x4af   : > { %v3078_v59 = vpop.permute.xlu1 %3077  ;;  %v3116_v1 = vpop.permute.xlu0 %3115 }
 0x4b0   : > { %v3082_v2 = vadd.f32 %v3078_v59, %v3026_v41  ;;  %v3121_v36 = vadd.f32 %v3116_v1, %v3089_v6  ;;  %v3705_v59 = vmul.f32 %v3704_v26, %v6801_v21  ;;  %v3718_v1 = vstv %s6824_s6  ;;  %s4244_s6 = sld [smem:[#allocation10 + $0x21]] }
 0x4b1   : > { %3587 = vrot.lane.b32.xlu1 %v3582_v29, %s4557_s11  ;;  %3599 = vrot.lane.b32.xlu0 %v3595_v58, %s4557_s11  ;;  %v3720_v7 = vmul.f32 %v3718_v1, %v6814_v20 }
 0x4b2   : > { %v3108_v11 = vadd.f32 %v3106_v10, %v3082_v2  ;;  %v3232_v2 = vmul.f32 %v3230_v40, %v6542_v43 }
 0x4b3   : > { %v3118_v60 = vpop.permute.xlu1 %3117  ;;  %v3130_v34 = vpop.permute.xlu0 %3129 }
 0x4b4   : > { %v3122_v62 = vadd.f32 %v3118_v60, %v3090_v48  ;;  %v3135_v25 = vadd.f32 %v3130_v34, %v3095_v56 }
 0x4b5   : > { %3601 = vrot.lane.b32.xlu1 %v3596_v0, %s4557_s11  ;;  %3613 = vrot.lane.b32.xlu0 %v3609_v13, %s4557_s11  ;;  %v3706_v0 = vmul.f32 %v3704_v26, %v6814_v20  ;;  %v3719_v13 = vmul.f32 %v3718_v1, %v6801_v21 }
 0x4b7   : > { %v3132_v53 = vpop.permute.xlu1 %3131  ;;  %v3144_v41 = vpop.permute.xlu0 %3143 }
 0x4b8   : > { %v3136_v42 = vadd.f32 %v3132_v53, %v3096_v38  ;;  %v3149_v6 = vadd.f32 %v3144_v41, %v3101_v46  ;;  %v3678_v38 = vmul.f32 %v3676_v27, %v6814_v20  ;;  %v3691_v46 = vmul.f32 %v3690_v50, %v6801_v21 }
 0x4b9   : > { %3615 = vrot.lane.b32.xlu1 %v3610_v24, %s4557_s11  ;;  %3627 = vrot.lane.b32.xlu0 %v3623_v45, %s4557_s11  ;;  %v3238_v53 = vmul.f32 %v3236_v16, %v6542_v43  ;;  %v3243_v41 = vmul.f32 %v3242_v14, %v6529_v39 }
 0x4bb   : > { %v3146_v33 = vpop.permute.xlu1 %3145  ;;  %v3158_v22 = vpop.permute.xlu0 %3157 }
 0x4bc   : > { %v3150_v63 = vadd.f32 %v3146_v33, %v3102_v32  ;;  %v3163_v51 = vadd.f32 %v3158_v22, %v3107_v28  ;;  %v3692_v28 = vmul.f32 %v3690_v50, %v6814_v20 }
 0x4bd   : > { %3629 = vrot.lane.b32.xlu1 %v3624_v35, %s4557_s11  ;;  %3667 = vrot.lane.b32.xlu0 %v3663_v9, %s4556_s27  ;;  %v3746_v9 = vstv %s6846_s14  ;;  %s6910_s14 = sld [smem:[#allocation10 + $0x8d]] }
 0x4bf   : > { %v3160_v48 = vpop.permute.xlu1 %3159  ;;  %v3172_v56 = vpop.permute.xlu0 %3171 }
 0x4c0   : > { %v3164_v15 = vadd.f32 %v3160_v48, %v3108_v11  ;;  %v3177_v31 = vadd.f32 %v3172_v56, %v3121_v36  ;;  %v3237_v36 = vmul.f32 %v3236_v16, %v6529_v39  ;;  %v3747_v48 = vmul.f32 %v3746_v9, %v6801_v21 }
 0x4c1   : > { %3669 = vrot.lane.b32.xlu1 %v3664_v61, %s4556_s27  ;;  %3681 = vrot.lane.b32.xlu0 %v3677_v49, %s4556_s27  ;;  %v3760_v49 = vstv %s6856_s15  ;;  %s3773_s15 = sld [smem:[#allocation12]] }
 0x4c2   : > { %v3227_v57 = vadd.f32 %v3225_v47, %v3177_v31  ;;  %v3748_v31 = vmul.f32 %v3746_v9, %v6814_v20  ;;  %v3761_v50 = vmul.f32 %v3760_v49, %v6801_v21 }
 0x4c3   : > { %v3174_v44 = vpop.permute.xlu1 %3173  ;;  %v3186_v4 = vpop.permute.xlu0 %3185 }
 0x4c4   : > { %v3178_v8 = vadd.f32 %v3174_v44, %v3122_v62  ;;  %v3191_v5 = vadd.f32 %v3186_v4, %v3135_v25  ;;  %v3732_v62 = vstv %s6836_s24  ;;  %v3762_v4 = vmul.f32 %v3760_v49, %v6814_v20  ;;  %s6907_s24 = sld [smem:[#allocation10 + $0x69]] }
 0x4c5   : > { %3683 = vrot.lane.b32.xlu1 %v3678_v38, %s4556_s27  ;;  %3695 = vrot.lane.b32.xlu0 %v3691_v46, %s4556_s27  ;;  %v3733_v33 = vmul.f32 %v3732_v62, %v6801_v21  ;;  %v3734_v55 = vmul.f32 %v3732_v62, %v6814_v20 }
 0x4c6   : > { %v3228_v19 = vadd.f32 %v3226_v17, %v3178_v8  ;;  %v3233_v12 = vadd.f32 %v3231_v37, %v3191_v5 }
 0x4c7   : > { %v3188_v54 = vpop.permute.xlu1 %3187  ;;  %v3200_v32 = vpop.permute.xlu0 %3199 }
 0x4c8   : > { %v3192_v29 = vadd.f32 %v3188_v54, %v3136_v42  ;;  %v3205_v58 = vadd.f32 %v3200_v32, %v3149_v6 }
 0x4c9   : > { %3697 = vrot.lane.b32.xlu1 %v3692_v28, %s4556_s27  ;;  %3709 = vrot.lane.b32.xlu0 %v3705_v59, %s4556_s27 }
 0x4ca   : > { %v3234_v10 = vadd.f32 %v3232_v2, %v3192_v29  ;;  %v3239_v11 = vadd.f32 %v3237_v36, %v3205_v58  ;;  %v3374_v58 = vstv %s6879_s23  ;;  %s6927_s23 = sld [smem:[#allocation12 + $0x3]] }
 0x4cb   : > { %v3202_v60 = vpop.permute.xlu1 %3201  ;;  %v3214_v34 = vpop.permute.xlu0 %3213 }
 0x4cc   : > { %v3206_v25 = vadd.f32 %v3202_v60, %v3150_v63  ;;  %v3219_v23 = vadd.f32 %v3214_v34, %v3163_v51  ;;  %v3244_v63 = vmul.f32 %v3242_v14, %v6542_v43 }
 0x4cd   : > { %3711 = vrot.lane.b32.xlu1 %v3706_v0, %s4556_s27  ;;  %3723 = vrot.lane.b32.xlu0 %v3719_v13, %s4557_s11  ;;  %s4220_s27 = sld [smem:[#allocation10 + $0x1b]]  ;;  %v3375_v0 = vmul.f32 %v3374_v58, %v6633_v18  ;;  %v3380_v13 = vstv %s6882_s17  ;;  %s6933_s17 = scalar_lea.vmem [#allocation14], %s3965_s30 }
 0x4ce   : > { %v3240_v24 = vadd.f32 %v3238_v53, %v3206_v25  ;;  %v3245_v45 = vadd.f32 %v3243_v41, %v3219_v23  ;;  %s4277_s30 = sshll.u32 %s4612_s22, 10  ;;  %s3821_s22 = scalar_lea.sflag [#allocation6], %s4776_s29 }
 0x4cf   : > { %v3216_v42 = vpop.permute.xlu1 %3215  ;;  %v3254_v6 = vpop.permute.xlu0 %3253 }
 0x4d0   : > { %v3220_v22 = vadd.f32 %v3216_v42, %v3164_v15  ;;  %v3259_v35 = vadd.f32 %v3254_v6, %v3227_v57  ;;  %v3381_v42 = vmul.f32 %v3380_v13, %v6633_v18 }
 0x4d1   : > { %3725 = vrot.lane.b32.xlu1 %v3720_v7, %s4557_s11  ;;  %3737 = vrot.lane.b32.xlu0 %v3733_v33, %s4557_s11 }
 0x4d2   : > { %v3246_v39 = vadd.f32 %v3244_v63, %v3220_v22  ;;  %v3382_v63 = vmul.f32 %v3380_v13, %v6646_v3 }
 0x4d3   : > { %v3256_v51 = vpop.permute.xlu1 %3255  ;;  %v3268_v27 = vpop.permute.xlu0 %3267  ;;  %v3362_v26 = vstv %s4220_s27  ;;  %s6921_s27 = sld [smem:[#allocation12 + $0x1]] }
 0x4d4   : > { %v3260_v56 = vadd.f32 %v3256_v51, %v3228_v19  ;;  %v3273_v61 = vadd.f32 %v3268_v27, %v3233_v12  ;;  %v3363_v16 = vmul.f32 %v3362_v26, %v6633_v18  ;;  %v3368_v19 = vstv %s4221_s12  ;;  %s6923_s12 = sld [smem:[#allocation12 + $0x2]] }
 0x4d5   : > { %3739 = vrot.lane.b32.xlu1 %v3734_v55, %s4557_s11  ;;  %3751 = vrot.lane.b32.xlu0 %v3747_v48, %s4557_s11  ;;  %v3364_v1 = vmul.f32 %v3362_v26, %v6646_v3  ;;  %v3369_v29 = vmul.f32 %v3368_v19, %v6633_v18  ;;  %v3370_v34 = vmul.f32 %v3368_v19, %v6646_v3  ;;  %v3512_v19 = vstv %s6893_s28 }
 0x4d7   : > { %v3270_v43 = vpop.permute.xlu1 %3269  ;;  %v3282_v15 = vpop.permute.xlu0 %3281 }
 0x4d8   : > { %v3274_v47 = vadd.f32 %v3270_v43, %v3234_v10  ;;  %v3287_v40 = vadd.f32 %v3282_v15, %v3239_v11 }
 0x4d9   : > { %3753 = vrot.lane.b32.xlu1 %v3748_v31, %s4557_s11  ;;  %3765 = vrot.lane.b32.xlu0 %v3761_v50, %s4557_s11 }
 0x4db   : > { %v3284_v57 = vpop.permute.xlu1 %3283  ;;  %v3296_v44 = vpop.permute.xlu0 %3295 }
 0x4dc   : > { %v3288_v38 = vadd.f32 %v3284_v57, %v3240_v24  ;;  %v3301_v46 = vadd.f32 %v3296_v44, %v3245_v45  ;;  %v3376_v45 = vmul.f32 %v3374_v58, %v6646_v3  ;;  %v3513_v58 = vmul.f32 %v3512_v19, %v6721_v52 }
 0x4dd   : > { %3767 = vrot.lane.b32.xlu1 %v3762_v4, %s4557_s11  ;;  %s4232_s11 = sld [smem:[#allocation10 + $0x1e]] }
 0x4df   : > { %v3298_v8 = vpop.permute.xlu1 %3297  ;;  %v3310_v5 = vpop.permute.xlu0 %3309 }
 0x4e0   : > { %v3302_v17 = vadd.f32 %v3298_v8, %v3246_v39  ;;  %v3315_v37 = vadd.f32 %v3310_v5, %v3259_v35 }
 0x4e2   : > { %v3365_v12 = vadd.f32 %v3363_v16, %v3315_v37 }
 0x4e3   : > { %v3312_v54 = vpop.permute.xlu1 %3311  ;;  %v3324_v32 = vpop.permute.xlu0 %3323 }
 0x4e4   : > { %v3316_v28 = vadd.f32 %v3312_v54, %v3260_v56  ;;  %v3329_v59 = vadd.f32 %v3324_v32, %v3273_v61 }
 0x4e6   : > { %v3366_v2 = vadd.f32 %v3364_v1, %v3316_v28  ;;  %v3371_v36 = vadd.f32 %v3369_v29, %v3329_v59 }
 0x4e7   : > { %v3326_v14 = vpop.permute.xlu1 %3325  ;;  %v3338_v10 = vpop.permute.xlu0 %3337 }
 0x4e8   : > { %v3330_v11 = vadd.f32 %v3326_v14, %v3274_v47  ;;  %v3343_v60 = vadd.f32 %v3338_v10, %v3287_v40  ;;  %v3500_v47 = vstv %s4232_s11  ;;  %s3834_s11 = sshll.u32 %s6933_s17, 4  ;;  %s6963_s11 = int_to_ptr.vmem [resolvable:$true] %s3834_s11 }
 0x4e9   : > { %v3501_v4 = vmul.f32 %v3500_v47, %v6721_v52  ;;  %v3502_v37 = vmul.f32 %v3500_v47, %v6734_v30 }
 0x4ea   : > { %v3372_v62 = vadd.f32 %v3370_v34, %v3330_v11  ;;  %v3377_v25 = vadd.f32 %v3375_v0, %v3343_v60  ;;  %v3514_v0 = vmul.f32 %v3512_v19, %v6734_v30 }
 0x4eb   : > { %v3340_v23 = vpop.permute.xlu1 %3339  ;;  %v3352_v53 = vpop.permute.xlu0 %3351 }
 0x4ec   : > { %v3344_v41 = vadd.f32 %v3340_v23, %v3288_v38  ;;  %v3357_v24 = vadd.f32 %v3352_v53, %v3301_v46  ;;  %v3506_v38 = vstv %s4233_s26 }
 0x4ed   : > { %v3507_v16 = vmul.f32 %v3506_v38, %v6721_v52  ;;  %v3508_v29 = vmul.f32 %v3506_v38, %v6734_v30 }
 0x4ee   : > { %v3378_v6 = vadd.f32 %v3376_v45, %v3344_v41  ;;  %v3383_v7 = vadd.f32 %v3381_v42, %v3357_v24 }
 0x4ef   : > { %v3354_v33 = vpop.permute.xlu1 %3353  ;;  %v3392_v22 = vpop.permute.xlu0 %3391 }
 0x4f0   : > { %v3358_v35 = vadd.f32 %v3354_v33, %v3302_v17  ;;  %v3397_v9 = vadd.f32 %v3392_v22, %v3365_v12 }
 0x4f2   : > { %v3384_v39 = vadd.f32 %v3382_v63, %v3358_v35 }
 0x4f3   : > { %v3394_v51 = vpop.permute.xlu1 %3393  ;;  %v3406_v27 = vpop.permute.xlu0 %3405 }
 0x4f4   : > { %v3398_v55 = vadd.f32 %v3394_v51, %v3366_v2  ;;  %v3411_v48 = vadd.f32 %v3406_v27, %v3371_v36  ;;  %v3518_v2 = vstv %s6896_s13  ;;  %s6961_s13 = scalar_lea.hbm %s7014_s5, %s4277_s30 }
 0x4f5   : > { %v3519_v13 = vmul.f32 %v3518_v2, %v6721_v52  ;;  %v3520_v24 = vmul.f32 %v3518_v2, %v6734_v30  ;;  %v3644_v30 = vstv %s4245_s10 }
 0x4f7   : > { %v3408_v56 = vpop.permute.xlu1 %3407  ;;  %v3420_v61 = vpop.permute.xlu0 %3419 }
 0x4f8   : > { %v3412_v49 = vadd.f32 %v3408_v56, %v3372_v62  ;;  %v3425_v43 = vadd.f32 %v3420_v61, %v3377_v25 }
 0x4fb   : > { %v3422_v18 = vpop.permute.xlu1 %3421  ;;  %v3434_v15 = vpop.permute.xlu0 %3433 }
 0x4fc   : > { %v3426_v31 = vadd.f32 %v3422_v18, %v3378_v6  ;;  %v3439_v50 = vadd.f32 %v3434_v15, %v3383_v7 }
 0x4ff   : > { %v3436_v3 = vpop.permute.xlu1 %3435  ;;  %v3448_v40 = vpop.permute.xlu0 %3447 }
 0x500   : > { %v3440_v57 = vadd.f32 %v3436_v3, %v3384_v39  ;;  %v3453_v44 = vadd.f32 %v3448_v40, %v3397_v9  ;;  %v3638_v9 = vstv %s4244_s6  ;;  %s4558_s6 = smov [#allocation14]  }
 0x501   : > { %v3639_v27 = vmul.f32 %v3638_v9, %v6801_v21  ;;  %v3640_v15 = vmul.f32 %v3638_v9, %v6814_v20  ;;  %s4468_s10 = sshll.u32 %s4558_s6, 4  ;;  %s4469_s10 = int_to_ptr.vmem [resolvable:$false] %s4468_s10 }
 0x502   : > { %v3503_v46 = vadd.f32 %v3501_v4, %v3453_v44  ;;  %p4471_p13 = scmp.lt.s32.totalorder %s6963_s11, %s4469_s10 }
 0x503   : > { %v3450_v26 = vpop.permute.xlu1 %3449  ;;  %v3462_v8 = vpop.permute.xlu0 %3461 }
 0x504   : > { %v3454_v5 = vadd.f32 %v3450_v26, %v3398_v55  ;;  %v3467_v17 = vadd.f32 %v3462_v8, %v3411_v48  ;;  %v3646_v26 = vmul.f32 %v3644_v30, %v6814_v20 }
 0x506   : > { %v3504_v12 = vadd.f32 %v3502_v37, %v3454_v5  ;;  %v3509_v54 = vadd.f32 %v3507_v16, %v3467_v17  ;;  %v3656_v5 = vstv %s6910_s14 }
 0x507   : > { %v3464_v32 = vpop.permute.xlu1 %3463  ;;  %v3476_v28 = vpop.permute.xlu0 %3475 }
 0x508   : > { %v3468_v59 = vadd.f32 %v3464_v32, %v3412_v49  ;;  %v3481_v1 = vadd.f32 %v3476_v28, %v3425_v43 }
 0x50a   : > { %v3510_v36 = vadd.f32 %v3508_v29, %v3468_v59  ;;  %v3515_v14 = vadd.f32 %v3513_v58, %v3481_v1  ;;  %v3657_v1 = vmul.f32 %v3656_v5, %v6801_v21 }
 0x50b   : > { %v3478_v10 = vpop.permute.xlu1 %3477  ;;  %v3490_v11 = vpop.permute.xlu0 %3489 }
 0x50c   : > { %v3482_v60 = vadd.f32 %v3478_v10, %v3426_v31  ;;  %v3495_v34 = vadd.f32 %v3490_v11, %v3439_v50  ;;  %v3645_v31 = vmul.f32 %v3644_v30, %v6801_v21  ;;  %v3650_v50 = vstv %s6907_s24  ;;  %s4470_s24 = scalar_lea.vmem %s4469_s10, 2048 }
 0x50d   : > { %v3651_v8 = vmul.f32 %v3650_v50, %v6801_v21  ;;  %v3652_v59 = vmul.f32 %v3650_v50, %v6814_v20  ;;  %v3658_v11 = vmul.f32 %v3656_v5, %v6814_v20  ;;  %v4258_v50 = vld [vmem:[%s4782_s9 + $0x18] sm:$0xff] }
 0x50e   : > { %v3516_v62 = vadd.f32 %v3514_v0, %v3482_v60  ;;  %v3521_v25 = vadd.f32 %v3519_v13, %v3495_v34 }
 0x50f   : > { %v3492_v23 = vpop.permute.xlu1 %3491  ;;  %v3530_v53 = vpop.permute.xlu0 %3529 }
 0x510   : > { %v3496_v41 = vadd.f32 %v3492_v23, %v3440_v57  ;;  %v3535_v52 = vadd.f32 %v3530_v53, %v3503_v46 }
 0x512   : > { %v3522_v45 = vadd.f32 %v3520_v24, %v3496_v41  ;;  %v3774_v41 = vstv %s3773_s15 }
 0x513   : > { %v3532_v42 = vpop.permute.xlu1 %3531  ;;  %v3544_v6 = vpop.permute.xlu0 %3543 }
 0x514   : > { %v3536_v55 = vadd.f32 %v3532_v42, %v3504_v12  ;;  %v3549_v48 = vadd.f32 %v3544_v6, %v3509_v54 }
 0x517   : > { %v3546_v7 = vpop.permute.xlu1 %3545  ;;  %v3558_v33 = vpop.permute.xlu0 %3557 }
 0x518   : > { %v3550_v47 = vadd.f32 %v3546_v7, %v3510_v36  ;;  %v3563_v3 = vadd.f32 %v3558_v33, %v3515_v14 }
 0x51b   : > { %v3560_v22 = vpop.permute.xlu1 %3559  ;;  %v3572_v35 = vpop.permute.xlu0 %3571 }
 0x51c   : > { %v3564_v17 = vadd.f32 %v3560_v22, %v3516_v62  ;;  %v3577_v37 = vadd.f32 %v3572_v35, %v3521_v25  ;;  %v3785_v22 = vstv %s6921_s27 }
 0x51f   : > { %v3574_v63 = vpop.permute.xlu1 %3573  ;;  %v3586_v39 = vpop.permute.xlu0 %3585 }
 0x520   : > { %v3591_v51 = vadd.f32 %v3586_v39, %v3535_v52  ;;  %v3578_v29 = vadd.f32 %v3574_v63, %v3522_v45  ;;  %v3777_v45 = vld [vmem:[%s4782_s9] sm:$0xff]  ;;  %v3778_v39 = vld [vmem:[%s4782_s9 + $0x8] sm:$0xff] }
 0x522   : > { %v3641_v56 = vadd.f32 %v3639_v27, %v3591_v51  ;;  %v4257_v51 = vld [vmem:[%s4782_s9 + $0x10] sm:$0xff] }
 0x523   : > { %v3588_v61 = vpop.permute.xlu1 %3587  ;;  %v3600_v49 = vpop.permute.xlu0 %3599 }
 0x524   : > { %v3592_v43 = vadd.f32 %v3588_v61, %v3536_v55  ;;  %v3605_v18 = vadd.f32 %v3600_v49, %v3549_v48  ;;  %v3797_v61 = vstv %s6923_s12 }
 0x526   : > { %v3642_v40 = vadd.f32 %v3640_v15, %v3592_v43  ;;  %v3647_v57 = vadd.f32 %v3645_v31, %v3605_v18 }
 0x527   : > { %v3602_v44 = vpop.permute.xlu1 %3601  ;;  %v3614_v4 = vpop.permute.xlu0 %3613 }
 0x528   : > { %v3606_v38 = vadd.f32 %v3602_v44, %v3550_v47  ;;  %v3619_v46 = vadd.f32 %v3614_v4, %v3563_v3  ;;  %v4262_v47 = vld [vmem:[%s4782_s9 + $0x20] sm:$0xff] }
 0x52a   : > { %v3648_v16 = vadd.f32 %v3646_v26, %v3606_v38  ;;  %v3653_v19 = vadd.f32 %v3651_v8, %v3619_v46  ;;  %v3809_v38 = vstv %s6927_s23 }
 0x52b   : > { %v3616_v12 = vpop.permute.xlu1 %3615  ;;  %v3628_v54 = vpop.permute.xlu0 %3627 }
 0x52c   : > { %v3620_v32 = vadd.f32 %v3616_v12, %v3564_v17  ;;  %v3633_v28 = vadd.f32 %v3628_v54, %v3577_v37  ;;  %v4263_v37 = vld [vmem:[%s4782_s9 + $0x28] sm:$0xff] }
 0x52e   : > { %v3654_v58 = vadd.f32 %v3652_v59, %v3620_v32  ;;  %v3659_v2 = vadd.f32 %v3657_v1, %v3633_v28 }
 0x52f   : > { %v3630_v36 = vpop.permute.xlu1 %3629  ;;  %v3668_v14 = vpop.permute.xlu0 %3667 }
 0x530   : > { %v3634_v10 = vadd.f32 %v3630_v36, %v3578_v29  ;;  %v3673_v21 = vadd.f32 %v3668_v14, %v3641_v56  ;;  %v4268_v29 = vld [vmem:[%s4782_s9 + $0x38] sm:$0xff] }
 0x532   : > { %v3660_v60 = vadd.f32 %v3658_v11, %v3634_v10 }
 0x533   : > { %v3670_v34 = vpop.permute.xlu1 %3669  ;;  %v3682_v0 = vpop.permute.xlu0 %3681 }
 0x534   : > { %v3674_v42 = vadd.f32 %v3670_v34, %v3642_v40  ;;  %v3687_v6 = vadd.f32 %v3682_v0, %v3647_v57 }
 0x537   : > { %v3684_v13 = vpop.permute.xlu1 %3683  ;;  %v3696_v62 = vpop.permute.xlu0 %3695 }
 0x538   : > { %v3688_v27 = vadd.f32 %v3684_v13, %v3648_v16  ;;  %v3701_v30 = vadd.f32 %v3696_v62, %v3653_v19  ;;  %v4267_v16 = vld [vmem:[%s4782_s9 + $0x30] sm:$0xff]  ;;  %s4464_s9 = scalar_lea.vmem %s6963_s11, 1024 }
 0x539   : > { %p4465_p3 = scmp.ne.s32.totalorder %s6963_s11, %s4464_s9  ;;  %p4472_p0 = scmp.lt.s32.totalorder %s4470_s24, %s4464_s9 }
 0x53b   : > { %v3698_v25 = vpop.permute.xlu1 %3697  ;;  %v3710_v23 = vpop.permute.xlu0 %3709  ;;  %p4466_p10 = pnand %p4465_p3, %p7032_p5  ;;  %p4473_p9 = por %p4472_p0, %p4471_p13 }
 0x53c   : > { %v3702_v3 = vadd.f32 %v3698_v25, %v3654_v58  ;;  %v3715_v40 = vadd.f32 %v3710_v23, %v3659_v2 }
 0x53d   : > { %p4467_p12 = pneg %p4466_p10 }
 0x53f   : > { %v3712_v53 = vpop.permute.xlu1 %3711  ;;  %v3724_v24 = vpop.permute.xlu0 %3723  ;;  %p4474_p6 = pnand %p4473_p9, %p4467_p12 }
 0x540   : > { %v3729_v20 = vadd.f32 %v3724_v24, %v3673_v21  ;;  %v3716_v19 = vadd.f32 %v3712_v53, %v3660_v60 }
 0x542   : > { %v3775_v7 = vadd.f32 %v3774_v41, %v3729_v20 }
 0x543   : > { %v3726_v33 = vpop.permute.xlu1 %3725  ;;  %v3738_v35 = vpop.permute.xlu0 %3737 }
 0x544   : > { %v3779_v9 = vadd.f32 %v3777_v45, %v3775_v7  ;;  %v3730_v52 = vadd.f32 %v3726_v33, %v3674_v42  ;;  %v3743_v63 = vadd.f32 %v3738_v35, %v3687_v6 }
 0x546   : > { %3782 = vst.msk [vmem:[%s6933_s17] sm:$0xff] %vm3781_vm14, %v3779_v9  ;;  %v3776_v55 = vadd.f32 %v3774_v41, %v3730_v52  ;;  %v3786_v48 = vadd.f32 %v3785_v22, %v3743_v63 }
 0x547   : > { %v3740_v56 = vpop.permute.xlu1 %3739  ;;  %v3752_v49 = vpop.permute.xlu0 %3751 }
 0x548   : > { %v3780_v43 = vadd.f32 %v3778_v39, %v3776_v55  ;;  %v3791_v18 = vadd.f32 %v4257_v51, %v3786_v48  ;;  %v3744_v15 = vadd.f32 %v3740_v56, %v3688_v27  ;;  %v3757_v31 = vadd.f32 %v3752_v49, %v3701_v30 }
 0x54a   : > { %3783 = vst.msk [vmem:[%s6933_s17 + $0x8] sm:$0xff] %vm3781_vm14, %v3780_v43  ;;  %4259 = vst.msk [vmem:[%s6933_s17 + $0x10] sm:$0xff] %vm3781_vm14, %v3791_v18  ;;  %v3787_v57 = vadd.f32 %v3785_v22, %v3744_v15  ;;  %v3798_v44 = vadd.f32 %v3797_v61, %v3757_v31 }
 0x54b   : > { %v3754_v4 = vpop.permute.xlu1 %3753  ;;  %v3766_v46 = vpop.permute.xlu0 %3765 }
 0x54c   : > { %v3792_v26 = vadd.f32 %v4258_v50, %v3787_v57  ;;  %v3803_v8 = vadd.f32 %v4262_v47, %v3798_v44  ;;  %v3758_v5 = vadd.f32 %v3754_v4, %v3702_v3  ;;  %v3771_v17 = vadd.f32 %v3766_v46, %v3715_v40 }
 0x54e   : > { %4260 = vst.msk [vmem:[%s6933_s17 + $0x18] sm:$0xff] %vm3781_vm14, %v3792_v26  ;;  %4264 = vst.msk [vmem:[%s6933_s17 + $0x20] sm:$0xff] %vm3781_vm14, %v3803_v8  ;;  %v3799_v12 = vadd.f32 %v3797_v61, %v3758_v5  ;;  %v3810_v54 = vadd.f32 %v3809_v38, %v3771_v17 }
 0x54f   : > { %v3768_v32 = vpop.permute.xlu1 %3767 }
 0x550   : > { %v3804_v28 = vadd.f32 %v4263_v37, %v3799_v12  ;;  %v3815_v59 = vadd.f32 %v4267_v16, %v3810_v54  ;;  %v3772_v1 = vadd.f32 %v3768_v32, %v3716_v19 }
 0x552   : > { %4265 = vst.msk [vmem:[%s6933_s17 + $0x28] sm:$0xff] %vm3781_vm14, %v3804_v28  ;;  %4269 = vst.msk [vmem:[%s6933_s17 + $0x30] sm:$0xff] %vm3781_vm14, %v3815_v59  ;;  %v3811_v58 = vadd.f32 %v3809_v38, %v3772_v1 }
 0x554   : > { %v3816_v2 = vadd.f32 %v4268_v29, %v3811_v58 }
 0x556   : > { %4270 = vst.msk [vmem:[%s6933_s17 + $0x38] sm:$0xff] %vm3781_vm14, %v3816_v2 }
 0x557   : > { %4477 = shalt.err (!%p4474_p6)
}
 0x558   : > { %s4478_s14 = scalar_lea.hbm %s6961_s13, 1024  ;;  %s4482_s12 = scalar_lea.hbm %s7014_s5, 2048 }
 0x559   : > { %p4479_p7 = scmp.ne.s32.totalorder %s6961_s13, %s4478_s14  ;;  %p4483_p2 = scmp.lt.u32.totalorder %s6961_s13, %s7014_s5 }
 0x55a   : > { %p4484_p11 = scmp.lt.u32.totalorder %s4482_s12, %s4478_s14  ;;  %p4486_p3 = scmp.lt.u32.totalorder %s4478_s14, %s6961_s13 }
 0x55b   : > { %p4480_p4 = pnand %p4479_p7, %p7032_p5 }
 0x55c   : > { %p4485_p8 = por %p4484_p11, %p4483_p2 }
 0x55d   : > { %p4481_p1 = pneg %p4480_p4 }
 0x55e   : > { %p4487_p10 = por %p4486_p3, %p4485_p8 }
 0x560   : > { %p4488_p12 = pnand %p4487_p10, %p4481_p1 }
 0x562   : > { %4491 = shalt.err (!%p4488_p12)
}
 0x563   : > { %s4559_s30 = smov 128   ;;  %s4560_s26 = smov 8  }
 0x564   : > { %4296 = dma.vmem_to_hbm [thread:$0]  (%p7032_p5), %s6963_s11, 1024, %s6961_s13, %s3821_s22, %s4559_s30, %s4559_s30, %s4560_s26  }
 0x565 PF: > { %s3849_s28 = sand.u32 1, %s4530_s18   ;;  %p7033_p13 = scmp.ne.s32.totalorder %s7019_s25, 0 }
 0x566   : > { %p7034_p0 = scmp.ge.s32.totalorder %s4542_s21, 2  ;;  %s3850_s9 = scalar_lea.sflag [#allocation6], %s3849_s28 }
 0x568   : > { %p4316_p9 = pnand %p7034_p0, %p7033_p13 }
 0x56a   : > { %4525 = dma.done.wait (!%p4316_p9), %s3850_s9, 1024  }
 0x56b   : > { %4527 = vsyncadd (!%p4316_p9), %s3850_s9, 4294966272  ;;  %p21_p6 = scmp.ge.s32.totalorder %s4702_s7, 4   ;;  %s7035_s18 = smov %s4534_s19 }
 0x56c   : > { %s7036_s19 = smov %s4538_s20  ;;  %s7037_s20 = smov %s4711_s8 }
 0x56d   : > { %s7038_s21 = smov %s4702_s7  ;;  %23 = sbr.rel (!%p21_p6) target bundleno = 8 (0x8), region = 115 }
 0x574   :  { %3855 = vsyncpa [#allocation5], 1 }
 0x575   :  { %3857 = vsyncpa [#allocation5 + $0x1], 1 }
 0x576   :  { %3858 = vsyncpa [#allocation6], 1 }
 0x577   :  { %3860 = vsyncpa [#allocation6 + $0x1], 1 }
 0x578   :  { %3861 = vsyncpa [#allocation7], 1 }
 0x579   :  { %3863 = vsyncpa [#allocation7 + $0x1], 1 }
 0x57a   :  { %3864 = vsyncpa [#allocation8], 1 }
 0x57b   :  { %3866 = vsyncpa [#allocation8 + $0x1], 1 }
 0x57c   :  { %3867 = vsyncpa [#allocation11], 1 }

</bundles_post_ra>
